<compile_context>
chip_gen: v5e
topology: v5e:2x2
jax: 0.10.0
libtpu: 0.0.40
codegen_flags: <defaults>
</compile_context>

<pallas_src>
import functools
import numpy as np

import jax
import jax.numpy as jnp
from jax.experimental import pallas as pl
from jax.experimental.pallas import tpu as pltpu


# ---------------------------------------------------------------------------
# helpers
# ---------------------------------------------------------------------------

def _rup(x, m):
    return ((x + m - 1) // m) * m


def _pick_tm(M):
    if M >= 1024:
        return 256
    if M >= 256:
        return 128           # gives >=2 M tiles at M=256 (v7x megacore)
    return _rup(M, 16)       # bf16 min sublane tile is 16


_VMEM_LIMIT = 32 * 1024 * 1024
_CP_1D = pltpu.CompilerParams(dimension_semantics=("parallel",),
                              vmem_limit_bytes=_VMEM_LIMIT)
_CP_2D = pltpu.CompilerParams(dimension_semantics=("parallel", "parallel"),
                              vmem_limit_bytes=_VMEM_LIMIT)

_BLOCK_STRIDES = (1, 1, 1, 2, 1, 1, 1)   # layer1 x3 + layer2 x4 (first block stride 2)


# ---------------------------------------------------------------------------
# Pallas kernels
# ---------------------------------------------------------------------------

def _matmul_affine_kernel(x_ref, w_ref, s_ref, b_ref, o_ref, *, relu):
    """o = maybe_relu((x @ w) * scale + shift). Single K step, no accumulator."""
    out = jnp.dot(x_ref[...], w_ref[...], preferred_element_type=jnp.float32)
    out = out * s_ref[...] + b_ref[...]
    if relu:
        out = jnp.maximum(out, 0.0)
    o_ref[...] = out.astype(o_ref.dtype)


def _conv1_ds_kernel(x_ref, w1_ref, s1_ref, b1_ref, wd_ref, sd_ref, bd_ref,
                     h1_ref, id_ref):
    """Fused bottleneck conv1(+BN+ReLU) and downsample(+BN), same input rows."""
    x = x_ref[...]
    h1 = jnp.dot(x, w1_ref[...], preferred_element_type=jnp.float32)
    h1_ref[...] = jnp.maximum(h1 * s1_ref[...] + b1_ref[...], 0.0).astype(h1_ref.dtype)
    idn = jnp.dot(x, wd_ref[...], preferred_element_type=jnp.float32)
    id_ref[...] = (idn * sd_ref[...] + bd_ref[...]).astype(id_ref.dtype)


def _block_tail_kernel(p_ref, id_ref, w2_ref, s2_ref, b2_ref,
                       w3_ref, s3_ref, b3_ref, *rest, has_next):
    """Fused: conv2(3x3, pre-im2col'd) -> conv3 + residual + ReLU [-> next conv1]."""
    if has_next:
        w1n_ref, s1n_ref, b1n_ref, y_ref, h1n_ref = rest
    else:
        (y_ref,) = rest
    h2 = jnp.dot(p_ref[...], w2_ref[...], preferred_element_type=jnp.float32)
    h2 = jnp.maximum(h2 * s2_ref[...] + b2_ref[...], 0.0).astype(jnp.bfloat16)
    y = jnp.dot(h2, w3_ref[...], preferred_element_type=jnp.float32)
    y = y * s3_ref[...] + b3_ref[...] + id_ref[...].astype(jnp.float32)
    y = jnp.maximum(y, 0.0)
    y_ref[...] = y.astype(y_ref.dtype)
    if has_next:
        h1n = jnp.dot(y.astype(jnp.bfloat16), w1n_ref[...],
                      preferred_element_type=jnp.float32)
        h1n = jnp.maximum(h1n * s1n_ref[...] + b1n_ref[...], 0.0)
        h1n_ref[...] = h1n.astype(h1n_ref.dtype)


def _head_kernel(x_ref, w1_ref, b1_ref, w2_ref, b2_ref, w3_ref, b3_ref, o_ref):
    """Fused head: 1x1 conv (1024->512) -> 1x1 (512->128) -> 1x1 (128->nc) -> ReLU."""
    h = jnp.dot(x_ref[...], w1_ref[...], preferred_element_type=jnp.float32) + b1_ref[...]
    h = h.astype(jnp.bfloat16)
    h = jnp.dot(h, w2_ref[...], preferred_element_type=jnp.float32) + b2_ref[...]
    h = h.astype(jnp.bfloat16)
    o = jnp.dot(h, w3_ref[...], preferred_element_type=jnp.float32) + b3_ref[...]
    o_ref[...] = jnp.maximum(o, 0.0)


def _max9_kernel(*refs):
    """Elementwise max over the 9 shifted pooling windows."""
    o_ref = refs[-1]
    m = refs[0][...]
    for r in refs[1:-1]:
        m = jnp.maximum(m, r[...])
    o_ref[...] = m


# ---------------------------------------------------------------------------
# Pallas wrappers
# ---------------------------------------------------------------------------

def pallas_matmul_affine(x, mm, relu):
    """x:[M,K]; mm['w']:[Kp,Np] bf16 pre-padded, scale/shift:(1,Np) f32 -> [M,Np] bf16."""
    M, K = x.shape
    Kp, N = mm['w'].shape
    x = x.astype(jnp.bfloat16)
    if K < Kp:                                  # only the 7x7 stem needs a K pad
        x = jnp.pad(x, ((0, 0), (0, Kp - K)))
    tm = _pick_tm(M)
    Mp = _rup(M, tm)
    if Mp != M:
        x = jnp.pad(x, ((0, Mp - M), (0, 0)))
    mg = Mp // tm
    if mg >= 2 and N % 256 == 0:
        tn = 256                                # full 256x256 MXU tiles (v6e/v7x)
    elif N >= 256:
        tn = 128                                # expose >=2 N tiles (v7x megacore)
    else:
        tn = N
    grid = (mg, N // tn)
    out = pl.pallas_call(
        functools.partial(_matmul_affine_kernel, relu=relu),
        out_shape=jax.ShapeDtypeStruct((Mp, N), jnp.bfloat16),
        grid_spec=pltpu.PrefetchScalarGridSpec(
            num_scalar_prefetch=0, grid=grid,
            in_specs=[pl.BlockSpec((tm, Kp), lambda i, j: (i, 0)),
                      pl.BlockSpec((Kp, tn), lambda i, j: (0, j)),
                      pl.BlockSpec((1, tn), lambda i, j: (0, j)),
                      pl.BlockSpec((1, tn), lambda i, j: (0, j))],
            out_specs=pl.BlockSpec((tm, tn), lambda i, j: (i, j))),
        compiler_params=_CP_2D,
        cost_estimate=pl.CostEstimate(
            flops=2 * Mp * N * Kp, transcendentals=0,
            bytes_accessed=(Mp * Kp + Kp * N + Mp * N) * 2 + 2 * N * 4),
    )(x, mm['w'], mm['scale'], mm['shift'])
    return out[:M] if Mp != M else out


def pallas_conv1_ds(x2d, c1, ds):
    """Fused block0 conv1(+BN+ReLU) and 1x1 downsample(+BN); two outputs."""
    M, K = x2d.shape
    _, N1 = c1['w'].shape
    _, Nd = ds['w'].shape
    tm = _pick_tm(M)
    Mp = _rup(M, tm)
    x2d = x2d.astype(jnp.bfloat16)
    if Mp != M:
        x2d = jnp.pad(x2d, ((0, Mp - M), (0, 0)))
    h1, idn = pl.pallas_call(
        _conv1_ds_kernel,
        out_shape=(jax.ShapeDtypeStruct((Mp, N1), jnp.bfloat16),
                   jax.ShapeDtypeStruct((Mp, Nd), jnp.bfloat16)),
        grid_spec=pltpu.PrefetchScalarGridSpec(
            num_scalar_prefetch=0, grid=(Mp // tm,),
            in_specs=[pl.BlockSpec((tm, K), lambda i: (i, 0)),
                      pl.BlockSpec((K, N1), lambda i: (0, 0)),
                      pl.BlockSpec((1, N1), lambda i: (0, 0)),
                      pl.BlockSpec((1, N1), lambda i: (0, 0)),
                      pl.BlockSpec((K, Nd), lambda i: (0, 0)),
                      pl.BlockSpec((1, Nd), lambda i: (0, 0)),
                      pl.BlockSpec((1, Nd), lambda i: (0, 0))],
            out_specs=[pl.BlockSpec((tm, N1), lambda i: (i, 0)),
                       pl.BlockSpec((tm, Nd), lambda i: (i, 0))]),
        compiler_params=_CP_1D,
        cost_estimate=pl.CostEstimate(
            flops=2 * Mp * K * (N1 + Nd), transcendentals=0,
            bytes_accessed=(Mp * K + K * (N1 + Nd) + Mp * (N1 + Nd)) * 2),
    )(x2d, c1['w'], c1['scale'], c1['shift'], ds['w'], ds['scale'], ds['shift'])
    if Mp != M:
        h1, idn = h1[:M], idn[:M]
    return h1, idn


def pallas_block_tail(patches, identity, c2, c3, c1_next):
    """Fused conv2 + conv3 + residual + ReLU (+ next block's conv1). One pallas_call."""
    M, K2 = patches.shape
    _, C2 = c2['w'].shape
    _, N3 = c3['w'].shape
    has_next = c1_next is not None
    tm = _pick_tm(M)
    Mp = _rup(M, tm)
    patches = patches.astype(jnp.bfloat16)
    identity = identity.astype(jnp.bfloat16)
    if Mp != M:
        patches = jnp.pad(patches, ((0, Mp - M), (0, 0)))
        identity = jnp.pad(identity, ((0, Mp - M), (0, 0)))

    in_specs = [pl.BlockSpec((tm, K2), lambda i: (i, 0)),
                pl.BlockSpec((tm, N3), lambda i: (i, 0)),
                pl.BlockSpec((K2, C2), lambda i: (0, 0)),
                pl.BlockSpec((1, C2), lambda i: (0, 0)),
                pl.BlockSpec((1, C2), lambda i: (0, 0)),
                pl.BlockSpec((C2, N3), lambda i: (0, 0)),
                pl.BlockSpec((1, N3), lambda i: (0, 0)),
                pl.BlockSpec((1, N3), lambda i: (0, 0))]
    args = [patches, identity, c2['w'], c2['scale'], c2['shift'],
            c3['w'], c3['scale'], c3['shift']]
    flops = 2 * Mp * (K2 * C2 + C2 * N3)
    bytes_accessed = (Mp * (K2 + 2 * N3) + K2 * C2 + C2 * N3) * 2
    if has_next:
        _, N1n = c1_next['w'].shape
        in_specs += [pl.BlockSpec((N3, N1n), lambda i: (0, 0)),
                     pl.BlockSpec((1, N1n), lambda i: (0, 0)),
                     pl.BlockSpec((1, N1n), lambda i: (0, 0))]
        args += [c1_next['w'], c1_next['scale'], c1_next['shift']]
        out_shape = (jax.ShapeDtypeStruct((Mp, N3), jnp.bfloat16),
                     jax.ShapeDtypeStruct((Mp, N1n), jnp.bfloat16))
        out_specs = [pl.BlockSpec((tm, N3), lambda i: (i, 0)),
                     pl.BlockSpec((tm, N1n), lambda i: (i, 0))]
        flops += 2 * Mp * N3 * N1n
        bytes_accessed += (N3 * N1n + Mp * N1n) * 2
    else:
        out_shape = jax.ShapeDtypeStruct((Mp, N3), jnp.bfloat16)
        out_specs = pl.BlockSpec((tm, N3), lambda i: (i, 0))

    res = pl.pallas_call(
        functools.partial(_block_tail_kernel, has_next=has_next),
        out_shape=out_shape,
        grid_spec=pltpu.PrefetchScalarGridSpec(
            num_scalar_prefetch=0, grid=(Mp // tm,),
            in_specs=in_specs, out_specs=out_specs),
        compiler_params=_CP_1D,
        cost_estimate=pl.CostEstimate(flops=flops, transcendentals=0,
                                      bytes_accessed=bytes_accessed),
    )(*args)

    if has_next:
        y, h1n = res
        if Mp != M:
            y, h1n = y[:M], h1n[:M]
        return y, h1n
    y = res[:M] if Mp != M else res
    return y, None


def pallas_head(x2d, head):
    """Fused 3x (1x1 conv + bias) chain, final ReLU. Whole head in one kernel."""
    M, K = x2d.shape
    _, N1 = head['c1']['w'].shape
    _, N2 = head['c2']['w'].shape
    _, N3 = head['c3']['w'].shape
    Mp = _rup(M, 16)
    x2d = x2d.astype(jnp.bfloat16)
    if Mp != M:
        x2d = jnp.pad(x2d, ((0, Mp - M), (0, 0)))
    out = pl.pallas_call(
        _head_kernel,
        out_shape=jax.ShapeDtypeStruct((Mp, N3), jnp.float32),
        grid_spec=pltpu.PrefetchScalarGridSpec(
            num_scalar_prefetch=0, grid=(1,),
            in_specs=[pl.BlockSpec((Mp, K), lambda i: (0, 0)),
                      pl.BlockSpec((K, N1), lambda i: (0, 0)),
                      pl.BlockSpec((1, N1), lambda i: (0, 0)),
                      pl.BlockSpec((N1, N2), lambda i: (0, 0)),
                      pl.BlockSpec((1, N2), lambda i: (0, 0)),
                      pl.BlockSpec((N2, N3), lambda i: (0, 0)),
                      pl.BlockSpec((1, N3), lambda i: (0, 0))],
            out_specs=pl.BlockSpec((Mp, N3), lambda i: (0, 0))),
        compiler_params=_CP_1D,
        cost_estimate=pl.CostEstimate(
            flops=2 * Mp * (K * N1 + N1 * N2 + N2 * N3), transcendentals=0,
            bytes_accessed=(Mp * K + K * N1 + N1 * N2 + N2 * N3) * 2 + Mp * N3 * 4),
    )(x2d, head['c1']['w'], head['c1']['shift'],
      head['c2']['w'], head['c2']['shift'],
      head['c3']['w'], head['c3']['shift'])
    return out[:M] if Mp != M else out


def pallas_maxpool_3x3_s2(x):
    """MaxPool2d(kernel=3, stride=2, padding=1) on NHWC bf16.
    Input is post-ReLU (>= 0), so zero-padding the spatial borders is exact."""
    B, H, W, C = x.shape
    assert C % 128 == 0
    pad, k, s = 1, 3, 2
    Ho = (H + 2 * pad - k) // s + 1
    Wo = (W + 2 * pad - k) // s + 1
    xp = jnp.pad(x, ((0, 0), (pad, pad), (pad, pad), (0, 0)))
    M = B * Ho * Wo
    wins = [xp[:, dy:dy + s * Ho:s, dx:dx + s * Wo:s, :].reshape(M, C)
            for dy in range(k) for dx in range(k)]
    tm = 128 if M % 128 == 0 else _rup(M, 16)
    Mp = _rup(M, tm)
    if Mp != M:
        wins = [jnp.pad(wn, ((0, Mp - M), (0, 0))) for wn in wins]
    out = pl.pallas_call(
        _max9_kernel,
        out_shape=jax.ShapeDtypeStruct((Mp, C), x.dtype),
        grid_spec=pltpu.PrefetchScalarGridSpec(
            num_scalar_prefetch=0, grid=(Mp // tm,),
            in_specs=[pl.BlockSpec((tm, C), lambda i: (i, 0))] * (k * k),
            out_specs=pl.BlockSpec((tm, C), lambda i: (i, 0))),
        compiler_params=_CP_1D,
    )(*wins)
    out = out[:M] if Mp != M else out
    return out.reshape(B, Ho, Wo, C)


# ---------------------------------------------------------------------------
# im2col glue (XLA) — activations are already channel-padded, so K stays aligned
# ---------------------------------------------------------------------------

def _im2col(x, kh, kw, stride, pad):
    B, H, W, C = x.shape
    if pad:
        x = jnp.pad(x, ((0, 0), (pad, pad), (pad, pad), (0, 0)))
    Ho = (H + 2 * pad - kh) // stride + 1
    Wo = (W + 2 * pad - kw) // stride + 1
    cols = [x[:, dy:dy + stride * Ho:stride, dx:dx + stride * Wo:stride, :]
            for dy in range(kh) for dx in range(kw)]
    patches = cols[0] if len(cols) == 1 else jnp.concatenate(cols, axis=-1)
    return patches.reshape(B * Ho * Wo, kh * kw * C), (B, Ho, Wo)


# ---------------------------------------------------------------------------
# Parameter init (pre-padded MXU layout)
# ---------------------------------------------------------------------------

def _conv_bn_params(key, kh, kw, cin, cout, cin_store):
    """He-init conv + eval-mode BN folded. Stored as [Kp, Np] bf16 with zero rows
    matching the channel-padded input layout; scale/shift (1, Np) f32."""
    cout_p = _rup(cout, 128)
    K = kh * kw * cin_store
    Kp = _rup(K, 128)
    w = jax.random.normal(key, (kh, kw, cin, cout), jnp.float32) * np.sqrt(
        2.0 / (cin * kh * kw))
    wp = jnp.zeros((kh, kw, cin_store, cout_p), jnp.float32).at[:, :, :cin, :cout].set(w)
    wm = jnp.zeros((Kp, cout_p), jnp.float32).at[:K, :].set(wp.reshape(K, cout_p))
    return {'w': wm.astype(jnp.bfloat16),
            'scale': jnp.ones((1, cout_p), jnp.float32),
            'shift': jnp.zeros((1, cout_p), jnp.float32)}


def _conv_bias_params(key, cin, cout):
    """1x1 conv with bias (head). scale=1, shift=bias (zero in padded channels)."""
    kw_, kb_ = jax.random.split(key)
    cout_p = _rup(cout, 128)
    w = jax.random.normal(kw_, (cin, cout), jnp.float32) * np.sqrt(2.0 / cin)
    b = jax.random.uniform(kb_, (cout,), jnp.float32, -0.05, 0.05)
    wm = jnp.zeros((cin, cout_p), jnp.float32).at[:, :cout].set(w)
    bm = jnp.zeros((1, cout_p), jnp.float32).at[0, :cout].set(b)
    return {'w': wm.astype(jnp.bfloat16),
            'scale': jnp.ones((1, cout_p), jnp.float32),
            'shift': bm}


def init_resnet_trunk(key):
    keys = iter(jax.random.split(key, 64))
    p = {'conv1': _conv_bn_params(next(keys), 7, 7, 3, 64, cin_store=3)}
    blocks = []
    # layer1: Bottleneck x3, planes=64 (stored channel-padded to 128), out 256
    for i in range(3):
        cin, cin_store = (64, 128) if i == 0 else (256, 256)
        blk = {'conv1': _conv_bn_params(next(keys), 1, 1, cin, 64, cin_store),
               'conv2': _conv_bn_params(next(keys), 3, 3, 64, 64, 128),
               'conv3': _conv_bn_params(next(keys), 1, 1, 64, 256, 128)}
        if i == 0:
            blk['downsample'] = _conv_bn_params(next(keys), 1, 1, cin, 256, cin_store)
        blocks.append(blk)
    # layer2: Bottleneck x4, planes=128, out 512, first block stride 2
    for i in range(4):
        cin = 256 if i == 0 else 512
        blk = {'conv1': _conv_bn_params(next(keys), 1, 1, cin, 128, cin),
               'conv2': _conv_bn_params(next(keys), 3, 3, 128, 128, 128),
               'conv3': _conv_bn_params(next(keys), 1, 1, 128, 512, 128)}
        if i == 0:
            blk['downsample'] = _conv_bn_params(next(keys), 1, 1, cin, 512, cin)
        blocks.append(blk)
    p['blocks'] = blocks
    return p


def init_params(key, num_classes=32):
    k_trunk, k1, k2, k3 = jax.random.split(key, 4)
    # Same checkpoint loaded into both branches in the PyTorch module -> shared trunk.
    trunk = init_resnet_trunk(k_trunk)
    head = {'c1': _conv_bias_params(k1, 1024, 512),
            'c2': _conv_bias_params(k2, 512, 128),
            'c3': _conv_bias_params(k3, 128, num_classes)}
    return {'trunk': trunk, 'head': head}


# ---------------------------------------------------------------------------
# Forward pass
# ---------------------------------------------------------------------------

def trunk_forward(x_nhwc, p):
    # stem: 7x7/s2 conv + BN + ReLU (one matmul kernel), then 3x3/s2 max-pool kernel
    patches, (B, Ho, Wo) = _im2col(x_nhwc.astype(jnp.bfloat16), 7, 7, 2, 3)
    h = pallas_matmul_affine(patches, p['conv1'], relu=True)          # [B*16*16, 128]
    h = h.reshape(B, Ho, Wo, -1)
    x = pallas_maxpool_3x3_s2(h)                                      # [B, 8, 8, 128]
    Hc, Wc = x.shape[1], x.shape[2]

    blocks = p['blocks']
    # layer1 block0: conv1 + downsample fused (they read identical rows)
    x2d = x.reshape(B * Hc * Wc, x.shape[-1])
    h1, identity = pallas_conv1_ds(x2d, blocks[0]['conv1'], blocks[0]['downsample'])

    y = None
    for i, blk in enumerate(blocks):
        stride = _BLOCK_STRIDES[i]
        h1_4d = h1.reshape(B, Hc, Wc, h1.shape[-1])
        patches, (_, Ho, Wo) = _im2col(h1_4d, 3, 3, stride, 1)
        nxt = blocks[i + 1] if i + 1 < len(blocks) else None
        y, h1_next = pallas_block_tail(
            patches, identity, blk['conv2'], blk['conv3'],
            nxt['conv1'] if nxt is not None else None)
        Hc, Wc = Ho, Wo
        if nxt is not None:
            h1 = h1_next
            if 'downsample' in nxt:
                # stride-2 1x1 projection of this block's output for the next residual
                y4 = y.reshape(B, Hc, Wc, y.shape[-1])
                ds_in, _ = _im2col(y4, 1, 1, _BLOCK_STRIDES[i + 1], 0)
                identity = pallas_matmul_affine(ds_in, nxt['downsample'], relu=False)
            else:
                identity = y
    return y.reshape(B, Hc, Wc, -1)                                   # [B, H/8, W/8, 512]


def rgbd_encoder_forward(params, rgb_nchw, depth_nchw, num_classes=32):
    rgb = jnp.transpose(rgb_nchw, (0, 2, 3, 1))
    depth = jnp.transpose(depth_nchw, (0, 2, 3, 1))
    B = rgb.shape[0]
    # Both branches carry identical checkpoint weights -> one batched trunk pass.
    both = jnp.concatenate([rgb, depth], axis=0)
    o = trunk_forward(both, params['trunk'])                          # [2B, h, w, 512]
    _, Hh, Wh, Ch = o.shape
    x = jnp.concatenate([o[:B], o[B:]], axis=-1)                      # cat along channels
    x2d = x.reshape(B * Hh * Wh, 2 * Ch)
    out = pallas_head(x2d, params['head'])                            # [B*h*w, 128] f32
    out = out[:, :num_classes].reshape(B, Hh, Wh, num_classes)
    return jnp.transpose(out, (0, 3, 1, 2))                           # back to NCHW


# ---------------------------------------------------------------------------

if __name__ == "__main__":
    key = jax.random.PRNGKey(0)
    k_params, k_rgb, k_depth = jax.random.split(key, 3)

    B, H, W = 2, 32, 32
    rgb_image = jax.random.normal(k_rgb, (B, 3, H, W), jnp.float32)
    depth_image = jax.random.normal(k_depth, (B, 3, H, W), jnp.float32)

    params = init_params(k_params, num_classes=32)

    fwd = jax.jit(rgbd_encoder_forward)
    out = jax.block_until_ready(fwd(params, rgb_image, depth_image))

    expected = (B, 32, H // 8, W // 8)
    assert out.shape == expected, (out.shape, expected)
    assert bool(jnp.all(jnp.isfinite(out))), "non-finite output"
    assert bool(jnp.all(out >= 0.0)), "final ReLU violated"
    print("KERNEL_OK")
</pallas_src>

<mosaic_0001>
module attributes {stable_mosaic.version = 11 : i64} {
  func.func @_matmul_affine_kernel(%arg0: i32, %arg1: i32, %arg2: memref<256x256xbf16, #tpu.memory_space<vmem>>, %arg3: memref<256x128xbf16, #tpu.memory_space<vmem>>, %arg4: memref<1x128xf32, #tpu.memory_space<vmem>>, %arg5: memref<1x128xf32, #tpu.memory_space<vmem>>, %arg6: memref<256x128xbf16, #tpu.memory_space<vmem>>) attributes {dimension_semantics = [#tpu.dimension_semantics<parallel>, #tpu.dimension_semantics<parallel>], iteration_bounds = array<i64: 4, 1>, scalar_prefetch = 0 : i64, scratch_operands = 0 : i64, tpu.core_type = #tpu.core_type<tc>, window_params = [{transform_indices = @transform_0, window_bounds = array<i64: 256, 256>}, {transform_indices = @transform_1, window_bounds = array<i64: 256, 128>}, {transform_indices = @transform_2, window_bounds = array<i64: 1, 128>}, {transform_indices = @transform_3, window_bounds = array<i64: 1, 128>}, {transform_indices = @transform_4, window_bounds = array<i64: 256, 128>}]} {
    %c0 = arith.constant 0 : index
    %c0_0 = arith.constant 0 : index
    %0 = vector.load %arg2[%c0, %c0_0] : memref<256x256xbf16, #tpu.memory_space<vmem>>, vector<256x256xbf16>
    %c0_1 = arith.constant 0 : index
    %c0_2 = arith.constant 0 : index
    %1 = vector.load %arg3[%c0_1, %c0_2] : memref<256x128xbf16, #tpu.memory_space<vmem>>, vector<256x128xbf16>
    %cst = arith.constant dense<0.000000e+00> : vector<256x128xf32>
    %2 = tpu.matmul %0, %1, %cst {dimension_numbers = #tpu.dot_dimension_numbers<[1], [0], [0], [1], [0, 0, 1, 1], [], []>} : vector<256x256xbf16>, vector<256x128xbf16>, vector<256x128xf32> -> vector<256x128xf32>
    %c0_3 = arith.constant 0 : index
    %c0_4 = arith.constant 0 : index
    %3 = vector.load %arg4[%c0_3, %c0_4] : memref<1x128xf32, #tpu.memory_space<vmem>>, vector<1x128xf32>
    %4 = vector.broadcast %3 : vector<1x128xf32> to vector<256x128xf32>
    %5 = arith.mulf %2, %4 : vector<256x128xf32>
    %c0_5 = arith.constant 0 : index
    %c0_6 = arith.constant 0 : index
    %6 = vector.load %arg5[%c0_5, %c0_6] : memref<1x128xf32, #tpu.memory_space<vmem>>, vector<1x128xf32>
    %7 = vector.broadcast %6 : vector<1x128xf32> to vector<256x128xf32>
    %8 = arith.addf %5, %7 : vector<256x128xf32>
    %cst_7 = arith.constant 0.000000e+00 : f32
    %9 = vector.broadcast %cst_7 : f32 to vector<256x128xf32>
    %10 = arith.maximumf %8, %9 : vector<256x128xf32>
    %11 = arith.truncf %10 : vector<256x128xf32> to vector<256x128xbf16>
    %c0_8 = arith.constant 0 : index
    %c0_9 = arith.constant 0 : index
    %12 = vector.load %arg6[%c0_8, %c0_9] : memref<256x128xbf16, #tpu.memory_space<vmem>>, vector<256x128xbf16>
    tpu.vector_store %arg6[%c0_8, %c0_9], %11 {strides = array<i32>} : memref<256x128xbf16, #tpu.memory_space<vmem>>, vector<256x128xbf16>,
    return
  }
  func.func @transform_0(%arg0: i32, %arg1: i32) -> (i32, i32) {
    %c0_i32 = arith.constant 0 : i32
    %c0_i32_0 = arith.constant 0 : i32
    return %arg0, %c0_i32 : i32, i32
  }
  func.func @transform_1(%arg0: i32, %arg1: i32) -> (i32, i32) {
    %c0_i32 = arith.constant 0 : i32
    %c0_i32_0 = arith.constant 0 : i32
    return %c0_i32, %arg1 : i32, i32
  }
  func.func @transform_2(%arg0: i32, %arg1: i32) -> (i32, i32) {
    %c0_i32 = arith.constant 0 : i32
    %c0_i32_0 = arith.constant 0 : i32
    return %c0_i32, %arg1 : i32, i32
  }
  func.func @transform_3(%arg0: i32, %arg1: i32) -> (i32, i32) {
    %c0_i32 = arith.constant 0 : i32
    %c0_i32_0 = arith.constant 0 : i32
    return %c0_i32, %arg1 : i32, i32
  }
  func.func @transform_4(%arg0: i32, %arg1: i32) -> (i32, i32) {
    %c0_i32 = arith.constant 0 : i32
    return %arg0, %arg1 : i32, i32
  }
}

module attributes {stable_mosaic.version = 11 : i64} {
  func.func @_max9_kernel(%arg0: i32, %arg1: memref<128x128xbf16, #tpu.memory_space<vmem>>, %arg2: memref<128x128xbf16, #tpu.memory_space<vmem>>, %arg3: memref<128x128xbf16, #tpu.memory_space<vmem>>, %arg4: memref<128x128xbf16, #tpu.memory_space<vmem>>, %arg5: memref<128x128xbf16, #tpu.memory_space<vmem>>, %arg6: memref<128x128xbf16, #tpu.memory_space<vmem>>, %arg7: memref<128x128xbf16, #tpu.memory_space<vmem>>, %arg8: memref<128x128xbf16, #tpu.memory_space<vmem>>, %arg9: memref<128x128xbf16, #tpu.memory_space<vmem>>, %arg10: memref<128x128xbf16, #tpu.memory_space<vmem>>) attributes {dimension_semantics = [#tpu.dimension_semantics<parallel>], iteration_bounds = array<i64: 2>, scalar_prefetch = 0 : i64, scratch_operands = 0 : i64, tpu.core_type = #tpu.core_type<tc>, window_params = [{transform_indices = @transform_0, window_bounds = array<i64: 128, 128>}, {transform_indices = @transform_1, window_bounds = array<i64: 128, 128>}, {transform_indices = @transform_2, window_bounds = array<i64: 128, 128>}, {transform_indices = @transform_3, window_bounds = array<i64: 128, 128>}, {transform_indices = @transform_4, window_bounds = array<i64: 128, 128>}, {transform_indices = @transform_5, window_bounds = array<i64: 128, 128>}, {transform_indices = @transform_6, window_bounds = array<i64: 128, 128>}, {transform_indices = @transform_7, window_bounds = array<i64: 128, 128>}, {transform_indices = @transform_8, window_bounds = array<i64: 128, 128>}, {transform_indices = @transform_9, window_bounds = array<i64: 128, 128>}]} {
    %c0 = arith.constant 0 : index
    %c0_0 = arith.constant 0 : index
    %0 = vector.load %arg1[%c0, %c0_0] : memref<128x128xbf16, #tpu.memory_space<vmem>>, vector<128x128xbf16>
    %c0_1 = arith.constant 0 : index
    %c0_2 = arith.constant 0 : index
    %1 = vector.load %arg2[%c0_1, %c0_2] : memref<128x128xbf16, #tpu.memory_space<vmem>>, vector<128x128xbf16>
    %2 = arith.maximumf %0, %1 : vector<128x128xbf16>
    %c0_3 = arith.constant 0 : index
    %c0_4 = arith.constant 0 : index
    %3 = vector.load %arg3[%c0_3, %c0_4] : memref<128x128xbf16, #tpu.memory_space<vmem>>, vector<128x128xbf16>
    %4 = arith.maximumf %2, %3 : vector<128x128xbf16>
    %c0_5 = arith.constant 0 : index
    %c0_6 = arith.constant 0 : index
    %5 = vector.load %arg4[%c0_5, %c0_6] : memref<128x128xbf16, #tpu.memory_space<vmem>>, vector<128x128xbf16>
    %6 = arith.maximumf %4, %5 : vector<128x128xbf16>
    %c0_7 = arith.constant 0 : index
    %c0_8 = arith.constant 0 : index
    %7 = vector.load %arg5[%c0_7, %c0_8] : memref<128x128xbf16, #tpu.memory_space<vmem>>, vector<128x128xbf16>
    %8 = arith.maximumf %6, %7 : vector<128x128xbf16>
    %c0_9 = arith.constant 0 : index
    %c0_10 = arith.constant 0 : index
    %9 = vector.load %arg6[%c0_9, %c0_10] : memref<128x128xbf16, #tpu.memory_space<vmem>>, vector<128x128xbf16>
    %10 = arith.maximumf %8, %9 : vector<128x128xbf16>
    %c0_11 = arith.constant 0 : index
    %c0_12 = arith.constant 0 : index
    %11 = vector.load %arg7[%c0_11, %c0_12] : memref<128x128xbf16, #tpu.memory_space<vmem>>, vector<128x128xbf16>
    %12 = arith.maximumf %10, %11 : vector<128x128xbf16>
    %c0_13 = arith.constant 0 : index
    %c0_14 = arith.constant 0 : index
    %13 = vector.load %arg8[%c0_13, %c0_14] : memref<128x128xbf16, #tpu.memory_space<vmem>>, vector<128x128xbf16>
    %14 = arith.maximumf %12, %13 : vector<128x128xbf16>
    %c0_15 = arith.constant 0 : index
    %c0_16 = arith.constant 0 : index
    %15 = vector.load %arg9[%c0_15, %c0_16] : memref<128x128xbf16, #tpu.memory_space<vmem>>, vector<128x128xbf16>
    %16 = arith.maximumf %14, %15 : vector<128x128xbf16>
    %c0_17 = arith.constant 0 : index
    %c0_18 = arith.constant 0 : index
    %17 = vector.load %arg10[%c0_17, %c0_18] : memref<128x128xbf16, #tpu.memory_space<vmem>>, vector<128x128xbf16>
    tpu.vector_store %arg10[%c0_17, %c0_18], %16 {strides = array<i32>} : memref<128x128xbf16, #tpu.memory_space<vmem>>, vector<128x128xbf16>,
    return
  }
  func.func @transform_0(%arg0: i32) -> (i32, i32) {
    %c0_i32 = arith.constant 0 : i32
    %c0_i32_0 = arith.constant 0 : i32
    return %arg0, %c0_i32 : i32, i32
  }
  func.func @transform_1(%arg0: i32) -> (i32, i32) {
    %c0_i32 = arith.constant 0 : i32
    %c0_i32_0 = arith.constant 0 : i32
    return %arg0, %c0_i32 : i32, i32
  }
  func.func @transform_2(%arg0: i32) -> (i32, i32) {
    %c0_i32 = arith.constant 0 : i32
    %c0_i32_0 = arith.constant 0 : i32
    return %arg0, %c0_i32 : i32, i32
  }
  func.func @transform_3(%arg0: i32) -> (i32, i32) {
    %c0_i32 = arith.constant 0 : i32
    %c0_i32_0 = arith.constant 0 : i32
    return %arg0, %c0_i32 : i32, i32
  }
  func.func @transform_4(%arg0: i32) -> (i32, i32) {
    %c0_i32 = arith.constant 0 : i32
    %c0_i32_0 = arith.constant 0 : i32
    return %arg0, %c0_i32 : i32, i32
  }
  func.func @transform_5(%arg0: i32) -> (i32, i32) {
    %c0_i32 = arith.constant 0 : i32
    %c0_i32_0 = arith.constant 0 : i32
    return %arg0, %c0_i32 : i32, i32
  }
  func.func @transform_6(%arg0: i32) -> (i32, i32) {
    %c0_i32 = arith.constant 0 : i32
    %c0_i32_0 = arith.constant 0 : i32
    return %arg0, %c0_i32 : i32, i32
  }
  func.func @transform_7(%arg0: i32) -> (i32, i32) {
    %c0_i32 = arith.constant 0 : i32
    %c0_i32_0 = arith.constant 0 : i32
    return %arg0, %c0_i32 : i32, i32
  }
  func.func @transform_8(%arg0: i32) -> (i32, i32) {
    %c0_i32 = arith.constant 0 : i32
    %c0_i32_0 = arith.constant 0 : i32
    return %arg0, %c0_i32 : i32, i32
  }
  func.func @transform_9(%arg0: i32) -> (i32, i32) {
    %c0_i32 = arith.constant 0 : i32
    %c0_i32_0 = arith.constant 0 : i32
    return %arg0, %c0_i32 : i32, i32
  }
}

module attributes {stable_mosaic.version = 11 : i64} {
  func.func @_conv1_ds_kernel(%arg0: i32, %arg1: memref<128x128xbf16, #tpu.memory_space<vmem>>, %arg2: memref<128x128xbf16, #tpu.memory_space<vmem>>, %arg3: memref<1x128xf32, #tpu.memory_space<vmem>>, %arg4: memref<1x128xf32, #tpu.memory_space<vmem>>, %arg5: memref<128x256xbf16, #tpu.memory_space<vmem>>, %arg6: memref<1x256xf32, #tpu.memory_space<vmem>>, %arg7: memref<1x256xf32, #tpu.memory_space<vmem>>, %arg8: memref<128x128xbf16, #tpu.memory_space<vmem>>, %arg9: memref<128x256xbf16, #tpu.memory_space<vmem>>) attributes {dimension_semantics = [#tpu.dimension_semantics<parallel>], iteration_bounds = array<i64: 2>, scalar_prefetch = 0 : i64, scratch_operands = 0 : i64, tpu.core_type = #tpu.core_type<tc>, window_params = [{transform_indices = @transform_0, window_bounds = array<i64: 128, 128>}, {pipeline_mode = #tpu.pipeline_mode<synchronous>, transform_indices = @transform_1, window_bounds = array<i64: 128, 128>}, {pipeline_mode = #tpu.pipeline_mode<synchronous>, transform_indices = @transform_2, window_bounds = array<i64: 1, 128>}, {pipeline_mode = #tpu.pipeline_mode<synchronous>, transform_indices = @transform_3, window_bounds = array<i64: 1, 128>}, {pipeline_mode = #tpu.pipeline_mode<synchronous>, transform_indices = @transform_4, window_bounds = array<i64: 128, 256>}, {pipeline_mode = #tpu.pipeline_mode<synchronous>, transform_indices = @transform_5, window_bounds = array<i64: 1, 256>}, {pipeline_mode = #tpu.pipeline_mode<synchronous>, transform_indices = @transform_6, window_bounds = array<i64: 1, 256>}, {transform_indices = @transform_7, window_bounds = array<i64: 128, 128>}, {transform_indices = @transform_8, window_bounds = array<i64: 128, 256>}]} {
    %c0 = arith.constant 0 : index
    %c0_0 = arith.constant 0 : index
    %0 = vector.load %arg1[%c0, %c0_0] : memref<128x128xbf16, #tpu.memory_space<vmem>>, vector<128x128xbf16>
    %c0_1 = arith.constant 0 : index
    %c0_2 = arith.constant 0 : index
    %1 = vector.load %arg2[%c0_1, %c0_2] : memref<128x128xbf16, #tpu.memory_space<vmem>>, vector<128x128xbf16>
    %cst = arith.constant dense<0.000000e+00> : vector<128x128xf32>
    %2 = tpu.matmul %0, %1, %cst {dimension_numbers = #tpu.dot_dimension_numbers<[1], [0], [0], [1], [0, 0, 1, 1], [], []>} : vector<128x128xbf16>, vector<128x128xbf16>, vector<128x128xf32> -> vector<128x128xf32>
    %c0_3 = arith.constant 0 : index
    %c0_4 = arith.constant 0 : index
    %3 = vector.load %arg3[%c0_3, %c0_4] : memref<1x128xf32, #tpu.memory_space<vmem>>, vector<1x128xf32>
    %4 = vector.broadcast %3 : vector<1x128xf32> to vector<128x128xf32>
    %5 = arith.mulf %2, %4 : vector<128x128xf32>
    %c0_5 = arith.constant 0 : index
    %c0_6 = arith.constant 0 : index
    %6 = vector.load %arg4[%c0_5, %c0_6] : memref<1x128xf32, #tpu.memory_space<vmem>>, vector<1x128xf32>
    %7 = vector.broadcast %6 : vector<1x128xf32> to vector<128x128xf32>
    %8 = arith.addf %5, %7 : vector<128x128xf32>
    %cst_7 = arith.constant 0.000000e+00 : f32
    %9 = vector.broadcast %cst_7 : f32 to vector<128x128xf32>
    %10 = arith.maximumf %8, %9 : vector<128x128xf32>
    %11 = arith.truncf %10 : vector<128x128xf32> to vector<128x128xbf16>
    %c0_8 = arith.constant 0 : index
    %c0_9 = arith.constant 0 : index
    %12 = vector.load %arg8[%c0_8, %c0_9] : memref<128x128xbf16, #tpu.memory_space<vmem>>, vector<128x128xbf16>
    tpu.vector_store %arg8[%c0_8, %c0_9], %11 {strides = array<i32>} : memref<128x128xbf16, #tpu.memory_space<vmem>>, vector<128x128xbf16>,
    %c0_10 = arith.constant 0 : index
    %c0_11 = arith.constant 0 : index
    %13 = vector.load %arg5[%c0_10, %c0_11] : memref<128x256xbf16, #tpu.memory_space<vmem>>, vector<128x256xbf16>
    %cst_12 = arith.constant dense<0.000000e+00> : vector<128x256xf32>
    %14 = tpu.matmul %0, %13, %cst_12 {dimension_numbers = #tpu.dot_dimension_numbers<[1], [0], [0], [1], [0, 0, 1, 1], [], []>} : vector<128x128xbf16>, vector<128x256xbf16>, vector<128x256xf32> -> vector<128x256xf32>
    %c0_13 = arith.constant 0 : index
    %c0_14 = arith.constant 0 : index
    %15 = vector.load %arg6[%c0_13, %c0_14] : memref<1x256xf32, #tpu.memory_space<vmem>>, vector<1x256xf32>
    %16 = vector.broadcast %15 : vector<1x256xf32> to vector<128x256xf32>
    %17 = arith.mulf %14, %16 : vector<128x256xf32>
    %c0_15 = arith.constant 0 : index
    %c0_16 = arith.constant 0 : index
    %18 = vector.load %arg7[%c0_15, %c0_16] : memref<1x256xf32, #tpu.memory_space<vmem>>, vector<1x256xf32>
    %19 = vector.broadcast %18 : vector<1x256xf32> to vector<128x256xf32>
    %20 = arith.addf %17, %19 : vector<128x256xf32>
    %21 = arith.truncf %20 : vector<128x256xf32> to vector<128x256xbf16>
    %c0_17 = arith.constant 0 : index
    %c0_18 = arith.constant 0 : index
    %22 = vector.load %arg9[%c0_17, %c0_18] : memref<128x256xbf16, #tpu.memory_space<vmem>>, vector<128x256xbf16>
    tpu.vector_store %arg9[%c0_17, %c0_18], %21 {strides = array<i32>} : memref<128x256xbf16, #tpu.memory_space<vmem>>, vector<128x256xbf16>,
    return
  }
  func.func @transform_0(%arg0: i32) -> (i32, i32) {
    %c0_i32 = arith.constant 0 : i32
    %c0_i32_0 = arith.constant 0 : i32
    return %arg0, %c0_i32 : i32, i32
  }
  func.func @transform_1(%arg0: i32) -> (i32, i32) {
    %c0_i32 = arith.constant 0 : i32
    %c0_i32_0 = arith.constant 0 : i32
    %c0_i32_1 = arith.constant 0 : i32
    return %c0_i32, %c0_i32_0 : i32, i32
  }
  func.func @transform_2(%arg0: i32) -> (i32, i32) {
    %c0_i32 = arith.constant 0 : i32
    %c0_i32_0 = arith.constant 0 : i32
    %c0_i32_1 = arith.constant 0 : i32
    return %c0_i32, %c0_i32_0 : i32, i32
  }
  func.func @transform_3(%arg0: i32) -> (i32, i32) {
    %c0_i32 = arith.constant 0 : i32
    %c0_i32_0 = arith.constant 0 : i32
    %c0_i32_1 = arith.constant 0 : i32
    return %c0_i32, %c0_i32_0 : i32, i32
  }
  func.func @transform_4(%arg0: i32) -> (i32, i32) {
    %c0_i32 = arith.constant 0 : i32
    %c0_i32_0 = arith.constant 0 : i32
    %c0_i32_1 = arith.constant 0 : i32
    return %c0_i32, %c0_i32_0 : i32, i32
  }
  func.func @transform_5(%arg0: i32) -> (i32, i32) {
    %c0_i32 = arith.constant 0 : i32
    %c0_i32_0 = arith.constant 0 : i32
    %c0_i32_1 = arith.constant 0 : i32
    return %c0_i32, %c0_i32_0 : i32, i32
  }
  func.func @transform_6(%arg0: i32) -> (i32, i32) {
    %c0_i32 = arith.constant 0 : i32
    %c0_i32_0 = arith.constant 0 : i32
    %c0_i32_1 = arith.constant 0 : i32
    return %c0_i32, %c0_i32_0 : i32, i32
  }
  func.func @transform_7(%arg0: i32) -> (i32, i32) {
    %c0_i32 = arith.constant 0 : i32
    %c0_i32_0 = arith.constant 0 : i32
    return %arg0, %c0_i32 : i32, i32
  }
  func.func @transform_8(%arg0: i32) -> (i32, i32) {
    %c0_i32 = arith.constant 0 : i32
    %c0_i32_0 = arith.constant 0 : i32
    return %arg0, %c0_i32 : i32, i32
  }
}

module attributes {stable_mosaic.version = 11 : i64} {
  func.func @_block_tail_kernel(%arg0: i32, %arg1: memref<128x1152xbf16, #tpu.memory_space<vmem>>, %arg2: memref<128x256xbf16, #tpu.memory_space<vmem>>, %arg3: memref<1152x128xbf16, #tpu.memory_space<vmem>>, %arg4: memref<1x128xf32, #tpu.memory_space<vmem>>, %arg5: memref<1x128xf32, #tpu.memory_space<vmem>>, %arg6: memref<128x256xbf16, #tpu.memory_space<vmem>>, %arg7: memref<1x256xf32, #tpu.memory_space<vmem>>, %arg8: memref<1x256xf32, #tpu.memory_space<vmem>>, %arg9: memref<256x128xbf16, #tpu.memory_space<vmem>>, %arg10: memref<1x128xf32, #tpu.memory_space<vmem>>, %arg11: memref<1x128xf32, #tpu.memory_space<vmem>>, %arg12: memref<128x256xbf16, #tpu.memory_space<vmem>>, %arg13: memref<128x128xbf16, #tpu.memory_space<vmem>>) attributes {dimension_semantics = [#tpu.dimension_semantics<parallel>], iteration_bounds = array<i64: 2>, scalar_prefetch = 0 : i64, scratch_operands = 0 : i64, tpu.core_type = #tpu.core_type<tc>, window_params = [{transform_indices = @transform_0, window_bounds = array<i64: 128, 1152>}, {transform_indices = @transform_1, window_bounds = array<i64: 128, 256>}, {pipeline_mode = #tpu.pipeline_mode<synchronous>, transform_indices = @transform_2, window_bounds = array<i64: 1152, 128>}, {pipeline_mode = #tpu.pipeline_mode<synchronous>, transform_indices = @transform_3, window_bounds = array<i64: 1, 128>}, {pipeline_mode = #tpu.pipeline_mode<synchronous>, transform_indices = @transform_4, window_bounds = array<i64: 1, 128>}, {pipeline_mode = #tpu.pipeline_mode<synchronous>, transform_indices = @transform_5, window_bounds = array<i64: 128, 256>}, {pipeline_mode = #tpu.pipeline_mode<synchronous>, transform_indices = @transform_6, window_bounds = array<i64: 1, 256>}, {pipeline_mode = #tpu.pipeline_mode<synchronous>, transform_indices = @transform_7, window_bounds = array<i64: 1, 256>}, {pipeline_mode = #tpu.pipeline_mode<synchronous>, transform_indices = @transform_8, window_bounds = array<i64: 256, 128>}, {pipeline_mode = #tpu.pipeline_mode<synchronous>, transform_indices = @transform_9, window_bounds = array<i64: 1, 128>}, {pipeline_mode = #tpu.pipeline_mode<synchronous>, transform_indices = @transform_10, window_bounds = array<i64: 1, 128>}, {transform_indices = @transform_11, window_bounds = array<i64: 128, 256>}, {transform_indices = @transform_12, window_bounds = array<i64: 128, 128>}]} {
    %c0 = arith.constant 0 : index
    %c0_0 = arith.constant 0 : index
    %0 = vector.load %arg1[%c0, %c0_0] : memref<128x1152xbf16, #tpu.memory_space<vmem>>, vector<128x1152xbf16>
    %c0_1 = arith.constant 0 : index
    %c0_2 = arith.constant 0 : index
    %1 = vector.load %arg3[%c0_1, %c0_2] : memref<1152x128xbf16, #tpu.memory_space<vmem>>, vector<1152x128xbf16>
    %cst = arith.constant dense<0.000000e+00> : vector<128x128xf32>
    %2 = tpu.matmul %0, %1, %cst {dimension_numbers = #tpu.dot_dimension_numbers<[1], [0], [0], [1], [0, 0, 1, 1], [], []>} : vector<128x1152xbf16>, vector<1152x128xbf16>, vector<128x128xf32> -> vector<128x128xf32>
    %c0_3 = arith.constant 0 : index
    %c0_4 = arith.constant 0 : index
    %3 = vector.load %arg4[%c0_3, %c0_4] : memref<1x128xf32, #tpu.memory_space<vmem>>, vector<1x128xf32>
    %4 = vector.broadcast %3 : vector<1x128xf32> to vector<128x128xf32>
    %5 = arith.mulf %2, %4 : vector<128x128xf32>
    %c0_5 = arith.constant 0 : index
    %c0_6 = arith.constant 0 : index
    %6 = vector.load %arg5[%c0_5, %c0_6] : memref<1x128xf32, #tpu.memory_space<vmem>>, vector<1x128xf32>
    %7 = vector.broadcast %6 : vector<1x128xf32> to vector<128x128xf32>
    %8 = arith.addf %5, %7 : vector<128x128xf32>
    %cst_7 = arith.constant 0.000000e+00 : f32
    %9 = vector.broadcast %cst_7 : f32 to vector<128x128xf32>
    %10 = arith.maximumf %8, %9 : vector<128x128xf32>
    %11 = arith.truncf %10 : vector<128x128xf32> to vector<128x128xbf16>
    %c0_8 = arith.constant 0 : index
    %c0_9 = arith.constant 0 : index
    %12 = vector.load %arg6[%c0_8, %c0_9] : memref<128x256xbf16, #tpu.memory_space<vmem>>, vector<128x256xbf16>
    %cst_10 = arith.constant dense<0.000000e+00> : vector<128x256xf32>
    %13 = tpu.matmul %11, %12, %cst_10 {dimension_numbers = #tpu.dot_dimension_numbers<[1], [0], [0], [1], [0, 0, 1, 1], [], []>} : vector<128x128xbf16>, vector<128x256xbf16>, vector<128x256xf32> -> vector<128x256xf32>
    %c0_11 = arith.constant 0 : index
    %c0_12 = arith.constant 0 : index
    %14 = vector.load %arg7[%c0_11, %c0_12] : memref<1x256xf32, #tpu.memory_space<vmem>>, vector<1x256xf32>
    %15 = vector.broadcast %14 : vector<1x256xf32> to vector<128x256xf32>
    %16 = arith.mulf %13, %15 : vector<128x256xf32>
    %c0_13 = arith.constant 0 : index
    %c0_14 = arith.constant 0 : index
    %17 = vector.load %arg8[%c0_13, %c0_14] : memref<1x256xf32, #tpu.memory_space<vmem>>, vector<1x256xf32>
    %18 = vector.broadcast %17 : vector<1x256xf32> to vector<128x256xf32>
    %19 = arith.addf %16, %18 : vector<128x256xf32>
    %c0_15 = arith.constant 0 : index
    %c0_16 = arith.constant 0 : index
    %20 = vector.load %arg2[%c0_15, %c0_16] : memref<128x256xbf16, #tpu.memory_space<vmem>>, vector<128x256xbf16>
    %21 = arith.extf %20 : vector<128x256xbf16> to vector<128x256xf32>
    %22 = arith.addf %19, %21 : vector<128x256xf32>
    %cst_17 = arith.constant 0.000000e+00 : f32
    %23 = vector.broadcast %cst_17 : f32 to vector<128x256xf32>
    %24 = arith.maximumf %22, %23 : vector<128x256xf32>
    %25 = arith.truncf %24 : vector<128x256xf32> to vector<128x256xbf16>
    %c0_18 = arith.constant 0 : index
    %c0_19 = arith.constant 0 : index
    %26 = vector.load %arg12[%c0_18, %c0_19] : memref<128x256xbf16, #tpu.memory_space<vmem>>, vector<128x256xbf16>
    tpu.vector_store %arg12[%c0_18, %c0_19], %25 {strides = array<i32>} : memref<128x256xbf16, #tpu.memory_space<vmem>>, vector<128x256xbf16>,
    %27 = arith.truncf %24 : vector<128x256xf32> to vector<128x256xbf16>
    %c0_20 = arith.constant 0 : index
    %c0_21 = arith.constant 0 : index
    %28 = vector.load %arg9[%c0_20, %c0_21] : memref<256x128xbf16, #tpu.memory_space<vmem>>, vector<256x128xbf16>
    %cst_22 = arith.constant dense<0.000000e+00> : vector<128x128xf32>
    %29 = tpu.matmul %27, %28, %cst_22 {dimension_numbers = #tpu.dot_dimension_numbers<[1], [0], [0], [1], [0, 0, 1, 1], [], []>} : vector<128x256xbf16>, vector<256x128xbf16>, vector<128x128xf32> -> vector<128x128xf32>
    %c0_23 = arith.constant 0 : index
    %c0_24 = arith.constant 0 : index
    %30 = vector.load %arg10[%c0_23, %c0_24] : memref<1x128xf32, #tpu.memory_space<vmem>>, vector<1x128xf32>
    %31 = vector.broadcast %30 : vector<1x128xf32> to vector<128x128xf32>
    %32 = arith.mulf %29, %31 : vector<128x128xf32>
    %c0_25 = arith.constant 0 : index
    %c0_26 = arith.constant 0 : index
    %33 = vector.load %arg11[%c0_25, %c0_26] : memref<1x128xf32, #tpu.memory_space<vmem>>, vector<1x128xf32>
    %34 = vector.broadcast %33 : vector<1x128xf32> to vector<128x128xf32>
    %35 = arith.addf %32, %34 : vector<128x128xf32>
    %cst_27 = arith.constant 0.000000e+00 : f32
    %36 = vector.broadcast %cst_27 : f32 to vector<128x128xf32>
    %37 = arith.maximumf %35, %36 : vector<128x128xf32>
    %38 = arith.truncf %37 : vector<128x128xf32> to vector<128x128xbf16>
    %c0_28 = arith.constant 0 : index
    %c0_29 = arith.constant 0 : index
    %39 = vector.load %arg13[%c0_28, %c0_29] : memref<128x128xbf16, #tpu.memory_space<vmem>>, vector<128x128xbf16>
    tpu.vector_store %arg13[%c0_28, %c0_29], %38 {strides = array<i32>} : memref<128x128xbf16, #tpu.memory_space<vmem>>, vector<128x128xbf16>,
    return
  }
  func.func @transform_0(%arg0: i32) -> (i32, i32) {
    %c0_i32 = arith.constant 0 : i32
    %c0_i32_0 = arith.constant 0 : i32
    return %arg0, %c0_i32 : i32, i32
  }
  func.func @transform_1(%arg0: i32) -> (i32, i32) {
    %c0_i32 = arith.constant 0 : i32
    %c0_i32_0 = arith.constant 0 : i32
    return %arg0, %c0_i32 : i32, i32
  }
  func.func @transform_2(%arg0: i32) -> (i32, i32) {
    %c0_i32 = arith.constant 0 : i32
    %c0_i32_0 = arith.constant 0 : i32
    %c0_i32_1 = arith.constant 0 : i32
    return %c0_i32, %c0_i32_0 : i32, i32
  }
  func.func @transform_3(%arg0: i32) -> (i32, i32) {
    %c0_i32 = arith.constant 0 : i32
    %c0_i32_0 = arith.constant 0 : i32
    %c0_i32_1 = arith.constant 0 : i32
    return %c0_i32, %c0_i32_0 : i32, i32
  }
  func.func @transform_4(%arg0: i32) -> (i32, i32) {
    %c0_i32 = arith.constant 0 : i32
    %c0_i32_0 = arith.constant 0 : i32
    %c0_i32_1 = arith.constant 0 : i32
    return %c0_i32, %c0_i32_0 : i32, i32
  }
  func.func @transform_5(%arg0: i32) -> (i32, i32) {
    %c0_i32 = arith.constant 0 : i32
    %c0_i32_0 = arith.constant 0 : i32
    %c0_i32_1 = arith.constant 0 : i32
    return %c0_i32, %c0_i32_0 : i32, i32
  }
  func.func @transform_6(%arg0: i32) -> (i32, i32) {
    %c0_i32 = arith.constant 0 : i32
    %c0_i32_0 = arith.constant 0 : i32
    %c0_i32_1 = arith.constant 0 : i32
    return %c0_i32, %c0_i32_0 : i32, i32
  }
  func.func @transform_7(%arg0: i32) -> (i32, i32) {
    %c0_i32 = arith.constant 0 : i32
    %c0_i32_0 = arith.constant 0 : i32
    %c0_i32_1 = arith.constant 0 : i32
    return %c0_i32, %c0_i32_0 : i32, i32
  }
  func.func @transform_8(%arg0: i32) -> (i32, i32) {
    %c0_i32 = arith.constant 0 : i32
    %c0_i32_0 = arith.constant 0 : i32
    %c0_i32_1 = arith.constant 0 : i32
    return %c0_i32, %c0_i32_0 : i32, i32
  }
  func.func @transform_9(%arg0: i32) -> (i32, i32) {
    %c0_i32 = arith.constant 0 : i32
    %c0_i32_0 = arith.constant 0 : i32
    %c0_i32_1 = arith.constant 0 : i32
    return %c0_i32, %c0_i32_0 : i32, i32
  }
  func.func @transform_10(%arg0: i32) -> (i32, i32) {
    %c0_i32 = arith.constant 0 : i32
    %c0_i32_0 = arith.constant 0 : i32
    %c0_i32_1 = arith.constant 0 : i32
    return %c0_i32, %c0_i32_0 : i32, i32
  }
  func.func @transform_11(%arg0: i32) -> (i32, i32) {
    %c0_i32 = arith.constant 0 : i32
    %c0_i32_0 = arith.constant 0 : i32
    return %arg0, %c0_i32 : i32, i32
  }
  func.func @transform_12(%arg0: i32) -> (i32, i32) {
    %c0_i32 = arith.constant 0 : i32
    %c0_i32_0 = arith.constant 0 : i32
    return %arg0, %c0_i32 : i32, i32
  }
}

module attributes {stable_mosaic.version = 11 : i64} {
  func.func @_matmul_affine_kernel(%arg0: i32, %arg1: i32, %arg2: memref<64x256xbf16, #tpu.memory_space<vmem>>, %arg3: memref<256x128xbf16, #tpu.memory_space<vmem>>, %arg4: memref<1x128xf32, #tpu.memory_space<vmem>>, %arg5: memref<1x128xf32, #tpu.memory_space<vmem>>, %arg6: memref<64x128xbf16, #tpu.memory_space<vmem>>) attributes {dimension_semantics = [#tpu.dimension_semantics<parallel>, #tpu.dimension_semantics<parallel>], iteration_bounds = array<i64: 1, 4>, scalar_prefetch = 0 : i64, scratch_operands = 0 : i64, tpu.core_type = #tpu.core_type<tc>, window_params = [{transform_indices = @transform_0, window_bounds = array<i64: 64, 256>}, {transform_indices = @transform_1, window_bounds = array<i64: 256, 128>}, {transform_indices = @transform_2, window_bounds = array<i64: 1, 128>}, {transform_indices = @transform_3, window_bounds = array<i64: 1, 128>}, {transform_indices = @transform_4, window_bounds = array<i64: 64, 128>}]} {
    %c0 = arith.constant 0 : index
    %c0_0 = arith.constant 0 : index
    %0 = vector.load %arg2[%c0, %c0_0] : memref<64x256xbf16, #tpu.memory_space<vmem>>, vector<64x256xbf16>
    %c0_1 = arith.constant 0 : index
    %c0_2 = arith.constant 0 : index
    %1 = vector.load %arg3[%c0_1, %c0_2] : memref<256x128xbf16, #tpu.memory_space<vmem>>, vector<256x128xbf16>
    %cst = arith.constant dense<0.000000e+00> : vector<64x128xf32>
    %2 = tpu.matmul %0, %1, %cst {dimension_numbers = #tpu.dot_dimension_numbers<[1], [0], [0], [1], [0, 0, 1, 1], [], []>} : vector<64x256xbf16>, vector<256x128xbf16>, vector<64x128xf32> -> vector<64x128xf32>
    %c0_3 = arith.constant 0 : index
    %c0_4 = arith.constant 0 : index
    %3 = vector.load %arg4[%c0_3, %c0_4] : memref<1x128xf32, #tpu.memory_space<vmem>>, vector<1x128xf32>
    %4 = vector.broadcast %3 : vector<1x128xf32> to vector<64x128xf32>
    %5 = arith.mulf %2, %4 : vector<64x128xf32>
    %c0_5 = arith.constant 0 : index
    %c0_6 = arith.constant 0 : index
    %6 = vector.load %arg5[%c0_5, %c0_6] : memref<1x128xf32, #tpu.memory_space<vmem>>, vector<1x128xf32>
    %7 = vector.broadcast %6 : vector<1x128xf32> to vector<64x128xf32>
    %8 = arith.addf %5, %7 : vector<64x128xf32>
    %9 = arith.truncf %8 : vector<64x128xf32> to vector<64x128xbf16>
    %c0_7 = arith.constant 0 : index
    %c0_8 = arith.constant 0 : index
    %10 = vector.load %arg6[%c0_7, %c0_8] : memref<64x128xbf16, #tpu.memory_space<vmem>>, vector<64x128xbf16>
    tpu.vector_store %arg6[%c0_7, %c0_8], %9 {strides = array<i32>} : memref<64x128xbf16, #tpu.memory_space<vmem>>, vector<64x128xbf16>,
    return
  }
  func.func @transform_0(%arg0: i32, %arg1: i32) -> (i32, i32) {
    %c0_i32 = arith.constant 0 : i32
    %c0_i32_0 = arith.constant 0 : i32
    return %arg0, %c0_i32 : i32, i32
  }
  func.func @transform_1(%arg0: i32, %arg1: i32) -> (i32, i32) {
    %c0_i32 = arith.constant 0 : i32
    %c0_i32_0 = arith.constant 0 : i32
    return %c0_i32, %arg1 : i32, i32
  }
  func.func @transform_2(%arg0: i32, %arg1: i32) -> (i32, i32) {
    %c0_i32 = arith.constant 0 : i32
    %c0_i32_0 = arith.constant 0 : i32
    return %c0_i32, %arg1 : i32, i32
  }
  func.func @transform_3(%arg0: i32, %arg1: i32) -> (i32, i32) {
    %c0_i32 = arith.constant 0 : i32
    %c0_i32_0 = arith.constant 0 : i32
    return %c0_i32, %arg1 : i32, i32
  }
  func.func @transform_4(%arg0: i32, %arg1: i32) -> (i32, i32) {
    %c0_i32 = arith.constant 0 : i32
    return %arg0, %arg1 : i32, i32
  }
}

module attributes {stable_mosaic.version = 11 : i64} {
  func.func @_block_tail_kernel(%arg0: i32, %arg1: memref<64x1152xbf16, #tpu.memory_space<vmem>>, %arg2: memref<64x512xbf16, #tpu.memory_space<vmem>>, %arg3: memref<1152x128xbf16, #tpu.memory_space<vmem>>, %arg4: memref<1x128xf32, #tpu.memory_space<vmem>>, %arg5: memref<1x128xf32, #tpu.memory_space<vmem>>, %arg6: memref<128x512xbf16, #tpu.memory_space<vmem>>, %arg7: memref<1x512xf32, #tpu.memory_space<vmem>>, %arg8: memref<1x512xf32, #tpu.memory_space<vmem>>, %arg9: memref<512x128xbf16, #tpu.memory_space<vmem>>, %arg10: memref<1x128xf32, #tpu.memory_space<vmem>>, %arg11: memref<1x128xf32, #tpu.memory_space<vmem>>, %arg12: memref<64x512xbf16, #tpu.memory_space<vmem>>, %arg13: memref<64x128xbf16, #tpu.memory_space<vmem>>) attributes {dimension_semantics = [#tpu.dimension_semantics<parallel>], iteration_bounds = array<i64: 1>, scalar_prefetch = 0 : i64, scratch_operands = 0 : i64, tpu.core_type = #tpu.core_type<tc>, window_params = [{transform_indices = @transform_0, window_bounds = array<i64: 64, 1152>}, {transform_indices = @transform_1, window_bounds = array<i64: 64, 512>}, {pipeline_mode = #tpu.pipeline_mode<synchronous>, transform_indices = @transform_2, window_bounds = array<i64: 1152, 128>}, {pipeline_mode = #tpu.pipeline_mode<synchronous>, transform_indices = @transform_3, window_bounds = array<i64: 1, 128>}, {pipeline_mode = #tpu.pipeline_mode<synchronous>, transform_indices = @transform_4, window_bounds = array<i64: 1, 128>}, {pipeline_mode = #tpu.pipeline_mode<synchronous>, transform_indices = @transform_5, window_bounds = array<i64: 128, 512>}, {pipeline_mode = #tpu.pipeline_mode<synchronous>, transform_indices = @transform_6, window_bounds = array<i64: 1, 512>}, {pipeline_mode = #tpu.pipeline_mode<synchronous>, transform_indices = @transform_7, window_bounds = array<i64: 1, 512>}, {pipeline_mode = #tpu.pipeline_mode<synchronous>, transform_indices = @transform_8, window_bounds = array<i64: 512, 128>}, {pipeline_mode = #tpu.pipeline_mode<synchronous>, transform_indices = @transform_9, window_bounds = array<i64: 1, 128>}, {pipeline_mode = #tpu.pipeline_mode<synchronous>, transform_indices = @transform_10, window_bounds = array<i64: 1, 128>}, {transform_indices = @transform_11, window_bounds = array<i64: 64, 512>}, {transform_indices = @transform_12, window_bounds = array<i64: 64, 128>}]} {
    %c0 = arith.constant 0 : index
    %c0_0 = arith.constant 0 : index
    %0 = vector.load %arg1[%c0, %c0_0] : memref<64x1152xbf16, #tpu.memory_space<vmem>>, vector<64x1152xbf16>
    %c0_1 = arith.constant 0 : index
    %c0_2 = arith.constant 0 : index
    %1 = vector.load %arg3[%c0_1, %c0_2] : memref<1152x128xbf16, #tpu.memory_space<vmem>>, vector<1152x128xbf16>
    %cst = arith.constant dense<0.000000e+00> : vector<64x128xf32>
    %2 = tpu.matmul %0, %1, %cst {dimension_numbers = #tpu.dot_dimension_numbers<[1], [0], [0], [1], [0, 0, 1, 1], [], []>} : vector<64x1152xbf16>, vector<1152x128xbf16>, vector<64x128xf32> -> vector<64x128xf32>
    %c0_3 = arith.constant 0 : index
    %c0_4 = arith.constant 0 : index
    %3 = vector.load %arg4[%c0_3, %c0_4] : memref<1x128xf32, #tpu.memory_space<vmem>>, vector<1x128xf32>
    %4 = vector.broadcast %3 : vector<1x128xf32> to vector<64x128xf32>
    %5 = arith.mulf %2, %4 : vector<64x128xf32>
    %c0_5 = arith.constant 0 : index
    %c0_6 = arith.constant 0 : index
    %6 = vector.load %arg5[%c0_5, %c0_6] : memref<1x128xf32, #tpu.memory_space<vmem>>, vector<1x128xf32>
    %7 = vector.broadcast %6 : vector<1x128xf32> to vector<64x128xf32>
    %8 = arith.addf %5, %7 : vector<64x128xf32>
    %cst_7 = arith.constant 0.000000e+00 : f32
    %9 = vector.broadcast %cst_7 : f32 to vector<64x128xf32>
    %10 = arith.maximumf %8, %9 : vector<64x128xf32>
    %11 = arith.truncf %10 : vector<64x128xf32> to vector<64x128xbf16>
    %c0_8 = arith.constant 0 : index
    %c0_9 = arith.constant 0 : index
    %12 = vector.load %arg6[%c0_8, %c0_9] : memref<128x512xbf16, #tpu.memory_space<vmem>>, vector<128x512xbf16>
    %cst_10 = arith.constant dense<0.000000e+00> : vector<64x512xf32>
    %13 = tpu.matmul %11, %12, %cst_10 {dimension_numbers = #tpu.dot_dimension_numbers<[1], [0], [0], [1], [0, 0, 1, 1], [], []>} : vector<64x128xbf16>, vector<128x512xbf16>, vector<64x512xf32> -> vector<64x512xf32>
    %c0_11 = arith.constant 0 : index
    %c0_12 = arith.constant 0 : index
    %14 = vector.load %arg7[%c0_11, %c0_12] : memref<1x512xf32, #tpu.memory_space<vmem>>, vector<1x512xf32>
    %15 = vector.broadcast %14 : vector<1x512xf32> to vector<64x512xf32>
    %16 = arith.mulf %13, %15 : vector<64x512xf32>
    %c0_13 = arith.constant 0 : index
    %c0_14 = arith.constant 0 : index
    %17 = vector.load %arg8[%c0_13, %c0_14] : memref<1x512xf32, #tpu.memory_space<vmem>>, vector<1x512xf32>
    %18 = vector.broadcast %17 : vector<1x512xf32> to vector<64x512xf32>
    %19 = arith.addf %16, %18 : vector<64x512xf32>
    %c0_15 = arith.constant 0 : index
    %c0_16 = arith.constant 0 : index
    %20 = vector.load %arg2[%c0_15, %c0_16] : memref<64x512xbf16, #tpu.memory_space<vmem>>, vector<64x512xbf16>
    %21 = arith.extf %20 : vector<64x512xbf16> to vector<64x512xf32>
    %22 = arith.addf %19, %21 : vector<64x512xf32>
    %cst_17 = arith.constant 0.000000e+00 : f32
    %23 = vector.broadcast %cst_17 : f32 to vector<64x512xf32>
    %24 = arith.maximumf %22, %23 : vector<64x512xf32>
    %25 = arith.truncf %24 : vector<64x512xf32> to vector<64x512xbf16>
    %c0_18 = arith.constant 0 : index
    %c0_19 = arith.constant 0 : index
    %26 = vector.load %arg12[%c0_18, %c0_19] : memref<64x512xbf16, #tpu.memory_space<vmem>>, vector<64x512xbf16>
    tpu.vector_store %arg12[%c0_18, %c0_19], %25 {strides = array<i32>} : memref<64x512xbf16, #tpu.memory_space<vmem>>, vector<64x512xbf16>,
    %27 = arith.truncf %24 : vector<64x512xf32> to vector<64x512xbf16>
    %c0_20 = arith.constant 0 : index
    %c0_21 = arith.constant 0 : index
    %28 = vector.load %arg9[%c0_20, %c0_21] : memref<512x128xbf16, #tpu.memory_space<vmem>>, vector<512x128xbf16>
    %cst_22 = arith.constant dense<0.000000e+00> : vector<64x128xf32>
    %29 = tpu.matmul %27, %28, %cst_22 {dimension_numbers = #tpu.dot_dimension_numbers<[1], [0], [0], [1], [0, 0, 1, 1], [], []>} : vector<64x512xbf16>, vector<512x128xbf16>, vector<64x128xf32> -> vector<64x128xf32>
    %c0_23 = arith.constant 0 : index
    %c0_24 = arith.constant 0 : index
    %30 = vector.load %arg10[%c0_23, %c0_24] : memref<1x128xf32, #tpu.memory_space<vmem>>, vector<1x128xf32>
    %31 = vector.broadcast %30 : vector<1x128xf32> to vector<64x128xf32>
    %32 = arith.mulf %29, %31 : vector<64x128xf32>
    %c0_25 = arith.constant 0 : index
    %c0_26 = arith.constant 0 : index
    %33 = vector.load %arg11[%c0_25, %c0_26] : memref<1x128xf32, #tpu.memory_space<vmem>>, vector<1x128xf32>
    %34 = vector.broadcast %33 : vector<1x128xf32> to vector<64x128xf32>
    %35 = arith.addf %32, %34 : vector<64x128xf32>
    %cst_27 = arith.constant 0.000000e+00 : f32
    %36 = vector.broadcast %cst_27 : f32 to vector<64x128xf32>
    %37 = arith.maximumf %35, %36 : vector<64x128xf32>
    %38 = arith.truncf %37 : vector<64x128xf32> to vector<64x128xbf16>
    %c0_28 = arith.constant 0 : index
    %c0_29 = arith.constant 0 : index
    %39 = vector.load %arg13[%c0_28, %c0_29] : memref<64x128xbf16, #tpu.memory_space<vmem>>, vector<64x128xbf16>
    tpu.vector_store %arg13[%c0_28, %c0_29], %38 {strides = array<i32>} : memref<64x128xbf16, #tpu.memory_space<vmem>>, vector<64x128xbf16>,
    return
  }
  func.func @transform_0(%arg0: i32) -> (i32, i32) {
    %c0_i32 = arith.constant 0 : i32
    %c0_i32_0 = arith.constant 0 : i32
    return %arg0, %c0_i32 : i32, i32
  }
  func.func @transform_1(%arg0: i32) -> (i32, i32) {
    %c0_i32 = arith.constant 0 : i32
    %c0_i32_0 = arith.constant 0 : i32
    return %arg0, %c0_i32 : i32, i32
  }
  func.func @transform_2(%arg0: i32) -> (i32, i32) {
    %c0_i32 = arith.constant 0 : i32
    %c0_i32_0 = arith.constant 0 : i32
    %c0_i32_1 = arith.constant 0 : i32
    return %c0_i32, %c0_i32_0 : i32, i32
  }
  func.func @transform_3(%arg0: i32) -> (i32, i32) {
    %c0_i32 = arith.constant 0 : i32
    %c0_i32_0 = arith.constant 0 : i32
    %c0_i32_1 = arith.constant 0 : i32
    return %c0_i32, %c0_i32_0 : i32, i32
  }
  func.func @transform_4(%arg0: i32) -> (i32, i32) {
    %c0_i32 = arith.constant 0 : i32
    %c0_i32_0 = arith.constant 0 : i32
    %c0_i32_1 = arith.constant 0 : i32
    return %c0_i32, %c0_i32_0 : i32, i32
  }
  func.func @transform_5(%arg0: i32) -> (i32, i32) {
    %c0_i32 = arith.constant 0 : i32
    %c0_i32_0 = arith.constant 0 : i32
    %c0_i32_1 = arith.constant 0 : i32
    return %c0_i32, %c0_i32_0 : i32, i32
  }
  func.func @transform_6(%arg0: i32) -> (i32, i32) {
    %c0_i32 = arith.constant 0 : i32
    %c0_i32_0 = arith.constant 0 : i32
    %c0_i32_1 = arith.constant 0 : i32
    return %c0_i32, %c0_i32_0 : i32, i32
  }
  func.func @transform_7(%arg0: i32) -> (i32, i32) {
    %c0_i32 = arith.constant 0 : i32
    %c0_i32_0 = arith.constant 0 : i32
    %c0_i32_1 = arith.constant 0 : i32
    return %c0_i32, %c0_i32_0 : i32, i32
  }
  func.func @transform_8(%arg0: i32) -> (i32, i32) {
    %c0_i32 = arith.constant 0 : i32
    %c0_i32_0 = arith.constant 0 : i32
    %c0_i32_1 = arith.constant 0 : i32
    return %c0_i32, %c0_i32_0 : i32, i32
  }
  func.func @transform_9(%arg0: i32) -> (i32, i32) {
    %c0_i32 = arith.constant 0 : i32
    %c0_i32_0 = arith.constant 0 : i32
    %c0_i32_1 = arith.constant 0 : i32
    return %c0_i32, %c0_i32_0 : i32, i32
  }
  func.func @transform_10(%arg0: i32) -> (i32, i32) {
    %c0_i32 = arith.constant 0 : i32
    %c0_i32_0 = arith.constant 0 : i32
    %c0_i32_1 = arith.constant 0 : i32
    return %c0_i32, %c0_i32_0 : i32, i32
  }
  func.func @transform_11(%arg0: i32) -> (i32, i32) {
    %c0_i32 = arith.constant 0 : i32
    %c0_i32_0 = arith.constant 0 : i32
    return %arg0, %c0_i32 : i32, i32
  }
  func.func @transform_12(%arg0: i32) -> (i32, i32) {
    %c0_i32 = arith.constant 0 : i32
    %c0_i32_0 = arith.constant 0 : i32
    return %arg0, %c0_i32 : i32, i32
  }
}

module attributes {stable_mosaic.version = 11 : i64} {
  func.func @_block_tail_kernel(%arg0: i32, %arg1: memref<64x1152xbf16, #tpu.memory_space<vmem>>, %arg2: memref<64x512xbf16, #tpu.memory_space<vmem>>, %arg3: memref<1152x128xbf16, #tpu.memory_space<vmem>>, %arg4: memref<1x128xf32, #tpu.memory_space<vmem>>, %arg5: memref<1x128xf32, #tpu.memory_space<vmem>>, %arg6: memref<128x512xbf16, #tpu.memory_space<vmem>>, %arg7: memref<1x512xf32, #tpu.memory_space<vmem>>, %arg8: memref<1x512xf32, #tpu.memory_space<vmem>>, %arg9: memref<64x512xbf16, #tpu.memory_space<vmem>>) attributes {dimension_semantics = [#tpu.dimension_semantics<parallel>], iteration_bounds = array<i64: 1>, scalar_prefetch = 0 : i64, scratch_operands = 0 : i64, tpu.core_type = #tpu.core_type<tc>, window_params = [{transform_indices = @transform_0, window_bounds = array<i64: 64, 1152>}, {transform_indices = @transform_1, window_bounds = array<i64: 64, 512>}, {pipeline_mode = #tpu.pipeline_mode<synchronous>, transform_indices = @transform_2, window_bounds = array<i64: 1152, 128>}, {pipeline_mode = #tpu.pipeline_mode<synchronous>, transform_indices = @transform_3, window_bounds = array<i64: 1, 128>}, {pipeline_mode = #tpu.pipeline_mode<synchronous>, transform_indices = @transform_4, window_bounds = array<i64: 1, 128>}, {pipeline_mode = #tpu.pipeline_mode<synchronous>, transform_indices = @transform_5, window_bounds = array<i64: 128, 512>}, {pipeline_mode = #tpu.pipeline_mode<synchronous>, transform_indices = @transform_6, window_bounds = array<i64: 1, 512>}, {pipeline_mode = #tpu.pipeline_mode<synchronous>, transform_indices = @transform_7, window_bounds = array<i64: 1, 512>}, {transform_indices = @transform_8, window_bounds = array<i64: 64, 512>}]} {
    %c0 = arith.constant 0 : index
    %c0_0 = arith.constant 0 : index
    %0 = vector.load %arg1[%c0, %c0_0] : memref<64x1152xbf16, #tpu.memory_space<vmem>>, vector<64x1152xbf16>
    %c0_1 = arith.constant 0 : index
    %c0_2 = arith.constant 0 : index
    %1 = vector.load %arg3[%c0_1, %c0_2] : memref<1152x128xbf16, #tpu.memory_space<vmem>>, vector<1152x128xbf16>
    %cst = arith.constant dense<0.000000e+00> : vector<64x128xf32>
    %2 = tpu.matmul %0, %1, %cst {dimension_numbers = #tpu.dot_dimension_numbers<[1], [0], [0], [1], [0, 0, 1, 1], [], []>} : vector<64x1152xbf16>, vector<1152x128xbf16>, vector<64x128xf32> -> vector<64x128xf32>
    %c0_3 = arith.constant 0 : index
    %c0_4 = arith.constant 0 : index
    %3 = vector.load %arg4[%c0_3, %c0_4] : memref<1x128xf32, #tpu.memory_space<vmem>>, vector<1x128xf32>
    %4 = vector.broadcast %3 : vector<1x128xf32> to vector<64x128xf32>
    %5 = arith.mulf %2, %4 : vector<64x128xf32>
    %c0_5 = arith.constant 0 : index
    %c0_6 = arith.constant 0 : index
    %6 = vector.load %arg5[%c0_5, %c0_6] : memref<1x128xf32, #tpu.memory_space<vmem>>, vector<1x128xf32>
    %7 = vector.broadcast %6 : vector<1x128xf32> to vector<64x128xf32>
    %8 = arith.addf %5, %7 : vector<64x128xf32>
    %cst_7 = arith.constant 0.000000e+00 : f32
    %9 = vector.broadcast %cst_7 : f32 to vector<64x128xf32>
    %10 = arith.maximumf %8, %9 : vector<64x128xf32>
    %11 = arith.truncf %10 : vector<64x128xf32> to vector<64x128xbf16>
    %c0_8 = arith.constant 0 : index
    %c0_9 = arith.constant 0 : index
    %12 = vector.load %arg6[%c0_8, %c0_9] : memref<128x512xbf16, #tpu.memory_space<vmem>>, vector<128x512xbf16>
    %cst_10 = arith.constant dense<0.000000e+00> : vector<64x512xf32>
    %13 = tpu.matmul %11, %12, %cst_10 {dimension_numbers = #tpu.dot_dimension_numbers<[1], [0], [0], [1], [0, 0, 1, 1], [], []>} : vector<64x128xbf16>, vector<128x512xbf16>, vector<64x512xf32> -> vector<64x512xf32>
    %c0_11 = arith.constant 0 : index
    %c0_12 = arith.constant 0 : index
    %14 = vector.load %arg7[%c0_11, %c0_12] : memref<1x512xf32, #tpu.memory_space<vmem>>, vector<1x512xf32>
    %15 = vector.broadcast %14 : vector<1x512xf32> to vector<64x512xf32>
    %16 = arith.mulf %13, %15 : vector<64x512xf32>
    %c0_13 = arith.constant 0 : index
    %c0_14 = arith.constant 0 : index
    %17 = vector.load %arg8[%c0_13, %c0_14] : memref<1x512xf32, #tpu.memory_space<vmem>>, vector<1x512xf32>
    %18 = vector.broadcast %17 : vector<1x512xf32> to vector<64x512xf32>
    %19 = arith.addf %16, %18 : vector<64x512xf32>
    %c0_15 = arith.constant 0 : index
    %c0_16 = arith.constant 0 : index
    %20 = vector.load %arg2[%c0_15, %c0_16] : memref<64x512xbf16, #tpu.memory_space<vmem>>, vector<64x512xbf16>
    %21 = arith.extf %20 : vector<64x512xbf16> to vector<64x512xf32>
    %22 = arith.addf %19, %21 : vector<64x512xf32>
    %cst_17 = arith.constant 0.000000e+00 : f32
    %23 = vector.broadcast %cst_17 : f32 to vector<64x512xf32>
    %24 = arith.maximumf %22, %23 : vector<64x512xf32>
    %25 = arith.truncf %24 : vector<64x512xf32> to vector<64x512xbf16>
    %c0_18 = arith.constant 0 : index
    %c0_19 = arith.constant 0 : index
    %26 = vector.load %arg9[%c0_18, %c0_19] : memref<64x512xbf16, #tpu.memory_space<vmem>>, vector<64x512xbf16>
    tpu.vector_store %arg9[%c0_18, %c0_19], %25 {strides = array<i32>} : memref<64x512xbf16, #tpu.memory_space<vmem>>, vector<64x512xbf16>,
    return
  }
  func.func @transform_0(%arg0: i32) -> (i32, i32) {
    %c0_i32 = arith.constant 0 : i32
    %c0_i32_0 = arith.constant 0 : i32
    return %arg0, %c0_i32 : i32, i32
  }
  func.func @transform_1(%arg0: i32) -> (i32, i32) {
    %c0_i32 = arith.constant 0 : i32
    %c0_i32_0 = arith.constant 0 : i32
    return %arg0, %c0_i32 : i32, i32
  }
  func.func @transform_2(%arg0: i32) -> (i32, i32) {
    %c0_i32 = arith.constant 0 : i32
    %c0_i32_0 = arith.constant 0 : i32
    %c0_i32_1 = arith.constant 0 : i32
    return %c0_i32, %c0_i32_0 : i32, i32
  }
  func.func @transform_3(%arg0: i32) -> (i32, i32) {
    %c0_i32 = arith.constant 0 : i32
    %c0_i32_0 = arith.constant 0 : i32
    %c0_i32_1 = arith.constant 0 : i32
    return %c0_i32, %c0_i32_0 : i32, i32
  }
  func.func @transform_4(%arg0: i32) -> (i32, i32) {
    %c0_i32 = arith.constant 0 : i32
    %c0_i32_0 = arith.constant 0 : i32
    %c0_i32_1 = arith.constant 0 : i32
    return %c0_i32, %c0_i32_0 : i32, i32
  }
  func.func @transform_5(%arg0: i32) -> (i32, i32) {
    %c0_i32 = arith.constant 0 : i32
    %c0_i32_0 = arith.constant 0 : i32
    %c0_i32_1 = arith.constant 0 : i32
    return %c0_i32, %c0_i32_0 : i32, i32
  }
  func.func @transform_6(%arg0: i32) -> (i32, i32) {
    %c0_i32 = arith.constant 0 : i32
    %c0_i32_0 = arith.constant 0 : i32
    %c0_i32_1 = arith.constant 0 : i32
    return %c0_i32, %c0_i32_0 : i32, i32
  }
  func.func @transform_7(%arg0: i32) -> (i32, i32) {
    %c0_i32 = arith.constant 0 : i32
    %c0_i32_0 = arith.constant 0 : i32
    %c0_i32_1 = arith.constant 0 : i32
    return %c0_i32, %c0_i32_0 : i32, i32
  }
  func.func @transform_8(%arg0: i32) -> (i32, i32) {
    %c0_i32 = arith.constant 0 : i32
    %c0_i32_0 = arith.constant 0 : i32
    return %arg0, %c0_i32 : i32, i32
  }
}

module attributes {stable_mosaic.version = 11 : i64} {
  func.func @_head_kernel(%arg0: i32, %arg1: memref<32x1024xbf16, #tpu.memory_space<vmem>>, %arg2: memref<1024x512xbf16, #tpu.memory_space<vmem>>, %arg3: memref<1x512xf32, #tpu.memory_space<vmem>>, %arg4: memref<512x128xbf16, #tpu.memory_space<vmem>>, %arg5: memref<1x128xf32, #tpu.memory_space<vmem>>, %arg6: memref<128x128xbf16, #tpu.memory_space<vmem>>, %arg7: memref<1x128xf32, #tpu.memory_space<vmem>>, %arg8: memref<32x128xf32, #tpu.memory_space<vmem>>) attributes {dimension_semantics = [#tpu.dimension_semantics<parallel>], iteration_bounds = array<i64: 1>, scalar_prefetch = 0 : i64, scratch_operands = 0 : i64, tpu.core_type = #tpu.core_type<tc>, window_params = [{pipeline_mode = #tpu.pipeline_mode<synchronous>, transform_indices = @transform_0, window_bounds = array<i64: 32, 1024>}, {pipeline_mode = #tpu.pipeline_mode<synchronous>, transform_indices = @transform_1, window_bounds = array<i64: 1024, 512>}, {pipeline_mode = #tpu.pipeline_mode<synchronous>, transform_indices = @transform_2, window_bounds = array<i64: 1, 512>}, {pipeline_mode = #tpu.pipeline_mode<synchronous>, transform_indices = @transform_3, window_bounds = array<i64: 512, 128>}, {pipeline_mode = #tpu.pipeline_mode<synchronous>, transform_indices = @transform_4, window_bounds = array<i64: 1, 128>}, {pipeline_mode = #tpu.pipeline_mode<synchronous>, transform_indices = @transform_5, window_bounds = array<i64: 128, 128>}, {pipeline_mode = #tpu.pipeline_mode<synchronous>, transform_indices = @transform_6, window_bounds = array<i64: 1, 128>}, {pipeline_mode = #tpu.pipeline_mode<synchronous>, transform_indices = @transform_7, window_bounds = array<i64: 32, 128>}]} {
    %c0 = arith.constant 0 : index
    %c0_0 = arith.constant 0 : index
    %0 = vector.load %arg1[%c0, %c0_0] : memref<32x1024xbf16, #tpu.memory_space<vmem>>, vector<32x1024xbf16>
    %c0_1 = arith.constant 0 : index
    %c0_2 = arith.constant 0 : index
    %1 = vector.load %arg2[%c0_1, %c0_2] : memref<1024x512xbf16, #tpu.memory_space<vmem>>, vector<1024x512xbf16>
    %cst = arith.constant dense<0.000000e+00> : vector<32x512xf32>
    %2 = tpu.matmul %0, %1, %cst {dimension_numbers = #tpu.dot_dimension_numbers<[1], [0], [0], [1], [0, 0, 1, 1], [], []>} : vector<32x1024xbf16>, vector<1024x512xbf16>, vector<32x512xf32> -> vector<32x512xf32>
    %c0_3 = arith.constant 0 : index
    %c0_4 = arith.constant 0 : index
    %3 = vector.load %arg3[%c0_3, %c0_4] : memref<1x512xf32, #tpu.memory_space<vmem>>, vector<1x512xf32>
    %4 = vector.broadcast %3 : vector<1x512xf32> to vector<32x512xf32>
    %5 = arith.addf %2, %4 : vector<32x512xf32>
    %6 = arith.truncf %5 : vector<32x512xf32> to vector<32x512xbf16>
    %c0_5 = arith.constant 0 : index
    %c0_6 = arith.constant 0 : index
    %7 = vector.load %arg4[%c0_5, %c0_6] : memref<512x128xbf16, #tpu.memory_space<vmem>>, vector<512x128xbf16>
    %cst_7 = arith.constant dense<0.000000e+00> : vector<32x128xf32>
    %8 = tpu.matmul %6, %7, %cst_7 {dimension_numbers = #tpu.dot_dimension_numbers<[1], [0], [0], [1], [0, 0, 1, 1], [], []>} : vector<32x512xbf16>, vector<512x128xbf16>, vector<32x128xf32> -> vector<32x128xf32>
    %c0_8 = arith.constant 0 : index
    %c0_9 = arith.constant 0 : index
    %9 = vector.load %arg5[%c0_8, %c0_9] : memref<1x128xf32, #tpu.memory_space<vmem>>, vector<1x128xf32>
    %10 = vector.broadcast %9 : vector<1x128xf32> to vector<32x128xf32>
    %11 = arith.addf %8, %10 : vector<32x128xf32>
    %12 = arith.truncf %11 : vector<32x128xf32> to vector<32x128xbf16>
    %c0_10 = arith.constant 0 : index
    %c0_11 = arith.constant 0 : index
    %13 = vector.load %arg6[%c0_10, %c0_11] : memref<128x128xbf16, #tpu.memory_space<vmem>>, vector<128x128xbf16>
    %cst_12 = arith.constant dense<0.000000e+00> : vector<32x128xf32>
    %14 = tpu.matmul %12, %13, %cst_12 {dimension_numbers = #tpu.dot_dimension_numbers<[1], [0], [0], [1], [0, 0, 1, 1], [], []>} : vector<32x128xbf16>, vector<128x128xbf16>, vector<32x128xf32> -> vector<32x128xf32>
    %c0_13 = arith.constant 0 : index
    %c0_14 = arith.constant 0 : index
    %15 = vector.load %arg7[%c0_13, %c0_14] : memref<1x128xf32, #tpu.memory_space<vmem>>, vector<1x128xf32>
    %16 = vector.broadcast %15 : vector<1x128xf32> to vector<32x128xf32>
    %17 = arith.addf %14, %16 : vector<32x128xf32>
    %cst_15 = arith.constant 0.000000e+00 : f32
    %18 = vector.broadcast %cst_15 : f32 to vector<32x128xf32>
    %19 = arith.maximumf %17, %18 : vector<32x128xf32>
    %c0_16 = arith.constant 0 : index
    %c0_17 = arith.constant 0 : index
    %20 = vector.load %arg8[%c0_16, %c0_17] : memref<32x128xf32, #tpu.memory_space<vmem>>, vector<32x128xf32>
    tpu.vector_store %arg8[%c0_16, %c0_17], %19 {strides = array<i32>} : memref<32x128xf32, #tpu.memory_space<vmem>>, vector<32x128xf32>,
    return
  }
  func.func @transform_0(%arg0: i32) -> (i32, i32) {
    %c0_i32 = arith.constant 0 : i32
    %c0_i32_0 = arith.constant 0 : i32
    %c0_i32_1 = arith.constant 0 : i32
    return %c0_i32, %c0_i32_0 : i32, i32
  }
  func.func @transform_1(%arg0: i32) -> (i32, i32) {
    %c0_i32 = arith.constant 0 : i32
    %c0_i32_0 = arith.constant 0 : i32
    %c0_i32_1 = arith.constant 0 : i32
    return %c0_i32, %c0_i32_0 : i32, i32
  }
  func.func @transform_2(%arg0: i32) -> (i32, i32) {
    %c0_i32 = arith.constant 0 : i32
    %c0_i32_0 = arith.constant 0 : i32
    %c0_i32_1 = arith.constant 0 : i32
    return %c0_i32, %c0_i32_0 : i32, i32
  }
  func.func @transform_3(%arg0: i32) -> (i32, i32) {
    %c0_i32 = arith.constant 0 : i32
    %c0_i32_0 = arith.constant 0 : i32
    %c0_i32_1 = arith.constant 0 : i32
    return %c0_i32, %c0_i32_0 : i32, i32
  }
  func.func @transform_4(%arg0: i32) -> (i32, i32) {
    %c0_i32 = arith.constant 0 : i32
    %c0_i32_0 = arith.constant 0 : i32
    %c0_i32_1 = arith.constant 0 : i32
    return %c0_i32, %c0_i32_0 : i32, i32
  }
  func.func @transform_5(%arg0: i32) -> (i32, i32) {
    %c0_i32 = arith.constant 0 : i32
    %c0_i32_0 = arith.constant 0 : i32
    %c0_i32_1 = arith.constant 0 : i32
    return %c0_i32, %c0_i32_0 : i32, i32
  }
  func.func @transform_6(%arg0: i32) -> (i32, i32) {
    %c0_i32 = arith.constant 0 : i32
    %c0_i32_0 = arith.constant 0 : i32
    %c0_i32_1 = arith.constant 0 : i32
    return %c0_i32, %c0_i32_0 : i32, i32
  }
  func.func @transform_7(%arg0: i32) -> (i32, i32) {
    %c0_i32 = arith.constant 0 : i32
    %c0_i32_0 = arith.constant 0 : i32
    %c0_i32_1 = arith.constant 0 : i32
    return %c0_i32, %c0_i32_0 : i32, i32
  }
}

</mosaic_0001>

<bundles_post_ra>
// kernel: rgbd_encoder_forward.12
= control target key start
LH: loop header
LB: loop body
LE: loop exit
PB: predicated region body
PF: predicated region fallthrough
CT: control target
= control target key end

     0   :  { %s1491_s15 = smov 0   ;;  %s1493_s16 = smov 0   ;;  %s1737_s0 = inlined_call_operand.vmem [shape: bf16[1024,256], index: 0, kind: input, shape index: {}]   ;;  %s1738_s1 = inlined_call_operand.vmem [shape: bf16[256,128], index: 1, kind: input, shape index: {}]   ;;  %s1739_s2 = inlined_call_operand.vmem [shape: f32[1,128], index: 2, kind: input, shape index: {}]   ;;  %s1740_s3 = inlined_call_operand.vmem [shape: f32[1,128], index: 3, kind: input, shape index: {}]   ;;  %s1741_s4 = inlined_call_operand.vmem [shape: bf16[1024,128], index: 4, kind: output, shape index: {}]  }
   0x1   :  { %s1495_s17 = smov 0  }
   0x2 LB: > { %s26_s18 = sadd.s32 1, %s1460_s16  ;;  %p1056_p0 = scmp.ge.s32.totalorder %s1464_s17, 1  ;;  %s1464_s17 = sphi %s1495_s17, %s14_s17   ;;  %s1460_s16 = sphi %s1493_s16, %s1743_s16   ;;  %s1456_s15 = sphi %s1491_s15, %s1742_s15  }
   0x3   : > { %p28_p1 = scmp.ge.s32.totalorder %s26_s18, 4  ;;  %p203_p2 = scmp.lt.s32.totalorder %s1464_s17, 5 }
   0x5   : > { %s1745_s18 = smov (%p28_p1, %s26_s18), 0  ;;  %p204_p3 = pnand %p1056_p0, %p203_p2 }
   0x6   : > { %s1057_s5 = sshll.u32 (!%p204_p3), %s1456_s15, 5 }
   0x7   : > { %207 = sbr.rel (%p204_p3) target bundleno = 308 (0x134), region = 36  ;;  %p244_p4 = scmp.lt.s32.totalorder (!%p204_p3), %s1057_s5, 127 }
   0xc   : > { %v1296_v0 = vld [vmem:[%s1738_s1 + $0x38] sm:$0xff]  ;;  %v1295_v2 = vld [vmem:[%s1738_s1 + $0x30] sm:$0xff]  ;;  %v1294_v4 = vld [vmem:[%s1738_s1 + $0x28] sm:$0xff]  ;;  %s1747_s5 = smov (!%p244_p4, %s1057_s5), 127 }
   0xd   : > { %v1304_v1 = vld [vmem:[%s1738_s1 + $0x78] sm:$0xff]  ;;  %589 = vmatpush.bf16.msra.mxu0 %v1296_v0  ;;  %1400 = vmatpush.bf16.msra.mxu2 %v1296_v0  ;;  %v1303_v3 = vld [vmem:[%s1738_s1 + $0x70] sm:$0xff]  ;;  %v1302_v5 = vld [vmem:[%s1738_s1 + $0x68] sm:$0xff]  ;;  %s1256_s21 = sshll.u32 %s1747_s5, 3  ;;  %s1061_s12 = sshll.u32 %s1747_s5, 2 }
   0xe   : > { %678 = vmatpush.bf16.msra.mxu1 %v1304_v1  ;;  %1408 = vmatpush.bf16.msra.mxu3 %v1304_v1  ;;  %v1293_v6 = vld [vmem:[%s1738_s1 + $0x20] sm:$0xff]  ;;  %v1292_v8 = vld [vmem:[%s1738_s1 + $0x18] sm:$0xff]  ;;  %v1291_v10 = vld [vmem:[%s1738_s1 + $0x10] sm:$0xff]  ;;  %s1557_s26 = scalar_lea.vmem %s1737_s0, %s1256_s21  ;;  %s1651_s15 = scalar_lea.vmem %s1741_s4, %s1061_s12 }
   0xf   : > { %v1301_v7 = vld [vmem:[%s1738_s1 + $0x60] sm:$0xff]  ;;  %v1300_v9 = vld [vmem:[%s1738_s1 + $0x58] sm:$0xff]  ;;  %v1299_v11 = vld [vmem:[%s1738_s1 + $0x50] sm:$0xff] }
  0x10   : > { %v1290_v12 = vld [vmem:[%s1738_s1 + $0x8] sm:$0xff]  ;;  %v1289_v14 = vld [vmem:[%s1738_s1] sm:$0xff]  ;;  %v1072_v28 = vld [vmem:[%s1557_s26 + $0x10] sm:$0xf] }
  0x11   : > { %590 = vmatpush.bf16.msra.mxu0 %v1295_v2  ;;  %1401 = vmatpush.bf16.msra.mxu2 %v1295_v2  ;;  %v1298_v13 = vld [vmem:[%s1738_s1 + $0x48] sm:$0xff]  ;;  %v1297_v15 = vld [vmem:[%s1738_s1 + $0x40] sm:$0xff]  ;;  %v1260_v29 = vld [vmem:[%s1557_s26 + $0x14] sm:$0xf0] }
  0x12   : > { %679 = vmatpush.bf16.msra.mxu1 %v1303_v3  ;;  %1409 = vmatpush.bf16.msra.mxu3 %v1303_v3  ;;  %v1064_v16 = vld [vmem:[%s1557_s26] sm:$0xf]  ;;  %v1258_v17 = vld [vmem:[%s1557_s26 + $0x4] sm:$0xf0]  ;;  %v1257_v20 = vld [vmem:[%s1557_s26 + $0x4] sm:$0xf]  ;;  %v1073_v36 = vor.u32 %v1260_v29, %v1072_v28 }
  0x13   : > { %v1128_v18 = vld [vmem:[%s1557_s26 + $0x80] sm:$0xf]  ;;  %v1274_v19 = vld [vmem:[%s1557_s26 + $0x84] sm:$0xf0]  ;;  %v1066_v21 = vld [vmem:[%s1557_s26 + $0x8] sm:$0xf0]  ;;  %v1065_v24 = vor.u32 %v1258_v17, %v1064_v16 }
  0x14   : > { %v1273_v22 = vld [vmem:[%s1557_s26 + $0x84] sm:$0xf]  ;;  %v1130_v23 = vld [vmem:[%s1557_s26 + $0x88] sm:$0xf0]  ;;  %v1129_v25 = vor.u32 %v1274_v19, %v1128_v18  ;;  %v1069_v26 = vor.u32 %v1257_v20, %v1066_v21  ;;  %v1136_v30 = vld [vmem:[%s1557_s26 + $0x90] sm:$0xf] }
  0x15   : > { %591 = vmatpush.bf16.msra.mxu0 %v1294_v4  ;;  %1402 = vmatpush.bf16.msra.mxu2 %v1294_v4  ;;  %v1133_v27 = vor.u32 %v1273_v22, %v1130_v23  ;;  %v1276_v31 = vld [vmem:[%s1557_s26 + $0x94] sm:$0xf0]  ;;  %v1259_v32 = vld [vmem:[%s1557_s26 + $0x14] sm:$0xf]  ;;  %v1074_v33 = vld [vmem:[%s1557_s26 + $0x18] sm:$0xf0] }
  0x16   : > { %680 = vmatpush.bf16.msra.mxu1 %v1302_v5  ;;  %1410 = vmatpush.bf16.msra.mxu3 %v1302_v5  ;;  %v1275_v34 = vld [vmem:[%s1557_s26 + $0x94] sm:$0xf]  ;;  %v1138_v35 = vld [vmem:[%s1557_s26 + $0x98] sm:$0xf0]  ;;  %v1137_v37 = vor.u32 %v1276_v31, %v1136_v30  ;;  %v1077_v38 = vor.u32 %v1259_v32, %v1074_v33  ;;  %v1080_v40 = vld [vmem:[%s1557_s26 + $0x20] sm:$0xf] }
  0x17   : > { %v1141_v39 = vor.u32 %v1275_v34, %v1138_v35  ;;  %v1262_v41 = vld [vmem:[%s1557_s26 + $0x24] sm:$0xf0]  ;;  %v1144_v42 = vld [vmem:[%s1557_s26 + $0xa0] sm:$0xf]  ;;  %v1261_v44 = vld [vmem:[%s1557_s26 + $0x24] sm:$0xf] }
  0x18   : > { %v1278_v43 = vld [vmem:[%s1557_s26 + $0xa4] sm:$0xf0]  ;;  %v1082_v45 = vld [vmem:[%s1557_s26 + $0x28] sm:$0xf0]  ;;  %v1277_v46 = vld [vmem:[%s1557_s26 + $0xa4] sm:$0xf]  ;;  %v1081_v48 = vor.u32 %v1262_v41, %v1080_v40 }
  0x19   : > { %592 = vmatpush.bf16.msra.mxu0 %v1293_v6  ;;  %1403 = vmatpush.bf16.msra.mxu2 %v1293_v6  ;;  %v1146_v47 = vld [vmem:[%s1557_s26 + $0xa8] sm:$0xf0]  ;;  %v1145_v49 = vor.u32 %v1278_v43, %v1144_v42  ;;  %v1085_v50 = vor.u32 %v1261_v44, %v1082_v45  ;;  %v1088_v52 = vld [vmem:[%s1557_s26 + $0x30] sm:$0xf]  ;;  %v1264_v53 = vld [vmem:[%s1557_s26 + $0x34] sm:$0xf0] }
  0x1a   : > { %681 = vmatpush.bf16.msra.mxu1 %v1301_v7  ;;  %1411 = vmatpush.bf16.msra.mxu3 %v1301_v7  ;;  %v1149_v51 = vor.u32 %v1277_v46, %v1146_v47  ;;  %v1152_v54 = vld [vmem:[%s1557_s26 + $0xb0] sm:$0xf]  ;;  %v1280_v55 = vld [vmem:[%s1557_s26 + $0xb4] sm:$0xf0]  ;;  %v1263_v56 = vld [vmem:[%s1557_s26 + $0x34] sm:$0xf]  ;;  %v1089_v60 = vor.u32 %v1264_v53, %v1088_v52 }
  0x1b   : > { %v1090_v57 = vld [vmem:[%s1557_s26 + $0x38] sm:$0xf0]  ;;  %v1279_v58 = vld [vmem:[%s1557_s26 + $0xb4] sm:$0xf]  ;;  %v1153_v61 = vor.u32 %v1280_v55, %v1152_v54  ;;  %v1096_v0 = vld [vmem:[%s1557_s26 + $0x40] sm:$0xf] }
  0x1c   : > { %v1154_v59 = vld [vmem:[%s1557_s26 + $0xb8] sm:$0xf0]  ;;  %v1093_v62 = vor.u32 %v1263_v56, %v1090_v57  ;;  %v1266_v1 = vld [vmem:[%s1557_s26 + $0x44] sm:$0xf0]  ;;  %v1160_v2 = vld [vmem:[%s1557_s26 + $0xc0] sm:$0xf] }
  0x1d   : > { %593 = vmatpush.bf16.msra.mxu0 %v1292_v8  ;;  %1404 = vmatpush.bf16.msra.mxu2 %v1292_v8  ;;  %v1157_v63 = vor.u32 %v1279_v58, %v1154_v59  ;;  %v1282_v3 = vld [vmem:[%s1557_s26 + $0xc4] sm:$0xf0]  ;;  %v1265_v4 = vld [vmem:[%s1557_s26 + $0x44] sm:$0xf]  ;;  %v1098_v5 = vld [vmem:[%s1557_s26 + $0x48] sm:$0xf0]  ;;  %v1097_v8 = vor.u32 %v1266_v1, %v1096_v0 }
  0x1e   : > { %682 = vmatpush.bf16.msra.mxu1 %v1300_v9  ;;  %1412 = vmatpush.bf16.msra.mxu3 %v1300_v9  ;;  %v1281_v6 = vld [vmem:[%s1557_s26 + $0xc4] sm:$0xf]  ;;  %v1162_v7 = vld [vmem:[%s1557_s26 + $0xc8] sm:$0xf0]  ;;  %v1161_v9 = vor.u32 %v1282_v3, %v1160_v2  ;;  %v1267_v16 = vld [vmem:[%s1557_s26 + $0x54] sm:$0xf] }
  0x1f   : > { %v1106_v17 = vld [vmem:[%s1557_s26 + $0x58] sm:$0xf0]  ;;  %v1283_v18 = vld [vmem:[%s1557_s26 + $0xd4] sm:$0xf]  ;;  %v1269_v28 = vld [vmem:[%s1557_s26 + $0x64] sm:$0xf] }
  0x20   : > { %v1170_v19 = vld [vmem:[%s1557_s26 + $0xd8] sm:$0xf0]  ;;  %v1109_v22 = vor.u32 %v1267_v16, %v1106_v17  ;;  %v1114_v29 = vld [vmem:[%s1557_s26 + $0x68] sm:$0xf0]  ;;  %v1285_v30 = vld [vmem:[%s1557_s26 + $0xe4] sm:$0xf] }
  0x21   : > { %594 = vmatpush.bf16.msra.mxu0 %v1291_v10  ;;  %1405 = vmatpush.bf16.msra.mxu2 %v1291_v10  ;;  %v1101_v10 = vor.u32 %v1265_v4, %v1098_v5  ;;  %v1173_v23 = vor.u32 %v1283_v18, %v1170_v19  ;;  %v1178_v31 = vld [vmem:[%s1557_s26 + $0xe8] sm:$0xf0]  ;;  %v1117_v34 = vor.u32 %v1269_v28, %v1114_v29  ;;  %v1271_v40 = vld [vmem:[%s1557_s26 + $0x74] sm:$0xf]  ;;  %v1122_v41 = vld [vmem:[%s1557_s26 + $0x78] sm:$0xf0] }
  0x22   : > { %683 = vmatpush.bf16.msra.mxu1 %v1299_v11  ;;  %1413 = vmatpush.bf16.msra.mxu3 %v1299_v11  ;;  %v1165_v11 = vor.u32 %v1281_v6, %v1162_v7  ;;  %v1181_v35 = vor.u32 %v1285_v30, %v1178_v31  ;;  %v1287_v42 = vld [vmem:[%s1557_s26 + $0xf4] sm:$0xf]  ;;  %v1186_v43 = vld [vmem:[%s1557_s26 + $0xf8] sm:$0xf0]  ;;  %v1125_v46 = vor.u32 %v1271_v40, %v1122_v41  ;;  %v1641_v55 = vld [vmem:[%s1740_s3] ss:$0 sm:$0xff] }
  0x23   : > { %v1189_v47 = vor.u32 %v1287_v42, %v1186_v43 }
  0x25   : > { %595 = vmatpush.bf16.msra.mxu0 %v1290_v12  ;;  %1406 = vmatpush.bf16.msra.mxu2 %v1290_v12  ;;  %v1104_v12 = vld [vmem:[%s1557_s26 + $0x50] sm:$0xf] }
  0x26   : > { %684 = vmatpush.bf16.msra.mxu1 %v1298_v13  ;;  %1414 = vmatpush.bf16.msra.mxu3 %v1298_v13  ;;  %v1268_v13 = vld [vmem:[%s1557_s26 + $0x54] sm:$0xf0] }
  0x27   : > { %v1105_v20 = vor.u32 %v1268_v13, %v1104_v12 }
  0x29   : > { %596 = vmatpush.bf16.msra.mxu0 %v1289_v14  ;;  %1407 = vmatpush.bf16.msra.mxu2 %v1289_v14  ;;  %v1168_v14 = vld [vmem:[%s1557_s26 + $0xd0] sm:$0xf] }
  0x2a   : > { %685 = vmatpush.bf16.msra.mxu1 %v1297_v15  ;;  %1415 = vmatpush.bf16.msra.mxu3 %v1297_v15  ;;  %v1284_v15 = vld [vmem:[%s1557_s26 + $0xd4] sm:$0xf0] }
  0x2b   : > { %v1169_v21 = vor.u32 %v1284_v15, %v1168_v14 }
  0x2c   : > { %597 = vmatmul.bf16.vlgmr.msra.gmra.mxu0 %v1065_v24  ;;  %637 = vmatmul.bf16.vlgmr.msra.gmra.mxu2 %v1129_v25  ;;  %v1112_v24 = vld [vmem:[%s1557_s26 + $0x60] sm:$0xf]  ;;  %v1270_v25 = vld [vmem:[%s1557_s26 + $0x64] sm:$0xf0] }
  0x2d   : > { %686 = vmatmul.bf16.vlgmr.msra.gmra.mxu1 %v1069_v26  ;;  %726 = vmatmul.bf16.vlgmr.msra.gmra.mxu3 %v1133_v27  ;;  %v1176_v26 = vld [vmem:[%s1557_s26 + $0xe0] sm:$0xf]  ;;  %v1286_v27 = vld [vmem:[%s1557_s26 + $0xe4] sm:$0xf0]  ;;  %v1113_v32 = vor.u32 %v1270_v25, %v1112_v24 }
  0x2e   : > { %v1177_v33 = vor.u32 %v1286_v27, %v1176_v26 }
  0x3c   : > { %602 = vmatmul.bf16.gmra.mxu0 %v1073_v36  ;;  %642 = vmatmul.bf16.gmra.mxu2 %v1137_v37  ;;  %v1120_v36 = vld [vmem:[%s1557_s26 + $0x70] sm:$0xf]  ;;  %v1272_v37 = vld [vmem:[%s1557_s26 + $0x74] sm:$0xf0] }
  0x3d   : > { %691 = vmatmul.bf16.gmra.mxu1 %v1077_v38  ;;  %731 = vmatmul.bf16.gmra.mxu3 %v1141_v39  ;;  %v1184_v38 = vld [vmem:[%s1557_s26 + $0xf0] sm:$0xf]  ;;  %v1288_v39 = vld [vmem:[%s1557_s26 + $0xf4] sm:$0xf0]  ;;  %v1121_v44 = vor.u32 %v1272_v37, %v1120_v36 }
  0x3e   : > { %v1185_v45 = vor.u32 %v1288_v39, %v1184_v38 }
  0x4c   : > { %607 = vmatmul.bf16.gmra.mxu0 %v1081_v48  ;;  %647 = vmatmul.bf16.gmra.mxu2 %v1145_v49 }
  0x4d   : > { %696 = vmatmul.bf16.gmra.mxu1 %v1085_v50  ;;  %736 = vmatmul.bf16.gmra.mxu3 %v1149_v51  ;;  %v1635_v51 = vld [vmem:[%s1739_s2] ss:$0 sm:$0xff] }
  0x5c   : > { %612 = vmatmul.bf16.gmra.mxu0 %v1089_v60  ;;  %652 = vmatmul.bf16.gmra.mxu2 %v1153_v61 }
  0x5d   : > { %701 = vmatmul.bf16.gmra.mxu1 %v1093_v62  ;;  %741 = vmatmul.bf16.gmra.mxu3 %v1157_v63 }
  0x6c   : > { %617 = vmatmul.bf16.gmra.mxu0 %v1097_v8  ;;  %657 = vmatmul.bf16.gmra.mxu2 %v1161_v9 }
  0x6d   : > { %706 = vmatmul.bf16.gmra.mxu1 %v1101_v10  ;;  %746 = vmatmul.bf16.gmra.mxu3 %v1165_v11 }
  0x7c   : > { %622 = vmatmul.bf16.gmra.mxu0 %v1105_v20  ;;  %662 = vmatmul.bf16.gmra.mxu2 %v1169_v21 }
  0x7d   : > { %711 = vmatmul.bf16.gmra.mxu1 %v1109_v22  ;;  %751 = vmatmul.bf16.gmra.mxu3 %v1173_v23 }
  0x8c   : > { %627 = vmatmul.bf16.gmra.mxu0 %v1113_v32  ;;  %667 = vmatmul.bf16.gmra.mxu2 %v1177_v33 }
  0x8d   : > { %716 = vmatmul.bf16.gmra.mxu1 %v1117_v34  ;;  %756 = vmatmul.bf16.gmra.mxu3 %v1181_v35 }
  0x9c   : > { %632 = vmatmul.bf16.gmra.mxu0 %v1121_v44  ;;  %672 = vmatmul.bf16.gmra.mxu2 %v1185_v45 }
  0x9d   : > { %721 = vmatmul.bf16.gmra.mxu1 %v1125_v46  ;;  %761 = vmatmul.bf16.gmra.mxu3 %v1189_v47 }
  0xa9   : > { %v598_v48 = vpop.f32.mrf.mxu0 }
  0xaa   : > { %v687_v49 = vpop.f32.mrf.mxu1 }
  0xab   : > { %v688_v50 = vadd.f32 %v687_v49, %v598_v48 }
  0xad   : > { %v771_v54 = vmul.f32 %v1635_v51, %v688_v50 }
  0xaf   : > { %v638_v52 = vpop.f32.mrf.mxu2  ;;  %v807_v60 = vadd.f32 %v1641_v55, %v771_v54 }
  0xb0   : > { %v727_v53 = vpop.f32.mrf.mxu3 }
  0xb1   : > { %v600_v56 = vpop.f32.mrf.mxu0  ;;  %v728_v58 = vadd.f32 %v727_v53, %v638_v52  ;;  %v839_v2 = vmax.f32 %v807_v60, 0.0 }
  0xb2   : > { %v689_v57 = vpop.f32.mrf.mxu1 }
  0xb3   : > { %v690_v59 = vadd.f32 %v689_v57, %v600_v56  ;;  %v787_v62 = vmul.f32 %v1635_v51, %v728_v58 }
  0xb5   : > { %v772_v61 = vmul.f32 %v1635_v51, %v690_v59  ;;  %v823_v7 = vadd.f32 %v1641_v55, %v787_v62 }
  0xb7   : > { %v808_v63 = vadd.f32 %v1641_v55, %v772_v61  ;;  %v640_v0 = vpop.f32.mrf.mxu2  ;;  %v855_v12 = vmax.f32 %v823_v7, 0.0 }
  0xb8   : > { %v729_v1 = vpop.f32.mrf.mxu3 }
  0xb9   : > { %v840_v3 = vmax.f32 %v808_v63, 0.0  ;;  %v730_v4 = vadd.f32 %v729_v1, %v640_v0  ;;  %v603_v5 = vpop.f32.mrf.mxu0 }
  0xba   : > { %v692_v6 = vpop.f32.mrf.mxu1 }
  0xbb   : > { %v1308_v8 = vpack.c.bf16 %v840_v3, %v839_v2  ;;  %v788_v9 = vmul.f32 %v1635_v51, %v730_v4  ;;  %v693_v11 = vadd.f32 %v692_v6, %v603_v5 }
  0xbd   : > { %1309 = vst [vmem:[%s1651_s15] sm:$0xff] %v1308_v8   ;;  %v824_v10 = vadd.f32 %v1641_v55, %v788_v9  ;;  %v773_v17 = vmul.f32 %v1635_v51, %v693_v11 }
  0xbf   : > { %v856_v13 = vmax.f32 %v824_v10, 0.0  ;;  %v643_v14 = vpop.f32.mrf.mxu2  ;;  %v809_v22 = vadd.f32 %v1641_v55, %v773_v17 }
  0xc0   : > { %v732_v15 = vpop.f32.mrf.mxu3 }
  0xc1   : > { %v1348_v16 = vpack.c.bf16 %v856_v13, %v855_v12  ;;  %v605_v18 = vpop.f32.mrf.mxu0  ;;  %v733_v20 = vadd.f32 %v732_v15, %v643_v14  ;;  %v841_v28 = vmax.f32 %v809_v22, 0.0 }
  0xc2   : > { %v694_v19 = vpop.f32.mrf.mxu1 }
  0xc3   : > { %1392 = vst [vmem:[%s1651_s15 + $0x40] sm:$0xff] %v1348_v16   ;;  %v695_v21 = vadd.f32 %v694_v19, %v605_v18  ;;  %v789_v24 = vmul.f32 %v1635_v51, %v733_v20 }
  0xc5   : > { %v774_v23 = vmul.f32 %v1635_v51, %v695_v21  ;;  %v825_v33 = vadd.f32 %v1641_v55, %v789_v24 }
  0xc7   : > { %v810_v25 = vadd.f32 %v1641_v55, %v774_v23  ;;  %v645_v26 = vpop.f32.mrf.mxu2  ;;  %v857_v38 = vmax.f32 %v825_v33, 0.0 }
  0xc8   : > { %v734_v27 = vpop.f32.mrf.mxu3 }
  0xc9   : > { %v842_v29 = vmax.f32 %v810_v25, 0.0  ;;  %v735_v30 = vadd.f32 %v734_v27, %v645_v26  ;;  %v608_v31 = vpop.f32.mrf.mxu0 }
  0xca   : > { %v697_v32 = vpop.f32.mrf.mxu1 }
  0xcb   : > { %v1313_v34 = vpack.c.bf16 %v842_v29, %v841_v28  ;;  %v790_v35 = vmul.f32 %v1635_v51, %v735_v30  ;;  %v698_v37 = vadd.f32 %v697_v32, %v608_v31 }
  0xcd   : > { %1385 = vst [vmem:[%s1651_s15 + $0x8] sm:$0xff] %v1313_v34   ;;  %v826_v36 = vadd.f32 %v1641_v55, %v790_v35  ;;  %v775_v43 = vmul.f32 %v1635_v51, %v698_v37 }
  0xcf   : > { %v858_v39 = vmax.f32 %v826_v36, 0.0  ;;  %v648_v40 = vpop.f32.mrf.mxu2  ;;  %v811_v48 = vadd.f32 %v1641_v55, %v775_v43 }
  0xd0   : > { %v737_v41 = vpop.f32.mrf.mxu3 }
  0xd1   : > { %v1353_v42 = vpack.c.bf16 %v858_v39, %v857_v38  ;;  %v610_v44 = vpop.f32.mrf.mxu0  ;;  %v738_v46 = vadd.f32 %v737_v41, %v648_v40  ;;  %v843_v56 = vmax.f32 %v811_v48, 0.0 }
  0xd2   : > { %v699_v45 = vpop.f32.mrf.mxu1 }
  0xd3   : > { %1393 = vst [vmem:[%s1651_s15 + $0x48] sm:$0xff] %v1353_v42   ;;  %v700_v47 = vadd.f32 %v699_v45, %v610_v44  ;;  %v791_v50 = vmul.f32 %v1635_v51, %v738_v46 }
  0xd5   : > { %v776_v49 = vmul.f32 %v1635_v51, %v700_v47  ;;  %v827_v61 = vadd.f32 %v1641_v55, %v791_v50 }
  0xd7   : > { %v812_v52 = vadd.f32 %v1641_v55, %v776_v49  ;;  %v650_v53 = vpop.f32.mrf.mxu2  ;;  %v859_v2 = vmax.f32 %v827_v61, 0.0 }
  0xd8   : > { %v739_v54 = vpop.f32.mrf.mxu3 }
  0xd9   : > { %v844_v57 = vmax.f32 %v812_v52, 0.0  ;;  %v740_v58 = vadd.f32 %v739_v54, %v650_v53  ;;  %v613_v59 = vpop.f32.mrf.mxu0 }
  0xda   : > { %v702_v60 = vpop.f32.mrf.mxu1 }
  0xdb   : > { %v1318_v62 = vpack.c.bf16 %v844_v57, %v843_v56  ;;  %v792_v63 = vmul.f32 %v1635_v51, %v740_v58  ;;  %v703_v1 = vadd.f32 %v702_v60, %v613_v59 }
  0xdd   : > { %1386 = vst [vmem:[%s1651_s15 + $0x10] sm:$0xff] %v1318_v62   ;;  %v828_v0 = vadd.f32 %v1641_v55, %v792_v63  ;;  %v777_v7 = vmul.f32 %v1635_v51, %v703_v1 }
  0xdf   : > { %v860_v3 = vmax.f32 %v828_v0, 0.0  ;;  %v653_v4 = vpop.f32.mrf.mxu2  ;;  %v813_v12 = vadd.f32 %v1641_v55, %v777_v7 }
  0xe0   : > { %v742_v5 = vpop.f32.mrf.mxu3 }
  0xe1   : > { %v1358_v6 = vpack.c.bf16 %v860_v3, %v859_v2  ;;  %v615_v8 = vpop.f32.mrf.mxu0  ;;  %v743_v10 = vadd.f32 %v742_v5, %v653_v4  ;;  %v845_v18 = vmax.f32 %v813_v12, 0.0 }
  0xe2   : > { %v704_v9 = vpop.f32.mrf.mxu1 }
  0xe3   : > { %1394 = vst [vmem:[%s1651_s15 + $0x50] sm:$0xff] %v1358_v6   ;;  %v705_v11 = vadd.f32 %v704_v9, %v615_v8  ;;  %v793_v14 = vmul.f32 %v1635_v51, %v743_v10 }
  0xe5   : > { %v778_v13 = vmul.f32 %v1635_v51, %v705_v11  ;;  %v829_v23 = vadd.f32 %v1641_v55, %v793_v14 }
  0xe7   : > { %v814_v15 = vadd.f32 %v1641_v55, %v778_v13  ;;  %v655_v16 = vpop.f32.mrf.mxu2  ;;  %v861_v28 = vmax.f32 %v829_v23, 0.0 }
  0xe8   : > { %v744_v17 = vpop.f32.mrf.mxu3 }
  0xe9   : > { %v846_v19 = vmax.f32 %v814_v15, 0.0  ;;  %v745_v20 = vadd.f32 %v744_v17, %v655_v16  ;;  %v618_v21 = vpop.f32.mrf.mxu0 }
  0xea   : > { %v707_v22 = vpop.f32.mrf.mxu1 }
  0xeb   : > { %v1323_v24 = vpack.c.bf16 %v846_v19, %v845_v18  ;;  %v794_v25 = vmul.f32 %v1635_v51, %v745_v20  ;;  %v708_v27 = vadd.f32 %v707_v22, %v618_v21 }
  0xed   : > { %1387 = vst [vmem:[%s1651_s15 + $0x18] sm:$0xff] %v1323_v24   ;;  %v830_v26 = vadd.f32 %v1641_v55, %v794_v25  ;;  %v779_v33 = vmul.f32 %v1635_v51, %v708_v27 }
  0xef   : > { %v862_v29 = vmax.f32 %v830_v26, 0.0  ;;  %v658_v30 = vpop.f32.mrf.mxu2  ;;  %v815_v38 = vadd.f32 %v1641_v55, %v779_v33 }
  0xf0   : > { %v747_v31 = vpop.f32.mrf.mxu3 }
  0xf1   : > { %v1363_v32 = vpack.c.bf16 %v862_v29, %v861_v28  ;;  %v620_v34 = vpop.f32.mrf.mxu0  ;;  %v748_v36 = vadd.f32 %v747_v31, %v658_v30  ;;  %v847_v44 = vmax.f32 %v815_v38, 0.0 }
  0xf2   : > { %v709_v35 = vpop.f32.mrf.mxu1 }
  0xf3   : > { %1395 = vst [vmem:[%s1651_s15 + $0x58] sm:$0xff] %v1363_v32   ;;  %v710_v37 = vadd.f32 %v709_v35, %v620_v34  ;;  %v795_v40 = vmul.f32 %v1635_v51, %v748_v36 }
  0xf5   : > { %v780_v39 = vmul.f32 %v1635_v51, %v710_v37  ;;  %v831_v49 = vadd.f32 %v1641_v55, %v795_v40 }
  0xf7   : > { %v816_v41 = vadd.f32 %v1641_v55, %v780_v39  ;;  %v660_v42 = vpop.f32.mrf.mxu2  ;;  %v863_v56 = vmax.f32 %v831_v49, 0.0 }
  0xf8   : > { %v749_v43 = vpop.f32.mrf.mxu3 }
  0xf9   : > { %v848_v45 = vmax.f32 %v816_v41, 0.0  ;;  %v750_v46 = vadd.f32 %v749_v43, %v660_v42  ;;  %v623_v47 = vpop.f32.mrf.mxu0 }
  0xfa   : > { %v712_v48 = vpop.f32.mrf.mxu1 }
  0xfb   : > { %v1328_v50 = vpack.c.bf16 %v848_v45, %v847_v44  ;;  %v796_v52 = vmul.f32 %v1635_v51, %v750_v46  ;;  %v713_v54 = vadd.f32 %v712_v48, %v623_v47 }
  0xfd   : > { %1388 = vst [vmem:[%s1651_s15 + $0x20] sm:$0xff] %v1328_v50   ;;  %v832_v53 = vadd.f32 %v1641_v55, %v796_v52  ;;  %v781_v61 = vmul.f32 %v1635_v51, %v713_v54 }
  0xff   : > { %v864_v57 = vmax.f32 %v832_v53, 0.0  ;;  %v663_v58 = vpop.f32.mrf.mxu2  ;;  %v817_v2 = vadd.f32 %v1641_v55, %v781_v61 }
 0x100   : > { %v752_v59 = vpop.f32.mrf.mxu3 }
 0x101   : > { %v1368_v60 = vpack.c.bf16 %v864_v57, %v863_v56  ;;  %v625_v62 = vpop.f32.mrf.mxu0  ;;  %v753_v0 = vadd.f32 %v752_v59, %v663_v58  ;;  %v849_v8 = vmax.f32 %v817_v2, 0.0 }
 0x102   : > { %v714_v63 = vpop.f32.mrf.mxu1 }
 0x103   : > { %1396 = vst [vmem:[%s1651_s15 + $0x60] sm:$0xff] %v1368_v60   ;;  %v715_v1 = vadd.f32 %v714_v63, %v625_v62  ;;  %v797_v4 = vmul.f32 %v1635_v51, %v753_v0 }
 0x105   : > { %v782_v3 = vmul.f32 %v1635_v51, %v715_v1  ;;  %v833_v13 = vadd.f32 %v1641_v55, %v797_v4 }
 0x107   : > { %v818_v5 = vadd.f32 %v1641_v55, %v782_v3  ;;  %v665_v6 = vpop.f32.mrf.mxu2  ;;  %v865_v18 = vmax.f32 %v833_v13, 0.0 }
 0x108   : > { %v754_v7 = vpop.f32.mrf.mxu3 }
 0x109   : > { %v850_v9 = vmax.f32 %v818_v5, 0.0  ;;  %v755_v10 = vadd.f32 %v754_v7, %v665_v6  ;;  %v628_v11 = vpop.f32.mrf.mxu0 }
 0x10a   : > { %v717_v12 = vpop.f32.mrf.mxu1 }
 0x10b   : > { %v1333_v14 = vpack.c.bf16 %v850_v9, %v849_v8  ;;  %v798_v15 = vmul.f32 %v1635_v51, %v755_v10  ;;  %v718_v17 = vadd.f32 %v717_v12, %v628_v11 }
 0x10d   : > { %1389 = vst [vmem:[%s1651_s15 + $0x28] sm:$0xff] %v1333_v14   ;;  %v834_v16 = vadd.f32 %v1641_v55, %v798_v15  ;;  %v783_v23 = vmul.f32 %v1635_v51, %v718_v17 }
 0x10f   : > { %v866_v19 = vmax.f32 %v834_v16, 0.0  ;;  %v668_v20 = vpop.f32.mrf.mxu2  ;;  %v819_v28 = vadd.f32 %v1641_v55, %v783_v23 }
 0x110   : > { %v757_v21 = vpop.f32.mrf.mxu3 }
 0x111   : > { %v1373_v22 = vpack.c.bf16 %v866_v19, %v865_v18  ;;  %v630_v24 = vpop.f32.mrf.mxu0  ;;  %v758_v26 = vadd.f32 %v757_v21, %v668_v20  ;;  %v851_v34 = vmax.f32 %v819_v28, 0.0 }
 0x112   : > { %v719_v25 = vpop.f32.mrf.mxu1 }
 0x113   : > { %1397 = vst [vmem:[%s1651_s15 + $0x68] sm:$0xff] %v1373_v22   ;;  %v720_v27 = vadd.f32 %v719_v25, %v630_v24  ;;  %v799_v30 = vmul.f32 %v1635_v51, %v758_v26 }
 0x115   : > { %v784_v29 = vmul.f32 %v1635_v51, %v720_v27  ;;  %v835_v39 = vadd.f32 %v1641_v55, %v799_v30 }
 0x117   : > { %v820_v31 = vadd.f32 %v1641_v55, %v784_v29  ;;  %v670_v32 = vpop.f32.mrf.mxu2  ;;  %v867_v44 = vmax.f32 %v835_v39, 0.0 }
 0x118   : > { %v759_v33 = vpop.f32.mrf.mxu3 }
 0x119   : > { %v852_v35 = vmax.f32 %v820_v31, 0.0  ;;  %v760_v36 = vadd.f32 %v759_v33, %v670_v32  ;;  %v633_v37 = vpop.f32.mrf.mxu0 }
 0x11a   : > { %v722_v38 = vpop.f32.mrf.mxu1 }
 0x11b   : > { %v1338_v40 = vpack.c.bf16 %v852_v35, %v851_v34  ;;  %v800_v41 = vmul.f32 %v1635_v51, %v760_v36  ;;  %v723_v43 = vadd.f32 %v722_v38, %v633_v37 }
 0x11d   : > { %1390 = vst [vmem:[%s1651_s15 + $0x30] sm:$0xff] %v1338_v40   ;;  %v836_v42 = vadd.f32 %v1641_v55, %v800_v41  ;;  %v785_v49 = vmul.f32 %v1635_v51, %v723_v43 }
 0x11f   : > { %v868_v45 = vmax.f32 %v836_v42, 0.0  ;;  %v673_v46 = vpop.f32.mrf.mxu2  ;;  %v821_v56 = vadd.f32 %v1641_v55, %v785_v49 }
 0x120   : > { %v762_v47 = vpop.f32.mrf.mxu3 }
 0x121   : > { %v1378_v48 = vpack.c.bf16 %v868_v45, %v867_v44  ;;  %v635_v50 = vpop.f32.mrf.mxu0  ;;  %v763_v53 = vadd.f32 %v762_v47, %v673_v46  ;;  %v853_v62 = vmax.f32 %v821_v56, 0.0 }
 0x122   : > { %v724_v52 = vpop.f32.mrf.mxu1 }
 0x123   : > { %1398 = vst [vmem:[%s1651_s15 + $0x70] sm:$0xff] %v1378_v48   ;;  %v725_v54 = vadd.f32 %v724_v52, %v635_v50  ;;  %v801_v58 = vmul.f32 %v1635_v51, %v763_v53 }
 0x125   : > { %v786_v57 = vmul.f32 %v1635_v51, %v725_v54  ;;  %v837_v1 = vadd.f32 %v1641_v55, %v801_v58 }
 0x127   : > { %v822_v59 = vadd.f32 %v1641_v55, %v786_v57  ;;  %v675_v60 = vpop.f32.mrf.mxu2  ;;  %v869_v5 = vmax.f32 %v837_v1, 0.0 }
 0x128   : > { %v764_v61 = vpop.f32.mrf.mxu3 }
 0x129   : > { %v854_v63 = vmax.f32 %v822_v59, 0.0  ;;  %v765_v0 = vadd.f32 %v764_v61, %v675_v60 }
 0x12b   : > { %v1343_v2 = vpack.c.bf16 %v854_v63, %v853_v62  ;;  %v802_v3 = vmul.f32 %v1635_v51, %v765_v0 }
 0x12d   : > { %1391 = vst [vmem:[%s1651_s15 + $0x38] sm:$0xff] %v1343_v2   ;;  %v838_v4 = vadd.f32 %v1641_v55, %v802_v3 }
 0x12f   : > { %v870_v6 = vmax.f32 %v838_v4, 0.0 }
 0x131   : > { %v1383_v7 = vpack.c.bf16 %v870_v6, %v869_v5 }
 0x133   : > { %1399 = vst [vmem:[%s1651_s15 + $0x78] sm:$0xff] %v1383_v7  }
 0x134 PF: > { %s14_s17 = sadd.s32 1, %s1464_s17   ;;  %s1742_s15 = smov %s1460_s16 }
 0x135   : > { %p11_p5 = scmp.ge.s32.totalorder %s14_s17, 6   ;;  %s1743_s16 = smov %s1745_s18 }
 0x137   :  { %13 = sbr.rel (!%p11_p5) target bundleno = 2 (0x2), region = 75 }

// kernel: rgbd_encoder_forward.14
= control target key start
LH: loop header
LB: loop body
LE: loop exit
PB: predicated region body
PF: predicated region fallthrough
CT: control target
= control target key end

     0   :  { %s1293_s27 = smov 0   ;;  %s1643_s0 = inlined_call_operand.vmem [shape: bf16[256,128], index: 0, kind: input, shape index: {}]   ;;  %s1644_s1 = inlined_call_operand.vmem [shape: bf16[128,128], index: 1, kind: input, shape index: {}]   ;;  %s1645_s2 = inlined_call_operand.vmem [shape: f32[1,128], index: 2, kind: input, shape index: {}]   ;;  %s1646_s3 = inlined_call_operand.vmem [shape: f32[1,128], index: 3, kind: input, shape index: {}]   ;;  %s1647_s4 = inlined_call_operand.vmem [shape: bf16[128,256], index: 4, kind: input, shape index: {}]   ;;  %s1648_s5 = inlined_call_operand.vmem [shape: f32[1,256], index: 5, kind: input, shape index: {}]   ;;  %s1649_s6 = inlined_call_operand.vmem [shape: f32[1,256], index: 6, kind: input, shape index: {}]   ;;  %s1650_s7 = inlined_call_operand.vmem [shape: bf16[256,128], index: 7, kind: output, shape index: {0}]   ;;  %s1651_s8 = inlined_call_operand.vmem [shape: bf16[256,256], index: 8, kind: output, shape index: {1}]  }
   0x1 LB: > { %s984_s28 = sadd.s32 4294967295, %s1246_s27   ;;  %p988_p0 = scmp.ge.s32.totalorder %s1246_s27, 1  ;;  %s1246_s27 = sphi %s1293_s27, %s19_s27  }
   0x2   : > { %p266_p1 = scmp.lt.s32.totalorder %s1246_s27, 3 }
   0x4   : > { %p267_p2 = pnand %p988_p0, %p266_p1 }
   0x5   : > { %s989_s11 = sshll.u32 (!%p267_p2), %s984_s28, 4 }
   0x6   : > { %270 = sbr.rel (%p267_p2) target bundleno = 273 (0x111), region = 48  ;;  %p307_p3 = scmp.lt.s32.totalorder (!%p267_p2), %s989_s11, 31 }
   0xb   : > { %v1142_v0 = vld [vmem:[%s1644_s1 + $0x38] sm:$0xff]  ;;  %v1118_v1 = vld [vmem:[%s1647_s4 + $0x70] sm:$0xf]  ;;  %v1157_v4 = vld [vmem:[%s1647_s4 + $0x74] sm:$0xf]  ;;  %s1653_s11 = smov (!%p307_p3, %s989_s11), 31 }
   0xc   : > { %v1158_v2 = vld [vmem:[%s1647_s4 + $0x74] sm:$0xf0]  ;;  %v1120_v5 = vld [vmem:[%s1647_s4 + $0x78] sm:$0xf0]  ;;  %v1141_v6 = vld [vmem:[%s1644_s1 + $0x30] sm:$0xff]  ;;  %453 = vmatpush.bf16.msra.mxu0 %v1142_v0  ;;  %1206 = vmatpush.bf16.msra.mxu3 %v1142_v0  ;;  %s990_s28 = sshll.u32 %s1653_s11, 2 }
   0xd   : > { %v1310_v3 = vor.u32 %v1158_v2, %v1118_v1  ;;  %v1321_v7 = vor.u32 %v1157_v4, %v1120_v5  ;;  %v1110_v8 = vld [vmem:[%s1647_s4 + $0x60] sm:$0xf]  ;;  %v1156_v9 = vld [vmem:[%s1647_s4 + $0x64] sm:$0xf0]  ;;  %v1155_v10 = vld [vmem:[%s1647_s4 + $0x64] sm:$0xf]  ;;  %s1458_s10 = scalar_lea.vmem %s1643_s0, %s990_s28  ;;  %s1521_s26 = scalar_lea.vmem %s1650_s7, %s990_s28 }
   0xe   : > { %v1333_v11 = vor.u32 %v1156_v9, %v1110_v8  ;;  %v1112_v12 = vld [vmem:[%s1647_s4 + $0x68] sm:$0xf0]  ;;  %v1102_v14 = vld [vmem:[%s1647_s4 + $0x50] sm:$0xf]  ;;  %v1154_v15 = vld [vmem:[%s1647_s4 + $0x54] sm:$0xf0] }
   0xf   : > { %686 = vmatpush.bf16.msra.mxu1 %v1310_v3  ;;  %735 = vmatpush.bf16.msra.mxu2 %v1321_v7  ;;  %v1339_v13 = vor.u32 %v1155_v10, %v1112_v12  ;;  %v1153_v16 = vld [vmem:[%s1647_s4 + $0x54] sm:$0xf]  ;;  %v1104_v17 = vld [vmem:[%s1647_s4 + $0x58] sm:$0xf0]  ;;  %v1140_v18 = vld [vmem:[%s1644_s1 + $0x28] sm:$0xff]  ;;  %v1357_v19 = vor.u32 %v1154_v15, %v1102_v14  ;;  %s1126_s20 = sshll.u32 %s1653_s11, 3 }
  0x10   : > { %454 = vmatpush.bf16.msra.mxu0 %v1141_v6  ;;  %1207 = vmatpush.bf16.msra.mxu3 %v1141_v6  ;;  %v1360_v20 = vor.u32 %v1153_v16, %v1104_v17  ;;  %v1094_v21 = vld [vmem:[%s1647_s4 + $0x40] sm:$0xf]  ;;  %v1152_v22 = vld [vmem:[%s1647_s4 + $0x44] sm:$0xf0]  ;;  %v1151_v23 = vld [vmem:[%s1647_s4 + $0x44] sm:$0xf]  ;;  %s1514_s23 = scalar_lea.vmem %s1651_s8, %s1126_s20 }
  0x11   : > { %v1096_v24 = vld [vmem:[%s1647_s4 + $0x48] sm:$0xf0]  ;;  %v1139_v25 = vld [vmem:[%s1644_s1 + $0x20] sm:$0xff]  ;;  %v1378_v26 = vor.u32 %v1152_v22, %v1094_v21  ;;  %v1086_v28 = vld [vmem:[%s1647_s4 + $0x30] sm:$0xf] }
  0x12   : > { %v1381_v27 = vor.u32 %v1151_v23, %v1096_v24  ;;  %v1150_v29 = vld [vmem:[%s1647_s4 + $0x34] sm:$0xf0]  ;;  %v1149_v30 = vld [vmem:[%s1647_s4 + $0x34] sm:$0xf]  ;;  %v1088_v31 = vld [vmem:[%s1647_s4 + $0x38] sm:$0xf0] }
  0x13   : > { %687 = vmatpush.bf16.msra.mxu1 %v1333_v11  ;;  %736 = vmatpush.bf16.msra.mxu2 %v1339_v13  ;;  %v1138_v32 = vld [vmem:[%s1644_s1 + $0x18] sm:$0xff]  ;;  %v1087_v33 = vor.u32 %v1150_v29, %v1086_v28  ;;  %v1402_v34 = vor.u32 %v1149_v30, %v1088_v31  ;;  %v1078_v35 = vld [vmem:[%s1647_s4 + $0x20] sm:$0xf]  ;;  %v1148_v36 = vld [vmem:[%s1647_s4 + $0x24] sm:$0xf0] }
  0x14   : > { %455 = vmatpush.bf16.msra.mxu0 %v1140_v18  ;;  %1208 = vmatpush.bf16.msra.mxu3 %v1140_v18  ;;  %v1147_v37 = vld [vmem:[%s1647_s4 + $0x24] sm:$0xf]  ;;  %v1080_v38 = vld [vmem:[%s1647_s4 + $0x28] sm:$0xf0]  ;;  %v1137_v39 = vld [vmem:[%s1644_s1 + $0x10] sm:$0xff]  ;;  %v1079_v40 = vor.u32 %v1148_v36, %v1078_v35 }
  0x15   : > { %v1083_v41 = vor.u32 %v1147_v37, %v1080_v38  ;;  %v1070_v42 = vld [vmem:[%s1647_s4 + $0x10] sm:$0xf]  ;;  %v1146_v43 = vld [vmem:[%s1647_s4 + $0x14] sm:$0xf0]  ;;  %v1145_v44 = vld [vmem:[%s1647_s4 + $0x14] sm:$0xf] }
  0x16   : > { %v1072_v45 = vld [vmem:[%s1647_s4 + $0x18] sm:$0xf0]  ;;  %v1136_v46 = vld [vmem:[%s1644_s1 + $0x8] sm:$0xff]  ;;  %v1071_v47 = vor.u32 %v1146_v43, %v1070_v42  ;;  %v1062_v49 = vld [vmem:[%s1647_s4] sm:$0xf] }
  0x17   : > { %688 = vmatpush.bf16.msra.mxu1 %v1357_v19  ;;  %737 = vmatpush.bf16.msra.mxu2 %v1360_v20  ;;  %v1075_v48 = vor.u32 %v1145_v44, %v1072_v45  ;;  %v1144_v50 = vld [vmem:[%s1647_s4 + $0x4] sm:$0xf0]  ;;  %v1143_v51 = vld [vmem:[%s1647_s4 + $0x4] sm:$0xf]  ;;  %v1064_v52 = vld [vmem:[%s1647_s4 + $0x8] sm:$0xf0] }
  0x18   : > { %456 = vmatpush.bf16.msra.mxu0 %v1139_v25  ;;  %1209 = vmatpush.bf16.msra.mxu3 %v1139_v25  ;;  %v1135_v53 = vld [vmem:[%s1644_s1] sm:$0xff]  ;;  %v1063_v54 = vor.u32 %v1144_v50, %v1062_v49  ;;  %v1067_v55 = vor.u32 %v1143_v51, %v1064_v52  ;;  %v1133_v57 = vld [vmem:[%s1458_s10 + $0x30] sm:$0xff]  ;;  %v1128_v58 = vld [vmem:[%s1458_s10 + $0x8] sm:$0xff] }
  0x19   : > { %v1127_v56 = vld [vmem:[%s1458_s10] sm:$0xff]  ;;  %v1134_v59 = vld [vmem:[%s1458_s10 + $0x38] sm:$0xff]  ;;  %v1129_v60 = vld [vmem:[%s1458_s10 + $0x10] sm:$0xff] }
  0x1a   : > { %v1130_v61 = vld [vmem:[%s1458_s10 + $0x18] sm:$0xff]  ;;  %v1131_v62 = vld [vmem:[%s1458_s10 + $0x20] sm:$0xff]  ;;  %v1132_v63 = vld [vmem:[%s1458_s10 + $0x28] sm:$0xff] }
  0x1b   : > { %689 = vmatpush.bf16.msra.mxu1 %v1378_v26  ;;  %738 = vmatpush.bf16.msra.mxu2 %v1381_v27  ;;  %v784_v0 = vld [vmem:[%s1648_s5] sm:$0x3] }
  0x1c   : > { %457 = vmatpush.bf16.msra.mxu0 %v1138_v32  ;;  %1210 = vmatpush.bf16.msra.mxu3 %v1138_v32  ;;  %v1483_v2 = vld [vmem:[%s1645_s2] ss:$0 sm:$0xff]  ;;  %v1485_v4 = vperm.slane %v784_v0, 0  ;;  %v1499_v10 = vperm.slane %v784_v0, 1 }
  0x1d   : > { %v822_v5 = vld [vmem:[%s1649_s6] sm:$0x3] }
  0x1e   : > { %v1497_v9 = vperm.slane %v822_v5, 0  ;;  %v1501_v12 = vperm.slane %v822_v5, 1 }
  0x1f   : > { %690 = vmatpush.bf16.msra.mxu1 %v1087_v33  ;;  %739 = vmatpush.bf16.msra.mxu2 %v1402_v34 }
  0x20   : > { %458 = vmatpush.bf16.msra.mxu0 %v1137_v39  ;;  %1211 = vmatpush.bf16.msra.mxu3 %v1137_v39 }
  0x23   : > { %691 = vmatpush.bf16.msra.mxu1 %v1079_v40  ;;  %740 = vmatpush.bf16.msra.mxu2 %v1083_v41 }
  0x24   : > { %459 = vmatpush.bf16.msra.mxu0 %v1136_v46  ;;  %1212 = vmatpush.bf16.msra.mxu3 %v1136_v46 }
  0x27   : > { %692 = vmatpush.bf16.msra.mxu1 %v1071_v47  ;;  %741 = vmatpush.bf16.msra.mxu2 %v1075_v48 }
  0x28   : > { %460 = vmatpush.bf16.msra.mxu0 %v1135_v53  ;;  %1213 = vmatpush.bf16.msra.mxu3 %v1135_v53 }
  0x2b   : > { %693 = vmatpush.bf16.msra.mxu1 %v1063_v54  ;;  %742 = vmatpush.bf16.msra.mxu2 %v1067_v55 }
  0x2c   : > { %1214 = vmatpush.bf16.msrb.mxu3 %v1310_v3  ;;  %461 = vmatmul.bf16.vlgmr.msra.gmra.mxu0 %v1127_v56 }
  0x2d   : > { %491 = vmatmul.bf16.vlgmr.msra.gmra.mxu3 %v1133_v57 }
  0x2e   : > { %694 = vmatmul.bf16.vlgmr.msra.gmra.mxu1 %v1127_v56  ;;  %743 = vmatmul.bf16.vlgmr.msra.gmra.mxu2 %v1127_v56 }
  0x30   : > { %1215 = vmatpush.bf16.msrb.mxu3 %v1333_v11 }
  0x34   : > { %1216 = vmatpush.bf16.msrb.mxu3 %v1357_v19 }
  0x38   : > { %1217 = vmatpush.bf16.msrb.mxu3 %v1378_v26 }
  0x3c   : > { %1218 = vmatpush.bf16.msrb.mxu3 %v1087_v33  ;;  %466 = vmatmul.bf16.gmra.mxu0 %v1128_v58 }
  0x3d   : > { %496 = vmatmul.bf16.gmra.mxu3 %v1134_v59 }
  0x3e   : > { %699 = vmatmul.bf16.gmra.mxu1 %v1128_v58  ;;  %748 = vmatmul.bf16.gmra.mxu2 %v1128_v58 }
  0x40   : > { %1219 = vmatpush.bf16.msrb.mxu3 %v1079_v40 }
  0x44   : > { %1220 = vmatpush.bf16.msrb.mxu3 %v1071_v47 }
  0x48   : > { %1221 = vmatpush.bf16.msrb.mxu3 %v1063_v54 }
  0x4c   : > { %1222 = vmatpush.bf16.msra.mxu3 %v1321_v7  ;;  %471 = vmatmul.bf16.gmra.mxu0 %v1129_v60  ;;  %v1494_v7 = vld [vmem:[%s1646_s3] ss:$0 sm:$0xff] }
  0x4d   : > { %724 = vmatmul.bf16.vlgmr.msrb.gmra.mxu3 %v1133_v57 }
  0x4e   : > { %704 = vmatmul.bf16.gmra.mxu1 %v1129_v60  ;;  %753 = vmatmul.bf16.gmra.mxu2 %v1129_v60 }
  0x50   : > { %1223 = vmatpush.bf16.msra.mxu3 %v1339_v13 }
  0x54   : > { %1224 = vmatpush.bf16.msra.mxu3 %v1360_v20 }
  0x58   : > { %1225 = vmatpush.bf16.msra.mxu3 %v1381_v27 }
  0x5c   : > { %1226 = vmatpush.bf16.msra.mxu3 %v1402_v34  ;;  %476 = vmatmul.bf16.gmra.mxu0 %v1130_v61 }
  0x5d   : > { %729 = vmatmul.bf16.gmra.mxu3 %v1134_v59 }
  0x5e   : > { %709 = vmatmul.bf16.gmra.mxu1 %v1130_v61  ;;  %758 = vmatmul.bf16.gmra.mxu2 %v1130_v61 }
  0x60   : > { %1227 = vmatpush.bf16.msra.mxu3 %v1083_v41 }
  0x64   : > { %1228 = vmatpush.bf16.msra.mxu3 %v1075_v48 }
  0x68   : > { %1229 = vmatpush.bf16.msra.mxu3 %v1067_v55 }
  0x6c   : > { %481 = vmatmul.bf16.gmra.mxu0 %v1131_v62 }
  0x6d   : > { %773 = vmatmul.bf16.vlgmr.msra.gmra.mxu3 %v1133_v57 }
  0x6e   : > { %714 = vmatmul.bf16.gmra.mxu1 %v1131_v62  ;;  %763 = vmatmul.bf16.gmra.mxu2 %v1131_v62 }
  0x7c   : > { %486 = vmatmul.bf16.gmra.mxu0 %v1132_v63 }
  0x7d   : > { %778 = vmatmul.bf16.gmra.mxu3 %v1134_v59 }
  0x7e   : > { %719 = vmatmul.bf16.gmra.mxu1 %v1132_v63  ;;  %768 = vmatmul.bf16.gmra.mxu2 %v1132_v63 }
  0xa9   : > { %v462_v1 = vpop.f32.mrf.mxu0 }
  0xaa   : > { %v506_v6 = vmul.f32 %v1483_v2, %v462_v1 }
  0xab   : > { %v695_v3 = vpop.f32.mrf.mxu1 }
  0xac   : > { %v790_v8 = vmul.f32 %v1485_v4, %v695_v3  ;;  %v526_v15 = vadd.f32 %v1494_v7, %v506_v6 }
  0xae   : > { %v828_v16 = vadd.f32 %v1497_v9, %v790_v8  ;;  %v542_v23 = vmax.f32 %v526_v15, 0.0 }
  0xb0   : > { %v492_v11 = vpop.f32.mrf.mxu3 }
  0xb1   : > { %v744_v13 = vpop.f32.mrf.mxu2  ;;  %v464_v14 = vpop.f32.mrf.mxu0  ;;  %v518_v20 = vmul.f32 %v1483_v2, %v492_v11 }
  0xb2   : > { %v791_v17 = vmul.f32 %v1499_v10, %v744_v13  ;;  %v507_v18 = vmul.f32 %v1483_v2, %v464_v14 }
  0xb3   : > { %v697_v19 = vpop.f32.mrf.mxu1  ;;  %v538_v27 = vadd.f32 %v1494_v7, %v518_v20 }
  0xb4   : > { %v829_v21 = vadd.f32 %v1501_v12, %v791_v17  ;;  %v527_v22 = vadd.f32 %v1494_v7, %v507_v18  ;;  %v792_v29 = vmul.f32 %v1485_v4, %v697_v19 }
  0xb5   : > { %v554_v36 = vmax.f32 %v538_v27, 0.0 }
  0xb6   : > { %v860_v24 = vpack.c.bf16 %v829_v21, %v828_v16  ;;  %v543_v25 = vmax.f32 %v527_v22, 0.0  ;;  %v830_v37 = vadd.f32 %v1497_v9, %v792_v29 }
  0xb8   : > { %v494_v26 = vpop.f32.mrf.mxu3  ;;  %876 = vst [vmem:[%s1514_s23] sm:$0xff] %v860_v24  ;;  %v1162_v28 = vpack.c.bf16 %v543_v25, %v542_v23 }
  0xb9   : > { %v519_v30 = vmul.f32 %v1483_v2, %v494_v26  ;;  %v746_v31 = vpop.f32.mrf.mxu2  ;;  %v467_v32 = vpop.f32.mrf.mxu0 }
  0xba   : > { %1163 = vst [vmem:[%s1521_s26] sm:$0xff] %v1162_v28   ;;  %v793_v34 = vmul.f32 %v1499_v10, %v746_v31  ;;  %v508_v42 = vmul.f32 %v1483_v2, %v467_v32 }
  0xbb   : > { %v539_v33 = vadd.f32 %v1494_v7, %v519_v30  ;;  %v700_v35 = vpop.f32.mrf.mxu1 }
  0xbc   : > { %v831_v39 = vadd.f32 %v1501_v12, %v793_v34  ;;  %v794_v43 = vmul.f32 %v1485_v4, %v700_v35  ;;  %v528_v47 = vadd.f32 %v1494_v7, %v508_v42 }
  0xbd   : > { %v555_v38 = vmax.f32 %v539_v33, 0.0 }
  0xbe   : > { %v861_v41 = vpack.c.bf16 %v831_v39, %v830_v37  ;;  %v832_v48 = vadd.f32 %v1497_v9, %v794_v43  ;;  %v544_v55 = vmax.f32 %v528_v47, 0.0 }
  0xbf   : > { %v1192_v40 = vpack.c.bf16 %v555_v38, %v554_v36 }
  0xc0   : > { %v497_v44 = vpop.f32.mrf.mxu3  ;;  %877 = vst [vmem:[%s1514_s23 + $0x8] sm:$0xff] %v861_v41 }
  0xc1   : > { %1204 = vst [vmem:[%s1521_s26 + $0x30] sm:$0xff] %v1192_v40   ;;  %v749_v45 = vpop.f32.mrf.mxu2  ;;  %v469_v46 = vpop.f32.mrf.mxu0  ;;  %v520_v52 = vmul.f32 %v1483_v2, %v497_v44 }
  0xc2   : > { %v795_v49 = vmul.f32 %v1499_v10, %v749_v45  ;;  %v509_v50 = vmul.f32 %v1483_v2, %v469_v46 }
  0xc3   : > { %v702_v51 = vpop.f32.mrf.mxu1  ;;  %v540_v59 = vadd.f32 %v1494_v7, %v520_v52 }
  0xc4   : > { %v833_v53 = vadd.f32 %v1501_v12, %v795_v49  ;;  %v529_v54 = vadd.f32 %v1494_v7, %v509_v50  ;;  %v796_v61 = vmul.f32 %v1485_v4, %v702_v51 }
  0xc5   : > { %v556_v6 = vmax.f32 %v540_v59, 0.0 }
  0xc6   : > { %v862_v56 = vpack.c.bf16 %v833_v53, %v832_v48  ;;  %v545_v57 = vmax.f32 %v529_v54, 0.0  ;;  %v834_v8 = vadd.f32 %v1497_v9, %v796_v61 }
  0xc8   : > { %v499_v58 = vpop.f32.mrf.mxu3  ;;  %878 = vst [vmem:[%s1514_s23 + $0x10] sm:$0xff] %v862_v56  ;;  %v1167_v60 = vpack.c.bf16 %v545_v57, %v544_v55 }
  0xc9   : > { %v521_v62 = vmul.f32 %v1483_v2, %v499_v58  ;;  %v751_v63 = vpop.f32.mrf.mxu2  ;;  %v472_v0 = vpop.f32.mrf.mxu0 }
  0xca   : > { %1199 = vst [vmem:[%s1521_s26 + $0x8] sm:$0xff] %v1167_v60   ;;  %v797_v3 = vmul.f32 %v1499_v10, %v751_v63  ;;  %v510_v16 = vmul.f32 %v1483_v2, %v472_v0 }
  0xcb   : > { %v541_v1 = vadd.f32 %v1494_v7, %v521_v62  ;;  %v705_v5 = vpop.f32.mrf.mxu1 }
  0xcc   : > { %v835_v13 = vadd.f32 %v1501_v12, %v797_v3  ;;  %v798_v17 = vmul.f32 %v1485_v4, %v705_v5  ;;  %v530_v21 = vadd.f32 %v1494_v7, %v510_v16 }
  0xcd   : > { %v557_v11 = vmax.f32 %v541_v1, 0.0 }
  0xce   : > { %v863_v15 = vpack.c.bf16 %v835_v13, %v834_v8  ;;  %v836_v22 = vadd.f32 %v1497_v9, %v798_v17  ;;  %v546_v28 = vmax.f32 %v530_v21, 0.0 }
  0xcf   : > { %v1197_v14 = vpack.c.bf16 %v557_v11, %v556_v6 }
  0xd0   : > { %v725_v18 = vpop.f32.mrf.mxu3  ;;  %879 = vst [vmem:[%s1514_s23 + $0x18] sm:$0xff] %v863_v15 }
  0xd1   : > { %1205 = vst [vmem:[%s1521_s26 + $0x38] sm:$0xff] %v1197_v14   ;;  %v754_v19 = vpop.f32.mrf.mxu2  ;;  %v474_v20 = vpop.f32.mrf.mxu0  ;;  %v814_v1 = vmul.f32 %v1485_v4, %v725_v18 }
  0xd2   : > { %v799_v23 = vmul.f32 %v1499_v10, %v754_v19  ;;  %v511_v24 = vmul.f32 %v1483_v2, %v474_v20 }
  0xd3   : > { %v707_v25 = vpop.f32.mrf.mxu1  ;;  %v852_v13 = vadd.f32 %v1497_v9, %v814_v1 }
  0xd4   : > { %v837_v26 = vadd.f32 %v1501_v12, %v799_v23  ;;  %v531_v27 = vadd.f32 %v1494_v7, %v511_v24  ;;  %v800_v33 = vmul.f32 %v1485_v4, %v707_v25 }
  0xd6   : > { %v864_v29 = vpack.c.bf16 %v837_v26, %v836_v22  ;;  %v547_v30 = vmax.f32 %v531_v27, 0.0  ;;  %v838_v38 = vadd.f32 %v1497_v9, %v800_v33 }
  0xd8   : > { %v727_v31 = vpop.f32.mrf.mxu3  ;;  %880 = vst [vmem:[%s1514_s23 + $0x20] sm:$0xff] %v864_v29  ;;  %v1172_v32 = vpack.c.bf16 %v547_v30, %v546_v28 }
  0xd9   : > { %v756_v34 = vpop.f32.mrf.mxu2  ;;  %v477_v35 = vpop.f32.mrf.mxu0  ;;  %v816_v25 = vmul.f32 %v1485_v4, %v727_v31 }
  0xda   : > { %1200 = vst [vmem:[%s1521_s26 + $0x10] sm:$0xff] %v1172_v32   ;;  %v801_v36 = vmul.f32 %v1499_v10, %v756_v34  ;;  %v512_v41 = vmul.f32 %v1483_v2, %v477_v35 }
  0xdb   : > { %v710_v37 = vpop.f32.mrf.mxu1 }
  0xdc   : > { %v839_v39 = vadd.f32 %v1501_v12, %v801_v36  ;;  %v802_v42 = vmul.f32 %v1485_v4, %v710_v37  ;;  %v532_v46 = vadd.f32 %v1494_v7, %v512_v41  ;;  %v854_v36 = vadd.f32 %v1497_v9, %v816_v25 }
  0xde   : > { %v865_v40 = vpack.c.bf16 %v839_v39, %v838_v38  ;;  %v840_v47 = vadd.f32 %v1497_v9, %v802_v42  ;;  %v548_v53 = vmax.f32 %v532_v46, 0.0 }
  0xe0   : > { %v1570_v43 = vpop.f32.mrf.mxu3  ;;  %881 = vst [vmem:[%s1514_s23 + $0x28] sm:$0xff] %v865_v40 }
  0xe1   : > { %v759_v44 = vpop.f32.mrf.mxu2  ;;  %v479_v45 = vpop.f32.mrf.mxu0  ;;  %v818_v42 = vmul.f32 %v1485_v4, %v1570_v43 }
  0xe2   : > { %v803_v48 = vmul.f32 %v1499_v10, %v759_v44  ;;  %v513_v49 = vmul.f32 %v1483_v2, %v479_v45 }
  0xe3   : > { %v712_v50 = vpop.f32.mrf.mxu1 }
  0xe4   : > { %v841_v51 = vadd.f32 %v1501_v12, %v803_v48  ;;  %v533_v52 = vadd.f32 %v1494_v7, %v513_v49  ;;  %v804_v58 = vmul.f32 %v1485_v4, %v712_v50  ;;  %v856_v49 = vadd.f32 %v1497_v9, %v818_v42 }
  0xe6   : > { %v866_v54 = vpack.c.bf16 %v841_v51, %v840_v47  ;;  %v549_v55 = vmax.f32 %v533_v52, 0.0  ;;  %v842_v63 = vadd.f32 %v1497_v9, %v804_v58 }
  0xe8   : > { %v1579_v56 = vpop.f32.mrf.mxu3  ;;  %882 = vst [vmem:[%s1514_s23 + $0x30] sm:$0xff] %v866_v54  ;;  %v1177_v57 = vpack.c.bf16 %v549_v55, %v548_v53 }
  0xe9   : > { %v761_v59 = vpop.f32.mrf.mxu2  ;;  %v482_v60 = vpop.f32.mrf.mxu0 }
  0xea   : > { %1201 = vst [vmem:[%s1521_s26 + $0x18] sm:$0xff] %v1177_v57   ;;  %v805_v61 = vmul.f32 %v1499_v10, %v761_v59  ;;  %v514_v3 = vmul.f32 %v1483_v2, %v482_v60 }
  0xeb   : > { %v715_v62 = vpop.f32.mrf.mxu1 }
  0xec   : > { %v843_v0 = vadd.f32 %v1501_v12, %v805_v61  ;;  %v806_v6 = vmul.f32 %v1485_v4, %v715_v62  ;;  %v534_v14 = vadd.f32 %v1494_v7, %v514_v3  ;;  %v820_v61 = vmul.f32 %v1485_v4, %v1579_v56 }
  0xee   : > { %v867_v5 = vpack.c.bf16 %v843_v0, %v842_v63  ;;  %v844_v17 = vadd.f32 %v1497_v9, %v806_v6  ;;  %v550_v26 = vmax.f32 %v534_v14, 0.0 }
  0xf0   : > { %v774_v8 = vpop.f32.mrf.mxu3  ;;  %883 = vst [vmem:[%s1514_s23 + $0x38] sm:$0xff] %v867_v5 }
  0xf1   : > { %v815_v11 = vmul.f32 %v1499_v10, %v774_v8  ;;  %v764_v15 = vpop.f32.mrf.mxu2  ;;  %v484_v16 = vpop.f32.mrf.mxu0 }
  0xf2   : > { %v807_v18 = vmul.f32 %v1499_v10, %v764_v15  ;;  %v515_v20 = vmul.f32 %v1483_v2, %v484_v16 }
  0xf3   : > { %v853_v19 = vadd.f32 %v1501_v12, %v815_v11  ;;  %v717_v21 = vpop.f32.mrf.mxu1 }
  0xf4   : > { %v845_v22 = vadd.f32 %v1501_v12, %v807_v18  ;;  %v535_v24 = vadd.f32 %v1494_v7, %v515_v20  ;;  %v808_v32 = vmul.f32 %v1485_v4, %v717_v21 }
  0xf5   : > { %v872_v23 = vpack.c.bf16 %v853_v19, %v852_v13 }
  0xf6   : > { %v868_v27 = vpack.c.bf16 %v845_v22, %v844_v17  ;;  %v551_v28 = vmax.f32 %v535_v24, 0.0  ;;  %v846_v39 = vadd.f32 %v1497_v9, %v808_v32 }
  0xf7   : > { %888 = vst [vmem:[%s1514_s23 + $0x60] sm:$0xff] %v872_v23 }
  0xf8   : > { %v776_v29 = vpop.f32.mrf.mxu3  ;;  %884 = vst [vmem:[%s1514_s23 + $0x40] sm:$0xff] %v868_v27  ;;  %v1182_v30 = vpack.c.bf16 %v551_v28, %v550_v26 }
  0xf9   : > { %v817_v33 = vmul.f32 %v1499_v10, %v776_v29  ;;  %v766_v34 = vpop.f32.mrf.mxu2  ;;  %v487_v35 = vpop.f32.mrf.mxu0 }
  0xfa   : > { %1202 = vst [vmem:[%s1521_s26 + $0x20] sm:$0xff] %v1182_v30   ;;  %v809_v31 = vmul.f32 %v1499_v10, %v766_v34  ;;  %v516_v44 = vmul.f32 %v1483_v2, %v487_v35 }
  0xfb   : > { %v855_v37 = vadd.f32 %v1501_v12, %v817_v33  ;;  %v720_v38 = vpop.f32.mrf.mxu1 }
  0xfc   : > { %v847_v40 = vadd.f32 %v1501_v12, %v809_v31  ;;  %v810_v46 = vmul.f32 %v1485_v4, %v720_v38  ;;  %v536_v50 = vadd.f32 %v1494_v7, %v516_v44 }
  0xfd   : > { %v873_v41 = vpack.c.bf16 %v855_v37, %v854_v36 }
  0xfe   : > { %v869_v45 = vpack.c.bf16 %v847_v40, %v846_v39  ;;  %v848_v43 = vadd.f32 %v1497_v9, %v810_v46  ;;  %v552_v62 = vmax.f32 %v536_v50, 0.0 }
  0xff   : > { %889 = vst [vmem:[%s1514_s23 + $0x68] sm:$0xff] %v873_v41 }
 0x100   : > { %v779_v47 = vpop.f32.mrf.mxu3  ;;  %885 = vst [vmem:[%s1514_s23 + $0x48] sm:$0xff] %v869_v45 }
 0x101   : > { %v819_v48 = vmul.f32 %v1499_v10, %v779_v47  ;;  %v769_v51 = vpop.f32.mrf.mxu2  ;;  %v489_v52 = vpop.f32.mrf.mxu0 }
 0x102   : > { %v811_v53 = vmul.f32 %v1499_v10, %v769_v51  ;;  %v517_v55 = vmul.f32 %v1483_v2, %v489_v52 }
 0x103   : > { %v857_v54 = vadd.f32 %v1501_v12, %v819_v48  ;;  %v722_v60 = vpop.f32.mrf.mxu1 }
 0x104   : > { %v849_v57 = vadd.f32 %v1501_v12, %v811_v53  ;;  %v537_v59 = vadd.f32 %v1494_v7, %v517_v55  ;;  %v812_v2 = vmul.f32 %v1485_v4, %v722_v60  ;;  %v858_v7 = vadd.f32 %v1497_v9, %v820_v61 }
 0x105   : > { %v874_v58 = vpack.c.bf16 %v857_v54, %v856_v49 }
 0x106   : > { %v870_v63 = vpack.c.bf16 %v849_v57, %v848_v43  ;;  %v553_v0 = vmax.f32 %v537_v59, 0.0  ;;  %v850_v11 = vadd.f32 %v1497_v9, %v812_v2 }
 0x107   : > { %890 = vst [vmem:[%s1514_s23 + $0x70] sm:$0xff] %v874_v58 }
 0x108   : > { %v781_v1 = vpop.f32.mrf.mxu3  ;;  %886 = vst [vmem:[%s1514_s23 + $0x50] sm:$0xff] %v870_v63  ;;  %v1187_v3 = vpack.c.bf16 %v553_v0, %v552_v62 }
 0x109   : > { %v821_v5 = vmul.f32 %v1499_v10, %v781_v1  ;;  %v771_v6 = vpop.f32.mrf.mxu2 }
 0x10a   : > { %1203 = vst [vmem:[%s1521_s26 + $0x28] sm:$0xff] %v1187_v3   ;;  %v813_v8 = vmul.f32 %v1499_v10, %v771_v6 }
 0x10b   : > { %v859_v56 = vadd.f32 %v1501_v12, %v821_v5 }
 0x10c   : > { %v851_v13 = vadd.f32 %v1501_v12, %v813_v8 }
 0x10d   : > { %v875_v14 = vpack.c.bf16 %v859_v56, %v858_v7 }
 0x10e   : > { %v871_v15 = vpack.c.bf16 %v851_v13, %v850_v11 }
 0x10f   : > { %891 = vst [vmem:[%s1514_s23 + $0x78] sm:$0xff] %v875_v14 }
 0x110   : > { %887 = vst [vmem:[%s1514_s23 + $0x58] sm:$0xff] %v871_v15 }
 0x111 PF: > { %s19_s27 = sadd.s32 1, %s1246_s27  }
 0x112   : > { %p16_p4 = scmp.ge.s32.totalorder %s19_s27, 4  }
 0x114   :  { %18 = sbr.rel (!%p16_p4) target bundleno = 1 (0x1), region = 90 }

// kernel: rgbd_encoder_forward.13
= control target key start
LH: loop header
LB: loop body
LE: loop exit
PB: predicated region body
PF: predicated region fallthrough
CT: control target
= control target key end

     0   :  { %s1827_s30 = smov 0   ;;  %s1984_s0 = inlined_call_operand.vmem [shape: bf16[256,128], index: 0, kind: input, shape index: {}]   ;;  %s1985_s1 = inlined_call_operand.vmem [shape: bf16[256,128], index: 1, kind: input, shape index: {}]   ;;  %s1986_s2 = inlined_call_operand.vmem [shape: bf16[256,128], index: 2, kind: input, shape index: {}]   ;;  %s1987_s3 = inlined_call_operand.vmem [shape: bf16[256,128], index: 3, kind: input, shape index: {}]   ;;  %s1988_s4 = inlined_call_operand.vmem [shape: bf16[256,128], index: 4, kind: input, shape index: {}]   ;;  %s1989_s5 = inlined_call_operand.vmem [shape: bf16[256,128], index: 5, kind: input, shape index: {}]   ;;  %s1990_s6 = inlined_call_operand.vmem [shape: bf16[256,128], index: 6, kind: input, shape index: {}]   ;;  %s1991_s7 = inlined_call_operand.vmem [shape: bf16[256,128], index: 7, kind: input, shape index: {}]   ;;  %s1992_s8 = inlined_call_operand.vmem [shape: bf16[256,128], index: 8, kind: input, shape index: {}]   ;;  %s1993_s9 = inlined_call_operand.vmem [shape: bf16[256,128], index: 9, kind: output, shape index: {}]  }
   0x1 LB: > { %s1336_s10 = sadd.s32 4294967295, %s1775_s30   ;;  %p1340_p0 = scmp.ge.s32.totalorder %s1775_s30, 1  ;;  %s1775_s30 = sphi %s1827_s30, %s19_s30  }
   0x2   : > { %p376_p1 = scmp.lt.s32.totalorder %s1775_s30, 3 }
   0x4   : > { %p377_p2 = pnand %p1340_p0, %p376_p1 }
   0x5   : > { %s1341_s11 = sshll.u32 (!%p377_p2), %s1336_s10, 4 }
   0x6   : > { %380 = sbr.rel (%p377_p2) target bundleno = 95 (0x5f), region = 56  ;;  %p453_p3 = scmp.lt.s32.totalorder (!%p377_p2), %s1341_s11, 31 }
   0xb   : > { %s1995_s11 = smov (!%p453_p3, %s1341_s11), 31 }
   0xc   : > { %s1835_s12 = sshll.u32 %s1995_s11, 2 }
   0xd   : > { %s1841_s15 = scalar_lea.vmem %s1984_s0, %s1835_s12  ;;  %s1847_s18 = scalar_lea.vmem %s1985_s1, %s1835_s12 }
   0xe   : > { %s1853_s21 = scalar_lea.vmem %s1986_s2, %s1835_s12  ;;  %s1859_s24 = scalar_lea.vmem %s1987_s3, %s1835_s12  ;;  %v1364_v0 = vld [vmem:[%s1841_s15] sm:$0xff]   ;;  %v1691_v19 = vld [vmem:[%s1841_s15 + $0x8] sm:$0xff]   ;;  %v1692_v61 = vld [vmem:[%s1841_s15 + $0x10] sm:$0xff]  }
   0xf   : > { %v1396_v1 = vld [vmem:[%s1847_s18] sm:$0xff]   ;;  %s1867_s27 = scalar_lea.vmem %s1988_s4, %s1835_s12  ;;  %s1873_s10 = scalar_lea.vmem %s1989_s5, %s1835_s12  ;;  %v1365_v2 = vunpack.c.l.bf16 %v1364_v0  ;;  %v1366_v3 = vunpack.c.h.bf16 %v1364_v0  ;;  %v1698_v25 = vld [vmem:[%s1847_s18 + $0x8] sm:$0xff]   ;;  %v1369_v34 = vunpack.c.l.bf16 %v1691_v19  ;;  %v1370_v35 = vunpack.c.h.bf16 %v1691_v19 }
  0x10   : > { %v1397_v4 = vunpack.c.l.bf16 %v1396_v1  ;;  %v1398_v5 = vunpack.c.h.bf16 %v1396_v1  ;;  %v1428_v6 = vld [vmem:[%s1853_s21] sm:$0xff]   ;;  %s1881_s14 = scalar_lea.vmem %s1990_s6, %s1835_s12  ;;  %s1887_s19 = scalar_lea.vmem %s1991_s7, %s1835_s12  ;;  %v1705_v30 = vld [vmem:[%s1853_s21 + $0x8] sm:$0xff]   ;;  %v1401_v38 = vunpack.c.l.bf16 %v1698_v25  ;;  %v1402_v39 = vunpack.c.h.bf16 %v1698_v25  ;;  %v1720_v25 = vld [vmem:[%s1867_s27 + $0x10] sm:$0xff]  }
  0x11   : > { %v1460_v7 = vld [vmem:[%s1859_s24] sm:$0xff]   ;;  %v1429_v8 = vunpack.c.l.bf16 %v1428_v6  ;;  %v1430_v9 = vunpack.c.h.bf16 %v1428_v6  ;;  %s1895_s23 = scalar_lea.vmem %s1992_s8, %s1835_s12  ;;  %v1712_v31 = vld [vmem:[%s1859_s24 + $0x8] sm:$0xff]   ;;  %v1433_v42 = vunpack.c.l.bf16 %v1705_v30  ;;  %v1434_v43 = vunpack.c.h.bf16 %v1705_v30  ;;  %v1699_v6 = vld [vmem:[%s1847_s18 + $0x10] sm:$0xff]   ;;  %s1922_s28 = scalar_lea.vmem %s1993_s9, %s1835_s12 }
  0x12   : > { %v1461_v10 = vunpack.c.l.bf16 %v1460_v7  ;;  %v1492_v11 = vld [vmem:[%s1867_s27] sm:$0xff]   ;;  %v576_v13 = vmax.f32 %v1365_v2, %v1397_v4  ;;  %v577_v14 = vmax.f32 %v1366_v3, %v1398_v5  ;;  %v1462_v15 = vunpack.c.h.bf16 %v1460_v7  ;;  %v1719_v40 = vld [vmem:[%s1867_s27 + $0x8] sm:$0xff]   ;;  %v1706_v7 = vld [vmem:[%s1853_s21 + $0x10] sm:$0xff]  }
  0x13   : > { %v1524_v12 = vld [vmem:[%s1873_s10] sm:$0xff]   ;;  %v1493_v16 = vunpack.c.l.bf16 %v1492_v11  ;;  %v1494_v20 = vunpack.c.h.bf16 %v1492_v11  ;;  %v1726_v41 = vld [vmem:[%s1873_s10 + $0x8] sm:$0xff]   ;;  %v1465_v44 = vunpack.c.l.bf16 %v1712_v31  ;;  %v1466_v45 = vunpack.c.h.bf16 %v1712_v31  ;;  %v1727_v30 = vld [vmem:[%s1873_s10 + $0x10] sm:$0xff]  }
  0x14   : > { %v1556_v17 = vld [vmem:[%s1881_s14] sm:$0xff]   ;;  %v1525_v21 = vunpack.c.l.bf16 %v1524_v12  ;;  %v1526_v22 = vunpack.c.h.bf16 %v1524_v12  ;;  %v656_v26 = vmax.f32 %v576_v13, %v1429_v8  ;;  %v657_v27 = vmax.f32 %v577_v14, %v1430_v9  ;;  %v1733_v50 = vld [vmem:[%s1881_s14 + $0x8] sm:$0xff]  }
  0x15   : > { %v1588_v18 = vld [vmem:[%s1887_s19] sm:$0xff]   ;;  %v1557_v23 = vunpack.c.l.bf16 %v1556_v17  ;;  %v1558_v28 = vunpack.c.h.bf16 %v1556_v17  ;;  %v578_v48 = vmax.f32 %v1369_v34, %v1401_v38  ;;  %v579_v49 = vmax.f32 %v1370_v35, %v1402_v39  ;;  %v1740_v51 = vld [vmem:[%s1887_s19 + $0x8] sm:$0xff]   ;;  %v1734_v35 = vld [vmem:[%s1881_s14 + $0x10] sm:$0xff]  }
  0x16   : > { %v1901_v24 = vld [vmem:[%s1895_s23] sm:$0xff]   ;;  %v1589_v29 = vunpack.c.l.bf16 %v1588_v18  ;;  %v1590_v32 = vunpack.c.h.bf16 %v1588_v18  ;;  %v736_v36 = vmax.f32 %v656_v26, %v1461_v10  ;;  %v737_v37 = vmax.f32 %v657_v27, %v1462_v15  ;;  %v1747_v60 = vld [vmem:[%s1895_s23 + $0x8] sm:$0xff]  }
  0x17   : > { %v1621_v33 = vunpack.c.l.bf16 %v1901_v24  ;;  %v1622_v52 = vunpack.c.h.bf16 %v1901_v24  ;;  %v1497_v53 = vunpack.c.l.bf16 %v1719_v40  ;;  %v1498_v54 = vunpack.c.h.bf16 %v1719_v40  ;;  %v1741_v40 = vld [vmem:[%s1887_s19 + $0x10] sm:$0xff]  }
  0x18   : > { %v816_v46 = vmax.f32 %v736_v36, %v1493_v16  ;;  %v817_v47 = vmax.f32 %v737_v37, %v1494_v20  ;;  %v1529_v55 = vunpack.c.l.bf16 %v1726_v41  ;;  %v658_v58 = vmax.f32 %v578_v48, %v1433_v42  ;;  %v1713_v16 = vld [vmem:[%s1859_s24 + $0x10] sm:$0xff]  }
  0x19   : > { %v659_v59 = vmax.f32 %v579_v49, %v1434_v43  ;;  %v1530_v62 = vunpack.c.h.bf16 %v1726_v41  ;;  %v1561_v63 = vunpack.c.l.bf16 %v1733_v50  ;;  %v1562_v0 = vunpack.c.h.bf16 %v1733_v50 }
  0x1a   : > { %v896_v56 = vmax.f32 %v816_v46, %v1525_v21  ;;  %v897_v57 = vmax.f32 %v817_v47, %v1526_v22  ;;  %v1593_v1 = vunpack.c.l.bf16 %v1740_v51  ;;  %v738_v4 = vmax.f32 %v658_v58, %v1465_v44  ;;  %v1693_v46 = vld [vmem:[%s1841_s15 + $0x18] sm:$0xff]  }
  0x1b   : > { %v739_v5 = vmax.f32 %v659_v59, %v1466_v45  ;;  %v1594_v8 = vunpack.c.h.bf16 %v1740_v51  ;;  %v1625_v9 = vunpack.c.l.bf16 %v1747_v60  ;;  %v1373_v10 = vunpack.c.l.bf16 %v1692_v61  ;;  %v1748_v45 = vld [vmem:[%s1895_s23 + $0x10] sm:$0xff]   ;;  %v1700_v51 = vld [vmem:[%s1847_s18 + $0x18] sm:$0xff]  }
  0x1c   : > { %v976_v2 = vmax.f32 %v896_v56, %v1557_v23  ;;  %v977_v3 = vmax.f32 %v897_v57, %v1558_v28  ;;  %v1374_v11 = vunpack.c.h.bf16 %v1692_v61  ;;  %v818_v14 = vmax.f32 %v738_v4, %v1497_v53  ;;  %v1707_v56 = vld [vmem:[%s1853_s21 + $0x18] sm:$0xff]  }
  0x1d   : > { %v819_v15 = vmax.f32 %v739_v5, %v1498_v54  ;;  %v1405_v17 = vunpack.c.l.bf16 %v1699_v6  ;;  %v1406_v18 = vunpack.c.h.bf16 %v1699_v6  ;;  %v1437_v19 = vunpack.c.l.bf16 %v1706_v7  ;;  %v1714_v61 = vld [vmem:[%s1859_s24 + $0x18] sm:$0xff]  }
  0x1e   : > { %v1056_v12 = vmax.f32 %v976_v2, %v1589_v29  ;;  %v1057_v13 = vmax.f32 %v977_v3, %v1590_v32  ;;  %v1438_v20 = vunpack.c.h.bf16 %v1706_v7  ;;  %v898_v23 = vmax.f32 %v818_v14, %v1529_v55  ;;  %v1721_v2 = vld [vmem:[%s1867_s27 + $0x18] sm:$0xff]  }
  0x1f   : > { %v899_v24 = vmax.f32 %v819_v15, %v1530_v62  ;;  %v580_v26 = vmax.f32 %v1373_v10, %v1405_v17  ;;  %v581_v27 = vmax.f32 %v1374_v11, %v1406_v18  ;;  %v1469_v28 = vunpack.c.l.bf16 %v1713_v16  ;;  %v1728_v7 = vld [vmem:[%s1873_s10 + $0x18] sm:$0xff]  }
  0x20   : > { %v1136_v21 = vmax.f32 %v1056_v12, %v1621_v33  ;;  %v1137_v22 = vmax.f32 %v1057_v13, %v1622_v52  ;;  %v1470_v29 = vunpack.c.h.bf16 %v1713_v16  ;;  %v978_v32 = vmax.f32 %v898_v23, %v1561_v63  ;;  %v1735_v12 = vld [vmem:[%s1881_s14 + $0x18] sm:$0xff]  }
  0x21   : > { %v979_v33 = vmax.f32 %v899_v24, %v1562_v0  ;;  %v1626_v34 = vunpack.c.h.bf16 %v1747_v60  ;;  %v660_v36 = vmax.f32 %v580_v26, %v1437_v19  ;;  %v661_v37 = vmax.f32 %v581_v27, %v1438_v20  ;;  %v1742_v17 = vld [vmem:[%s1887_s19 + $0x18] sm:$0xff]   ;;  %v1694_v27 = vld [vmem:[%s1841_s15 + $0x20] sm:$0xff]  }
  0x22   : > { %v1654_v31 = vpack.c.bf16 %v1137_v22, %v1136_v21  ;;  %v1501_v38 = vunpack.c.l.bf16 %v1720_v25  ;;  %v1502_v39 = vunpack.c.h.bf16 %v1720_v25  ;;  %v1058_v41 = vmax.f32 %v978_v32, %v1593_v1  ;;  %v1749_v22 = vld [vmem:[%s1895_s23 + $0x18] sm:$0xff]   ;;  %v1701_v32 = vld [vmem:[%s1847_s18 + $0x20] sm:$0xff]  }
  0x23   : > { %v1059_v42 = vmax.f32 %v979_v33, %v1594_v8  ;;  %v1533_v43 = vunpack.c.l.bf16 %v1727_v30  ;;  %v1534_v44 = vunpack.c.h.bf16 %v1727_v30  ;;  %v740_v47 = vmax.f32 %v660_v36, %v1469_v28  ;;  %v1708_v33 = vld [vmem:[%s1853_s21 + $0x20] sm:$0xff]  }
  0x24   : > { %1655 = vst [vmem:[%s1922_s28] sm:$0xff] %v1654_v31   ;;  %v741_v48 = vmax.f32 %v661_v37, %v1470_v29  ;;  %v1565_v49 = vunpack.c.l.bf16 %v1734_v35  ;;  %v1566_v50 = vunpack.c.h.bf16 %v1734_v35  ;;  %v1138_v52 = vmax.f32 %v1058_v41, %v1625_v9 }
  0x25   : > { %v1139_v53 = vmax.f32 %v1059_v42, %v1626_v34  ;;  %v1597_v54 = vunpack.c.l.bf16 %v1741_v40  ;;  %v1598_v55 = vunpack.c.h.bf16 %v1741_v40  ;;  %v820_v57 = vmax.f32 %v740_v47, %v1501_v38  ;;  %v1715_v42 = vld [vmem:[%s1859_s24 + $0x20] sm:$0xff]  }
  0x26   : > { %v821_v58 = vmax.f32 %v741_v48, %v1502_v39  ;;  %v1629_v59 = vunpack.c.l.bf16 %v1748_v45  ;;  %v1377_v60 = vunpack.c.l.bf16 %v1693_v46  ;;  %v1378_v63 = vunpack.c.h.bf16 %v1693_v46  ;;  %v1722_v47 = vld [vmem:[%s1867_s27 + $0x20] sm:$0xff]  }
  0x27   : > { %v1659_v62 = vpack.c.bf16 %v1139_v53, %v1138_v52  ;;  %v1409_v0 = vunpack.c.l.bf16 %v1700_v51  ;;  %v1410_v1 = vunpack.c.h.bf16 %v1700_v51  ;;  %v900_v3 = vmax.f32 %v820_v57, %v1533_v43  ;;  %v1729_v52 = vld [vmem:[%s1873_s10 + $0x20] sm:$0xff]  }
  0x28   : > { %v901_v4 = vmax.f32 %v821_v58, %v1534_v44  ;;  %v1441_v5 = vunpack.c.l.bf16 %v1707_v56  ;;  %v1442_v6 = vunpack.c.h.bf16 %v1707_v56  ;;  %v1473_v10 = vunpack.c.l.bf16 %v1714_v61  ;;  %v1736_v57 = vld [vmem:[%s1881_s14 + $0x20] sm:$0xff]  }
  0x29   : > { %1754 = vst [vmem:[%s1922_s28 + $0x8] sm:$0xff] %v1659_v62   ;;  %v582_v8 = vmax.f32 %v1377_v60, %v1409_v0  ;;  %v583_v9 = vmax.f32 %v1378_v63, %v1410_v1  ;;  %v1474_v11 = vunpack.c.h.bf16 %v1714_v61  ;;  %v980_v13 = vmax.f32 %v900_v3, %v1565_v49  ;;  %v1743_v62 = vld [vmem:[%s1887_s19 + $0x20] sm:$0xff]  }
  0x2a   : > { %v981_v14 = vmax.f32 %v901_v4, %v1566_v50  ;;  %v1630_v15 = vunpack.c.h.bf16 %v1748_v45  ;;  %v1505_v16 = vunpack.c.l.bf16 %v1721_v2  ;;  %v1506_v20 = vunpack.c.h.bf16 %v1721_v2  ;;  %v1750_v3 = vld [vmem:[%s1895_s23 + $0x20] sm:$0xff]   ;;  %v1695_v4 = vld [vmem:[%s1841_s15 + $0x28] sm:$0xff]  }
  0x2b   : > { %v662_v18 = vmax.f32 %v582_v8, %v1441_v5  ;;  %v663_v19 = vmax.f32 %v583_v9, %v1442_v6  ;;  %v1537_v21 = vunpack.c.l.bf16 %v1728_v7  ;;  %v1060_v23 = vmax.f32 %v980_v13, %v1597_v54  ;;  %v1702_v9 = vld [vmem:[%s1847_s18 + $0x28] sm:$0xff]  }
  0x2c   : > { %v1061_v24 = vmax.f32 %v981_v14, %v1598_v55  ;;  %v1538_v25 = vunpack.c.h.bf16 %v1728_v7  ;;  %v1569_v26 = vunpack.c.l.bf16 %v1735_v12  ;;  %v1570_v30 = vunpack.c.h.bf16 %v1735_v12  ;;  %v1709_v14 = vld [vmem:[%s1853_s21 + $0x28] sm:$0xff]  }
  0x2d   : > { %v742_v28 = vmax.f32 %v662_v18, %v1473_v10  ;;  %v743_v29 = vmax.f32 %v663_v19, %v1474_v11  ;;  %v1601_v31 = vunpack.c.l.bf16 %v1742_v17  ;;  %v1140_v34 = vmax.f32 %v1060_v23, %v1629_v59  ;;  %v1716_v19 = vld [vmem:[%s1859_s24 + $0x28] sm:$0xff]  }
  0x2e   : > { %v1141_v35 = vmax.f32 %v1061_v24, %v1630_v15  ;;  %v1602_v36 = vunpack.c.h.bf16 %v1742_v17  ;;  %v1633_v37 = vunpack.c.l.bf16 %v1749_v22  ;;  %v1381_v40 = vunpack.c.l.bf16 %v1694_v27  ;;  %v1723_v24 = vld [vmem:[%s1867_s27 + $0x28] sm:$0xff]  }
  0x2f   : > { %v822_v38 = vmax.f32 %v742_v28, %v1505_v16  ;;  %v823_v39 = vmax.f32 %v743_v29, %v1506_v20  ;;  %v1382_v41 = vunpack.c.h.bf16 %v1694_v27  ;;  %v1413_v44 = vunpack.c.l.bf16 %v1701_v32 }
  0x30   : > { %v1664_v43 = vpack.c.bf16 %v1141_v35, %v1140_v34  ;;  %v1414_v45 = vunpack.c.h.bf16 %v1701_v32  ;;  %v1445_v46 = vunpack.c.l.bf16 %v1708_v33  ;;  %v1634_v50 = vunpack.c.h.bf16 %v1749_v22  ;;  %v1737_v34 = vld [vmem:[%s1881_s14 + $0x28] sm:$0xff]  }
  0x31   : > { %v902_v48 = vmax.f32 %v822_v38, %v1537_v21  ;;  %v903_v49 = vmax.f32 %v823_v39, %v1538_v25  ;;  %v1446_v51 = vunpack.c.h.bf16 %v1708_v33  ;;  %v584_v53 = vmax.f32 %v1381_v40, %v1413_v44  ;;  %v1730_v33 = vld [vmem:[%s1873_s10 + $0x28] sm:$0xff]  }
  0x32   : > { %1755 = vst [vmem:[%s1922_s28 + $0x10] sm:$0xff] %v1664_v43   ;;  %v585_v54 = vmax.f32 %v1382_v41, %v1414_v45  ;;  %v1477_v55 = vunpack.c.l.bf16 %v1715_v42  ;;  %v1478_v56 = vunpack.c.h.bf16 %v1715_v42  ;;  %v1509_v60 = vunpack.c.l.bf16 %v1722_v47  ;;  %v1744_v43 = vld [vmem:[%s1887_s19 + $0x28] sm:$0xff]  }
  0x33   : > { %v982_v58 = vmax.f32 %v902_v48, %v1569_v26  ;;  %v983_v59 = vmax.f32 %v903_v49, %v1570_v30  ;;  %v1510_v61 = vunpack.c.h.bf16 %v1722_v47  ;;  %v664_v63 = vmax.f32 %v584_v53, %v1445_v46  ;;  %v1751_v44 = vld [vmem:[%s1895_s23 + $0x28] sm:$0xff]   ;;  %v1696_v49 = vld [vmem:[%s1841_s15 + $0x30] sm:$0xff]  }
  0x34   : > { %v665_v0 = vmax.f32 %v585_v54, %v1446_v51  ;;  %v1541_v1 = vunpack.c.l.bf16 %v1729_v52  ;;  %v1542_v2 = vunpack.c.h.bf16 %v1729_v52  ;;  %v1573_v7 = vunpack.c.l.bf16 %v1736_v57  ;;  %v1703_v54 = vld [vmem:[%s1847_s18 + $0x30] sm:$0xff]  }
  0x35   : > { %v1062_v5 = vmax.f32 %v982_v58, %v1601_v31  ;;  %v1063_v6 = vmax.f32 %v983_v59, %v1602_v36  ;;  %v1574_v8 = vunpack.c.h.bf16 %v1736_v57  ;;  %v744_v10 = vmax.f32 %v664_v63, %v1477_v55  ;;  %v1710_v59 = vld [vmem:[%s1853_s21 + $0x30] sm:$0xff]  }
  0x36   : > { %v745_v11 = vmax.f32 %v665_v0, %v1478_v56  ;;  %v1605_v12 = vunpack.c.l.bf16 %v1743_v62  ;;  %v1606_v13 = vunpack.c.h.bf16 %v1743_v62  ;;  %v1637_v17 = vunpack.c.l.bf16 %v1750_v3  ;;  %v1717_v0 = vld [vmem:[%s1859_s24 + $0x30] sm:$0xff]  }
  0x37   : > { %v1142_v15 = vmax.f32 %v1062_v5, %v1633_v37  ;;  %v1143_v16 = vmax.f32 %v1063_v6, %v1634_v50  ;;  %v1385_v18 = vunpack.c.l.bf16 %v1695_v4  ;;  %v824_v20 = vmax.f32 %v744_v10, %v1509_v60  ;;  %v1724_v5 = vld [vmem:[%s1867_s27 + $0x30] sm:$0xff]  }
  0x38   : > { %v825_v21 = vmax.f32 %v745_v11, %v1510_v61  ;;  %v1386_v22 = vunpack.c.h.bf16 %v1695_v4  ;;  %v1417_v23 = vunpack.c.l.bf16 %v1702_v9  ;;  %v1418_v26 = vunpack.c.h.bf16 %v1702_v9 }
  0x39   : > { %v1669_v25 = vpack.c.bf16 %v1143_v16, %v1142_v15  ;;  %v1449_v27 = vunpack.c.l.bf16 %v1709_v14  ;;  %v1450_v28 = vunpack.c.h.bf16 %v1709_v14  ;;  %v904_v29 = vmax.f32 %v824_v20, %v1541_v1  ;;  %v1731_v14 = vld [vmem:[%s1873_s10 + $0x30] sm:$0xff]  }
  0x3a   : > { %v905_v30 = vmax.f32 %v825_v21, %v1542_v2  ;;  %v586_v31 = vmax.f32 %v1385_v18, %v1417_v23  ;;  %v1481_v32 = vunpack.c.l.bf16 %v1716_v19  ;;  %v1638_v35 = vunpack.c.h.bf16 %v1750_v3 }
  0x3b   : > { %1756 = vst [vmem:[%s1922_s28 + $0x18] sm:$0xff] %v1669_v25   ;;  %v587_v36 = vmax.f32 %v1386_v22, %v1418_v26  ;;  %v1482_v37 = vunpack.c.h.bf16 %v1716_v19  ;;  %v1513_v38 = vunpack.c.l.bf16 %v1723_v24  ;;  %v984_v39 = vmax.f32 %v904_v29, %v1573_v7  ;;  %v1738_v19 = vld [vmem:[%s1881_s14 + $0x30] sm:$0xff]  }
  0x3c   : > { %v985_v40 = vmax.f32 %v905_v30, %v1574_v8  ;;  %v666_v41 = vmax.f32 %v586_v31, %v1449_v27  ;;  %v1514_v42 = vunpack.c.h.bf16 %v1723_v24  ;;  %v1545_v46 = vunpack.c.l.bf16 %v1730_v33  ;;  %v1745_v24 = vld [vmem:[%s1887_s19 + $0x30] sm:$0xff]  }
  0x3d   : > { %v667_v45 = vmax.f32 %v587_v36, %v1450_v28  ;;  %v1546_v47 = vunpack.c.h.bf16 %v1730_v33  ;;  %v1577_v48 = vunpack.c.l.bf16 %v1737_v34  ;;  %v1064_v50 = vmax.f32 %v984_v39, %v1605_v12  ;;  %v1697_v28 = vld [vmem:[%s1841_s15 + $0x38] sm:$0xff]  }
  0x3e   : > { %v1065_v51 = vmax.f32 %v985_v40, %v1606_v13  ;;  %v746_v52 = vmax.f32 %v666_v41, %v1481_v32  ;;  %v1578_v53 = vunpack.c.h.bf16 %v1737_v34  ;;  %v1609_v56 = vunpack.c.l.bf16 %v1744_v43  ;;  %v1704_v33 = vld [vmem:[%s1847_s18 + $0x38] sm:$0xff]  }
  0x3f   : > { %v747_v55 = vmax.f32 %v667_v45, %v1482_v37  ;;  %v1610_v57 = vunpack.c.h.bf16 %v1744_v43  ;;  %v1641_v58 = vunpack.c.l.bf16 %v1751_v44  ;;  %v1144_v60 = vmax.f32 %v1064_v50, %v1637_v17  ;;  %v1711_v34 = vld [vmem:[%s1853_s21 + $0x38] sm:$0xff]  }
  0x40   : > { %v1145_v61 = vmax.f32 %v1065_v51, %v1638_v35  ;;  %v826_v62 = vmax.f32 %v746_v52, %v1513_v38  ;;  %v1389_v63 = vunpack.c.l.bf16 %v1696_v49  ;;  %v1390_v2 = vunpack.c.h.bf16 %v1696_v49  ;;  %v1718_v43 = vld [vmem:[%s1859_s24 + $0x38] sm:$0xff]  }
  0x41   : > { %v827_v1 = vmax.f32 %v747_v55, %v1514_v42  ;;  %v1421_v3 = vunpack.c.l.bf16 %v1703_v54  ;;  %v1422_v4 = vunpack.c.h.bf16 %v1703_v54  ;;  %v1453_v8 = vunpack.c.l.bf16 %v1710_v59 }
  0x42   : > { %v1674_v6 = vpack.c.bf16 %v1145_v61, %v1144_v60  ;;  %v906_v7 = vmax.f32 %v826_v62, %v1545_v46  ;;  %v1454_v9 = vunpack.c.h.bf16 %v1710_v59  ;;  %v1485_v13 = vunpack.c.l.bf16 %v1717_v0  ;;  %v1732_v62 = vld [vmem:[%s1873_s10 + $0x38] sm:$0xff]  }
  0x43   : > { %v907_v10 = vmax.f32 %v827_v1, %v1546_v47  ;;  %v588_v11 = vmax.f32 %v1389_v63, %v1421_v3  ;;  %v589_v12 = vmax.f32 %v1390_v2, %v1422_v4  ;;  %v1642_v16 = vunpack.c.h.bf16 %v1751_v44  ;;  %v1752_v44 = vld [vmem:[%s1895_s23 + $0x30] sm:$0xff]  }
  0x44   : > { %1757 = vst [vmem:[%s1922_s28 + $0x20] sm:$0xff] %v1674_v6   ;;  %v986_v15 = vmax.f32 %v906_v7, %v1577_v48  ;;  %v1486_v17 = vunpack.c.h.bf16 %v1717_v0  ;;  %v1517_v18 = vunpack.c.l.bf16 %v1724_v5  ;;  %v1518_v23 = vunpack.c.h.bf16 %v1724_v5  ;;  %v1739_v5 = vld [vmem:[%s1881_s14 + $0x38] sm:$0xff]  }
  0x45   : > { %v987_v20 = vmax.f32 %v907_v10, %v1578_v53  ;;  %v668_v21 = vmax.f32 %v588_v11, %v1453_v8  ;;  %v669_v22 = vmax.f32 %v589_v12, %v1454_v9  ;;  %v1549_v26 = vunpack.c.l.bf16 %v1731_v14  ;;  %v1725_v53 = vld [vmem:[%s1867_s27 + $0x38] sm:$0xff]  }
  0x46   : > { %v1066_v25 = vmax.f32 %v986_v15, %v1609_v56  ;;  %v1550_v27 = vunpack.c.h.bf16 %v1731_v14  ;;  %v1581_v32 = vunpack.c.l.bf16 %v1738_v19  ;;  %v1582_v36 = vunpack.c.h.bf16 %v1738_v19  ;;  %v1746_v12 = vld [vmem:[%s1887_s19 + $0x38] sm:$0xff]  }
  0x47   : > { %v1067_v29 = vmax.f32 %v987_v20, %v1610_v57  ;;  %v748_v30 = vmax.f32 %v668_v21, %v1485_v13  ;;  %v749_v31 = vmax.f32 %v669_v22, %v1486_v17  ;;  %v1613_v37 = vunpack.c.l.bf16 %v1745_v24 }
  0x48   : > { %v1146_v35 = vmax.f32 %v1066_v25, %v1641_v58  ;;  %v1614_v38 = vunpack.c.h.bf16 %v1745_v24  ;;  %v1393_v42 = vunpack.c.l.bf16 %v1697_v28  ;;  %v1394_v45 = vunpack.c.h.bf16 %v1697_v28 }
  0x49   : > { %v1147_v39 = vmax.f32 %v1067_v29, %v1642_v16  ;;  %v828_v40 = vmax.f32 %v748_v30, %v1517_v18  ;;  %v829_v41 = vmax.f32 %v749_v31, %v1518_v23  ;;  %v1425_v46 = vunpack.c.l.bf16 %v1704_v33  ;;  %v1753_v18 = vld [vmem:[%s1895_s23 + $0x38] sm:$0xff]  }
  0x4a   : > { %v1426_v47 = vunpack.c.h.bf16 %v1704_v33  ;;  %v1457_v48 = vunpack.c.l.bf16 %v1711_v34  ;;  %v1458_v52 = vunpack.c.h.bf16 %v1711_v34  ;;  %v1489_v56 = vunpack.c.l.bf16 %v1718_v43 }
  0x4b   : > { %v1679_v49 = vpack.c.bf16 %v1147_v39, %v1146_v35  ;;  %v908_v50 = vmax.f32 %v828_v40, %v1549_v26  ;;  %v909_v51 = vmax.f32 %v829_v41, %v1550_v27  ;;  %v590_v54 = vmax.f32 %v1393_v42, %v1425_v46 }
  0x4c   : > { %v591_v55 = vmax.f32 %v1394_v45, %v1426_v47  ;;  %v1490_v57 = vunpack.c.h.bf16 %v1718_v43  ;;  %v1645_v60 = vunpack.c.l.bf16 %v1752_v44  ;;  %v1646_v61 = vunpack.c.h.bf16 %v1752_v44 }
  0x4d   : > { %1758 = vst [vmem:[%s1922_s28 + $0x28] sm:$0xff] %v1679_v49   ;;  %v988_v58 = vmax.f32 %v908_v50, %v1581_v32  ;;  %v989_v59 = vmax.f32 %v909_v51, %v1582_v36  ;;  %v670_v63 = vmax.f32 %v590_v54, %v1457_v48  ;;  %v1521_v1 = vunpack.c.l.bf16 %v1725_v53 }
  0x4e   : > { %v671_v0 = vmax.f32 %v591_v55, %v1458_v52  ;;  %v1522_v2 = vunpack.c.h.bf16 %v1725_v53  ;;  %v1553_v8 = vunpack.c.l.bf16 %v1732_v62  ;;  %v1554_v9 = vunpack.c.h.bf16 %v1732_v62 }
  0x4f   : > { %v1068_v3 = vmax.f32 %v988_v58, %v1613_v37  ;;  %v1069_v4 = vmax.f32 %v989_v59, %v1614_v38  ;;  %v750_v6 = vmax.f32 %v670_v63, %v1489_v56  ;;  %v1585_v15 = vunpack.c.l.bf16 %v1739_v5 }
  0x50   : > { %v751_v7 = vmax.f32 %v671_v0, %v1490_v57  ;;  %v1586_v16 = vunpack.c.h.bf16 %v1739_v5  ;;  %v1617_v21 = vunpack.c.l.bf16 %v1746_v12  ;;  %v1618_v22 = vunpack.c.h.bf16 %v1746_v12 }
  0x51   : > { %v1148_v10 = vmax.f32 %v1068_v3, %v1645_v60  ;;  %v1149_v11 = vmax.f32 %v1069_v4, %v1646_v61  ;;  %v830_v13 = vmax.f32 %v750_v6, %v1521_v1  ;;  %v1649_v25 = vunpack.c.l.bf16 %v1753_v18 }
  0x52   : > { %v831_v14 = vmax.f32 %v751_v7, %v1522_v2  ;;  %v1650_v26 = vunpack.c.h.bf16 %v1753_v18 }
  0x53   : > { %v1684_v17 = vpack.c.bf16 %v1149_v11, %v1148_v10  ;;  %v910_v19 = vmax.f32 %v830_v13, %v1553_v8 }
  0x54   : > { %v911_v20 = vmax.f32 %v831_v14, %v1554_v9 }
  0x55   : > { %1759 = vst [vmem:[%s1922_s28 + $0x30] sm:$0xff] %v1684_v17   ;;  %v990_v23 = vmax.f32 %v910_v19, %v1585_v15 }
  0x56   : > { %v991_v24 = vmax.f32 %v911_v20, %v1586_v16 }
  0x57   : > { %v1070_v27 = vmax.f32 %v990_v23, %v1617_v21 }
  0x58   : > { %v1071_v28 = vmax.f32 %v991_v24, %v1618_v22 }
  0x59   : > { %v1150_v29 = vmax.f32 %v1070_v27, %v1649_v25 }
  0x5a   : > { %v1151_v30 = vmax.f32 %v1071_v28, %v1650_v26 }
  0x5c   : > { %v1689_v31 = vpack.c.bf16 %v1151_v30, %v1150_v29 }
  0x5e   : > { %1760 = vst [vmem:[%s1922_s28 + $0x38] sm:$0xff] %v1689_v31  }
  0x5f PF: > { %s19_s30 = sadd.s32 1, %s1775_s30  }
  0x60   : > { %p16_p4 = scmp.ge.s32.totalorder %s19_s30, 4  }
  0x62   :  { %18 = sbr.rel (!%p16_p4) target bundleno = 1 (0x1), region = 110 }

// kernel: rgbd_encoder_forward.18
= control target key start
LH: loop header
LB: loop body
LE: loop exit
PB: predicated region body
PF: predicated region fallthrough
CT: control target
= control target key end

     0   :  { %s1162_s15 = smov 0   ;;  %s1164_s16 = smov 0   ;;  %s1398_s0 = inlined_call_operand.vmem [shape: bf16[64,256], index: 0, kind: input, shape index: {}]   ;;  %s1399_s1 = inlined_call_operand.vmem [shape: bf16[256,512], index: 1, kind: input, shape index: {}]   ;;  %s1400_s2 = inlined_call_operand.vmem [shape: f32[1,512], index: 2, kind: input, shape index: {}]   ;;  %s1401_s3 = inlined_call_operand.vmem [shape: f32[1,512], index: 3, kind: input, shape index: {}]   ;;  %s1402_s4 = inlined_call_operand.vmem [shape: bf16[64,512], index: 4, kind: output, shape index: {}]  }
   0x1   :  { %s1166_s17 = smov 0   ;;  %s1168_s18 = smov 0  }
   0x2   :  { %s1170_s19 = smov 0  }
   0x3 LB: > { %s23_s20 = sadd.s32 1, %s1131_s18  ;;  %s882_s21 = sadd.s32 4294967295, %s1135_s19   ;;  %s1135_s19 = sphi %s1170_s19, %s14_s19   ;;  %s1131_s18 = sphi %s1168_s18, %s1407_s18   ;;  %s1127_s17 = sphi %s1166_s17, %s1406_s17   ;;  %s1123_s16 = sphi %s1164_s16, %s1405_s16   ;;  %s1119_s15 = sphi %s1162_s15, %s1404_s15  }
   0x4   : > { %p24_p0 = scmp.ge.s32.totalorder %s23_s20, 4  ;;  %p66_p1 = scmp.ne.s32.totalorder %s1123_s16, %s1119_s15 }
   0x5   : > { %p67_p2 = scmp.eq.s32.totalorder %s1135_s19, 0  ;;  %p150_p4 = scmp.eq.s32.totalorder %s882_s21, 3 }
   0x6   : > { %s1409_s20 = smov (%p24_p0, %s23_s20), 0  ;;  %s59_s23 = sadd.s32 1, %s1123_s16 }
   0x7   : > { %p68_p3 = por %p67_p2, %p66_p1  ;;  %s56_s22 = ssub.s32 %s1131_s18, %s1409_s20 }
   0x8   : > { %p57_p5 = scmp.eq.s32.totalorder %s56_s22, 0  ;;  %p1197_p6 = por %p150_p4, %p66_p1 }
   0x9   : > { %p886_p7 = scmp.ge.s32.totalorder %s1135_s19, 4 }
   0xa   : > { %s1202_s25 = scalar_select %p57_p5, %s1123_s16, %s59_s23  }
   0xb   : > { %182 = sbr.rel (%p886_p7) target bundleno = 52 (0x34), region = 20 }
  0x10   : > { %185 = sbr.rel (!%p68_p3) target bundleno = 52 (0x34), region = 24  ;;  %s187_s26 = sand.u32 (%p68_p3), 1, %s1123_s16  }
  0x11   : > { %s888_s27 = sshll.u32 (%p68_p3), %s1131_s18, 2  ;;  %s887_s28 = sshll.u32 (%p68_p3), %s187_s26, 7 }
  0x12   : > { %s1210_s5 = scalar_lea.vmem (%p68_p3), %s1399_s1, %s888_s27  ;;  %s1214_s6 = scalar_lea.vmem (%p68_p3), [#allocation2], %s887_s28 }
  0x13   : > { %v208_v0 = vld [vmem:[%s1210_s5] sm:$0xf] (%p68_p3)  ;;  %v210_v1 = vld [vmem:[%s1210_s5 + $0x10] sm:$0xf] (%p68_p3) }
  0x14   : > { %209 = vst [vmem:[%s1214_s6] sm:$0xf] (%p68_p3), %v208_v0  ;;  %v212_v2 = vld [vmem:[%s1210_s5 + $0x20] sm:$0xf] (%p68_p3)  ;;  %v214_v3 = vld [vmem:[%s1210_s5 + $0x30] sm:$0xf] (%p68_p3) }
  0x15   : > { %211 = vst [vmem:[%s1214_s6 + $0x4] sm:$0xf] %v210_v1  ;;  %v216_v4 = vld [vmem:[%s1210_s5 + $0x40] sm:$0xf]  ;;  %v218_v5 = vld [vmem:[%s1210_s5 + $0x50] sm:$0xf] }
  0x16   : > { %213 = vst [vmem:[%s1214_s6 + $0x8] sm:$0xf] %v212_v2  ;;  %v220_v6 = vld [vmem:[%s1210_s5 + $0x60] sm:$0xf]  ;;  %v222_v7 = vld [vmem:[%s1210_s5 + $0x70] sm:$0xf] }
  0x17   : > { %215 = vst [vmem:[%s1214_s6 + $0xc] sm:$0xf] %v214_v3  ;;  %v224_v8 = vld [vmem:[%s1210_s5 + $0x80] sm:$0xf]  ;;  %v226_v9 = vld [vmem:[%s1210_s5 + $0x90] sm:$0xf] }
  0x18   : > { %217 = vst [vmem:[%s1214_s6 + $0x10] sm:$0xf] %v216_v4  ;;  %v228_v10 = vld [vmem:[%s1210_s5 + $0xa0] sm:$0xf]  ;;  %v230_v11 = vld [vmem:[%s1210_s5 + $0xb0] sm:$0xf] }
  0x19   : > { %219 = vst [vmem:[%s1214_s6 + $0x14] sm:$0xf] %v218_v5  ;;  %v232_v12 = vld [vmem:[%s1210_s5 + $0xc0] sm:$0xf]  ;;  %v234_v13 = vld [vmem:[%s1210_s5 + $0xd0] sm:$0xf] }
  0x1a   : > { %221 = vst [vmem:[%s1214_s6 + $0x18] sm:$0xf] %v220_v6  ;;  %v236_v14 = vld [vmem:[%s1210_s5 + $0xe0] sm:$0xf]  ;;  %v238_v15 = vld [vmem:[%s1210_s5 + $0xf0] sm:$0xf] }
  0x1b   : > { %223 = vst [vmem:[%s1214_s6 + $0x1c] sm:$0xf] %v222_v7  ;;  %v240_v16 = vld [vmem:[%s1210_s5 + $0x100] sm:$0xf]  ;;  %v242_v17 = vld [vmem:[%s1210_s5 + $0x110] sm:$0xf] }
  0x1c   : > { %225 = vst [vmem:[%s1214_s6 + $0x20] sm:$0xf] %v224_v8  ;;  %v244_v18 = vld [vmem:[%s1210_s5 + $0x120] sm:$0xf]  ;;  %v246_v19 = vld [vmem:[%s1210_s5 + $0x130] sm:$0xf] }
  0x1d   : > { %227 = vst [vmem:[%s1214_s6 + $0x24] sm:$0xf] %v226_v9  ;;  %v248_v20 = vld [vmem:[%s1210_s5 + $0x140] sm:$0xf]  ;;  %v250_v21 = vld [vmem:[%s1210_s5 + $0x150] sm:$0xf] }
  0x1e   : > { %229 = vst [vmem:[%s1214_s6 + $0x28] sm:$0xf] %v228_v10  ;;  %v252_v22 = vld [vmem:[%s1210_s5 + $0x160] sm:$0xf]  ;;  %v254_v23 = vld [vmem:[%s1210_s5 + $0x170] sm:$0xf] }
  0x1f   : > { %231 = vst [vmem:[%s1214_s6 + $0x2c] sm:$0xf] %v230_v11  ;;  %v256_v24 = vld [vmem:[%s1210_s5 + $0x180] sm:$0xf]  ;;  %v258_v25 = vld [vmem:[%s1210_s5 + $0x190] sm:$0xf] }
  0x20   : > { %233 = vst [vmem:[%s1214_s6 + $0x30] sm:$0xf] %v232_v12  ;;  %v260_v26 = vld [vmem:[%s1210_s5 + $0x1a0] sm:$0xf]  ;;  %v262_v27 = vld [vmem:[%s1210_s5 + $0x1b0] sm:$0xf] }
  0x21   : > { %235 = vst [vmem:[%s1214_s6 + $0x34] sm:$0xf] %v234_v13  ;;  %v264_v28 = vld [vmem:[%s1210_s5 + $0x1c0] sm:$0xf]  ;;  %v266_v29 = vld [vmem:[%s1210_s5 + $0x1d0] sm:$0xf] }
  0x22   : > { %237 = vst [vmem:[%s1214_s6 + $0x38] sm:$0xf] %v236_v14  ;;  %v268_v30 = vld [vmem:[%s1210_s5 + $0x1e0] sm:$0xf]  ;;  %v270_v31 = vld [vmem:[%s1210_s5 + $0x1f0] sm:$0xf] }
  0x23   : > { %239 = vst [vmem:[%s1214_s6 + $0x3c] sm:$0xf] %v238_v15 }
  0x24   : > { %241 = vst [vmem:[%s1214_s6 + $0x40] sm:$0xf] %v240_v16 }
  0x25   : > { %243 = vst [vmem:[%s1214_s6 + $0x44] sm:$0xf] %v242_v17 }
  0x26   : > { %245 = vst [vmem:[%s1214_s6 + $0x48] sm:$0xf] %v244_v18 }
  0x27   : > { %247 = vst [vmem:[%s1214_s6 + $0x4c] sm:$0xf] %v246_v19 }
  0x28   : > { %249 = vst [vmem:[%s1214_s6 + $0x50] sm:$0xf] %v248_v20 }
  0x29   : > { %251 = vst [vmem:[%s1214_s6 + $0x54] sm:$0xf] %v250_v21 }
  0x2a   : > { %253 = vst [vmem:[%s1214_s6 + $0x58] sm:$0xf] %v252_v22 }
  0x2b   : > { %255 = vst [vmem:[%s1214_s6 + $0x5c] sm:$0xf] %v254_v23 }
  0x2c   : > { %257 = vst [vmem:[%s1214_s6 + $0x60] sm:$0xf] %v256_v24 }
  0x2d   : > { %259 = vst [vmem:[%s1214_s6 + $0x64] sm:$0xf] %v258_v25 }
  0x2e   : > { %261 = vst [vmem:[%s1214_s6 + $0x68] sm:$0xf] %v260_v26 }
  0x2f   : > { %263 = vst [vmem:[%s1214_s6 + $0x6c] sm:$0xf] %v262_v27 }
  0x30   : > { %265 = vst [vmem:[%s1214_s6 + $0x70] sm:$0xf] %v264_v28 }
  0x31   : > { %267 = vst [vmem:[%s1214_s6 + $0x74] sm:$0xf] %v266_v29 }
  0x32   : > { %269 = vst [vmem:[%s1214_s6 + $0x78] sm:$0xf] %v268_v30 }
  0x33   : > { %271 = vst [vmem:[%s1214_s6 + $0x7c] sm:$0xf] %v270_v31 }
  0x34 PF: > { %p889_p8 = scmp.ge.s32.totalorder %s1135_s19, 1  ;;  %p370_p9 = scmp.lt.s32.totalorder %s1135_s19, 5 }
  0x36   : > { %p371_p10 = pnand %p889_p8, %p370_p9 }
  0x37   : > { %s377_s7 = sand.u32 (!%p371_p10), 1, %s1119_s15   ;;  %p420_p11 = scmp.lt.s32.totalorder (!%p371_p10), %s1127_s17, 3 }
  0x38   : > { %374 = sbr.rel (%p371_p10) target bundleno = 268 (0x10c), region = 73  ;;  %s890_s8 = sshll.u32 (!%p371_p10), %s377_s7, 7 }
  0x39   : > { %s1283_s9 = scalar_lea.vmem (!%p371_p10), [#allocation2], %s890_s8  ;;  %s891_s23 = sshll.u32 (!%p371_p10), %s377_s7, 5 }
  0x3d   : > { %v1007_v32 = vld [vmem:[%s1283_s9 + $0x38] sm:$0xff]  ;;  %v1006_v34 = vld [vmem:[%s1283_s9 + $0x30] sm:$0xff]  ;;  %v1005_v36 = vld [vmem:[%s1283_s9 + $0x28] sm:$0xff]  ;;  %s989_s15 = sshll.u32 (%p1197_p6), %s1127_s17, 2 }
  0x3e   : > { %v1015_v33 = vld [vmem:[%s1283_s9 + $0x78] sm:$0xff]  ;;  %603 = vmatpush.bf16.msra.mxu0 %v1007_v32  ;;  %1039 = vmatpush.bf16.msra.mxu2 %v1007_v32  ;;  %v1014_v35 = vld [vmem:[%s1283_s9 + $0x70] sm:$0xff]  ;;  %v1013_v37 = vld [vmem:[%s1283_s9 + $0x68] sm:$0xff]  ;;  %s712_s26 = scalar_lea.vmem (%p1197_p6), %s1402_s4, %s989_s15 }
  0x3f   : > { %632 = vmatpush.bf16.msra.mxu1 %v1015_v33  ;;  %1047 = vmatpush.bf16.msra.mxu3 %v1015_v33  ;;  %v1004_v38 = vld [vmem:[%s1283_s9 + $0x20] sm:$0xff]  ;;  %v1003_v40 = vld [vmem:[%s1283_s9 + $0x18] sm:$0xff]  ;;  %v1002_v42 = vld [vmem:[%s1283_s9 + $0x10] sm:$0xff] }
  0x40   : > { %v1012_v39 = vld [vmem:[%s1283_s9 + $0x60] sm:$0xff]  ;;  %v1011_v41 = vld [vmem:[%s1283_s9 + $0x58] sm:$0xff]  ;;  %v1010_v43 = vld [vmem:[%s1283_s9 + $0x50] sm:$0xff] }
  0x41   : > { %v1001_v44 = vld [vmem:[%s1283_s9 + $0x8] sm:$0xff]  ;;  %v894_v46 = vld [vmem:[%s1398_s0] sm:$0xf]  ;;  %v992_v52 = vld [vmem:[%s1398_s0 + $0x4] sm:$0xf] }
  0x42   : > { %604 = vmatpush.bf16.msra.mxu0 %v1006_v34  ;;  %1040 = vmatpush.bf16.msra.mxu2 %v1006_v34  ;;  %v1009_v45 = vld [vmem:[%s1283_s9 + $0x48] sm:$0xff]  ;;  %v1000_v47 = vld [vmem:[%s1283_s9] sm:$0xff]  ;;  %v902_v60 = vld [vmem:[%s1398_s0 + $0x10] sm:$0xf] }
  0x43   : > { %633 = vmatpush.bf16.msra.mxu1 %v1014_v35  ;;  %1048 = vmatpush.bf16.msra.mxu3 %v1014_v35  ;;  %v1008_v48 = vld [vmem:[%s1283_s9 + $0x40] sm:$0xff]  ;;  %v993_v49 = vld [vmem:[%s1398_s0 + $0x4] sm:$0xf0]  ;;  %v896_v53 = vld [vmem:[%s1398_s0 + $0x8] sm:$0xf0]  ;;  %s1327_s9 = scalar_select %p420_p11, %s1127_s17, 3 }
  0x44   : > { %v910_v50 = vld [vmem:[%s1398_s0 + $0x20] sm:$0xf]  ;;  %v997_v51 = vld [vmem:[%s1398_s0 + $0x24] sm:$0xf0]  ;;  %v996_v54 = vld [vmem:[%s1398_s0 + $0x24] sm:$0xf]  ;;  %v895_v56 = vor.u32 %v993_v49, %v894_v46  ;;  %v899_v58 = vor.u32 %v992_v52, %v896_v53 }
  0x45   : > { %v912_v55 = vld [vmem:[%s1398_s0 + $0x28] sm:$0xf0]  ;;  %v911_v57 = vor.u32 %v997_v51, %v910_v50  ;;  %s422_s12 = scalar_lea.vmem %s1400_s2, %s1327_s9  ;;  %s425_s21 = scalar_lea.vmem %s1401_s3, %s1327_s9  ;;  %v995_v61 = vld [vmem:[%s1398_s0 + $0x14] sm:$0xf0]  ;;  %v918_v62 = vld [vmem:[%s1398_s0 + $0x30] sm:$0xf] }
  0x46   : > { %605 = vmatpush.bf16.msra.mxu0 %v1005_v36  ;;  %1041 = vmatpush.bf16.msra.mxu2 %v1005_v36  ;;  %v915_v59 = vor.u32 %v996_v54, %v912_v55  ;;  %v999_v63 = vld [vmem:[%s1398_s0 + $0x34] sm:$0xf0]  ;;  %v994_v0 = vld [vmem:[%s1398_s0 + $0x14] sm:$0xf]  ;;  %v904_v1 = vld [vmem:[%s1398_s0 + $0x18] sm:$0xf0]  ;;  %v903_v4 = vor.u32 %v995_v61, %v902_v60 }
  0x47   : > { %634 = vmatpush.bf16.msra.mxu1 %v1013_v37  ;;  %1049 = vmatpush.bf16.msra.mxu3 %v1013_v37  ;;  %v998_v2 = vld [vmem:[%s1398_s0 + $0x34] sm:$0xf]  ;;  %v920_v3 = vld [vmem:[%s1398_s0 + $0x38] sm:$0xf0]  ;;  %v919_v5 = vor.u32 %v999_v63, %v918_v62  ;;  %v907_v6 = vor.u32 %v994_v0, %v904_v1  ;;  %v1095_v11 = vld [vmem:[%s422_s12] ss:$0 sm:$0xff] }
  0x48   : > { %v923_v7 = vor.u32 %v998_v2, %v920_v3  ;;  %v1096_v17 = vld [vmem:[%s425_s21] ss:$0 sm:$0xff]  ;;  %s1363_s12 = scalar_lea.vmem [#allocation3], %s891_s23 }
  0x4a   : > { %606 = vmatpush.bf16.msra.mxu0 %v1004_v38  ;;  %1042 = vmatpush.bf16.msra.mxu2 %v1004_v38 }
  0x4b   : > { %635 = vmatpush.bf16.msra.mxu1 %v1012_v39  ;;  %1050 = vmatpush.bf16.msra.mxu3 %v1012_v39 }
  0x4e   : > { %607 = vmatpush.bf16.msra.mxu0 %v1003_v40  ;;  %1043 = vmatpush.bf16.msra.mxu2 %v1003_v40 }
  0x4f   : > { %636 = vmatpush.bf16.msra.mxu1 %v1011_v41  ;;  %1051 = vmatpush.bf16.msra.mxu3 %v1011_v41 }
  0x52   : > { %608 = vmatpush.bf16.msra.mxu0 %v1002_v42  ;;  %1044 = vmatpush.bf16.msra.mxu2 %v1002_v42 }
  0x53   : > { %637 = vmatpush.bf16.msra.mxu1 %v1010_v43  ;;  %1052 = vmatpush.bf16.msra.mxu3 %v1010_v43 }
  0x56   : > { %609 = vmatpush.bf16.msra.mxu0 %v1001_v44  ;;  %1045 = vmatpush.bf16.msra.mxu2 %v1001_v44 }
  0x57   : > { %638 = vmatpush.bf16.msra.mxu1 %v1009_v45  ;;  %1053 = vmatpush.bf16.msra.mxu3 %v1009_v45 }
  0x5a   : > { %610 = vmatpush.bf16.msra.mxu0 %v1000_v47  ;;  %1046 = vmatpush.bf16.msra.mxu2 %v1000_v47 }
  0x5b   : > { %639 = vmatpush.bf16.msra.mxu1 %v1008_v48  ;;  %1054 = vmatpush.bf16.msra.mxu3 %v1008_v48 }
  0x5d   : > { %611 = vmatmul.bf16.vlgmr.msra.gmra.mxu0 %v895_v56  ;;  %621 = vmatmul.bf16.vlgmr.msra.gmra.mxu2 %v911_v57 }
  0x5e   : > { %640 = vmatmul.bf16.vlgmr.msra.gmra.mxu1 %v899_v58  ;;  %650 = vmatmul.bf16.vlgmr.msra.gmra.mxu3 %v915_v59 }
  0x6d   : > { %616 = vmatmul.bf16.gmra.mxu0 %v903_v4  ;;  %626 = vmatmul.bf16.gmra.mxu2 %v919_v5 }
  0x6e   : > { %645 = vmatmul.bf16.gmra.mxu1 %v907_v6  ;;  %655 = vmatmul.bf16.gmra.mxu3 %v923_v7 }
  0xda   : > { %v612_v8 = vpop.f32.mrf.mxu0 }
  0xdb   : > { %v641_v9 = vpop.f32.mrf.mxu1 }
  0xdc   : > { %v642_v10 = vadd.f32 %v641_v9, %v612_v8 }
  0xde   : > { %v665_v16 = vmul.f32 %v1095_v11, %v642_v10 }
  0xe0   : > { %v622_v12 = vpop.f32.mrf.mxu2  ;;  %v677_v21 = vadd.f32 %v1096_v17, %v665_v16 }
  0xe1   : > { %v651_v13 = vpop.f32.mrf.mxu3 }
  0xe2   : > { %v614_v14 = vpop.f32.mrf.mxu0  ;;  %v652_v19 = vadd.f32 %v651_v13, %v622_v12 }
  0xe3   : > { %v643_v15 = vpop.f32.mrf.mxu1 }
  0xe4   : > { %v644_v18 = vadd.f32 %v643_v15, %v614_v14  ;;  %v669_v25 = vmul.f32 %v1095_v11, %v652_v19 }
  0xe6   : > { %v666_v20 = vmul.f32 %v1095_v11, %v644_v18  ;;  %v681_v31 = vadd.f32 %v1096_v17, %v669_v25 }
  0xe8   : > { %v678_v22 = vadd.f32 %v1096_v17, %v666_v20  ;;  %v624_v23 = vpop.f32.mrf.mxu2 }
  0xe9   : > { %v653_v24 = vpop.f32.mrf.mxu3 }
  0xea   : > { %v1019_v26 = vpack.c.bf16 %v678_v22, %v677_v21  ;;  %v654_v27 = vadd.f32 %v653_v24, %v624_v23  ;;  %v617_v28 = vpop.f32.mrf.mxu0 }
  0xeb   : > { %v646_v29 = vpop.f32.mrf.mxu1 }
  0xec   : > { %1020 = vst [vmem:[%s1363_s12] sm:$0xff] %v1019_v26   ;;  %v670_v30 = vmul.f32 %v1095_v11, %v654_v27  ;;  %v647_v34 = vadd.f32 %v646_v29, %v617_v28 }
  0xee   : > { %v682_v32 = vadd.f32 %v1096_v17, %v670_v30  ;;  %v667_v39 = vmul.f32 %v1095_v11, %v647_v34 }
  0xf0   : > { %v1029_v33 = vpack.c.bf16 %v682_v32, %v681_v31  ;;  %v627_v35 = vpop.f32.mrf.mxu2  ;;  %v679_v43 = vadd.f32 %v1096_v17, %v667_v39 }
  0xf1   : > { %v656_v36 = vpop.f32.mrf.mxu3 }
  0xf2   : > { %1037 = vst [vmem:[%s1363_s12 + $0x10] sm:$0xff] %v1029_v33   ;;  %v619_v37 = vpop.f32.mrf.mxu0  ;;  %v657_v41 = vadd.f32 %v656_v36, %v627_v35 }
  0xf3   : > { %v648_v38 = vpop.f32.mrf.mxu1  ;;  %v729_v54 = vld [vmem:[%s1363_s12] sm:$0xf] (%p1197_p6)  ;;  %v731_v55 = vld [vmem:[%s1363_s12 + $0x4] sm:$0xf] (%p1197_p6) }
  0xf4   : > { %v649_v40 = vadd.f32 %v648_v38, %v619_v37  ;;  %v671_v47 = vmul.f32 %v1095_v11, %v657_v41  ;;  %730 = vst [vmem:[%s712_s26] sm:$0xf] (%p1197_p6), %v729_v54 }
  0xf5   : > { %732 = vst [vmem:[%s712_s26 + $0x10] sm:$0xf] (%p1197_p6), %v731_v55 }
  0xf6   : > { %v668_v42 = vmul.f32 %v1095_v11, %v649_v40  ;;  %v683_v51 = vadd.f32 %v1096_v17, %v671_v47 }
  0xf8   : > { %v680_v44 = vadd.f32 %v1096_v17, %v668_v42  ;;  %v629_v45 = vpop.f32.mrf.mxu2 }
  0xf9   : > { %v658_v46 = vpop.f32.mrf.mxu3  ;;  %v737_v58 = vld [vmem:[%s1363_s12 + $0x10] sm:$0xf] (%p1197_p6)  ;;  %v739_v59 = vld [vmem:[%s1363_s12 + $0x14] sm:$0xf] (%p1197_p6) }
  0xfa   : > { %v1024_v48 = vpack.c.bf16 %v680_v44, %v679_v43  ;;  %v659_v49 = vadd.f32 %v658_v46, %v629_v45  ;;  %738 = vst [vmem:[%s712_s26 + $0x40] sm:$0xf] (%p1197_p6), %v737_v58 }
  0xfb   : > { %740 = vst [vmem:[%s712_s26 + $0x50] sm:$0xf] (%p1197_p6), %v739_v59 }
  0xfc   : > { %1036 = vst [vmem:[%s1363_s12 + $0x8] sm:$0xff] %v1024_v48   ;;  %v672_v50 = vmul.f32 %v1095_v11, %v659_v49 }
  0xfe   : > { %v684_v52 = vadd.f32 %v1096_v17, %v672_v50  ;;  %707 = sbr.rel (!%p1197_p6) target bundleno = 268 (0x10c), region = 81 }
 0x100   : > { %v1034_v53 = vpack.c.bf16 %v684_v52, %v683_v51 }
 0x102   : > { %1038 = vst [vmem:[%s1363_s12 + $0x18] sm:$0xff] %v1034_v53  }
 0x103   : > { %v733_v56 = vld [vmem:[%s1363_s12 + $0x8] sm:$0xf]  ;;  %v735_v57 = vld [vmem:[%s1363_s12 + $0xc] sm:$0xf] }
 0x104   : > { %734 = vst [vmem:[%s712_s26 + $0x20] sm:$0xf] %v733_v56 }
 0x105   : > { %736 = vst [vmem:[%s712_s26 + $0x30] sm:$0xf] %v735_v57 }
 0x109   : > { %v741_v60 = vld [vmem:[%s1363_s12 + $0x18] sm:$0xf]  ;;  %v743_v61 = vld [vmem:[%s1363_s12 + $0x1c] sm:$0xf] }
 0x10a   : > { %742 = vst [vmem:[%s712_s26 + $0x60] sm:$0xf] %v741_v60 }
 0x10b   : > { %744 = vst [vmem:[%s712_s26 + $0x70] sm:$0xf] %v743_v61 }
 0x10c PF: > { %s14_s19 = sadd.s32 1, %s1135_s19   ;;  %s1404_s15 = smov %s1123_s16 }
 0x10d   : > { %p11_p12 = scmp.ge.s32.totalorder %s14_s19, 6   ;;  %s1405_s16 = smov %s1202_s25 }
 0x10e   : > { %s1406_s17 = smov %s1131_s18  ;;  %s1407_s18 = smov %s1409_s20 }
 0x10f   :  { %13 = sbr.rel (!%p11_p12) target bundleno = 3 (0x3), region = 162 }

// kernel: rgbd_encoder_forward.15
= control target key start
LH: loop header
LB: loop body
LE: loop exit
PB: predicated region body
PF: predicated region fallthrough
CT: control target
= control target key end

     0   :  { %s3958_s21 = smov 0   ;;  %s4826_s0 = inlined_call_operand.vmem [shape: bf16[256,1152], index: 0, kind: input, shape index: {}]   ;;  %s4827_s1 = inlined_call_operand.vmem [shape: bf16[256,256], index: 1, kind: input, shape index: {}]   ;;  %s4828_s2 = inlined_call_operand.vmem [shape: bf16[1152,128], index: 2, kind: input, shape index: {}]   ;;  %s4829_s3 = inlined_call_operand.vmem [shape: f32[1,128], index: 3, kind: input, shape index: {}]   ;;  %s4830_s4 = inlined_call_operand.vmem [shape: f32[1,128], index: 4, kind: input, shape index: {}]   ;;  %s4831_s5 = inlined_call_operand.vmem [shape: bf16[128,256], index: 5, kind: input, shape index: {}]   ;;  %s4832_s6 = inlined_call_operand.vmem [shape: f32[1,256], index: 6, kind: input, shape index: {}]   ;;  %s4833_s7 = inlined_call_operand.vmem [shape: f32[1,256], index: 7, kind: input, shape index: {}]   ;;  %s4834_s8 = inlined_call_operand.vmem [shape: bf16[256,128], index: 8, kind: input, shape index: {}]   ;;  %s4835_s9 = inlined_call_operand.vmem [shape: f32[1,128], index: 9, kind: input, shape index: {}]   ;;  %s4836_s10 = inlined_call_operand.vmem [shape: f32[1,128], index: 10, kind: input, shape index: {}]   ;;  %s4837_s11 = inlined_call_operand.vmem [shape: bf16[256,256], index: 11, kind: output, shape index: {0}]   ;;  %s4838_s12 = inlined_call_operand.vmem [shape: bf16[256,128], index: 12, kind: output, shape index: {1}]  }
   0x1 LB: > { %s2902_s22 = sadd.s32 4294967295, %s3891_s21   ;;  %p2906_p0 = scmp.ge.s32.totalorder %s3891_s21, 1  ;;  %s3891_s21 = sphi %s3958_s21, %s23_s21  }
   0x2   : > { %p379_p1 = scmp.lt.s32.totalorder %s3891_s21, 3 }
   0x4   : > { %p380_p2 = pnand %p2906_p0, %p379_p1 }
   0x5   : > { %s2907_s29 = sshll.u32 (!%p380_p2), %s2902_s22, 4 }
   0x6   : > { %383 = sbr.rel (%p380_p2) target bundleno = 774 (0x306), region = 64  ;;  %p435_p3 = scmp.lt.s32.totalorder (!%p380_p2), %s2907_s29, 31 }
   0xb   : > { %v3704_v0 = vld [vmem:[%s4828_s2 + $0x38] sm:$0xff]  ;;  %v3703_v1 = vld [vmem:[%s4828_s2 + $0x30] sm:$0xff]  ;;  %v3702_v2 = vld [vmem:[%s4828_s2 + $0x28] sm:$0xff]  ;;  %s4840_s29 = smov (!%p435_p3, %s2907_s29), 31 }
   0xc   : > { %3848 = vmatpush.bf16.msra.mxu1 %v3704_v0  ;;  %3849 = vmatpush.bf16.msra.mxu2 %v3704_v0  ;;  %v3701_v3 = vld [vmem:[%s4828_s2 + $0x20] sm:$0xff]  ;;  %v3700_v4 = vld [vmem:[%s4828_s2 + $0x18] sm:$0xff]  ;;  %v3699_v5 = vld [vmem:[%s4828_s2 + $0x10] sm:$0xff]  ;;  %s3872_s18 = smul.u32 36, %s4840_s29  ;;  %s3623_s30 = sshll.u32 %s4840_s29, 3 }
   0xd   : > { %3850 = vmatpush.bf16.msra.mxu3 %v3704_v0  ;;  %1485 = vmatpush.bf16.msra.mxu0 %v3704_v0  ;;  %v3698_v6 = vld [vmem:[%s4828_s2 + $0x8] sm:$0xff]  ;;  %v3697_v7 = vld [vmem:[%s4828_s2] sm:$0xff]  ;;  %v3720_v16 = vld [vmem:[%s4828_s2 + $0xb8] sm:$0xff]  ;;  %s4658_s17 = scalar_lea.vmem %s4827_s1, %s3623_s30  ;;  %s4677_s19 = scalar_lea.vmem %s4837_s11, %s3623_s30 }
   0xe   : > { %s3993_s24 = scalar_lea.vmem %s4826_s0, %s3872_s18  ;;  %v3712_v17 = vld [vmem:[%s4828_s2 + $0x78] sm:$0xff]  ;;  %v3719_v24 = vld [vmem:[%s4828_s2 + $0xb0] sm:$0xff]  ;;  %v3718_v28 = vld [vmem:[%s4828_s2 + $0xa8] sm:$0xff]  ;;  %s2916_s26 = sshll.u32 %s4840_s29, 2 }
   0xf   : > { %v2991_v8 = vld [vmem:[%s3993_s24 + $0x90] sm:$0xf]  ;;  %v3647_v9 = vld [vmem:[%s3993_s24 + $0xb0] sm:$0xf0]  ;;  %v3063_v10 = vld [vmem:[%s3993_s24 + $0x120] sm:$0xf]  ;;  %s4785_s30 = scalar_lea.vmem %s4838_s12, %s2916_s26 }
  0x10   : > { %3851 = vmatpush.bf16.msra.mxu1 %v3703_v1  ;;  %3852 = vmatpush.bf16.msra.mxu2 %v3703_v1  ;;  %v3665_v11 = vld [vmem:[%s3993_s24 + $0x140] sm:$0xf0]  ;;  %v3135_v12 = vld [vmem:[%s3993_s24 + $0x1b0] sm:$0xf]  ;;  %v3683_v13 = vld [vmem:[%s3993_s24 + $0x1d0] sm:$0xf0]  ;;  %v2992_v18 = vor.u32 %v3647_v9, %v2991_v8 }
  0x11   : > { %3853 = vmatpush.bf16.msra.mxu3 %v3703_v1  ;;  %1486 = vmatpush.bf16.msra.mxu0 %v3703_v1  ;;  %v2919_v14 = vld [vmem:[%s3993_s24] sm:$0xf]  ;;  %v3629_v15 = vld [vmem:[%s3993_s24 + $0x20] sm:$0xf0]  ;;  %v3064_v19 = vor.u32 %v3665_v11, %v3063_v10  ;;  %v3136_v20 = vor.u32 %v3683_v13, %v3135_v12  ;;  %v3728_v22 = vld [vmem:[%s4828_s2 + $0xf8] sm:$0xff] }
  0x12   : > { %v2920_v21 = vor.u32 %v3629_v15, %v2919_v14  ;;  %v3736_v23 = vld [vmem:[%s4828_s2 + $0x138] sm:$0xff]  ;;  %v3711_v25 = vld [vmem:[%s4828_s2 + $0x70] sm:$0xff]  ;;  %v3710_v29 = vld [vmem:[%s4828_s2 + $0x68] sm:$0xff] }
  0x13   : > { %v3727_v26 = vld [vmem:[%s4828_s2 + $0xf0] sm:$0xff]  ;;  %v3726_v30 = vld [vmem:[%s4828_s2 + $0xe8] sm:$0xff]  ;;  %v3717_v32 = vld [vmem:[%s4828_s2 + $0xa0] sm:$0xff] }
  0x14   : > { %3854 = vmatpush.bf16.msra.mxu1 %v3702_v2  ;;  %3855 = vmatpush.bf16.msra.mxu2 %v3702_v2  ;;  %v3735_v27 = vld [vmem:[%s4828_s2 + $0x130] sm:$0xff]  ;;  %v3734_v31 = vld [vmem:[%s4828_s2 + $0x128] sm:$0xff]  ;;  %v3709_v33 = vld [vmem:[%s4828_s2 + $0x60] sm:$0xff] }
  0x15   : > { %3856 = vmatpush.bf16.msra.mxu3 %v3702_v2  ;;  %1487 = vmatpush.bf16.msra.mxu0 %v3702_v2  ;;  %v3725_v34 = vld [vmem:[%s4828_s2 + $0xe0] sm:$0xff]  ;;  %v3027_v36 = vld [vmem:[%s3993_s24 + $0xd8] sm:$0xf]  ;;  %v3656_v37 = vld [vmem:[%s3993_s24 + $0xf8] sm:$0xf0] }
  0x16   : > { %v3733_v35 = vld [vmem:[%s4828_s2 + $0x120] sm:$0xff]  ;;  %v3099_v38 = vld [vmem:[%s3993_s24 + $0x168] sm:$0xf]  ;;  %v3674_v39 = vld [vmem:[%s3993_s24 + $0x188] sm:$0xf0]  ;;  %v3028_v46 = vor.u32 %v3656_v37, %v3027_v36 }
  0x17   : > { %v3171_v40 = vld [vmem:[%s3993_s24 + $0x1f8] sm:$0xf]  ;;  %v3692_v41 = vld [vmem:[%s3993_s24 + $0x218] sm:$0xf0]  ;;  %v2955_v42 = vld [vmem:[%s3993_s24 + $0x48] sm:$0xf]  ;;  %v3100_v47 = vor.u32 %v3674_v39, %v3099_v38 }
  0x18   : > { %3857 = vmatpush.bf16.msra.mxu1 %v3701_v3  ;;  %3858 = vmatpush.bf16.msra.mxu2 %v3701_v3  ;;  %v3638_v43 = vld [vmem:[%s3993_s24 + $0x68] sm:$0xf0]  ;;  %v3716_v44 = vld [vmem:[%s4828_s2 + $0x98] sm:$0xff]  ;;  %v3172_v48 = vor.u32 %v3692_v41, %v3171_v40  ;;  %v3715_v52 = vld [vmem:[%s4828_s2 + $0x90] sm:$0xff] }
  0x19   : > { %3859 = vmatpush.bf16.msra.mxu3 %v3701_v3  ;;  %1488 = vmatpush.bf16.msra.mxu0 %v3701_v3  ;;  %v3708_v45 = vld [vmem:[%s4828_s2 + $0x58] sm:$0xff]  ;;  %v2956_v49 = vor.u32 %v3638_v43, %v2955_v42  ;;  %v3707_v53 = vld [vmem:[%s4828_s2 + $0x50] sm:$0xff]  ;;  %v3714_v56 = vld [vmem:[%s4828_s2 + $0x88] sm:$0xff] }
  0x1a   : > { %v3724_v50 = vld [vmem:[%s4828_s2 + $0xd8] sm:$0xff]  ;;  %v3723_v54 = vld [vmem:[%s4828_s2 + $0xd0] sm:$0xff]  ;;  %v3706_v57 = vld [vmem:[%s4828_s2 + $0x48] sm:$0xff] }
  0x1b   : > { %v3732_v51 = vld [vmem:[%s4828_s2 + $0x118] sm:$0xff]  ;;  %v3731_v55 = vld [vmem:[%s4828_s2 + $0x110] sm:$0xff]  ;;  %v3722_v58 = vld [vmem:[%s4828_s2 + $0xc8] sm:$0xff] }
  0x1c   : > { %3860 = vmatpush.bf16.msra.mxu1 %v3700_v4  ;;  %3861 = vmatpush.bf16.msra.mxu2 %v3700_v4  ;;  %v3730_v59 = vld [vmem:[%s4828_s2 + $0x108] sm:$0xff]  ;;  %v3713_v60 = vld [vmem:[%s4828_s2 + $0x80] sm:$0xff]  ;;  %v3752_v2 = vld [vmem:[%s4828_s2 + $0x1b8] sm:$0xff] }
  0x1d   : > { %3862 = vmatpush.bf16.msra.mxu3 %v3700_v4  ;;  %1489 = vmatpush.bf16.msra.mxu0 %v3700_v4  ;;  %v3705_v61 = vld [vmem:[%s4828_s2 + $0x40] sm:$0xff]  ;;  %v2921_v1 = vld [vmem:[%s3993_s24 + $0x24] sm:$0xf0]  ;;  %v3744_v3 = vld [vmem:[%s4828_s2 + $0x178] sm:$0xff] }
  0x1e   : > { %v3625_v62 = vld [vmem:[%s3993_s24 + $0x4] sm:$0xf]  ;;  %v2927_v4 = vld [vmem:[%s3993_s24 + $0x8] sm:$0xf]  ;;  %v2935_v8 = vld [vmem:[%s3993_s24 + $0x10] sm:$0xf] }
  0x1f   : > { %v3721_v63 = vld [vmem:[%s4828_s2 + $0xc0] sm:$0xff]  ;;  %v3631_v9 = vld [vmem:[%s3993_s24 + $0x30] sm:$0xf0]  ;;  %v3760_v10 = vld [vmem:[%s4828_s2 + $0x1f8] sm:$0xff]  ;;  %v2924_v12 = vor.u32 %v3625_v62, %v2921_v1 }
  0x20   : > { %3863 = vmatpush.bf16.msra.mxu1 %v3699_v5  ;;  %3864 = vmatpush.bf16.msra.mxu2 %v3699_v5  ;;  %v3729_v0 = vld [vmem:[%s4828_s2 + $0x100] sm:$0xff]  ;;  %v3768_v11 = vld [vmem:[%s4828_s2 + $0x238] sm:$0xff]  ;;  %v2936_v15 = vor.u32 %v3631_v9, %v2935_v8  ;;  %v3643_v40 = vld [vmem:[%s3993_s24 + $0x94] sm:$0xf] }
  0x21   : > { %3865 = vmatpush.bf16.msra.mxu3 %v3699_v5  ;;  %1490 = vmatpush.bf16.msra.mxu0 %v3699_v5  ;;  %v3630_v5 = vld [vmem:[%s3993_s24 + $0x28] sm:$0xf0]  ;;  %v3749_v36 = vld [vmem:[%s4828_s2 + $0x1a0] sm:$0xff]  ;;  %v2993_v41 = vld [vmem:[%s3993_s24 + $0xb4] sm:$0xf0] }
  0x22   : > { %v2928_v13 = vor.u32 %v3630_v5, %v2927_v4  ;;  %v3757_v37 = vld [vmem:[%s4828_s2 + $0x1e0] sm:$0xff]  ;;  %v2999_v42 = vld [vmem:[%s3993_s24 + $0x98] sm:$0xf]  ;;  %v3648_v43 = vld [vmem:[%s3993_s24 + $0xb8] sm:$0xf0] }
  0x23   : > { %v3741_v38 = vld [vmem:[%s4828_s2 + $0x160] sm:$0xff]  ;;  %v3043_v62 = vld [vmem:[%s3993_s24 + $0xe8] sm:$0xf]  ;;  %v3747_v4 = vld [vmem:[%s4828_s2 + $0x190] sm:$0xff] }
  0x24   : > { %3866 = vmatpush.bf16.msra.mxu1 %v3698_v6  ;;  %3867 = vmatpush.bf16.msra.mxu2 %v3698_v6  ;;  %v3765_v39 = vld [vmem:[%s4828_s2 + $0x220] sm:$0xff]  ;;  %v3755_v5 = vld [vmem:[%s4828_s2 + $0x1d0] sm:$0xff]  ;;  %v3065_v9 = vld [vmem:[%s3993_s24 + $0x144] sm:$0xf0] }
  0x25   : > { %3868 = vmatpush.bf16.msra.mxu3 %v3698_v6  ;;  %1491 = vmatpush.bf16.msra.mxu0 %v3698_v6  ;;  %v3626_v6 = vld [vmem:[%s3993_s24 + $0xc] sm:$0xf]  ;;  %v3661_v8 = vld [vmem:[%s3993_s24 + $0x124] sm:$0xf] }
  0x28   : > { %3869 = vmatpush.bf16.msra.mxu1 %v3697_v7  ;;  %3870 = vmatpush.bf16.msra.mxu2 %v3697_v7 }
  0x29   : > { %3871 = vmatpush.bf16.msra.mxu3 %v3697_v7  ;;  %1492 = vmatpush.bf16.msra.mxu0 %v3697_v7  ;;  %v2929_v7 = vld [vmem:[%s3993_s24 + $0x2c] sm:$0xf0] }
  0x2a   : > { %v2932_v14 = vor.u32 %v3626_v6, %v2929_v7  ;;  %v3739_v6 = vld [vmem:[%s4828_s2 + $0x150] sm:$0xff] }
  0x2b   : > { %1503 = vmatmul.bf16.vlgmr.msra.gmra.mxu1 %v2992_v18  ;;  %1513 = vmatmul.bf16.vlgmr.msra.gmra.mxu2 %v3064_v19  ;;  %v3759_v18 = vld [vmem:[%s4828_s2 + $0x1f0] sm:$0xff] }
  0x2c   : > { %1583 = vmatpush.bf16.msrb.mxu2 %v3720_v16  ;;  %1534 = vmatpush.bf16.msrb.mxu1 %v3712_v17  ;;  %v3751_v16 = vld [vmem:[%s4828_s2 + $0x1b0] sm:$0xff] }
  0x2d   : > { %1523 = vmatmul.bf16.vlgmr.msra.gmra.mxu3 %v3136_v20  ;;  %1493 = vmatmul.bf16.vlgmr.msra.gmra.mxu0 %v2920_v21  ;;  %v3743_v17 = vld [vmem:[%s4828_s2 + $0x170] sm:$0xff]  ;;  %v3750_v20 = vld [vmem:[%s4828_s2 + $0x1a8] sm:$0xff] }
  0x2e   : > { %1632 = vmatpush.bf16.msrb.mxu3 %v3728_v22  ;;  %1681 = vmatpush.bf16.msrb.mxu0 %v3736_v23  ;;  %v3767_v19 = vld [vmem:[%s4828_s2 + $0x230] sm:$0xff]  ;;  %v3742_v21 = vld [vmem:[%s4828_s2 + $0x168] sm:$0xff] }
  0x2f   : > { %v3758_v22 = vld [vmem:[%s4828_s2 + $0x1e8] sm:$0xff]  ;;  %v3763_v7 = vld [vmem:[%s4828_s2 + $0x210] sm:$0xff] }
  0x30   : > { %1584 = vmatpush.bf16.msrb.mxu2 %v3719_v24  ;;  %1535 = vmatpush.bf16.msrb.mxu1 %v3711_v25  ;;  %v3766_v23 = vld [vmem:[%s4828_s2 + $0x228] sm:$0xff]  ;;  %v2957_v25 = vld [vmem:[%s3993_s24 + $0x6c] sm:$0xf0] }
  0x31   : > { %v3634_v24 = vld [vmem:[%s3993_s24 + $0x4c] sm:$0xf] }
  0x32   : > { %1633 = vmatpush.bf16.msrb.mxu3 %v3727_v26  ;;  %1682 = vmatpush.bf16.msrb.mxu0 %v3735_v27  ;;  %v2963_v26 = vld [vmem:[%s3993_s24 + $0x50] sm:$0xf]  ;;  %v3639_v27 = vld [vmem:[%s3993_s24 + $0x70] sm:$0xf0] }
  0x34   : > { %1585 = vmatpush.bf16.msrb.mxu2 %v3718_v28  ;;  %1536 = vmatpush.bf16.msrb.mxu1 %v3710_v29  ;;  %v3635_v28 = vld [vmem:[%s3993_s24 + $0x54] sm:$0xf]  ;;  %v2965_v29 = vld [vmem:[%s3993_s24 + $0x74] sm:$0xf0] }
  0x36   : > { %1634 = vmatpush.bf16.msrb.mxu3 %v3726_v30  ;;  %1683 = vmatpush.bf16.msrb.mxu0 %v3734_v31  ;;  %v2971_v30 = vld [vmem:[%s3993_s24 + $0x58] sm:$0xf]  ;;  %v3640_v31 = vld [vmem:[%s3993_s24 + $0x78] sm:$0xf0] }
  0x38   : > { %1586 = vmatpush.bf16.msrb.mxu2 %v3717_v32  ;;  %1537 = vmatpush.bf16.msrb.mxu1 %v3709_v33  ;;  %v2960_v32 = vor.u32 %v3634_v24, %v2957_v25  ;;  %v2964_v33 = vor.u32 %v3639_v27, %v2963_v26  ;;  %v3670_v24 = vld [vmem:[%s3993_s24 + $0x16c] sm:$0xf]  ;;  %v3101_v25 = vld [vmem:[%s3993_s24 + $0x18c] sm:$0xf0]  ;;  %v3675_v27 = vld [vmem:[%s3993_s24 + $0x190] sm:$0xf0] }
  0x39   : > { %v3107_v26 = vld [vmem:[%s3993_s24 + $0x170] sm:$0xf] }
  0x3a   : > { %1635 = vmatpush.bf16.msrb.mxu3 %v3725_v34  ;;  %1684 = vmatpush.bf16.msrb.mxu0 %v3733_v35  ;;  %v2968_v34 = vor.u32 %v3635_v28, %v2965_v29  ;;  %v2972_v35 = vor.u32 %v3640_v31, %v2971_v30  ;;  %v3671_v28 = vld [vmem:[%s3993_s24 + $0x174] sm:$0xf]  ;;  %v3109_v29 = vld [vmem:[%s3993_s24 + $0x194] sm:$0xf0]  ;;  %v3676_v31 = vld [vmem:[%s3993_s24 + $0x198] sm:$0xf0] }
  0x3b   : > { %1508 = vmatmul.bf16.gmra.mxu1 %v3028_v46  ;;  %1518 = vmatmul.bf16.gmra.mxu2 %v3100_v47  ;;  %v3007_v46 = vld [vmem:[%s3993_s24 + $0xa0] sm:$0xf]  ;;  %v3649_v47 = vld [vmem:[%s3993_s24 + $0xc0] sm:$0xf0]  ;;  %v3115_v30 = vld [vmem:[%s3993_s24 + $0x178] sm:$0xf] }
  0x3c   : > { %1587 = vmatpush.bf16.msrb.mxu2 %v3716_v44  ;;  %1538 = vmatpush.bf16.msrb.mxu1 %v3708_v45  ;;  %v3644_v44 = vld [vmem:[%s3993_s24 + $0x9c] sm:$0xf]  ;;  %v3001_v45 = vld [vmem:[%s3993_s24 + $0xbc] sm:$0xf0] }
  0x3d   : > { %1528 = vmatmul.bf16.gmra.mxu3 %v3172_v48  ;;  %1498 = vmatmul.bf16.gmra.mxu0 %v2956_v49  ;;  %v2996_v48 = vor.u32 %v3643_v40, %v2993_v41  ;;  %v3000_v49 = vor.u32 %v3648_v43, %v2999_v42  ;;  %v3679_v40 = vld [vmem:[%s3993_s24 + $0x1b4] sm:$0xf]  ;;  %v3137_v41 = vld [vmem:[%s3993_s24 + $0x1d4] sm:$0xf0]  ;;  %v3684_v43 = vld [vmem:[%s3993_s24 + $0x1d8] sm:$0xf0] }
  0x3e   : > { %1636 = vmatpush.bf16.msrb.mxu3 %v3724_v50  ;;  %1685 = vmatpush.bf16.msrb.mxu0 %v3732_v51  ;;  %v3004_v50 = vor.u32 %v3644_v44, %v3001_v45  ;;  %v3008_v51 = vor.u32 %v3649_v47, %v3007_v46  ;;  %v3143_v42 = vld [vmem:[%s3993_s24 + $0x1b8] sm:$0xf]  ;;  %v3680_v44 = vld [vmem:[%s3993_s24 + $0x1bc] sm:$0xf]  ;;  %v3145_v45 = vld [vmem:[%s3993_s24 + $0x1dc] sm:$0xf0] }
  0x3f   : > { %v3151_v46 = vld [vmem:[%s3993_s24 + $0x1c0] sm:$0xf]  ;;  %v3685_v47 = vld [vmem:[%s3993_s24 + $0x1e0] sm:$0xf0] }
  0x40   : > { %1588 = vmatpush.bf16.msrb.mxu2 %v3715_v52  ;;  %1539 = vmatpush.bf16.msrb.mxu1 %v3707_v53  ;;  %v3748_v52 = vld [vmem:[%s4828_s2 + $0x198] sm:$0xff] }
  0x41   : > { %v3756_v53 = vld [vmem:[%s4828_s2 + $0x1d8] sm:$0xff] }
  0x42   : > { %1637 = vmatpush.bf16.msrb.mxu3 %v3723_v54  ;;  %1686 = vmatpush.bf16.msrb.mxu0 %v3731_v55  ;;  %v3740_v54 = vld [vmem:[%s4828_s2 + $0x158] sm:$0xff] }
  0x43   : > { %v3764_v55 = vld [vmem:[%s4828_s2 + $0x218] sm:$0xff] }
  0x44   : > { %1589 = vmatpush.bf16.msrb.mxu2 %v3714_v56  ;;  %1540 = vmatpush.bf16.msrb.mxu1 %v3706_v57  ;;  %v3652_v56 = vld [vmem:[%s3993_s24 + $0xdc] sm:$0xf]  ;;  %v3029_v57 = vld [vmem:[%s3993_s24 + $0xfc] sm:$0xf0] }
  0x46   : > { %1638 = vmatpush.bf16.msrb.mxu3 %v3722_v58  ;;  %1687 = vmatpush.bf16.msrb.mxu0 %v3730_v59  ;;  %v3035_v58 = vld [vmem:[%s3993_s24 + $0xe0] sm:$0xf]  ;;  %v3657_v59 = vld [vmem:[%s3993_s24 + $0x100] sm:$0xf0] }
  0x47   : > { %v3036_v1 = vor.u32 %v3657_v59, %v3035_v58  ;;  %v3688_v58 = vld [vmem:[%s3993_s24 + $0x1fc] sm:$0xf]  ;;  %v3173_v59 = vld [vmem:[%s3993_s24 + $0x21c] sm:$0xf0] }
  0x48   : > { %1590 = vmatpush.bf16.msrb.mxu2 %v3713_v60  ;;  %1541 = vmatpush.bf16.msrb.mxu1 %v3705_v61  ;;  %v3653_v60 = vld [vmem:[%s3993_s24 + $0xe4] sm:$0xf]  ;;  %v3037_v61 = vld [vmem:[%s3993_s24 + $0x104] sm:$0xf0] }
  0x4a   : > { %1639 = vmatpush.bf16.msrb.mxu3 %v3721_v63  ;;  %1688 = vmatpush.bf16.msrb.mxu0 %v3729_v0  ;;  %v3658_v63 = vld [vmem:[%s3993_s24 + $0x108] sm:$0xf0]  ;;  %v3032_v0 = vor.u32 %v3652_v56, %v3029_v57 }
  0x4b   : > { %1542 = vmatmul.bf16.vlgmr.msrb.gmra.mxu1 %v2924_v12  ;;  %1591 = vmatmul.bf16.vlgmr.msrb.gmra.mxu2 %v2928_v13  ;;  %v3662_v12 = vld [vmem:[%s3993_s24 + $0x12c] sm:$0xf]  ;;  %v3073_v13 = vld [vmem:[%s3993_s24 + $0x14c] sm:$0xf0] }
  0x4c   : > { %1779 = vmatpush.bf16.msra.mxu2 %v3752_v2  ;;  %1730 = vmatpush.bf16.msra.mxu1 %v3744_v3  ;;  %v3040_v2 = vor.u32 %v3653_v60, %v3037_v61  ;;  %v3044_v3 = vor.u32 %v3658_v63, %v3043_v62  ;;  %v3179_v60 = vld [vmem:[%s3993_s24 + $0x200] sm:$0xf]  ;;  %v3693_v61 = vld [vmem:[%s3993_s24 + $0x220] sm:$0xf0]  ;;  %v3181_v63 = vld [vmem:[%s3993_s24 + $0x224] sm:$0xf0] }
  0x4d   : > { %1640 = vmatmul.bf16.vlgmr.msrb.gmra.mxu3 %v2932_v14  ;;  %1689 = vmatmul.bf16.vlgmr.msrb.gmra.mxu0 %v2936_v15  ;;  %v3079_v14 = vld [vmem:[%s3993_s24 + $0x130] sm:$0xf]  ;;  %v3667_v15 = vld [vmem:[%s3993_s24 + $0x150] sm:$0xf0]  ;;  %v3689_v62 = vld [vmem:[%s3993_s24 + $0x204] sm:$0xf] }
  0x4e   : > { %1828 = vmatpush.bf16.msra.mxu3 %v3760_v10  ;;  %1877 = vmatpush.bf16.msra.mxu0 %v3768_v11  ;;  %v3071_v10 = vld [vmem:[%s3993_s24 + $0x128] sm:$0xf]  ;;  %v3666_v11 = vld [vmem:[%s3993_s24 + $0x148] sm:$0xf0] }
  0x50   : > { %1780 = vmatpush.bf16.msra.mxu2 %v3751_v16  ;;  %1731 = vmatpush.bf16.msra.mxu1 %v3743_v17  ;;  %v3068_v16 = vor.u32 %v3661_v8, %v3065_v9  ;;  %v3072_v17 = vor.u32 %v3666_v11, %v3071_v10 }
  0x52   : > { %1829 = vmatpush.bf16.msra.mxu3 %v3759_v18  ;;  %1878 = vmatpush.bf16.msra.mxu0 %v3767_v19  ;;  %v3076_v18 = vor.u32 %v3662_v12, %v3073_v13  ;;  %v3080_v19 = vor.u32 %v3667_v15, %v3079_v14  ;;  %v3783_v14 = vld [vmem:[%s4831_s5 + $0x74] sm:$0xf]  ;;  %v3553_v15 = vld [vmem:[%s4831_s5 + $0x78] sm:$0xf0] }
  0x54   : > { %1781 = vmatpush.bf16.msra.mxu2 %v3750_v20  ;;  %1732 = vmatpush.bf16.msra.mxu1 %v3742_v21  ;;  %v3746_v20 = vld [vmem:[%s4828_s2 + $0x188] sm:$0xff] }
  0x55   : > { %v3754_v21 = vld [vmem:[%s4828_s2 + $0x1c8] sm:$0xff] }
  0x56   : > { %1830 = vmatpush.bf16.msra.mxu3 %v3758_v22  ;;  %1879 = vmatpush.bf16.msra.mxu0 %v3766_v23  ;;  %v3738_v22 = vld [vmem:[%s4828_s2 + $0x148] sm:$0xff] }
  0x57   : > { %v3762_v23 = vld [vmem:[%s4828_s2 + $0x208] sm:$0xff] }
  0x58   : > { %1782 = vmatpush.bf16.msra.mxu2 %v3749_v36  ;;  %1733 = vmatpush.bf16.msra.mxu1 %v3741_v38  ;;  %v3745_v36 = vld [vmem:[%s4828_s2 + $0x180] sm:$0xff] }
  0x59   : > { %v3737_v38 = vld [vmem:[%s4828_s2 + $0x140] sm:$0xff] }
  0x5a   : > { %1831 = vmatpush.bf16.msra.mxu3 %v3757_v37  ;;  %1880 = vmatpush.bf16.msra.mxu0 %v3765_v39  ;;  %v3753_v37 = vld [vmem:[%s4828_s2 + $0x1c0] sm:$0xff] }
  0x5b   : > { %1547 = vmatmul.bf16.gmra.mxu1 %v2960_v32  ;;  %1596 = vmatmul.bf16.gmra.mxu2 %v2964_v33  ;;  %v3104_v32 = vor.u32 %v3670_v24, %v3101_v25  ;;  %v3108_v33 = vor.u32 %v3675_v27, %v3107_v26  ;;  %v3761_v39 = vld [vmem:[%s4828_s2 + $0x200] sm:$0xff] }
  0x5c   : > { %1783 = vmatpush.bf16.msra.mxu2 %v3748_v52  ;;  %1734 = vmatpush.bf16.msra.mxu1 %v3740_v54  ;;  %v3152_v52 = vor.u32 %v3685_v47, %v3151_v46  ;;  %v3633_v24 = vld [vmem:[%s3993_s24 + $0x40] sm:$0xf0]  ;;  %v3636_v47 = vld [vmem:[%s3993_s24 + $0x5c] sm:$0xf] }
  0x5d   : > { %1645 = vmatmul.bf16.gmra.mxu3 %v2968_v34  ;;  %1694 = vmatmul.bf16.gmra.mxu0 %v2972_v35  ;;  %v3112_v34 = vor.u32 %v3671_v28, %v3109_v29  ;;  %v3116_v35 = vor.u32 %v3676_v31, %v3115_v30 }
  0x5e   : > { %1832 = vmatpush.bf16.msra.mxu3 %v3756_v53  ;;  %1881 = vmatpush.bf16.msra.mxu0 %v3764_v55 }
  0x60   : > { %1784 = vmatpush.bf16.msra.mxu2 %v3747_v4  ;;  %1735 = vmatpush.bf16.msra.mxu1 %v3739_v6  ;;  %v3176_v4 = vor.u32 %v3688_v58, %v3173_v59  ;;  %v2981_v58 = vld [vmem:[%s3993_s24 + $0x84] sm:$0xf0]  ;;  %v3642_v59 = vld [vmem:[%s3993_s24 + $0x88] sm:$0xf0] }
  0x62   : > { %1833 = vmatpush.bf16.msra.mxu3 %v3755_v5  ;;  %1882 = vmatpush.bf16.msra.mxu0 %v3763_v7  ;;  %v3180_v5 = vor.u32 %v3693_v61, %v3179_v60  ;;  %v3184_v7 = vor.u32 %v3689_v62, %v3181_v63 }
  0x64   : > { %1785 = vmatpush.bf16.msra.mxu2 %v3746_v20  ;;  %1736 = vmatpush.bf16.msra.mxu1 %v3738_v22  ;;  %v3632_v20 = vld [vmem:[%s3993_s24 + $0x38] sm:$0xf0]  ;;  %v2945_v22 = vld [vmem:[%s3993_s24 + $0x3c] sm:$0xf0] }
  0x66   : > { %1834 = vmatpush.bf16.msra.mxu3 %v3754_v21  ;;  %1883 = vmatpush.bf16.msra.mxu0 %v3762_v23  ;;  %v3628_v21 = vld [vmem:[%s3993_s24 + $0x1c] sm:$0xf]  ;;  %v2951_v23 = vld [vmem:[%s3993_s24 + $0x20] sm:$0xf] }
  0x67   : > { %v2948_v30 = vor.u32 %v3628_v21, %v2945_v22  ;;  %v2952_v31 = vor.u32 %v3633_v24, %v2951_v23 }
  0x68   : > { %1786 = vmatpush.bf16.msra.mxu2 %v3745_v36  ;;  %1737 = vmatpush.bf16.msra.mxu1 %v3737_v38 }
  0x6a   : > { %1835 = vmatpush.bf16.msra.mxu3 %v3753_v37  ;;  %1884 = vmatpush.bf16.msra.mxu0 %v3761_v39 }
  0x6b   : > { %1552 = vmatmul.bf16.gmra.mxu1 %v2996_v48  ;;  %1601 = vmatmul.bf16.gmra.mxu2 %v3000_v49  ;;  %v3140_v48 = vor.u32 %v3679_v40, %v3137_v41  ;;  %v3144_v49 = vor.u32 %v3684_v43, %v3143_v42 }
  0x6d   : > { %1650 = vmatmul.bf16.gmra.mxu3 %v3004_v50  ;;  %1699 = vmatmul.bf16.gmra.mxu0 %v3008_v51  ;;  %v3148_v51 = vor.u32 %v3680_v44, %v3145_v45  ;;  %v3781_v44 = vld [vmem:[%s4831_s5 + $0x64] sm:$0xf]  ;;  %v3545_v45 = vld [vmem:[%s4831_s5 + $0x68] sm:$0xf0] }
  0x6e   : > { %v3548_v46 = vor.u32 %v3781_v44, %v3545_v45 }
  0x7b   : > { %1557 = vmatmul.bf16.gmra.mxu1 %v3032_v0  ;;  %1606 = vmatmul.bf16.gmra.mxu2 %v3036_v1  ;;  %v3187_v0 = vld [vmem:[%s3993_s24 + $0x208] sm:$0xf]  ;;  %v3694_v1 = vld [vmem:[%s3993_s24 + $0x228] sm:$0xf0] }
  0x7c   : > { %v3188_v8 = vor.u32 %v3694_v1, %v3187_v0 }
  0x7d   : > { %1655 = vmatmul.bf16.gmra.mxu3 %v3040_v2  ;;  %1704 = vmatmul.bf16.gmra.mxu0 %v3044_v3 }
  0x8b   : > { %1562 = vmatmul.bf16.gmra.mxu1 %v3068_v16  ;;  %1611 = vmatmul.bf16.gmra.mxu2 %v3072_v17  ;;  %v3556_v16 = vor.u32 %v3783_v14, %v3553_v15  ;;  %v3627_v17 = vld [vmem:[%s3993_s24 + $0x14] sm:$0xf] }
  0x8d   : > { %1660 = vmatmul.bf16.gmra.mxu3 %v3076_v18  ;;  %1709 = vmatmul.bf16.gmra.mxu0 %v3080_v19  ;;  %v2937_v18 = vld [vmem:[%s3993_s24 + $0x34] sm:$0xf0] }
  0x8e   : > { %v2943_v19 = vld [vmem:[%s3993_s24 + $0x18] sm:$0xf]  ;;  %2135 = vmatpush.bf16.msrb.mxu2 %v3556_v16  ;;  %v2940_v27 = vor.u32 %v3627_v17, %v2937_v18  ;;  %v3543_v16 = vld [vmem:[%s4831_s5 + $0x60] sm:$0xf]  ;;  %v3782_v17 = vld [vmem:[%s4831_s5 + $0x64] sm:$0xf0] }
  0x8f   : > { %v2944_v28 = vor.u32 %v3632_v20, %v2943_v19  ;;  %v3544_v18 = vor.u32 %v3782_v17, %v3543_v16  ;;  %v3659_v16 = vld [vmem:[%s3993_s24 + $0x110] sm:$0xf0] }
  0x90   : > { %v3655_v17 = vld [vmem:[%s3993_s24 + $0xf4] sm:$0xf] }
  0x92   : > { %2136 = vmatpush.bf16.msrb.mxu2 %v3548_v46 }
  0x9b   : > { %1567 = vmatmul.bf16.gmra.mxu1 %v3104_v32  ;;  %1616 = vmatmul.bf16.gmra.mxu2 %v3108_v33 }
  0x9d   : > { %1665 = vmatmul.bf16.gmra.mxu3 %v3112_v34  ;;  %1714 = vmatmul.bf16.gmra.mxu0 %v3116_v35  ;;  %v3551_v34 = vld [vmem:[%s4831_s5 + $0x70] sm:$0xf]  ;;  %v3784_v35 = vld [vmem:[%s4831_s5 + $0x74] sm:$0xf0] }
  0x9e   : > { %v3552_v36 = vor.u32 %v3784_v35, %v3551_v34  ;;  %v3650_v34 = vld [vmem:[%s3993_s24 + $0xc8] sm:$0xf0] }
  0x9f   : > { %v3646_v35 = vld [vmem:[%s3993_s24 + $0xac] sm:$0xf] }
  0xa0   : > { %2086 = vmatpush.bf16.msrb.mxu1 %v3552_v36  ;;  %v3017_v36 = vld [vmem:[%s3993_s24 + $0xcc] sm:$0xf0] }
  0xa1   : > { %v3020_v44 = vor.u32 %v3646_v35, %v3017_v36  ;;  %v3778_v35 = vld [vmem:[%s4831_s5 + $0x44] sm:$0xf0] }
  0xa4   : > { %2087 = vmatpush.bf16.msrb.mxu1 %v3544_v18  ;;  %v3053_v18 = vld [vmem:[%s3993_s24 + $0x114] sm:$0xf0] }
  0xa8   : > { %v4262_v50 = vpop.f32.mrf.mxu1 }
  0xaa   : > { %v1494_v53 = vpop.f32.mrf.mxu0 }
  0xab   : > { %1572 = vmatmul.bf16.gmra.mxu1 %v3140_v48  ;;  %1621 = vmatmul.bf16.gmra.mxu2 %v3144_v49  ;;  %v2973_v48 = vld [vmem:[%s3993_s24 + $0x7c] sm:$0xf0] }
  0xac   : > { %v2976_v63 = vor.u32 %v3636_v47, %v2973_v48 }
  0xad   : > { %1670 = vmatmul.bf16.gmra.mxu3 %v3148_v51  ;;  %1719 = vmatmul.bf16.gmra.mxu0 %v3152_v52  ;;  %v2979_v51 = vld [vmem:[%s3993_s24 + $0x60] sm:$0xf]  ;;  %v3641_v52 = vld [vmem:[%s3993_s24 + $0x80] sm:$0xf0] }
  0xae   : > { %v4264_v54 = vpop.f32.mrf.mxu2  ;;  %v2980_v0 = vor.u32 %v3641_v52, %v2979_v51  ;;  %v3535_v52 = vld [vmem:[%s4831_s5 + $0x50] sm:$0xf] }
  0xb0   : > { %v4266_v55 = vpop.f32.mrf.mxu3  ;;  %v4268_v56 = vpop.f32.mrf.mxu1 }
  0xb2   : > { %v1496_v57 = vpop.f32.mrf.mxu0 }
  0xb6   : > { %v4278_v2 = vpop.f32.mrf.mxu2 }
  0xb8   : > { %v4280_v3 = vpop.f32.mrf.mxu3  ;;  %v4282_v6 = vpop.f32.mrf.mxu1 }
  0xba   : > { %v4284_v9 = vpop.f32.mrf.mxu0 }
  0xbb   : > { %1577 = vmatmul.bf16.gmra.mxu1 %v3176_v4  ;;  %1626 = vmatmul.bf16.gmra.mxu2 %v3180_v5 }
  0xbd   : > { %1675 = vmatmul.bf16.gmra.mxu3 %v3184_v7  ;;  %1724 = vmatmul.bf16.gmra.mxu0 %v3188_v8 }
  0xbe   : > { %v4286_v10 = vpop.f32.mrf.mxu2 }
  0xc0   : > { %v4288_v11 = vpop.f32.mrf.mxu3  ;;  %v4290_v12 = vpop.f32.mrf.mxu1 }
  0xc2   : > { %v4292_v13 = vpop.f32.mrf.mxu0 }
  0xc6   : > { %v4308_v25 = vpop.f32.mrf.mxu2 }
  0xc8   : > { %v4310_v26 = vpop.f32.mrf.mxu3  ;;  %v1543_v29 = vpop.f32.mrf.mxu1 }
  0xc9   : > { %v1544_v32 = vadd.f32 %v1543_v29, %v1494_v53  ;;  %v3637_v53 = vld [vmem:[%s3993_s24 + $0x64] sm:$0xf] }
  0xca   : > { %v1690_v33 = vpop.f32.mrf.mxu0  ;;  %v2984_v4 = vor.u32 %v3637_v53, %v2981_v58  ;;  %v3780_v53 = vld [vmem:[%s4831_s5 + $0x54] sm:$0xf0] }
  0xcb   : > { %1738 = vmatmul.bf16.vlgmr.msra.gmra.mxu1 %v2940_v27  ;;  %1787 = vmatmul.bf16.vlgmr.msra.gmra.mxu2 %v2944_v28  ;;  %v3779_v27 = vld [vmem:[%s4831_s5 + $0x54] sm:$0xf]  ;;  %v3537_v28 = vld [vmem:[%s4831_s5 + $0x58] sm:$0xf0]  ;;  %v3536_v58 = vor.u32 %v3780_v53, %v3535_v52 }
  0xcc   : > { %v3540_v29 = vor.u32 %v3779_v27, %v3537_v28  ;;  %v3056_v27 = vor.u32 %v3655_v17, %v3053_v18  ;;  %v3668_v52 = vld [vmem:[%s3993_s24 + $0x158] sm:$0xf0] }
  0xcd   : > { %1836 = vmatmul.bf16.vlgmr.msra.gmra.mxu3 %v2948_v30  ;;  %1885 = vmatmul.bf16.vlgmr.msra.gmra.mxu0 %v2952_v31  ;;  %v3645_v30 = vld [vmem:[%s3993_s24 + $0xa4] sm:$0xf]  ;;  %v3009_v31 = vld [vmem:[%s3993_s24 + $0xc4] sm:$0xf0]  ;;  %v3664_v53 = vld [vmem:[%s3993_s24 + $0x13c] sm:$0xf] }
  0xce   : > { %v1592_v37 = vpop.f32.mrf.mxu2  ;;  %2137 = vmatpush.bf16.msrb.mxu2 %v3540_v29  ;;  %2088 = vmatpush.bf16.msrb.mxu1 %v3536_v58  ;;  %v3089_v58 = vld [vmem:[%s3993_s24 + $0x15c] sm:$0xf0] }
  0xcf   : > { %v1593_v38 = vadd.f32 %v1592_v37, %v1544_v32  ;;  %v3651_v37 = vld [vmem:[%s3993_s24 + $0xd0] sm:$0xf0] }
  0xd0   : > { %v1641_v39 = vpop.f32.mrf.mxu3  ;;  %v1545_v40 = vpop.f32.mrf.mxu1 }
  0xd1   : > { %v1642_v41 = vadd.f32 %v1641_v39, %v1593_v38  ;;  %v1546_v42 = vadd.f32 %v1545_v40, %v1496_v57  ;;  %v2987_v57 = vld [vmem:[%s3993_s24 + $0x68] sm:$0xf] }
  0xd2   : > { %v1692_v43 = vpop.f32.mrf.mxu0  ;;  %v2988_v5 = vor.u32 %v3642_v59, %v2987_v57 }
  0xd3   : > { %v4326_v49 = vadd.f32 %v1690_v33, %v1642_v41  ;;  %v3015_v33 = vld [vmem:[%s3993_s24 + $0xa8] sm:$0xf]  ;;  %v3012_v41 = vor.u32 %v3645_v30, %v3009_v31 }
  0xd6   : > { %v1594_v60 = vpop.f32.mrf.mxu2 }
  0xd7   : > { %v1595_v61 = vadd.f32 %v1594_v60, %v1546_v42  ;;  %v3016_v42 = vor.u32 %v3650_v34, %v3015_v33  ;;  %v3527_v34 = vld [vmem:[%s4831_s5 + $0x40] sm:$0xf] }
  0xd8   : > { %v1643_v62 = vpop.f32.mrf.mxu3  ;;  %v1548_v1 = vpop.f32.mrf.mxu1  ;;  %v3528_v36 = vor.u32 %v3778_v35, %v3527_v34  ;;  %v3673_v34 = vld [vmem:[%s3993_s24 + $0x184] sm:$0xf]  ;;  %v3125_v35 = vld [vmem:[%s3993_s24 + $0x1a4] sm:$0xf0] }
  0xd9   : > { %v1644_v7 = vadd.f32 %v1643_v62, %v1595_v61  ;;  %v1549_v8 = vadd.f32 %v1548_v1, %v4284_v9  ;;  %v3529_v1 = vld [vmem:[%s4831_s5 + $0x48] sm:$0xf0] }
  0xda   : > { %v1695_v14 = vpop.f32.mrf.mxu0  ;;  %2089 = vmatpush.bf16.msrb.mxu1 %v3528_v36  ;;  %v3131_v36 = vld [vmem:[%s3993_s24 + $0x188] sm:$0xf] }
  0xdb   : > { %1743 = vmatmul.bf16.gmra.mxu1 %v2976_v63  ;;  %1792 = vmatmul.bf16.gmra.mxu2 %v2980_v0  ;;  %v4335_v15 = vadd.f32 %v1692_v43, %v1644_v7  ;;  %v3777_v0 = vld [vmem:[%s4831_s5 + $0x44] sm:$0xf]  ;;  %v3045_v7 = vld [vmem:[%s3993_s24 + $0x10c] sm:$0xf0] }
  0xdd   : > { %1841 = vmatmul.bf16.gmra.mxu3 %v2984_v4  ;;  %1890 = vmatmul.bf16.gmra.mxu0 %v2988_v5  ;;  %v3532_v4 = vor.u32 %v3777_v0, %v3529_v1  ;;  %v3654_v5 = vld [vmem:[%s3993_s24 + $0xec] sm:$0xf]  ;;  %v3092_v0 = vor.u32 %v3664_v53, %v3089_v58 }
  0xde   : > { %v1597_v9 = vpop.f32.mrf.mxu2 }
  0xdf   : > { %v1598_v19 = vadd.f32 %v1597_v9, %v1549_v8  ;;  %2138 = vmatpush.bf16.msrb.mxu2 %v3532_v4  ;;  %v3660_v9 = vld [vmem:[%s3993_s24 + $0x118] sm:$0xf0] }
  0xe0   : > { %v1646_v20 = vpop.f32.mrf.mxu3  ;;  %v1550_v21 = vpop.f32.mrf.mxu1 }
  0xe1   : > { %v1647_v22 = vadd.f32 %v1646_v20, %v1598_v19  ;;  %v1551_v23 = vadd.f32 %v1550_v21, %v4292_v13  ;;  %v3023_v13 = vld [vmem:[%s3993_s24 + $0xb0] sm:$0xf] }
  0xe2   : > { %v1697_v24 = vpop.f32.mrf.mxu0  ;;  %v3024_v45 = vor.u32 %v3651_v37, %v3023_v13 }
  0xe3   : > { %v4352_v32 = vadd.f32 %v1695_v14, %v1647_v22  ;;  %v3051_v14 = vld [vmem:[%s3993_s24 + $0xf0] sm:$0xf]  ;;  %v3048_v22 = vor.u32 %v3654_v5, %v3045_v7 }
  0xe6   : > { %v1599_v38 = vpop.f32.mrf.mxu2 }
  0xe7   : > { %v1600_v39 = vadd.f32 %v1599_v38, %v1551_v23  ;;  %v3052_v23 = vor.u32 %v3659_v16, %v3051_v14  ;;  %v3519_v14 = vld [vmem:[%s4831_s5 + $0x30] sm:$0xf]  ;;  %v3776_v16 = vld [vmem:[%s4831_s5 + $0x34] sm:$0xf0] }
  0xe8   : > { %v1648_v40 = vpop.f32.mrf.mxu3  ;;  %v1553_v43 = vpop.f32.mrf.mxu1  ;;  %v3520_v18 = vor.u32 %v3776_v16, %v3519_v14  ;;  %v3167_v14 = vld [vmem:[%s3993_s24 + $0x1d0] sm:$0xf]  ;;  %v3687_v16 = vld [vmem:[%s3993_s24 + $0x1f0] sm:$0xf0] }
  0xe9   : > { %v1649_v46 = vadd.f32 %v1648_v40, %v1600_v39  ;;  %v1554_v47 = vadd.f32 %v1553_v43, %v4262_v50  ;;  %v3521_v43 = vld [vmem:[%s4831_s5 + $0x38] sm:$0xf0] }
  0xea   : > { %v1700_v48 = vpop.f32.mrf.mxu0  ;;  %2090 = vmatpush.bf16.msrb.mxu1 %v3520_v18 }
  0xeb   : > { %1748 = vmatmul.bf16.gmra.mxu1 %v3012_v41  ;;  %1797 = vmatmul.bf16.gmra.mxu2 %v3016_v42  ;;  %v4361_v51 = vadd.f32 %v1697_v24, %v1649_v46  ;;  %v3775_v42 = vld [vmem:[%s4831_s5 + $0x34] sm:$0xf]  ;;  %v3081_v46 = vld [vmem:[%s3993_s24 + $0x154] sm:$0xf0] }
  0xed   : > { %1846 = vmatmul.bf16.gmra.mxu3 %v3020_v44  ;;  %1895 = vmatmul.bf16.gmra.mxu0 %v3024_v45  ;;  %v3524_v44 = vor.u32 %v3775_v42, %v3521_v43  ;;  %v3663_v45 = vld [vmem:[%s3993_s24 + $0x134] sm:$0xf] }
  0xee   : > { %v1602_v50 = vpop.f32.mrf.mxu2 }
  0xef   : > { %v1603_v57 = vadd.f32 %v1602_v50, %v1554_v47  ;;  %2139 = vmatpush.bf16.msrb.mxu2 %v3524_v44  ;;  %v3669_v50 = vld [vmem:[%s3993_s24 + $0x160] sm:$0xf0]  ;;  %v3511_v44 = vld [vmem:[%s4831_s5 + $0x20] sm:$0xf] }
  0xf0   : > { %v1651_v59 = vpop.f32.mrf.mxu3  ;;  %v1555_v60 = vpop.f32.mrf.mxu1 }
  0xf1   : > { %v1652_v61 = vadd.f32 %v1651_v59, %v1603_v57  ;;  %v1556_v62 = vadd.f32 %v1555_v60, %v4268_v56  ;;  %v3059_v56 = vld [vmem:[%s3993_s24 + $0xf8] sm:$0xf] }
  0xf2   : > { %v1702_v63 = vpop.f32.mrf.mxu0  ;;  %v3060_v28 = vor.u32 %v3660_v9, %v3059_v56 }
  0xf3   : > { %v4378_v8 = vadd.f32 %v1700_v48, %v1652_v61  ;;  %v3087_v48 = vld [vmem:[%s3993_s24 + $0x138] sm:$0xf]  ;;  %v3084_v61 = vor.u32 %v3663_v45, %v3081_v46  ;;  %v3774_v45 = vld [vmem:[%s4831_s5 + $0x24] sm:$0xf0] }
  0xf6   : > { %v1604_v19 = vpop.f32.mrf.mxu2 }
  0xf7   : > { %v1605_v20 = vadd.f32 %v1604_v19, %v1556_v62  ;;  %v3088_v62 = vor.u32 %v3668_v52, %v3087_v48  ;;  %v3512_v48 = vor.u32 %v3774_v45, %v3511_v44  ;;  %v3691_v44 = vld [vmem:[%s3993_s24 + $0x214] sm:$0xf]  ;;  %v3197_v45 = vld [vmem:[%s3993_s24 + $0x234] sm:$0xf0] }
  0xf8   : > { %v1653_v21 = vpop.f32.mrf.mxu3  ;;  %v1558_v24 = vpop.f32.mrf.mxu1 }
  0xf9   : > { %v1654_v29 = vadd.f32 %v1653_v21, %v1605_v20  ;;  %v1559_v30 = vadd.f32 %v1558_v24, %v4282_v6  ;;  %2091 = vmatpush.bf16.msrb.mxu1 %v3512_v48 }
  0xfa   : > { %v1705_v31 = vpop.f32.mrf.mxu0 }
  0xfb   : > { %1753 = vmatmul.bf16.gmra.mxu1 %v3048_v22  ;;  %1802 = vmatmul.bf16.gmra.mxu2 %v3052_v23  ;;  %v4387_v33 = vadd.f32 %v1702_v63, %v1654_v29  ;;  %v3773_v23 = vld [vmem:[%s4831_s5 + $0x24] sm:$0xf] }
  0xfd   : > { %1851 = vmatmul.bf16.gmra.mxu3 %v3056_v27  ;;  %1900 = vmatmul.bf16.gmra.mxu0 %v3060_v28  ;;  %v3672_v27 = vld [vmem:[%s3993_s24 + $0x17c] sm:$0xf]  ;;  %v3117_v28 = vld [vmem:[%s3993_s24 + $0x19c] sm:$0xf0] }
  0xfe   : > { %v1607_v6 = vpop.f32.mrf.mxu2 }
  0xff   : > { %v1608_v13 = vadd.f32 %v1607_v6, %v1559_v30  ;;  %v3123_v30 = vld [vmem:[%s3993_s24 + $0x180] sm:$0xf]  ;;  %v3678_v6 = vld [vmem:[%s3993_s24 + $0x1a8] sm:$0xf0] }
 0x100   : > { %v1656_v37 = vpop.f32.mrf.mxu3  ;;  %v1560_v38 = vpop.f32.mrf.mxu1  ;;  %v3132_v42 = vor.u32 %v3678_v6, %v3131_v36 }
 0x101   : > { %v1657_v39 = vadd.f32 %v1656_v37, %v1608_v13  ;;  %v1561_v40 = vadd.f32 %v1560_v38, %v4290_v12  ;;  %v3095_v12 = vld [vmem:[%s3993_s24 + $0x140] sm:$0xf]  ;;  %v3120_v38 = vor.u32 %v3672_v27, %v3117_v28  ;;  %v3772_v27 = vld [vmem:[%s4831_s5 + $0x14] sm:$0xf0] }
 0x102   : > { %v1707_v41 = vpop.f32.mrf.mxu0  ;;  %v3096_v1 = vor.u32 %v3669_v50, %v3095_v12 }
 0x103   : > { %v4404_v47 = vadd.f32 %v1705_v31, %v1657_v39  ;;  %v3677_v31 = vld [vmem:[%s3993_s24 + $0x1a0] sm:$0xf0] }
 0x104   : > { %v3124_v39 = vor.u32 %v3677_v31, %v3123_v30 }
 0x106   : > { %v1609_v57 = vpop.f32.mrf.mxu2 }
 0x107   : > { %v1610_v59 = vadd.f32 %v1609_v57, %v1561_v40 }
 0x108   : > { %v1658_v60 = vpop.f32.mrf.mxu3  ;;  %v1563_v63 = vpop.f32.mrf.mxu1 }
 0x109   : > { %v1659_v4 = vadd.f32 %v1658_v60, %v1610_v59  ;;  %v1564_v17 = vadd.f32 %v1563_v63, %v4264_v54  ;;  %v3513_v54 = vld [vmem:[%s4831_s5 + $0x28] sm:$0xf0]  ;;  %v3771_v59 = vld [vmem:[%s4831_s5 + $0x14] sm:$0xf] }
 0x10a   : > { %v1710_v5 = vpop.f32.mrf.mxu0  ;;  %v3516_v24 = vor.u32 %v3773_v23, %v3513_v54  ;;  %v3168_v23 = vor.u32 %v3687_v16, %v3167_v14 }
 0x10b   : > { %1758 = vmatmul.bf16.gmra.mxu1 %v3084_v61  ;;  %1807 = vmatmul.bf16.gmra.mxu2 %v3088_v62  ;;  %v4412_v7 = vadd.f32 %v1707_v41, %v1659_v4  ;;  %v3128_v41 = vor.u32 %v3673_v34, %v3125_v35  ;;  %v3681_v61 = vld [vmem:[%s3993_s24 + $0x1c4] sm:$0xf]  ;;  %v3153_v62 = vld [vmem:[%s3993_s24 + $0x1e4] sm:$0xf0]  ;;  %v3682_v4 = vld [vmem:[%s3993_s24 + $0x1cc] sm:$0xf] }
 0x10c   : > { %2140 = vmatpush.bf16.msrb.mxu2 %v3516_v24  ;;  %v3503_v24 = vld [vmem:[%s4831_s5 + $0x10] sm:$0xf] }
 0x10d   : > { %1856 = vmatmul.bf16.gmra.mxu3 %v3092_v0  ;;  %1905 = vmatmul.bf16.gmra.mxu0 %v3096_v1  ;;  %v3159_v0 = vld [vmem:[%s3993_s24 + $0x1c8] sm:$0xf]  ;;  %v3686_v1 = vld [vmem:[%s3993_s24 + $0x1e8] sm:$0xf0]  ;;  %v3504_v28 = vor.u32 %v3772_v27, %v3503_v24 }
 0x10e   : > { %v1612_v56 = vpop.f32.mrf.mxu2 }
 0x10f   : > { %v1613_v9 = vadd.f32 %v1612_v56, %v1564_v17  ;;  %v3156_v56 = vor.u32 %v3681_v61, %v3153_v62  ;;  %2092 = vmatpush.bf16.msrb.mxu1 %v3504_v28  ;;  %v3769_v61 = vld [vmem:[%s4831_s5 + $0x4] sm:$0xf]  ;;  %v3497_v62 = vld [vmem:[%s4831_s5 + $0x8] sm:$0xf0] }
 0x110   : > { %v1661_v19 = vpop.f32.mrf.mxu3  ;;  %v4421_v20 = vpop.f32.mrf.mxu1 }
 0x111   : > { %v1662_v21 = vadd.f32 %v1661_v19, %v1613_v9  ;;  %v3160_v9 = vor.u32 %v3686_v1, %v3159_v0  ;;  %v3500_v0 = vor.u32 %v3769_v61, %v3497_v62 }
 0x112   : > { %v4423_v22 = vpop.f32.mrf.mxu0 }
 0x113   : > { %v4433_v29 = vadd.f32 %v1710_v5, %v1662_v21  ;;  %v3161_v5 = vld [vmem:[%s3993_s24 + $0x1ec] sm:$0xf0] }
 0x114   : > { %v3164_v21 = vor.u32 %v3682_v4, %v3161_v5 }
 0x116   : > { %v4441_v13 = vpop.f32.mrf.mxu2 }
 0x118   : > { %v4443_v37 = vpop.f32.mrf.mxu3  ;;  %v1568_v40 = vpop.f32.mrf.mxu1 }
 0x119   : > { %v1569_v46 = vadd.f32 %v1568_v40, %v4286_v10  ;;  %v3505_v10 = vld [vmem:[%s4831_s5 + $0x18] sm:$0xf0]  ;;  %v3189_v40 = vld [vmem:[%s3993_s24 + $0x22c] sm:$0xf0] }
 0x11a   : > { %v1715_v43 = vpop.f32.mrf.mxu0  ;;  %v3508_v60 = vor.u32 %v3771_v59, %v3505_v10  ;;  %v3200_v59 = vor.u32 %v3691_v44, %v3197_v45 }
 0x11b   : > { %1763 = vmatmul.bf16.gmra.mxu1 %v3120_v38  ;;  %1812 = vmatmul.bf16.gmra.mxu2 %v3124_v39  ;;  %v3690_v39 = vld [vmem:[%s3993_s24 + $0x20c] sm:$0xf] }
 0x11c   : > { %2141 = vmatpush.bf16.msrb.mxu2 %v3508_v60 }
 0x11d   : > { %1861 = vmatmul.bf16.gmra.mxu3 %v3128_v41  ;;  %1910 = vmatmul.bf16.gmra.mxu0 %v3132_v42  ;;  %v3195_v42 = vld [vmem:[%s3993_s24 + $0x210] sm:$0xf] }
 0x11e   : > { %v1617_v52 = vpop.f32.mrf.mxu2 }
 0x11f   : > { %v1618_v53 = vadd.f32 %v1617_v52, %v1569_v46  ;;  %v3203_v46 = vld [vmem:[%s3993_s24 + $0x218] sm:$0xf] }
 0x120   : > { %v1666_v58 = vpop.f32.mrf.mxu3  ;;  %v4452_v12 = vpop.f32.mrf.mxu1  ;;  %2142 = vmatpush.bf16.msrb.mxu2 %v3500_v0 }
 0x121   : > { %v1667_v50 = vadd.f32 %v1666_v58, %v1618_v53  ;;  %v3192_v53 = vor.u32 %v3690_v39, %v3189_v40 }
 0x122   : > { %v4454_v57 = vpop.f32.mrf.mxu0 }
 0x123   : > { %v4464_v63 = vadd.f32 %v1715_v43, %v1667_v50  ;;  %v3695_v43 = vld [vmem:[%s3993_s24 + $0x230] sm:$0xf0] }
 0x124   : > { %v3196_v58 = vor.u32 %v3695_v43, %v3195_v42  ;;  %v4528_v43 = vld [vmem:[%s4829_s3] ss:$0 sm:$0xff] }
 0x126   : > { %v4472_v17 = vpop.f32.mrf.mxu2 }
 0x128   : > { %v4474_v18 = vpop.f32.mrf.mxu3  ;;  %v1573_v19 = vpop.f32.mrf.mxu1 }
 0x129   : > { %v1574_v30 = vadd.f32 %v1573_v19, %v4266_v55  ;;  %v3696_v55 = vld [vmem:[%s3993_s24 + $0x238] sm:$0xf0] }
 0x12a   : > { %v1720_v54 = vpop.f32.mrf.mxu0  ;;  %v3204_v10 = vor.u32 %v3696_v55, %v3203_v46 }
 0x12b   : > { %1768 = vmatmul.bf16.gmra.mxu1 %v3156_v56  ;;  %1817 = vmatmul.bf16.gmra.mxu2 %v3160_v9  ;;  %v3495_v56 = vld [vmem:[%s4831_s5] sm:$0xf]  ;;  %v3770_v9 = vld [vmem:[%s4831_s5 + $0x4] sm:$0xf0] }
 0x12d   : > { %1866 = vmatmul.bf16.gmra.mxu3 %v3164_v21  ;;  %1915 = vmatmul.bf16.gmra.mxu0 %v3168_v23  ;;  %v3496_v23 = vor.u32 %v3770_v9, %v3495_v56 }
 0x12e   : > { %v1622_v31 = vpop.f32.mrf.mxu2 }
 0x12f   : > { %v1623_v34 = vadd.f32 %v1622_v31, %v1574_v30  ;;  %2093 = vmatpush.bf16.msrb.mxu1 %v3496_v23 }
 0x130   : > { %v1671_v35 = vpop.f32.mrf.mxu3  ;;  %v4483_v36 = vpop.f32.mrf.mxu1 }
 0x131   : > { %v1672_v6 = vadd.f32 %v1671_v35, %v1623_v34 }
 0x132   : > { %v4485_v38 = vpop.f32.mrf.mxu0 }
 0x133   : > { %v4489_v41 = vadd.f32 %v1720_v54, %v1672_v6 }
 0x136   : > { %v4497_v48 = vpop.f32.mrf.mxu2 }
 0x138   : > { %v4499_v52 = vpop.f32.mrf.mxu3  ;;  %v1578_v50 = vpop.f32.mrf.mxu1 }
 0x139   : > { %v1579_v1 = vadd.f32 %v1578_v50, %v4288_v11 }
 0x13a   : > { %v1725_v60 = vpop.f32.mrf.mxu0 }
 0x13b   : > { %1773 = vmatmul.bf16.gmra.mxu1 %v3192_v53  ;;  %1822 = vmatmul.bf16.gmra.mxu2 %v3196_v58  ;;  %v4535_v58 = vld [vmem:[%s4830_s4] ss:$0 sm:$0xff] }
 0x13d   : > { %1871 = vmatmul.bf16.gmra.mxu3 %v3200_v59  ;;  %1920 = vmatmul.bf16.gmra.mxu0 %v3204_v10 }
 0x13e   : > { %v1627_v4 = vpop.f32.mrf.mxu2 }
 0x13f   : > { %v1628_v5 = vadd.f32 %v1627_v4, %v1579_v1 }
 0x140   : > { %v1676_v14 = vpop.f32.mrf.mxu3  ;;  %v4508_v16 = vpop.f32.mrf.mxu1 }
 0x141   : > { %v1677_v19 = vadd.f32 %v1676_v14, %v1628_v5 }
 0x142   : > { %v4516_v21 = vpop.f32.mrf.mxu0 }
 0x143   : > { %v4518_v11 = vadd.f32 %v1725_v60, %v1677_v19 }
 0x146   : > { %v4520_v54 = vpop.f32.mrf.mxu2 }
 0x148   : > { %v4522_v24 = vpop.f32.mrf.mxu3  ;;  %v1739_v27 = vpop.f32.mrf.mxu1 }
 0x149   : > { %v1740_v30 = vadd.f32 %v1739_v27, %v4326_v49 }
 0x14a   : > { %v1886_v28 = vpop.f32.mrf.mxu0 }
 0x14e   : > { %v1788_v31 = vpop.f32.mrf.mxu2 }
 0x14f   : > { %v1789_v34 = vadd.f32 %v1788_v31, %v1740_v30  ;;  %v3800_v30 = vld [vmem:[%s4834_s8 + $0x78] sm:$0xff] }
 0x150   : > { %v1837_v35 = vpop.f32.mrf.mxu3  ;;  %v1741_v6 = vpop.f32.mrf.mxu1  ;;  %2661 = vmatpush.bf16.msrb.mxu0 %v3800_v30 }
 0x151   : > { %v1838_v39 = vadd.f32 %v1837_v35, %v1789_v34  ;;  %v1742_v44 = vadd.f32 %v1741_v6, %v4335_v15 }
 0x152   : > { %v1888_v40 = vpop.f32.mrf.mxu0 }
 0x153   : > { %v1887_v42 = vadd.f32 %v1886_v28, %v1838_v39 }
 0x155   : > { %v1930_v49 = vmul.f32 %v4528_v43, %v1887_v42 }
 0x156   : > { %v1790_v45 = vpop.f32.mrf.mxu2 }
 0x157   : > { %v1791_v46 = vadd.f32 %v1790_v45, %v1742_v44  ;;  %v1950_v60 = vadd.f32 %v4535_v58, %v1930_v49 }
 0x158   : > { %v1839_v55 = vpop.f32.mrf.mxu3  ;;  %v1744_v53 = vpop.f32.mrf.mxu1 }
 0x159   : > { %v1840_v50 = vadd.f32 %v1839_v55, %v1791_v46  ;;  %v1745_v15 = vadd.f32 %v1744_v53, %v4352_v32  ;;  %v1966_v14 = vmax.f32 %v1950_v60, 0.0  ;;  %v3792_v32 = vld [vmem:[%s4834_s8 + $0x38] sm:$0xff] }
 0x15a   : > { %v1891_v59 = vpop.f32.mrf.mxu0  ;;  %2612 = vmatpush.bf16.msrb.mxu3 %v3792_v32 }
 0x15b   : > { %v1889_v10 = vadd.f32 %v1888_v40, %v1840_v50 }
 0x15d   : > { %v1931_v61 = vmul.f32 %v4528_v43, %v1889_v10 }
 0x15e   : > { %v1793_v62 = vpop.f32.mrf.mxu2 }
 0x15f   : > { %v1951_v0 = vadd.f32 %v4535_v58, %v1931_v61  ;;  %v1794_v1 = vadd.f32 %v1793_v62, %v1745_v15 }
 0x160   : > { %v1842_v4 = vpop.f32.mrf.mxu3  ;;  %v1746_v5 = vpop.f32.mrf.mxu1 }
 0x161   : > { %v1967_v56 = vmax.f32 %v1951_v0, 0.0  ;;  %v1843_v9 = vadd.f32 %v1842_v4, %v1794_v1  ;;  %v1747_v28 = vadd.f32 %v1746_v5, %v4361_v51  ;;  %v3799_v4 = vld [vmem:[%s4834_s8 + $0x70] sm:$0xff] }
 0x162   : > { %v1893_v19 = vpop.f32.mrf.mxu0  ;;  %2662 = vmatpush.bf16.msrb.mxu0 %v3799_v4 }
 0x163   : > { %v1982_v23 = vpack.c.bf16 %v1967_v56, %v1966_v14  ;;  %v1892_v27 = vadd.f32 %v1891_v59, %v1843_v9 }
 0x165   : > { %2094 = vmatmul.bf16.vlgmr.msrb.gmra.mxu1 %v1982_v23  ;;  %2143 = vmatmul.bf16.vlgmr.msrb.gmra.mxu2 %v1982_v23  ;;  %v1932_v39 = vmul.f32 %v4528_v43, %v1892_v27 }
 0x166   : > { %v1795_v31 = vpop.f32.mrf.mxu2 }
 0x167   : > { %v1796_v34 = vadd.f32 %v1795_v31, %v1747_v28  ;;  %v1952_v46 = vadd.f32 %v4535_v58, %v1932_v39 }
 0x168   : > { %v1844_v35 = vpop.f32.mrf.mxu3  ;;  %v1749_v6 = vpop.f32.mrf.mxu1 }
 0x169   : > { %v1845_v40 = vadd.f32 %v1844_v35, %v1796_v34  ;;  %v1750_v45 = vadd.f32 %v1749_v6, %v4378_v8  ;;  %v1968_v61 = vmax.f32 %v1952_v46, 0.0  ;;  %v3791_v8 = vld [vmem:[%s4834_s8 + $0x30] sm:$0xff] }
 0x16a   : > { %v1896_v51 = vpop.f32.mrf.mxu0  ;;  %2613 = vmatpush.bf16.msrb.mxu3 %v3791_v8 }
 0x16b   : > { %v1894_v42 = vadd.f32 %v1893_v19, %v1845_v40 }
 0x16d   : > { %v1933_v44 = vmul.f32 %v4528_v43, %v1894_v42 }
 0x16e   : > { %v1798_v55 = vpop.f32.mrf.mxu2 }
 0x16f   : > { %v1799_v53 = vadd.f32 %v1798_v55, %v1750_v45  ;;  %v1953_v50 = vadd.f32 %v4535_v58, %v1933_v44 }
 0x170   : > { %v1847_v49 = vpop.f32.mrf.mxu3  ;;  %v1751_v59 = vpop.f32.mrf.mxu1 }
 0x171   : > { %v1848_v10 = vadd.f32 %v1847_v49, %v1799_v53  ;;  %v1969_v15 = vmax.f32 %v1953_v50, 0.0  ;;  %v1752_v1 = vadd.f32 %v1751_v59, %v4387_v33  ;;  %v3798_v53 = vld [vmem:[%s4834_s8 + $0x68] sm:$0xff] }
 0x172   : > { %v1898_v60 = vpop.f32.mrf.mxu0  ;;  %2663 = vmatpush.bf16.msrb.mxu0 %v3798_v53 }
 0x173   : > { %v1983_v62 = vpack.c.bf16 %v1969_v15, %v1968_v61  ;;  %v1897_v0 = vadd.f32 %v1896_v51, %v1848_v10 }
 0x175   : > { %2099 = vmatmul.bf16.gmra.mxu1 %v1983_v62  ;;  %2148 = vmatmul.bf16.gmra.mxu2 %v1983_v62  ;;  %v1934_v19 = vmul.f32 %v4528_v43, %v1897_v0 }
 0x176   : > { %v1800_v5 = vpop.f32.mrf.mxu2 }
 0x177   : > { %v1801_v14 = vadd.f32 %v1800_v5, %v1752_v1  ;;  %v1954_v30 = vadd.f32 %v4535_v58, %v1934_v19 }
 0x178   : > { %v1849_v56 = vpop.f32.mrf.mxu3  ;;  %v1754_v9 = vpop.f32.mrf.mxu1 }
 0x179   : > { %v1850_v23 = vadd.f32 %v1849_v56, %v1801_v14  ;;  %v1755_v32 = vadd.f32 %v1754_v9, %v4404_v47  ;;  %v1970_v42 = vmax.f32 %v1954_v30, 0.0  ;;  %v3790_v47 = vld [vmem:[%s4834_s8 + $0x28] sm:$0xff] }
 0x17a   : > { %v1901_v33 = vpop.f32.mrf.mxu0  ;;  %2614 = vmatpush.bf16.msrb.mxu3 %v3790_v47 }
 0x17b   : > { %v1899_v27 = vadd.f32 %v1898_v60, %v1850_v23  ;;  %v1566_v60 = vadd.f32 %v4421_v20, %v4278_v2 }
 0x17d   : > { %v1935_v28 = vmul.f32 %v4528_v43, %v1899_v27  ;;  %v1615_v62 = vadd.f32 %v4441_v13, %v1566_v60 }
 0x17e   : > { %v1803_v31 = vpop.f32.mrf.mxu2 }
 0x17f   : > { %v1804_v34 = vadd.f32 %v1803_v31, %v1755_v32  ;;  %v1955_v6 = vadd.f32 %v4535_v58, %v1935_v28  ;;  %v1664_v14 = vadd.f32 %v4443_v37, %v1615_v62  ;;  %v3797_v37 = vld [vmem:[%s4834_s8 + $0x60] sm:$0xff] }
 0x180   : > { %v1852_v35 = vpop.f32.mrf.mxu3  ;;  %v1756_v39 = vpop.f32.mrf.mxu1  ;;  %2664 = vmatpush.bf16.msrb.mxu0 %v3797_v37 }
 0x181   : > { %v1853_v40 = vadd.f32 %v1852_v35, %v1804_v34  ;;  %v1971_v44 = vmax.f32 %v1955_v6, 0.0  ;;  %v1757_v55 = vadd.f32 %v1756_v39, %v4412_v7  ;;  %v1713_v13 = vadd.f32 %v4423_v22, %v1664_v14 }
 0x182   : > { %v1903_v51 = vpop.f32.mrf.mxu0  ;;  %v1571_v22 = vadd.f32 %v4452_v12, %v4308_v25 }
 0x183   : > { %v1984_v45 = vpack.c.bf16 %v1971_v44, %v1970_v42  ;;  %v1902_v46 = vadd.f32 %v1901_v33, %v1853_v40 }
 0x184   : > { %v1620_v42 = vadd.f32 %v4472_v17, %v1571_v22 }
 0x185   : > { %2104 = vmatmul.bf16.gmra.mxu1 %v1984_v45  ;;  %2153 = vmatmul.bf16.gmra.mxu2 %v1984_v45  ;;  %v1936_v7 = vmul.f32 %v4528_v43, %v1902_v46 }
 0x186   : > { %v1805_v49 = vpop.f32.mrf.mxu2  ;;  %v1669_v53 = vadd.f32 %v4474_v18, %v1620_v42  ;;  %v3796_v18 = vld [vmem:[%s4834_s8 + $0x58] sm:$0xff] }
 0x187   : > { %v1806_v50 = vadd.f32 %v1805_v49, %v1757_v55  ;;  %v1956_v4 = vadd.f32 %v4535_v58, %v1936_v7  ;;  %2665 = vmatpush.bf16.msrb.mxu0 %v3796_v18 }
 0x188   : > { %v1854_v59 = vpop.f32.mrf.mxu3  ;;  %v1759_v10 = vpop.f32.mrf.mxu1  ;;  %v1718_v17 = vadd.f32 %v4454_v57, %v1669_v53  ;;  %v1576_v57 = vadd.f32 %v4483_v36, %v4280_v3 }
 0x189   : > { %v1855_v61 = vadd.f32 %v1854_v59, %v1806_v50  ;;  %v1760_v8 = vadd.f32 %v1759_v10, %v4433_v29  ;;  %v1972_v33 = vmax.f32 %v1956_v4, 0.0  ;;  %v3789_v29 = vld [vmem:[%s4834_s8 + $0x20] sm:$0xff] }
 0x18a   : > { %v1906_v15 = vpop.f32.mrf.mxu0  ;;  %2615 = vmatpush.bf16.msrb.mxu3 %v3789_v29 }
 0x18b   : > { %v1904_v0 = vadd.f32 %v1903_v51, %v1855_v61 }
 0x18d   : > { %v1937_v1 = vmul.f32 %v4528_v43, %v1904_v0 }
 0x18e   : > { %v1808_v5 = vpop.f32.mrf.mxu2 }
 0x18f   : > { %v1809_v56 = vadd.f32 %v1808_v5, %v1760_v8  ;;  %v1957_v2 = vadd.f32 %v4535_v58, %v1937_v1 }
 0x190   : > { %v1857_v9 = vpop.f32.mrf.mxu3  ;;  %v1761_v20 = vpop.f32.mrf.mxu1 }
 0x191   : > { %v1858_v19 = vadd.f32 %v1857_v9, %v1809_v56  ;;  %v1973_v27 = vmax.f32 %v1957_v2, 0.0  ;;  %v1762_v30 = vadd.f32 %v1761_v20, %v1713_v13  ;;  %v1625_v56 = vadd.f32 %v4497_v48, %v1576_v57 }
 0x192   : > { %v1908_v23 = vpop.f32.mrf.mxu0 }
 0x193   : > { %v1985_v28 = vpack.c.bf16 %v1973_v27, %v1972_v33  ;;  %v1907_v32 = vadd.f32 %v1906_v15, %v1858_v19  ;;  %v3787_v33 = vld [vmem:[%s4834_s8 + $0x10] sm:$0xff]  ;;  %v1674_v3 = vadd.f32 %v4499_v52, %v1625_v56 }
 0x194   : > { %v3795_v52 = vld [vmem:[%s4834_s8 + $0x50] sm:$0xff] }
 0x195   : > { %2109 = vmatmul.bf16.gmra.mxu1 %v1985_v28  ;;  %2158 = vmatmul.bf16.gmra.mxu2 %v1985_v28  ;;  %v1938_v39 = vmul.f32 %v4528_v43, %v1907_v32 }
 0x196   : > { %v1810_v31 = vpop.f32.mrf.mxu2  ;;  %2666 = vmatpush.bf16.msrb.mxu0 %v3795_v52 }
 0x197   : > { %v1811_v34 = vadd.f32 %v1810_v31, %v1762_v30  ;;  %v1958_v55 = vadd.f32 %v4535_v58, %v1938_v39 }
 0x198   : > { %v1859_v35 = vpop.f32.mrf.mxu3  ;;  %v1764_v6 = vpop.f32.mrf.mxu1 }
 0x199   : > { %v1860_v40 = vadd.f32 %v1859_v35, %v1811_v34  ;;  %v1765_v46 = vadd.f32 %v1764_v6, %v4464_v63  ;;  %v1974_v10 = vmax.f32 %v1958_v55, 0.0  ;;  %v3788_v63 = vld [vmem:[%s4834_s8 + $0x18] sm:$0xff]  ;;  %v3786_v35 = vld [vmem:[%s4834_s8 + $0x8] sm:$0xff] }
 0x19a   : > { %v1911_v51 = vpop.f32.mrf.mxu0  ;;  %2616 = vmatpush.bf16.msrb.mxu3 %v3788_v63 }
 0x19b   : > { %v1909_v44 = vadd.f32 %v1908_v23, %v1860_v40 }
 0x19d   : > { %v1939_v45 = vmul.f32 %v4528_v43, %v1909_v44 }
 0x19e   : > { %v1813_v47 = vpop.f32.mrf.mxu2  ;;  %2617 = vmatpush.bf16.msrb.mxu3 %v3787_v33 }
 0x19f   : > { %v1814_v49 = vadd.f32 %v1813_v47, %v1765_v46  ;;  %v1959_v25 = vadd.f32 %v4535_v58, %v1939_v45 }
 0x1a0   : > { %v1862_v50 = vpop.f32.mrf.mxu3  ;;  %v1766_v12 = vpop.f32.mrf.mxu1 }
 0x1a1   : > { %v1863_v59 = vadd.f32 %v1862_v50, %v1814_v49  ;;  %v1975_v60 = vmax.f32 %v1959_v25, 0.0  ;;  %v1767_v62 = vadd.f32 %v1766_v12, %v1718_v17 }
 0x1a2   : > { %v1913_v7 = vpop.f32.mrf.mxu0  ;;  %2618 = vmatpush.bf16.msrb.mxu3 %v3786_v35 }
 0x1a3   : > { %v1986_v61 = vpack.c.bf16 %v1975_v60, %v1974_v10  ;;  %v1912_v15 = vadd.f32 %v1911_v51, %v1863_v59  ;;  %v1581_v51 = vadd.f32 %v4508_v16, %v4310_v26 }
 0x1a5   : > { %2114 = vmatmul.bf16.gmra.mxu1 %v1986_v61  ;;  %2163 = vmatmul.bf16.gmra.mxu2 %v1986_v61  ;;  %v1940_v5 = vmul.f32 %v4528_v43, %v1912_v15  ;;  %v1630_v45 = vadd.f32 %v4520_v54, %v1581_v51 }
 0x1a6   : > { %v1815_v0 = vpop.f32.mrf.mxu2 }
 0x1a7   : > { %v1816_v1 = vadd.f32 %v1815_v0, %v1767_v62  ;;  %v1960_v23 = vadd.f32 %v4535_v58, %v1940_v5  ;;  %v1679_v50 = vadd.f32 %v4522_v24, %v1630_v45  ;;  %v3794_v0 = vld [vmem:[%s4834_s8 + $0x48] sm:$0xff] }
 0x1a8   : > { %v1864_v8 = vpop.f32.mrf.mxu3  ;;  %v1769_v4 = vpop.f32.mrf.mxu1  ;;  %2667 = vmatpush.bf16.msrb.mxu0 %v3794_v0 }
 0x1a9   : > { %v1865_v14 = vadd.f32 %v1864_v8, %v1816_v1  ;;  %v1770_v19 = vadd.f32 %v1769_v4, %v4489_v41  ;;  %v1976_v30 = vmax.f32 %v1960_v23, 0.0  ;;  %v1723_v41 = vadd.f32 %v4485_v38, %v1674_v3 }
 0x1aa   : > { %v1916_v2 = vpop.f32.mrf.mxu0  ;;  %v1728_v54 = vadd.f32 %v4516_v21, %v1679_v50 }
 0x1ab   : > { %v1914_v9 = vadd.f32 %v1913_v7, %v1865_v14 }
 0x1ad   : > { %v1941_v20 = vmul.f32 %v4528_v43, %v1914_v9  ;;  %v3785_v9 = vld [vmem:[%s4834_s8] sm:$0xff] }
 0x1ae   : > { %v1818_v27 = vpop.f32.mrf.mxu2  ;;  %2619 = vmatpush.bf16.msrb.mxu3 %v3785_v9 }
 0x1af   : > { %v1819_v36 = vadd.f32 %v1818_v27, %v1770_v19  ;;  %v1961_v28 = vadd.f32 %v4535_v58, %v1941_v20  ;;  %v2222_v20 = vld [vmem:[%s4833_s7] sm:$0x3] }
 0x1b0   : > { %v1867_v13 = vpop.f32.mrf.mxu3  ;;  %v1771_v48 = vpop.f32.mrf.mxu1  ;;  %v4661_v33 = vperm.slane %v2222_v20, 0  ;;  %v2260_v27 = vld [vmem:[%s4658_s17] sm:$0xff] }
 0x1b1   : > { %v1868_v32 = vadd.f32 %v1867_v13, %v1819_v36  ;;  %v1977_v29 = vmax.f32 %v1961_v28, 0.0  ;;  %v1772_v34 = vadd.f32 %v1771_v48, %v1723_v41  ;;  %v2276_v13 = vunpack.c.l.bf16 %v2260_v27 }
 0x1b2   : > { %v1918_v6 = vpop.f32.mrf.mxu0  ;;  %v4667_v28 = vperm.slane %v2222_v20, 1 }
 0x1b3   : > { %v1987_v37 = vpack.c.bf16 %v1977_v29, %v1976_v30  ;;  %v1917_v31 = vadd.f32 %v1916_v2, %v1868_v32  ;;  %v3793_v2 = vld [vmem:[%s4834_s8 + $0x40] sm:$0xff]  ;;  %v2277_v30 = vunpack.c.h.bf16 %v2260_v27 }
 0x1b4   : > { %2668 = vmatpush.bf16.msrb.mxu0 %v3793_v2 }
 0x1b5   : > { %2119 = vmatmul.bf16.gmra.mxu1 %v1987_v37  ;;  %2168 = vmatmul.bf16.gmra.mxu2 %v1987_v37  ;;  %v1942_v42 = vmul.f32 %v4528_v43, %v1917_v31 }
 0x1b6   : > { %v1820_v22 = vpop.f32.mrf.mxu2 }
 0x1b7   : > { %v1821_v39 = vadd.f32 %v1820_v22, %v1772_v34  ;;  %v1962_v53 = vadd.f32 %v4535_v58, %v1942_v42  ;;  %v2261_v34 = vld [vmem:[%s4658_s17 + $0x8] sm:$0xff] }
 0x1b8   : > { %v1869_v40 = vpop.f32.mrf.mxu3  ;;  %v1774_v38 = vpop.f32.mrf.mxu1  ;;  %v2279_v42 = vunpack.c.h.bf16 %v2261_v34 }
 0x1b9   : > { %v1870_v44 = vadd.f32 %v1869_v40, %v1821_v39  ;;  %v1775_v47 = vadd.f32 %v1774_v38, %v4518_v11  ;;  %v1978_v10 = vmax.f32 %v1962_v53, 0.0  ;;  %v2278_v39 = vunpack.c.l.bf16 %v2261_v34 }
 0x1ba   : > { %v1921_v26 = vpop.f32.mrf.mxu0 }
 0x1bb   : > { %v1919_v46 = vadd.f32 %v1918_v6, %v1870_v44 }
 0x1bd   : > { %v1943_v55 = vmul.f32 %v4528_v43, %v1919_v46 }
 0x1be   : > { %v1823_v49 = vpop.f32.mrf.mxu2 }
 0x1bf   : > { %v1824_v25 = vadd.f32 %v1823_v49, %v1775_v47  ;;  %v1963_v59 = vadd.f32 %v4535_v58, %v1943_v55  ;;  %v2262_v47 = vld [vmem:[%s4658_s17 + $0x10] sm:$0xff] }
 0x1c0   : > { %v1872_v12 = vpop.f32.mrf.mxu3  ;;  %v1776_v7 = vpop.f32.mrf.mxu1  ;;  %v2280_v50 = vunpack.c.l.bf16 %v2262_v47 }
 0x1c1   : > { %v1873_v16 = vadd.f32 %v1872_v12, %v1824_v25  ;;  %v1979_v60 = vmax.f32 %v1963_v59, 0.0  ;;  %v1777_v15 = vadd.f32 %v1776_v7, %v1728_v54 }
 0x1c2   : > { %v1923_v1 = vpop.f32.mrf.mxu0 }
 0x1c3   : > { %v1988_v17 = vpack.c.bf16 %v1979_v60, %v1978_v10  ;;  %v1922_v61 = vadd.f32 %v1921_v26, %v1873_v16  ;;  %v2281_v10 = vunpack.c.h.bf16 %v2262_v47 }
 0x1c5   : > { %2124 = vmatmul.bf16.gmra.mxu1 %v1988_v17  ;;  %2173 = vmatmul.bf16.gmra.mxu2 %v1988_v17  ;;  %v1944_v24 = vmul.f32 %v4528_v43, %v1922_v61 }
 0x1c6   : > { %v1825_v11 = vpop.f32.mrf.mxu2 }
 0x1c7   : > { %v1826_v62 = vadd.f32 %v1825_v11, %v1777_v15  ;;  %v1964_v4 = vadd.f32 %v4535_v58, %v1944_v24 }
 0x1c8   : > { %v1874_v63 = vpop.f32.mrf.mxu3 }
 0x1c9   : > { %v1875_v18 = vadd.f32 %v1874_v63, %v1826_v62  ;;  %v1980_v5 = vmax.f32 %v1964_v4, 0.0  ;;  %v2263_v63 = vld [vmem:[%s4658_s17 + $0x18] sm:$0xff] }
 0x1ca   : > { %v2282_v4 = vunpack.c.l.bf16 %v2263_v63 }
 0x1cb   : > { %v1924_v8 = vadd.f32 %v1923_v1, %v1875_v18 }
 0x1cd   : > { %v1945_v21 = vmul.f32 %v4528_v43, %v1924_v8  ;;  %v2184_v43 = vld [vmem:[%s4832_s6] sm:$0x3] }
 0x1ce   : > { %v4664_v3 = vperm.slane %v2184_v43, 1 }
 0x1cf   : > { %v1965_v57 = vadd.f32 %v4535_v58, %v1945_v21  ;;  %v4650_v58 = vperm.slane %v2184_v43, 0 }
 0x1d1   : > { %v1981_v14 = vmax.f32 %v1965_v57, 0.0 }
 0x1d3   : > { %v1989_v56 = vpack.c.bf16 %v1981_v14, %v1980_v5 }
 0x1d5   : > { %2129 = vmatmul.bf16.gmra.mxu1 %v1989_v56  ;;  %2178 = vmatmul.bf16.gmra.mxu2 %v1989_v56  ;;  %v2283_v56 = vunpack.c.h.bf16 %v2263_v63 }
 0x1e2   : > { %v2095_v19 = vpop.f32.mrf.mxu1 }
 0x1e3   : > { %v2190_v23 = vmul.f32 %v4650_v58, %v2095_v19  ;;  %v2264_v19 = vld [vmem:[%s4658_s17 + $0x20] sm:$0xff] }
 0x1e5   : > { %v2228_v36 = vadd.f32 %v4661_v33, %v2190_v23 }
 0x1e7   : > { %v2308_v41 = vadd.f32 %v2276_v13, %v2228_v36  ;;  %v2284_v36 = vunpack.c.l.bf16 %v2264_v19 }
 0x1e8   : > { %v2144_v48 = vpop.f32.mrf.mxu2 }
 0x1e9   : > { %v2191_v32 = vmul.f32 %v4664_v3, %v2144_v48  ;;  %v2340_v35 = vmax.f32 %v2308_v41, 0.0  ;;  %v2285_v41 = vunpack.c.h.bf16 %v2264_v19 }
 0x1ea   : > { %v2097_v29 = vpop.f32.mrf.mxu1 }
 0x1eb   : > { %v2229_v37 = vadd.f32 %v4667_v28, %v2191_v32  ;;  %v2192_v31 = vmul.f32 %v4650_v58, %v2097_v29 }
 0x1ed   : > { %v2309_v52 = vadd.f32 %v2277_v30, %v2229_v37  ;;  %v2230_v22 = vadd.f32 %v4661_v33, %v2192_v31 }
 0x1ef   : > { %v2341_v6 = vmax.f32 %v2309_v52, 0.0  ;;  %v2310_v45 = vadd.f32 %v2278_v39, %v2230_v22 }
 0x1f0   : > { %v2146_v40 = vpop.f32.mrf.mxu2 }
 0x1f1   : > { %v2372_v38 = vpack.c.bf16 %v2341_v6, %v2340_v35  ;;  %v2193_v51 = vmul.f32 %v4664_v3, %v2146_v40  ;;  %v2342_v25 = vmax.f32 %v2310_v45, 0.0  ;;  %v2265_v40 = vld [vmem:[%s4658_s17 + $0x28] sm:$0xff] }
 0x1f2   : > { %v2100_v44 = vpop.f32.mrf.mxu1 }
 0x1f3   : > { %2388 = vst [vmem:[%s4677_s19] sm:$0xff] %v2372_v38  ;;  %v2231_v46 = vadd.f32 %v4667_v28, %v2193_v51  ;;  %v2194_v55 = vmul.f32 %v4650_v58, %v2100_v44  ;;  %v2452_v60 = vunpack.c.l.b16 %v2372_v38  ;;  %v2453_v7 = vunpack.c.h.b16 %v2372_v38 }
 0x1f5   : > { %v2311_v53 = vadd.f32 %v2279_v42, %v2231_v46  ;;  %v2232_v49 = vadd.f32 %v4661_v33, %v2194_v55  ;;  %v2286_v55 = vunpack.c.l.bf16 %v2265_v40 }
 0x1f7   : > { %v2343_v12 = vmax.f32 %v2311_v53, 0.0  ;;  %v2312_v54 = vadd.f32 %v2280_v50, %v2232_v49  ;;  %v2287_v50 = vunpack.c.h.bf16 %v2265_v40 }
 0x1f8   : > { %v2149_v59 = vpop.f32.mrf.mxu2 }
 0x1f9   : > { %v2373_v26 = vpack.c.bf16 %v2343_v12, %v2342_v25  ;;  %v2195_v16 = vmul.f32 %v4664_v3, %v2149_v59  ;;  %v2344_v1 = vmax.f32 %v2312_v54, 0.0 }
 0x1fa   : > { %v2102_v17 = vpop.f32.mrf.mxu1 }
 0x1fb   : > { %2389 = vst [vmem:[%s4677_s19 + $0x8] sm:$0xff] %v2373_v26  ;;  %v2454_v61 = vunpack.c.l.b16 %v2373_v26  ;;  %v2455_v15 = vunpack.c.h.b16 %v2373_v26  ;;  %v2233_v11 = vadd.f32 %v4667_v28, %v2195_v16  ;;  %v2196_v62 = vmul.f32 %v4650_v58, %v2102_v17  ;;  %v2266_v16 = vld [vmem:[%s4658_s17 + $0x30] sm:$0xff] }
 0x1fd   : > { %v2313_v24 = vadd.f32 %v2281_v10, %v2233_v11  ;;  %v2484_v18 = vpack.c.b16 %v2454_v61, %v2452_v60  ;;  %v2485_v0 = vpack.c.b16 %v2455_v15, %v2453_v7  ;;  %v2234_v21 = vadd.f32 %v4661_v33, %v2196_v62 }
 0x1fe   : > { %v2288_v7 = vunpack.c.l.bf16 %v2266_v16  ;;  %v2289_v62 = vunpack.c.h.bf16 %v2266_v16 }
 0x1ff   : > { %v2345_v8 = vmax.f32 %v2313_v24, 0.0  ;;  %2620 = vmatmul.bf16.vlgmr.msrb.gmra.mxu3 %v2484_v18  ;;  %2669 = vmatmul.bf16.vlgmr.msrb.gmra.mxu0 %v2485_v0  ;;  %v2314_v2 = vadd.f32 %v2282_v4, %v2234_v21 }
 0x200   : > { %v2151_v57 = vpop.f32.mrf.mxu2 }
 0x201   : > { %v2374_v5 = vpack.c.bf16 %v2345_v8, %v2344_v1  ;;  %v2197_v14 = vmul.f32 %v4664_v3, %v2151_v57  ;;  %v2346_v13 = vmax.f32 %v2314_v2, 0.0  ;;  %v2267_v57 = vld [vmem:[%s4658_s17 + $0x38] sm:$0xff] }
 0x202   : > { %v2105_v9 = vpop.f32.mrf.mxu1 }
 0x203   : > { %2390 = vst [vmem:[%s4677_s19 + $0x10] sm:$0xff] %v2374_v5  ;;  %v2235_v43 = vadd.f32 %v4667_v28, %v2197_v14  ;;  %v2198_v20 = vmul.f32 %v4650_v58, %v2105_v9  ;;  %v2456_v34 = vunpack.c.l.b16 %v2374_v5  ;;  %v2457_v52 = vunpack.c.h.b16 %v2374_v5 }
 0x205   : > { %v2315_v23 = vadd.f32 %v2283_v56, %v2235_v43  ;;  %v2236_v27 = vadd.f32 %v4661_v33, %v2198_v20  ;;  %v2290_v20 = vunpack.c.l.bf16 %v2267_v57 }
 0x207   : > { %v2347_v48 = vmax.f32 %v2315_v23, 0.0  ;;  %v2316_v37 = vadd.f32 %v2284_v36, %v2236_v27  ;;  %v2291_v36 = vunpack.c.h.bf16 %v2267_v57 }
 0x208   : > { %v2154_v32 = vpop.f32.mrf.mxu2 }
 0x209   : > { %v2375_v30 = vpack.c.bf16 %v2347_v48, %v2346_v13  ;;  %v2199_v29 = vmul.f32 %v4664_v3, %v2154_v32  ;;  %v2348_v44 = vmax.f32 %v2316_v37, 0.0 }
 0x20a   : > { %v2107_v31 = vpop.f32.mrf.mxu1 }
 0x20b   : > { %2391 = vst [vmem:[%s4677_s19 + $0x18] sm:$0xff] %v2375_v30  ;;  %v2237_v35 = vadd.f32 %v4667_v28, %v2199_v29  ;;  %v2200_v6 = vmul.f32 %v4650_v58, %v2107_v31  ;;  %v2458_v22 = vunpack.c.l.b16 %v2375_v30  ;;  %v2459_v39 = vunpack.c.h.b16 %v2375_v30  ;;  %v2268_v29 = vld [vmem:[%s4658_s17 + $0x40] sm:$0xff] }
 0x20c   : > { %v2292_v31 = vunpack.c.l.bf16 %v2268_v29 }
 0x20d   : > { %v2317_v38 = vadd.f32 %v2285_v41, %v2237_v35  ;;  %v2486_v51 = vpack.c.b16 %v2458_v22, %v2456_v34  ;;  %v2487_v42 = vpack.c.b16 %v2459_v39, %v2457_v52  ;;  %v2238_v46 = vadd.f32 %v4661_v33, %v2200_v6 }
 0x20e   : > { %v2293_v39 = vunpack.c.h.bf16 %v2268_v29 }
 0x20f   : > { %v2349_v45 = vmax.f32 %v2317_v38, 0.0  ;;  %2625 = vmatmul.bf16.gmra.mxu3 %v2486_v51  ;;  %2674 = vmatmul.bf16.gmra.mxu0 %v2487_v42  ;;  %v2318_v12 = vadd.f32 %v2286_v55, %v2238_v46 }
 0x210   : > { %v2156_v47 = vpop.f32.mrf.mxu2 }
 0x211   : > { %v2376_v53 = vpack.c.bf16 %v2349_v45, %v2348_v44  ;;  %v2201_v49 = vmul.f32 %v4664_v3, %v2156_v47  ;;  %v2350_v54 = vmax.f32 %v2318_v12, 0.0  ;;  %v2269_v47 = vld [vmem:[%s4658_s17 + $0x48] sm:$0xff] }
 0x212   : > { %v2110_v25 = vpop.f32.mrf.mxu1 }
 0x213   : > { %2392 = vst [vmem:[%s4677_s19 + $0x20] sm:$0xff] %v2376_v53  ;;  %v2239_v59 = vadd.f32 %v4667_v28, %v2201_v49  ;;  %v2202_v26 = vmul.f32 %v4650_v58, %v2110_v25  ;;  %v2460_v18 = vunpack.c.l.b16 %v2376_v53  ;;  %v2461_v0 = vunpack.c.h.b16 %v2376_v53 }
 0x215   : > { %v2319_v10 = vadd.f32 %v2287_v50, %v2239_v59  ;;  %v2240_v60 = vadd.f32 %v4661_v33, %v2202_v26  ;;  %v2294_v26 = vunpack.c.l.bf16 %v2269_v47 }
 0x217   : > { %v2351_v17 = vmax.f32 %v2319_v10, 0.0  ;;  %v2320_v63 = vadd.f32 %v2288_v7, %v2240_v60  ;;  %v2295_v7 = vunpack.c.h.bf16 %v2269_v47 }
 0x218   : > { %v2159_v61 = vpop.f32.mrf.mxu2 }
 0x219   : > { %v2377_v15 = vpack.c.bf16 %v2351_v17, %v2350_v54  ;;  %v2203_v11 = vmul.f32 %v4664_v3, %v2159_v61  ;;  %v2352_v9 = vmax.f32 %v2320_v63, 0.0 }
 0x21a   : > { %v2112_v24 = vpop.f32.mrf.mxu1 }
 0x21b   : > { %2393 = vst [vmem:[%s4677_s19 + $0x28] sm:$0xff] %v2377_v15  ;;  %v2241_v1 = vadd.f32 %v4667_v28, %v2203_v11  ;;  %v2204_v8 = vmul.f32 %v4650_v58, %v2112_v24  ;;  %v2462_v21 = vunpack.c.l.b16 %v2377_v15  ;;  %v2463_v4 = vunpack.c.h.b16 %v2377_v15  ;;  %v2270_v11 = vld [vmem:[%s4658_s17 + $0x50] sm:$0xff] }
 0x21c   : > { %v2296_v24 = vunpack.c.l.bf16 %v2270_v11 }
 0x21d   : > { %v2321_v5 = vadd.f32 %v2289_v62, %v2241_v1  ;;  %v2488_v14 = vpack.c.b16 %v2462_v21, %v2460_v18  ;;  %v2489_v56 = vpack.c.b16 %v2463_v4, %v2461_v0  ;;  %v2242_v43 = vadd.f32 %v4661_v33, %v2204_v8 }
 0x21e   : > { %v2297_v4 = vunpack.c.h.bf16 %v2270_v11 }
 0x21f   : > { %v2353_v2 = vmax.f32 %v2321_v5, 0.0  ;;  %2630 = vmatmul.bf16.gmra.mxu3 %v2488_v14  ;;  %2679 = vmatmul.bf16.gmra.mxu0 %v2489_v56  ;;  %v2322_v48 = vadd.f32 %v2290_v20, %v2242_v43 }
 0x220   : > { %v2161_v19 = vpop.f32.mrf.mxu2 }
 0x221   : > { %v2378_v23 = vpack.c.bf16 %v2353_v2, %v2352_v9  ;;  %v2205_v27 = vmul.f32 %v4664_v3, %v2161_v19  ;;  %v2354_v34 = vmax.f32 %v2322_v48, 0.0  ;;  %v2271_v19 = vld [vmem:[%s4658_s17 + $0x58] sm:$0xff] }
 0x222   : > { %v2115_v13 = vpop.f32.mrf.mxu1 }
 0x223   : > { %2394 = vst [vmem:[%s4677_s19 + $0x30] sm:$0xff] %v2378_v23  ;;  %v2243_v32 = vadd.f32 %v4667_v28, %v2205_v27  ;;  %v2206_v30 = vmul.f32 %v4650_v58, %v2115_v13  ;;  %v2464_v51 = vunpack.c.l.b16 %v2378_v23  ;;  %v2465_v42 = vunpack.c.h.b16 %v2378_v23 }
 0x225   : > { %v2323_v41 = vadd.f32 %v2291_v36, %v2243_v32  ;;  %v2244_v37 = vadd.f32 %v4661_v33, %v2206_v30  ;;  %v2298_v30 = vunpack.c.l.bf16 %v2271_v19 }
 0x227   : > { %v2355_v52 = vmax.f32 %v2323_v41, 0.0  ;;  %v2324_v40 = vadd.f32 %v2292_v31, %v2244_v37  ;;  %v2299_v31 = vunpack.c.h.bf16 %v2271_v19 }
 0x228   : > { %v2164_v35 = vpop.f32.mrf.mxu2 }
 0x229   : > { %v2379_v6 = vpack.c.bf16 %v2355_v52, %v2354_v34  ;;  %v2207_v22 = vmul.f32 %v4664_v3, %v2164_v35  ;;  %v2356_v25 = vmax.f32 %v2324_v40, 0.0 }
 0x22a   : > { %v2117_v38 = vpop.f32.mrf.mxu1 }
 0x22b   : > { %2395 = vst [vmem:[%s4677_s19 + $0x38] sm:$0xff] %v2379_v6  ;;  %v2245_v44 = vadd.f32 %v4667_v28, %v2207_v22  ;;  %v2208_v45 = vmul.f32 %v4650_v58, %v2117_v38  ;;  %v2466_v46 = vunpack.c.l.b16 %v2379_v6  ;;  %v2467_v55 = vunpack.c.h.b16 %v2379_v6  ;;  %v2272_v22 = vld [vmem:[%s4658_s17 + $0x60] sm:$0xff] }
 0x22c   : > { %v2300_v38 = vunpack.c.l.bf16 %v2272_v22 }
 0x22d   : > { %v2325_v53 = vadd.f32 %v2293_v39, %v2245_v44  ;;  %v2490_v49 = vpack.c.b16 %v2466_v46, %v2464_v51  ;;  %v2491_v50 = vpack.c.b16 %v2467_v55, %v2465_v42  ;;  %v2246_v59 = vadd.f32 %v4661_v33, %v2208_v45 }
 0x22e   : > { %v2301_v55 = vunpack.c.h.bf16 %v2272_v22 }
 0x22f   : > { %v2357_v12 = vmax.f32 %v2325_v53, 0.0  ;;  %2635 = vmatmul.bf16.gmra.mxu3 %v2490_v49  ;;  %2684 = vmatmul.bf16.gmra.mxu0 %v2491_v50  ;;  %v2326_v17 = vadd.f32 %v2294_v26, %v2246_v59 }
 0x230   : > { %v2166_v16 = vpop.f32.mrf.mxu2 }
 0x231   : > { %v2380_v10 = vpack.c.bf16 %v2357_v12, %v2356_v25  ;;  %v2209_v60 = vmul.f32 %v4664_v3, %v2166_v16  ;;  %v2358_v18 = vmax.f32 %v2326_v17, 0.0  ;;  %v2273_v16 = vld [vmem:[%s4658_s17 + $0x68] sm:$0xff] }
 0x232   : > { %v2120_v54 = vpop.f32.mrf.mxu1 }
 0x233   : > { %2396 = vst [vmem:[%s4677_s19 + $0x40] sm:$0xff] %v2380_v10  ;;  %v2247_v61 = vadd.f32 %v4667_v28, %v2209_v60  ;;  %v2210_v15 = vmul.f32 %v4650_v58, %v2120_v54  ;;  %v2468_v14 = vunpack.c.l.b16 %v2380_v10  ;;  %v2469_v56 = vunpack.c.h.b16 %v2380_v10 }
 0x235   : > { %v2327_v62 = vadd.f32 %v2295_v7, %v2247_v61  ;;  %v2248_v63 = vadd.f32 %v4661_v33, %v2210_v15  ;;  %v2302_v15 = vunpack.c.l.bf16 %v2273_v16 }
 0x237   : > { %v2359_v0 = vmax.f32 %v2327_v62, 0.0  ;;  %v2328_v57 = vadd.f32 %v2296_v24, %v2248_v63  ;;  %v2303_v24 = vunpack.c.h.bf16 %v2273_v16  ;;  %v4776_v16 = vld [vmem:[%s4836_s10] ss:$0 sm:$0xff] }
 0x238   : > { %v2169_v1 = vpop.f32.mrf.mxu2 }
 0x239   : > { %v2381_v8 = vpack.c.bf16 %v2359_v0, %v2358_v18  ;;  %v2211_v21 = vmul.f32 %v4664_v3, %v2169_v1  ;;  %v2360_v13 = vmax.f32 %v2328_v57, 0.0 }
 0x23a   : > { %v2122_v5 = vpop.f32.mrf.mxu1 }
 0x23b   : > { %2397 = vst [vmem:[%s4677_s19 + $0x48] sm:$0xff] %v2381_v8  ;;  %v2249_v9 = vadd.f32 %v4667_v28, %v2211_v21  ;;  %v2212_v2 = vmul.f32 %v4650_v58, %v2122_v5  ;;  %v2470_v43 = vunpack.c.l.b16 %v2381_v8  ;;  %v2471_v20 = vunpack.c.h.b16 %v2381_v8  ;;  %v2274_v21 = vld [vmem:[%s4658_s17 + $0x70] sm:$0xff] }
 0x23c   : > { %v2304_v5 = vunpack.c.l.bf16 %v2274_v21 }
 0x23d   : > { %v2329_v23 = vadd.f32 %v2297_v4, %v2249_v9  ;;  %v2492_v27 = vpack.c.b16 %v2470_v43, %v2468_v14  ;;  %v2493_v36 = vpack.c.b16 %v2471_v20, %v2469_v56  ;;  %v2250_v32 = vadd.f32 %v4661_v33, %v2212_v2 }
 0x23e   : > { %v2305_v20 = vunpack.c.h.bf16 %v2274_v21 }
 0x23f   : > { %v2361_v48 = vmax.f32 %v2329_v23, 0.0  ;;  %2640 = vmatmul.bf16.gmra.mxu3 %v2492_v27  ;;  %2689 = vmatmul.bf16.gmra.mxu0 %v2493_v36  ;;  %v2330_v52 = vadd.f32 %v2298_v30, %v2250_v32 }
 0x240   : > { %v2171_v29 = vpop.f32.mrf.mxu2 }
 0x241   : > { %v2382_v41 = vpack.c.bf16 %v2361_v48, %v2360_v13  ;;  %v2213_v37 = vmul.f32 %v4664_v3, %v2171_v29  ;;  %v2362_v51 = vmax.f32 %v2330_v52, 0.0  ;;  %v2275_v29 = vld [vmem:[%s4658_s17 + $0x78] sm:$0xff] }
 0x242   : > { %v2125_v34 = vpop.f32.mrf.mxu1 }
 0x243   : > { %2398 = vst [vmem:[%s4677_s19 + $0x50] sm:$0xff] %v2382_v41  ;;  %v2251_v35 = vadd.f32 %v4667_v28, %v2213_v37  ;;  %v2214_v6 = vmul.f32 %v4650_v58, %v2125_v34  ;;  %v2472_v49 = vunpack.c.l.b16 %v2382_v41  ;;  %v2473_v50 = vunpack.c.h.b16 %v2382_v41 }
 0x245   : > { %v2331_v39 = vadd.f32 %v2299_v31, %v2251_v35  ;;  %v2252_v40 = vadd.f32 %v4661_v33, %v2214_v6  ;;  %v2306_v6 = vunpack.c.l.bf16 %v2275_v29 }
 0x247   : > { %v2363_v42 = vmax.f32 %v2331_v39, 0.0  ;;  %v2332_v47 = vadd.f32 %v2300_v38, %v2252_v40 }
 0x248   : > { %v2174_v44 = vpop.f32.mrf.mxu2 }
 0x249   : > { %v2383_v45 = vpack.c.bf16 %v2363_v42, %v2362_v51  ;;  %v2215_v46 = vmul.f32 %v4664_v3, %v2174_v44  ;;  %v2364_v54 = vmax.f32 %v2332_v47, 0.0 }
 0x24a   : > { %v2127_v53 = vpop.f32.mrf.mxu1 }
 0x24b   : > { %2399 = vst [vmem:[%s4677_s19 + $0x58] sm:$0xff] %v2383_v45  ;;  %v2253_v25 = vadd.f32 %v4667_v28, %v2215_v46  ;;  %v2216_v12 = vmul.f32 %v4650_v58, %v2127_v53  ;;  %v2474_v59 = vunpack.c.l.b16 %v2383_v45  ;;  %v2475_v26 = vunpack.c.h.b16 %v2383_v45 }
 0x24d   : > { %v2333_v10 = vadd.f32 %v2301_v55, %v2253_v25  ;;  %v2494_v60 = vpack.c.b16 %v2474_v59, %v2472_v49  ;;  %v2495_v7 = vpack.c.b16 %v2475_v26, %v2473_v50  ;;  %v2254_v61 = vadd.f32 %v4661_v33, %v2216_v12 }
 0x24f   : > { %v2365_v17 = vmax.f32 %v2333_v10, 0.0  ;;  %2645 = vmatmul.bf16.gmra.mxu3 %v2494_v60  ;;  %2694 = vmatmul.bf16.gmra.mxu0 %v2495_v7  ;;  %v2334_v0 = vadd.f32 %v2302_v15, %v2254_v61 }
 0x250   : > { %v2176_v11 = vpop.f32.mrf.mxu2 }
 0x251   : > { %v2384_v62 = vpack.c.bf16 %v2365_v17, %v2364_v54  ;;  %v2217_v63 = vmul.f32 %v4664_v3, %v2176_v11  ;;  %v2366_v14 = vmax.f32 %v2334_v0, 0.0 }
 0x252   : > { %v2130_v18 = vpop.f32.mrf.mxu1 }
 0x253   : > { %2400 = vst [vmem:[%s4677_s19 + $0x60] sm:$0xff] %v2384_v62  ;;  %v2255_v1 = vadd.f32 %v4667_v28, %v2217_v63  ;;  %v2218_v8 = vmul.f32 %v4650_v58, %v2130_v18  ;;  %v2476_v27 = vunpack.c.l.b16 %v2384_v62  ;;  %v2477_v36 = vunpack.c.h.b16 %v2384_v62 }
 0x255   : > { %v2335_v4 = vadd.f32 %v2303_v24, %v2255_v1  ;;  %v2256_v57 = vadd.f32 %v4661_v33, %v2218_v8 }
 0x257   : > { %v2367_v56 = vmax.f32 %v2335_v4, 0.0  ;;  %v2336_v19 = vadd.f32 %v2304_v5, %v2256_v57 }
 0x258   : > { %v2179_v9 = vpop.f32.mrf.mxu2 }
 0x259   : > { %v2385_v2 = vpack.c.bf16 %v2367_v56, %v2366_v14  ;;  %v2219_v43 = vmul.f32 %v4664_v3, %v2179_v9  ;;  %v2368_v34 = vmax.f32 %v2336_v19, 0.0 }
 0x25a   : > { %v2132_v23 = vpop.f32.mrf.mxu1 }
 0x25b   : > { %2401 = vst [vmem:[%s4677_s19 + $0x68] sm:$0xff] %v2385_v2  ;;  %v2257_v13 = vadd.f32 %v4667_v28, %v2219_v43  ;;  %v2220_v48 = vmul.f32 %v4650_v58, %v2132_v23  ;;  %v2478_v32 = vunpack.c.l.b16 %v2385_v2  ;;  %v2479_v30 = vunpack.c.h.b16 %v2385_v2 }
 0x25c   : > { %v2307_v58 = vunpack.c.h.bf16 %v2275_v29 }
 0x25d   : > { %v2337_v41 = vadd.f32 %v2305_v20, %v2257_v13  ;;  %v2496_v37 = vpack.c.b16 %v2478_v32, %v2476_v27  ;;  %v2497_v31 = vpack.c.b16 %v2479_v30, %v2477_v36  ;;  %v2258_v35 = vadd.f32 %v4661_v33, %v2220_v48 }
 0x25f   : > { %v2369_v52 = vmax.f32 %v2337_v41, 0.0  ;;  %2650 = vmatmul.bf16.gmra.mxu3 %v2496_v37  ;;  %2699 = vmatmul.bf16.gmra.mxu0 %v2497_v31  ;;  %v2338_v38 = vadd.f32 %v2306_v6, %v2258_v35 }
 0x260   : > { %v2181_v22 = vpop.f32.mrf.mxu2 }
 0x261   : > { %v2386_v39 = vpack.c.bf16 %v2369_v52, %v2368_v34  ;;  %v2221_v40 = vmul.f32 %v4664_v3, %v2181_v22  ;;  %v2370_v44 = vmax.f32 %v2338_v38, 0.0 }
 0x263   : > { %2402 = vst [vmem:[%s4677_s19 + $0x70] sm:$0xff] %v2386_v39  ;;  %v2259_v51 = vadd.f32 %v4667_v28, %v2221_v40  ;;  %v2480_v55 = vunpack.c.l.b16 %v2386_v39  ;;  %v2481_v33 = vunpack.c.h.b16 %v2386_v39  ;;  %v4770_v28 = vld [vmem:[%s4835_s9] ss:$0 sm:$0xff] }
 0x265   : > { %v2339_v42 = vadd.f32 %v2307_v58, %v2259_v51 }
 0x267   : > { %v2371_v45 = vmax.f32 %v2339_v42, 0.0 }
 0x269   : > { %v2387_v46 = vpack.c.bf16 %v2371_v45, %v2370_v44 }
 0x26b   : > { %2403 = vst [vmem:[%s4677_s19 + $0x78] sm:$0xff] %v2387_v46  ;;  %v2482_v47 = vunpack.c.l.b16 %v2387_v46  ;;  %v2483_v53 = vunpack.c.h.b16 %v2387_v46 }
 0x26d   : > { %v2498_v49 = vpack.c.b16 %v2482_v47, %v2480_v55  ;;  %v2499_v50 = vpack.c.b16 %v2483_v53, %v2481_v33 }
 0x26f   : > { %2655 = vmatmul.bf16.gmra.mxu3 %v2498_v49  ;;  %2704 = vmatmul.bf16.gmra.mxu0 %v2499_v50 }
 0x27c   : > { %v2670_v3 = vpop.f32.mrf.mxu0 }
 0x282   : > { %v2621_v25 = vpop.f32.mrf.mxu3 }
 0x283   : > { %v2671_v59 = vadd.f32 %v2670_v3, %v2621_v25 }
 0x284   : > { %v2672_v12 = vpop.f32.mrf.mxu0 }
 0x285   : > { %v2714_v26 = vmul.f32 %v4770_v28, %v2671_v59 }
 0x287   : > { %v2734_v54 = vadd.f32 %v4776_v16, %v2714_v26 }
 0x289   : > { %v2750_v15 = vmax.f32 %v2734_v54, 0.0 }
 0x28a   : > { %v2623_v10 = vpop.f32.mrf.mxu3 }
 0x28b   : > { %v2673_v60 = vadd.f32 %v2672_v12, %v2623_v10 }
 0x28c   : > { %v2675_v7 = vpop.f32.mrf.mxu0 }
 0x28d   : > { %v2715_v17 = vmul.f32 %v4770_v28, %v2673_v60 }
 0x28f   : > { %v2735_v61 = vadd.f32 %v4776_v16, %v2715_v17 }
 0x291   : > { %v2751_v11 = vmax.f32 %v2735_v61, 0.0 }
 0x292   : > { %v2626_v62 = vpop.f32.mrf.mxu3 }
 0x293   : > { %v3804_v63 = vpack.c.bf16 %v2751_v11, %v2750_v15  ;;  %v2676_v18 = vadd.f32 %v2675_v7, %v2626_v62 }
 0x294   : > { %v2677_v24 = vpop.f32.mrf.mxu0 }
 0x295   : > { %3805 = vst [vmem:[%s4785_s30] sm:$0xff] %v3804_v63   ;;  %v2716_v0 = vmul.f32 %v4770_v28, %v2676_v18 }
 0x297   : > { %v2736_v4 = vadd.f32 %v4776_v16, %v2716_v0 }
 0x299   : > { %v2752_v14 = vmax.f32 %v2736_v4, 0.0 }
 0x29a   : > { %v2628_v1 = vpop.f32.mrf.mxu3 }
 0x29b   : > { %v2678_v8 = vadd.f32 %v2677_v24, %v2628_v1 }
 0x29c   : > { %v2680_v21 = vpop.f32.mrf.mxu0 }
 0x29d   : > { %v2717_v57 = vmul.f32 %v4770_v28, %v2678_v8 }
 0x29f   : > { %v2737_v5 = vadd.f32 %v4776_v16, %v2717_v57 }
 0x2a1   : > { %v2753_v56 = vmax.f32 %v2737_v5, 0.0 }
 0x2a2   : > { %v2631_v9 = vpop.f32.mrf.mxu3 }
 0x2a3   : > { %v3809_v2 = vpack.c.bf16 %v2753_v56, %v2752_v14  ;;  %v2681_v20 = vadd.f32 %v2680_v21, %v2631_v9 }
 0x2a4   : > { %v2682_v43 = vpop.f32.mrf.mxu0 }
 0x2a5   : > { %3841 = vst [vmem:[%s4785_s30 + $0x8] sm:$0xff] %v3809_v2   ;;  %v2718_v19 = vmul.f32 %v4770_v28, %v2681_v20 }
 0x2a7   : > { %v2738_v13 = vadd.f32 %v4776_v16, %v2718_v19 }
 0x2a9   : > { %v2754_v30 = vmax.f32 %v2738_v13, 0.0 }
 0x2aa   : > { %v2633_v23 = vpop.f32.mrf.mxu3 }
 0x2ab   : > { %v2683_v27 = vadd.f32 %v2682_v43, %v2633_v23 }
 0x2ac   : > { %v2685_v36 = vpop.f32.mrf.mxu0 }
 0x2ad   : > { %v2719_v48 = vmul.f32 %v4770_v28, %v2683_v27 }
 0x2af   : > { %v2739_v32 = vadd.f32 %v4776_v16, %v2719_v48 }
 0x2b1   : > { %v2755_v29 = vmax.f32 %v2739_v32, 0.0 }
 0x2b2   : > { %v2636_v41 = vpop.f32.mrf.mxu3 }
 0x2b3   : > { %v3814_v37 = vpack.c.bf16 %v2755_v29, %v2754_v30  ;;  %v2686_v34 = vadd.f32 %v2685_v36, %v2636_v41 }
 0x2b4   : > { %v2687_v31 = vpop.f32.mrf.mxu0 }
 0x2b5   : > { %3842 = vst [vmem:[%s4785_s30 + $0x10] sm:$0xff] %v3814_v37   ;;  %v2720_v52 = vmul.f32 %v4770_v28, %v2686_v34 }
 0x2b7   : > { %v2740_v39 = vadd.f32 %v4776_v16, %v2720_v52 }
 0x2b9   : > { %v2756_v38 = vmax.f32 %v2740_v39, 0.0 }
 0x2ba   : > { %v2638_v35 = vpop.f32.mrf.mxu3 }
 0x2bb   : > { %v2688_v6 = vadd.f32 %v2687_v31, %v2638_v35 }
 0x2bc   : > { %v2690_v22 = vpop.f32.mrf.mxu0 }
 0x2bd   : > { %v2721_v40 = vmul.f32 %v4770_v28, %v2688_v6 }
 0x2bf   : > { %v2741_v58 = vadd.f32 %v4776_v16, %v2721_v40 }
 0x2c1   : > { %v2757_v51 = vmax.f32 %v2741_v58, 0.0 }
 0x2c2   : > { %v2641_v42 = vpop.f32.mrf.mxu3 }
 0x2c3   : > { %v3819_v44 = vpack.c.bf16 %v2757_v51, %v2756_v38  ;;  %v2691_v46 = vadd.f32 %v2690_v22, %v2641_v42 }
 0x2c4   : > { %v2692_v45 = vpop.f32.mrf.mxu0 }
 0x2c5   : > { %3843 = vst [vmem:[%s4785_s30 + $0x18] sm:$0xff] %v3819_v44   ;;  %v2722_v55 = vmul.f32 %v4770_v28, %v2691_v46 }
 0x2c7   : > { %v2742_v49 = vadd.f32 %v4776_v16, %v2722_v55 }
 0x2c9   : > { %v2758_v25 = vmax.f32 %v2742_v49, 0.0 }
 0x2ca   : > { %v2643_v47 = vpop.f32.mrf.mxu3 }
 0x2cb   : > { %v2693_v33 = vadd.f32 %v2692_v45, %v2643_v47 }
 0x2cc   : > { %v2695_v53 = vpop.f32.mrf.mxu0 }
 0x2cd   : > { %v2723_v50 = vmul.f32 %v4770_v28, %v2693_v33 }
 0x2cf   : > { %v2743_v3 = vadd.f32 %v4776_v16, %v2723_v50 }
 0x2d1   : > { %v2759_v12 = vmax.f32 %v2743_v3, 0.0 }
 0x2d2   : > { %v2646_v59 = vpop.f32.mrf.mxu3 }
 0x2d3   : > { %v3824_v26 = vpack.c.bf16 %v2759_v12, %v2758_v25  ;;  %v2696_v60 = vadd.f32 %v2695_v53, %v2646_v59 }
 0x2d4   : > { %v2697_v10 = vpop.f32.mrf.mxu0 }
 0x2d5   : > { %3844 = vst [vmem:[%s4785_s30 + $0x20] sm:$0xff] %v3824_v26   ;;  %v2724_v7 = vmul.f32 %v4770_v28, %v2696_v60 }
 0x2d7   : > { %v2744_v15 = vadd.f32 %v4776_v16, %v2724_v7 }
 0x2d9   : > { %v2760_v63 = vmax.f32 %v2744_v15, 0.0 }
 0x2da   : > { %v2648_v54 = vpop.f32.mrf.mxu3 }
 0x2db   : > { %v2698_v17 = vadd.f32 %v2697_v10, %v2648_v54 }
 0x2dc   : > { %v2700_v61 = vpop.f32.mrf.mxu0 }
 0x2dd   : > { %v2725_v11 = vmul.f32 %v4770_v28, %v2698_v17 }
 0x2df   : > { %v2745_v62 = vadd.f32 %v4776_v16, %v2725_v11 }
 0x2e1   : > { %v2761_v24 = vmax.f32 %v2745_v62, 0.0 }
 0x2e2   : > { %v2651_v18 = vpop.f32.mrf.mxu3 }
 0x2e3   : > { %v3829_v0 = vpack.c.bf16 %v2761_v24, %v2760_v63  ;;  %v2701_v1 = vadd.f32 %v2700_v61, %v2651_v18 }
 0x2e4   : > { %v2702_v8 = vpop.f32.mrf.mxu0 }
 0x2e5   : > { %3845 = vst [vmem:[%s4785_s30 + $0x28] sm:$0xff] %v3829_v0   ;;  %v2726_v21 = vmul.f32 %v4770_v28, %v2701_v1 }
 0x2e7   : > { %v2746_v5 = vadd.f32 %v4776_v16, %v2726_v21 }
 0x2e9   : > { %v2762_v2 = vmax.f32 %v2746_v5, 0.0 }
 0x2ea   : > { %v2653_v4 = vpop.f32.mrf.mxu3 }
 0x2eb   : > { %v2703_v57 = vadd.f32 %v2702_v8, %v2653_v4 }
 0x2ec   : > { %v2705_v9 = vpop.f32.mrf.mxu0 }
 0x2ed   : > { %v2727_v14 = vmul.f32 %v4770_v28, %v2703_v57 }
 0x2ef   : > { %v2747_v56 = vadd.f32 %v4776_v16, %v2727_v14 }
 0x2f1   : > { %v2763_v43 = vmax.f32 %v2747_v56, 0.0 }
 0x2f2   : > { %v2656_v20 = vpop.f32.mrf.mxu3 }
 0x2f3   : > { %v3834_v19 = vpack.c.bf16 %v2763_v43, %v2762_v2  ;;  %v2706_v23 = vadd.f32 %v2705_v9, %v2656_v20 }
 0x2f4   : > { %v2707_v36 = vpop.f32.mrf.mxu0 }
 0x2f5   : > { %3846 = vst [vmem:[%s4785_s30 + $0x30] sm:$0xff] %v3834_v19   ;;  %v2728_v27 = vmul.f32 %v4770_v28, %v2706_v23 }
 0x2f7   : > { %v2748_v32 = vadd.f32 %v4776_v16, %v2728_v27 }
 0x2f9   : > { %v2764_v41 = vmax.f32 %v2748_v32, 0.0 }
 0x2fa   : > { %v2658_v13 = vpop.f32.mrf.mxu3 }
 0x2fb   : > { %v2708_v48 = vadd.f32 %v2707_v36, %v2658_v13 }
 0x2fd   : > { %v2729_v30 = vmul.f32 %v4770_v28, %v2708_v48 }
 0x2ff   : > { %v2749_v29 = vadd.f32 %v4776_v16, %v2729_v30 }
 0x301   : > { %v2765_v37 = vmax.f32 %v2749_v29, 0.0 }
 0x303   : > { %v3839_v31 = vpack.c.bf16 %v2765_v37, %v2764_v41 }
 0x305   : > { %3847 = vst [vmem:[%s4785_s30 + $0x38] sm:$0xff] %v3839_v31  }
 0x306 PF: > { %s23_s21 = sadd.s32 1, %s3891_s21  }
 0x307   : > { %p20_p4 = scmp.ge.s32.totalorder %s23_s21, 4  }
 0x309   :  { %22 = sbr.rel (!%p20_p4) target bundleno = 1 (0x1), region = 109 }

// kernel: rgbd_encoder_forward.19
= control target key start
LH: loop header
LB: loop body
LE: loop exit
PB: predicated region body
PF: predicated region fallthrough
CT: control target
= control target key end

     0   :  { %s4234_s2 = inlined_call_operand.vmem [shape: bf16[1152,128], index: 2, kind: input, shape index: {}]   ;;  %s4235_s0 = inlined_call_operand.vmem [shape: bf16[64,1152], index: 0, kind: input, shape index: {}]   ;;  %s4236_s3 = inlined_call_operand.vmem [shape: f32[1,128], index: 3, kind: input, shape index: {}]   ;;  %s4237_s4 = inlined_call_operand.vmem [shape: f32[1,128], index: 4, kind: input, shape index: {}]   ;;  %s4238_s5 = inlined_call_operand.vmem [shape: bf16[128,512], index: 5, kind: input, shape index: {}]   ;;  %s4239_s8 = inlined_call_operand.vmem [shape: bf16[512,128], index: 8, kind: input, shape index: {}]   ;;  %s4240_s6 = inlined_call_operand.vmem [shape: f32[1,512], index: 6, kind: input, shape index: {}]   ;;  %s4241_s7 = inlined_call_operand.vmem [shape: f32[1,512], index: 7, kind: input, shape index: {}]   ;;  %s4242_s1 = inlined_call_operand.vmem [shape: bf16[64,512], index: 1, kind: input, shape index: {}]   ;;  %s4243_s11 = inlined_call_operand.vmem [shape: bf16[64,512], index: 11, kind: output, shape index: {0}]   ;;  %s4244_s9 = inlined_call_operand.vmem [shape: f32[1,128], index: 9, kind: input, shape index: {}]   ;;  %s4245_s10 = inlined_call_operand.vmem [shape: f32[1,128], index: 10, kind: input, shape index: {}]   ;;  %s4246_s12 = inlined_call_operand.vmem [shape: bf16[64,128], index: 12, kind: output, shape index: {1}]  }
   0x1   :  { %v2912_v0 = vld [vmem:[%s4234_s2 + $0x38] sm:$0xff]  ;;  %v2911_v1 = vld [vmem:[%s4234_s2 + $0x30] sm:$0xff]  ;;  %v2910_v6 = vld [vmem:[%s4234_s2 + $0x28] sm:$0xff] }
   0x2   :  { %840 = vmatpush.bf16.msra.mxu0 %v2912_v0  ;;  %3064 = vmatpush.bf16.msra.mxu1 %v2912_v0  ;;  %v2928_v2 = vld [vmem:[%s4234_s2 + $0xb8] sm:$0xff]  ;;  %v2927_v4 = vld [vmem:[%s4234_s2 + $0xb0] sm:$0xff]  ;;  %v2926_v7 = vld [vmem:[%s4234_s2 + $0xa8] sm:$0xff] }
   0x3   :  { %v2936_v3 = vld [vmem:[%s4234_s2 + $0xf8] sm:$0xff]  ;;  %898 = vmatpush.bf16.msra.mxu2 %v2928_v2  ;;  %v2935_v5 = vld [vmem:[%s4234_s2 + $0xf0] sm:$0xff]  ;;  %v2934_v8 = vld [vmem:[%s4234_s2 + $0xe8] sm:$0xff] }
   0x4   :  { %927 = vmatpush.bf16.msra.mxu3 %v2936_v3  ;;  %v2909_v9 = vld [vmem:[%s4234_s2 + $0x20] sm:$0xff]  ;;  %v2908_v12 = vld [vmem:[%s4234_s2 + $0x18] sm:$0xff]  ;;  %v2907_v15 = vld [vmem:[%s4234_s2 + $0x10] sm:$0xff] }
   0x5   :  { %v2925_v10 = vld [vmem:[%s4234_s2 + $0xa0] sm:$0xff]  ;;  %v2924_v13 = vld [vmem:[%s4234_s2 + $0x98] sm:$0xff]  ;;  %v2923_v16 = vld [vmem:[%s4234_s2 + $0x90] sm:$0xff] }
   0x6   :  { %841 = vmatpush.bf16.msra.mxu0 %v2911_v1  ;;  %3065 = vmatpush.bf16.msra.mxu1 %v2911_v1  ;;  %v2933_v11 = vld [vmem:[%s4234_s2 + $0xe0] sm:$0xff]  ;;  %v2932_v14 = vld [vmem:[%s4234_s2 + $0xd8] sm:$0xff]  ;;  %v2931_v17 = vld [vmem:[%s4234_s2 + $0xd0] sm:$0xff] }
   0x7   :  { %899 = vmatpush.bf16.msra.mxu2 %v2927_v4  ;;  %v2906_v18 = vld [vmem:[%s4234_s2 + $0x8] sm:$0xff]  ;;  %v2905_v21 = vld [vmem:[%s4234_s2] sm:$0xff]  ;;  %v2255_v24 = vld [vmem:[%s4235_s0 + $0x90] sm:$0xf] }
   0x8   :  { %928 = vmatpush.bf16.msra.mxu3 %v2935_v5  ;;  %v2922_v19 = vld [vmem:[%s4234_s2 + $0x88] sm:$0xff]  ;;  %v2183_v22 = vld [vmem:[%s4235_s0] sm:$0xf]  ;;  %v2873_v23 = vld [vmem:[%s4235_s0 + $0x20] sm:$0xf0] }
   0x9   :  { %v2930_v20 = vld [vmem:[%s4234_s2 + $0xc8] sm:$0xff]  ;;  %v2891_v25 = vld [vmem:[%s4235_s0 + $0xb0] sm:$0xf0]  ;;  %v2920_v26 = vld [vmem:[%s4234_s2 + $0x78] sm:$0xff]  ;;  %v2184_v31 = vor.u32 %v2873_v23, %v2183_v22 }
   0xa   :  { %842 = vmatpush.bf16.msra.mxu0 %v2910_v6  ;;  %3066 = vmatpush.bf16.msra.mxu1 %v2910_v6  ;;  %v2944_v27 = vld [vmem:[%s4234_s2 + $0x138] sm:$0xff]  ;;  %v2921_v28 = vld [vmem:[%s4234_s2 + $0x80] sm:$0xff]  ;;  %v2191_v30 = vld [vmem:[%s4235_s0 + $0x8] sm:$0xf]  ;;  %v2256_v32 = vor.u32 %v2891_v25, %v2255_v24 }
   0xb   :  { %900 = vmatpush.bf16.msra.mxu2 %v2926_v7  ;;  %v2929_v29 = vld [vmem:[%s4234_s2 + $0xc0] sm:$0xff]  ;;  %v2874_v33 = vld [vmem:[%s4235_s0 + $0x28] sm:$0xf0]  ;;  %v2193_v35 = vld [vmem:[%s4235_s0 + $0x2c] sm:$0xf0] }
   0xc   :  { %929 = vmatpush.bf16.msra.mxu3 %v2934_v8  ;;  %v2870_v34 = vld [vmem:[%s4235_s0 + $0xc] sm:$0xf]  ;;  %v2960_v36 = vld [vmem:[%s4234_s2 + $0x1b8] sm:$0xff]  ;;  %v2919_v38 = vld [vmem:[%s4234_s2 + $0x70] sm:$0xff]  ;;  %v2192_v40 = vor.u32 %v2874_v33, %v2191_v30 }
   0xd   :  { %v2968_v37 = vld [vmem:[%s4234_s2 + $0x1f8] sm:$0xff]  ;;  %v2943_v39 = vld [vmem:[%s4234_s2 + $0x130] sm:$0xff]  ;;  %v2196_v41 = vor.u32 %v2870_v34, %v2193_v35  ;;  %v2918_v43 = vld [vmem:[%s4234_s2 + $0x68] sm:$0xff] }
   0xe   :  { %843 = vmatpush.bf16.msra.mxu0 %v2909_v9  ;;  %3067 = vmatpush.bf16.msra.mxu1 %v2909_v9  ;;  %v2959_v42 = vld [vmem:[%s4234_s2 + $0x1b0] sm:$0xff]  ;;  %v2942_v44 = vld [vmem:[%s4234_s2 + $0x128] sm:$0xff]  ;;  %v2917_v48 = vld [vmem:[%s4234_s2 + $0x60] sm:$0xff] }
   0xf   :  { %901 = vmatpush.bf16.msra.mxu2 %v2925_v10  ;;  %v2967_v45 = vld [vmem:[%s4234_s2 + $0x1f0] sm:$0xff]  ;;  %v2958_v46 = vld [vmem:[%s4234_s2 + $0x1a8] sm:$0xff]  ;;  %v2941_v49 = vld [vmem:[%s4234_s2 + $0x120] sm:$0xff] }
  0x10   :  { %930 = vmatpush.bf16.msra.mxu3 %v2933_v11  ;;  %v2966_v47 = vld [vmem:[%s4234_s2 + $0x1e8] sm:$0xff]  ;;  %v2291_v52 = vld [vmem:[%s4235_s0 + $0xd8] sm:$0xf]  ;;  %v2900_v53 = vld [vmem:[%s4235_s0 + $0xf8] sm:$0xf0] }
  0x11   :  { %v2219_v50 = vld [vmem:[%s4235_s0 + $0x48] sm:$0xf]  ;;  %v2882_v51 = vld [vmem:[%s4235_s0 + $0x68] sm:$0xf0]  ;;  %v2916_v54 = vld [vmem:[%s4234_s2 + $0x58] sm:$0xff]  ;;  %v2292_v58 = vor.u32 %v2900_v53, %v2291_v52 }
  0x12   :  { %844 = vmatpush.bf16.msra.mxu0 %v2908_v12  ;;  %3068 = vmatpush.bf16.msra.mxu1 %v2908_v12  ;;  %v2940_v55 = vld [vmem:[%s4234_s2 + $0x118] sm:$0xff]  ;;  %v2227_v56 = vld [vmem:[%s4235_s0 + $0x50] sm:$0xf]  ;;  %v2220_v57 = vor.u32 %v2882_v51, %v2219_v50  ;;  %v2883_v59 = vld [vmem:[%s4235_s0 + $0x70] sm:$0xf0] }
  0x13   :  { %902 = vmatpush.bf16.msra.mxu2 %v2924_v13  ;;  %v2879_v60 = vld [vmem:[%s4235_s0 + $0x54] sm:$0xf]  ;;  %v2229_v61 = vld [vmem:[%s4235_s0 + $0x74] sm:$0xf0]  ;;  %v2228_v0 = vor.u32 %v2883_v59, %v2227_v56  ;;  %v2957_v2 = vld [vmem:[%s4234_s2 + $0x1a0] sm:$0xff] }
  0x14   :  { %931 = vmatpush.bf16.msra.mxu3 %v2932_v14  ;;  %v2915_v62 = vld [vmem:[%s4234_s2 + $0x50] sm:$0xff]  ;;  %v2232_v1 = vor.u32 %v2879_v60, %v2229_v61  ;;  %v2914_v3 = vld [vmem:[%s4234_s2 + $0x48] sm:$0xff]  ;;  %v2965_v5 = vld [vmem:[%s4234_s2 + $0x1e0] sm:$0xff] }
  0x15   :  { %v2939_v63 = vld [vmem:[%s4234_s2 + $0x110] sm:$0xff]  ;;  %v2938_v4 = vld [vmem:[%s4234_s2 + $0x108] sm:$0xff]  ;;  %v2956_v6 = vld [vmem:[%s4234_s2 + $0x198] sm:$0xff] }
  0x16   :  { %845 = vmatpush.bf16.msra.mxu0 %v2907_v15  ;;  %3069 = vmatpush.bf16.msra.mxu1 %v2907_v15  ;;  %v2964_v7 = vld [vmem:[%s4234_s2 + $0x1d8] sm:$0xff]  ;;  %v2913_v8 = vld [vmem:[%s4234_s2 + $0x40] sm:$0xff]  ;;  %v2185_v13 = vld [vmem:[%s4235_s0 + $0x24] sm:$0xf0] }
  0x17   :  { %903 = vmatpush.bf16.msra.mxu2 %v2923_v16  ;;  %v2937_v9 = vld [vmem:[%s4234_s2 + $0x100] sm:$0xff]  ;;  %v2952_v10 = vld [vmem:[%s4234_s2 + $0x178] sm:$0xff]  ;;  %v2199_v14 = vld [vmem:[%s4235_s0 + $0x10] sm:$0xf] }
  0x18   :  { %932 = vmatpush.bf16.msra.mxu3 %v2931_v17  ;;  %v2976_v11 = vld [vmem:[%s4234_s2 + $0x238] sm:$0xff]  ;;  %v2869_v12 = vld [vmem:[%s4235_s0 + $0x4] sm:$0xf]  ;;  %v2875_v15 = vld [vmem:[%s4235_s0 + $0x30] sm:$0xf0] }
  0x19   :  { %v2951_v16 = vld [vmem:[%s4234_s2 + $0x170] sm:$0xff]  ;;  %v2888_v22 = vld [vmem:[%s4235_s0 + $0x9c] sm:$0xf]  ;;  %v2265_v23 = vld [vmem:[%s4235_s0 + $0xbc] sm:$0xf0] }
  0x1a   :  { %846 = vmatpush.bf16.msra.mxu0 %v2906_v18  ;;  %3070 = vmatpush.bf16.msra.mxu1 %v2906_v18  ;;  %v2975_v17 = vld [vmem:[%s4234_s2 + $0x230] sm:$0xff]  ;;  %v2188_v18 = vor.u32 %v2869_v12, %v2185_v13  ;;  %v2950_v24 = vld [vmem:[%s4234_s2 + $0x168] sm:$0xff]  ;;  %v2949_v30 = vld [vmem:[%s4234_s2 + $0x160] sm:$0xff] }
  0x1b   :  { %904 = vmatpush.bf16.msra.mxu2 %v2922_v19  ;;  %v2200_v19 = vor.u32 %v2875_v15, %v2199_v14  ;;  %v2962_v33 = vld [vmem:[%s4234_s2 + $0x1c8] sm:$0xff]  ;;  %v2948_v34 = vld [vmem:[%s4234_s2 + $0x158] sm:$0xff]  ;;  %v2961_v52 = vld [vmem:[%s4234_s2 + $0x1c0] sm:$0xff] }
  0x1c   :  { %933 = vmatpush.bf16.msra.mxu3 %v2930_v20  ;;  %v2263_v20 = vld [vmem:[%s4235_s0 + $0x98] sm:$0xf]  ;;  %v2878_v35 = vld [vmem:[%s4235_s0 + $0x4c] sm:$0xf]  ;;  %v2887_v56 = vld [vmem:[%s4235_s0 + $0x94] sm:$0xf] }
  0x1d   :  { %v2946_v51 = vld [vmem:[%s4234_s2 + $0x148] sm:$0xff]  ;;  %v2893_v59 = vld [vmem:[%s4235_s0 + $0xc0] sm:$0xf0] }
  0x1e   :  { %847 = vmatpush.bf16.msra.mxu0 %v2905_v21  ;;  %3071 = vmatpush.bf16.msra.mxu1 %v2905_v21  ;;  %v2892_v21 = vld [vmem:[%s4235_s0 + $0xb8] sm:$0xf0]  ;;  %v2970_v53 = vld [vmem:[%s4234_s2 + $0x208] sm:$0xff]  ;;  %v2881_v12 = vld [vmem:[%s4235_s0 + $0x64] sm:$0xf] }
  0x1f   :  { %905 = vmatpush.bf16.msra.mxu2 %v2921_v28  ;;  %v2264_v25 = vor.u32 %v2892_v21, %v2263_v20  ;;  %v2955_v28 = vld [vmem:[%s4234_s2 + $0x190] sm:$0xff]  ;;  %v2245_v13 = vld [vmem:[%s4235_s0 + $0x84] sm:$0xf0] }
  0x20   :  { %934 = vmatpush.bf16.msra.mxu3 %v2929_v29  ;;  %v2963_v29 = vld [vmem:[%s4234_s2 + $0x1d0] sm:$0xff]  ;;  %v2248_v15 = vor.u32 %v2881_v12, %v2245_v13 }
  0x21   :  { %848 = vmatmul.bf16.vlgmr.msra.gmra.mxu0 %v2184_v31  ;;  %858 = vmatmul.bf16.vlgmr.msra.gmra.mxu1 %v2256_v32  ;;  %v2973_v31 = vld [vmem:[%s4234_s2 + $0x220] sm:$0xff]  ;;  %v2954_v32 = vld [vmem:[%s4234_s2 + $0x188] sm:$0xff] }
  0x22   :  { %869 = vmatpush.bf16.msrb.mxu1 %v2920_v26  ;;  %956 = vmatpush.bf16.msrb.mxu0 %v2944_v27  ;;  %v2268_v26 = vor.u32 %v2888_v22, %v2265_v23  ;;  %v2974_v27 = vld [vmem:[%s4234_s2 + $0x228] sm:$0xff] }
  0x23   :  { %1014 = vmatpush.bf16.msrb.mxu2 %v2960_v36  ;;  %935 = vmatmul.bf16.vlgmr.msra.gmra.mxu3 %v2196_v41  ;;  %v2972_v36 = vld [vmem:[%s4234_s2 + $0x218] sm:$0xff]  ;;  %v2279_v22 = vld [vmem:[%s4235_s0 + $0xa8] sm:$0xf]  ;;  %v2894_v23 = vld [vmem:[%s4235_s0 + $0xc8] sm:$0xf0] }
  0x24   :  { %1043 = vmatpush.bf16.msrb.mxu3 %v2968_v37  ;;  %906 = vmatmul.bf16.vlgmr.msra.gmra.mxu2 %v2192_v40  ;;  %v2221_v37 = vld [vmem:[%s4235_s0 + $0x6c] sm:$0xf0] }
  0x25   :  { %v2947_v40 = vld [vmem:[%s4234_s2 + $0x150] sm:$0xff]  ;;  %v2224_v41 = vor.u32 %v2878_v35, %v2221_v37  ;;  %v2317_v37 = vld [vmem:[%s4235_s0 + $0x114] sm:$0xf0] }
  0x26   :  { %870 = vmatpush.bf16.msrb.mxu1 %v2919_v38  ;;  %957 = vmatpush.bf16.msrb.mxu0 %v2943_v39  ;;  %v2235_v38 = vld [vmem:[%s4235_s0 + $0x58] sm:$0xf]  ;;  %v2884_v39 = vld [vmem:[%s4235_s0 + $0x78] sm:$0xf0]  ;;  %v2903_v35 = vld [vmem:[%s4235_s0 + $0x110] sm:$0xf0] }
  0x27   :  { %1015 = vmatpush.bf16.msrb.mxu2 %v2959_v42  ;;  %v2236_v42 = vor.u32 %v2884_v39, %v2235_v38 }
  0x28   :  { %1044 = vmatpush.bf16.msrb.mxu3 %v2967_v45  ;;  %v2897_v45 = vld [vmem:[%s4235_s0 + $0xe4] sm:$0xf] }
  0x2a   :  { %871 = vmatpush.bf16.msrb.mxu1 %v2918_v43  ;;  %958 = vmatpush.bf16.msrb.mxu0 %v2942_v44  ;;  %v2299_v43 = vld [vmem:[%s4235_s0 + $0xe0] sm:$0xf]  ;;  %v2901_v44 = vld [vmem:[%s4235_s0 + $0x100] sm:$0xf0] }
  0x2b   :  { %1016 = vmatpush.bf16.msrb.mxu2 %v2958_v46  ;;  %v2301_v46 = vld [vmem:[%s4235_s0 + $0x104] sm:$0xf0] }
  0x2c   :  { %1045 = vmatpush.bf16.msrb.mxu3 %v2966_v47  ;;  %v2971_v47 = vld [vmem:[%s4234_s2 + $0x210] sm:$0xff]  ;;  %v2304_v50 = vor.u32 %v2897_v45, %v2301_v46 }
  0x2e   :  { %872 = vmatpush.bf16.msrb.mxu1 %v2917_v48  ;;  %959 = vmatpush.bf16.msrb.mxu0 %v2941_v49  ;;  %v2300_v48 = vor.u32 %v2901_v44, %v2299_v43  ;;  %v2953_v49 = vld [vmem:[%s4234_s2 + $0x180] sm:$0xff]  ;;  %v2895_v43 = vld [vmem:[%s4235_s0 + $0xd0] sm:$0xf0] }
  0x2f   :  { %1017 = vmatpush.bf16.msrb.mxu2 %v2957_v2 }
  0x30   :  { %1046 = vmatpush.bf16.msrb.mxu3 %v2965_v5  ;;  %v2293_v5 = vld [vmem:[%s4235_s0 + $0xfc] sm:$0xf0] }
  0x31   :  { %853 = vmatmul.bf16.gmra.mxu0 %v2220_v57  ;;  %863 = vmatmul.bf16.gmra.mxu1 %v2292_v58  ;;  %v2257_v57 = vld [vmem:[%s4235_s0 + $0xb4] sm:$0xf0]  ;;  %v2271_v58 = vld [vmem:[%s4235_s0 + $0xa0] sm:$0xf] }
  0x32   :  { %873 = vmatpush.bf16.msrb.mxu1 %v2916_v54  ;;  %960 = vmatpush.bf16.msrb.mxu0 %v2940_v55  ;;  %v2945_v54 = vld [vmem:[%s4234_s2 + $0x140] sm:$0xff]  ;;  %v2260_v60 = vor.u32 %v2887_v56, %v2257_v57  ;;  %v2272_v61 = vor.u32 %v2893_v59, %v2271_v58 }
  0x33   :  { %940 = vmatmul.bf16.gmra.mxu3 %v2232_v1  ;;  %1018 = vmatpush.bf16.msrb.mxu2 %v2956_v6  ;;  %v2969_v55 = vld [vmem:[%s4234_s2 + $0x200] sm:$0xff]  ;;  %v2307_v6 = vld [vmem:[%s4235_s0 + $0xe8] sm:$0xf] }
  0x34   :  { %911 = vmatmul.bf16.gmra.mxu2 %v2228_v0  ;;  %1047 = vmatpush.bf16.msrb.mxu3 %v2964_v7  ;;  %v2872_v0 = vld [vmem:[%s4235_s0 + $0x1c] sm:$0xf]  ;;  %v2209_v1 = vld [vmem:[%s4235_s0 + $0x3c] sm:$0xf0]  ;;  %v2902_v7 = vld [vmem:[%s4235_s0 + $0x108] sm:$0xf0] }
  0x36   :  { %874 = vmatpush.bf16.msrb.mxu1 %v2915_v62  ;;  %961 = vmatpush.bf16.msrb.mxu0 %v2939_v63  ;;  %v2207_v62 = vld [vmem:[%s4235_s0 + $0x18] sm:$0xf]  ;;  %v2876_v63 = vld [vmem:[%s4235_s0 + $0x38] sm:$0xf0] }
  0x37   :  { %1019 = vmatpush.bf16.msrb.mxu2 %v2955_v28  ;;  %v2208_v2 = vor.u32 %v2876_v63, %v2207_v62  ;;  %v2880_v28 = vld [vmem:[%s4235_s0 + $0x5c] sm:$0xf] }
  0x38   :  { %1048 = vmatpush.bf16.msrb.mxu3 %v2963_v29  ;;  %v2237_v29 = vld [vmem:[%s4235_s0 + $0x7c] sm:$0xf0] }
  0x3a   :  { %875 = vmatpush.bf16.msrb.mxu1 %v2914_v3  ;;  %962 = vmatpush.bf16.msrb.mxu0 %v2938_v4  ;;  %v2212_v3 = vor.u32 %v2872_v0, %v2209_v1  ;;  %v2896_v4 = vld [vmem:[%s4235_s0 + $0xdc] sm:$0xf] }
  0x3b   :  { %1020 = vmatpush.bf16.msrb.mxu2 %v2954_v32  ;;  %v2240_v32 = vor.u32 %v2880_v28, %v2237_v29  ;;  %v2997_v29 = vld [vmem:[%s4238_s5 + $0xa4] sm:$0xf] }
  0x3c   :  { %1049 = vmatpush.bf16.msrb.mxu3 %v2962_v33 }
  0x3e   :  { %876 = vmatpush.bf16.msrb.mxu1 %v2913_v8  ;;  %963 = vmatpush.bf16.msrb.mxu0 %v2937_v9  ;;  %v2296_v8 = vor.u32 %v2896_v4, %v2293_v5  ;;  %v2308_v9 = vor.u32 %v2902_v7, %v2307_v6  ;;  %v2727_v4 = vld [vmem:[%s4238_s5 + $0xe0] sm:$0xf] }
  0x3f   :  { %1021 = vmatpush.bf16.msrb.mxu2 %v2953_v49 }
  0x40   :  { %1050 = vmatpush.bf16.msrb.mxu3 %v2961_v52  ;;  %v2898_v52 = vld [vmem:[%s4235_s0 + $0xec] sm:$0xf] }
  0x41   :  { %877 = vmatmul.bf16.vlgmr.msrb.gmra.mxu1 %v2188_v18  ;;  %964 = vmatmul.bf16.vlgmr.msrb.gmra.mxu0 %v2200_v19  ;;  %v2215_v18 = vld [vmem:[%s4235_s0 + $0x20] sm:$0xf]  ;;  %v2877_v19 = vld [vmem:[%s4235_s0 + $0x40] sm:$0xf0] }
  0x42   :  { %985 = vmatpush.bf16.msra.mxu1 %v2952_v10  ;;  %1072 = vmatpush.bf16.msra.mxu0 %v2976_v11  ;;  %v2243_v10 = vld [vmem:[%s4235_s0 + $0x60] sm:$0xf]  ;;  %v2885_v11 = vld [vmem:[%s4235_s0 + $0x80] sm:$0xf0]  ;;  %v2216_v21 = vor.u32 %v2877_v19, %v2215_v18 }
  0x43   :  { %945 = vmatmul.bf16.gmra.mxu3 %v2268_v26  ;;  %v2244_v14 = vor.u32 %v2885_v11, %v2243_v10  ;;  %v2280_v26 = vor.u32 %v2894_v23, %v2279_v22  ;;  %v2711_v18 = vld [vmem:[%s4238_s5 + $0xc0] sm:$0xf]  ;;  %v3003_v22 = vld [vmem:[%s4238_s5 + $0xcc] sm:$0xf0]  ;;  %v2735_v23 = vld [vmem:[%s4238_s5 + $0xe8] sm:$0xf] }
  0x44   :  { %916 = vmatmul.bf16.gmra.mxu2 %v2264_v25  ;;  %v2281_v25 = vld [vmem:[%s4235_s0 + $0xcc] sm:$0xf0] }
  0x46   :  { %986 = vmatpush.bf16.msra.mxu1 %v2951_v16  ;;  %1073 = vmatpush.bf16.msra.mxu0 %v2975_v17  ;;  %v2871_v16 = vld [vmem:[%s4235_s0 + $0x14] sm:$0xf]  ;;  %v2201_v17 = vld [vmem:[%s4235_s0 + $0x34] sm:$0xf0] }
  0x47   :  { %v2204_v20 = vor.u32 %v2871_v16, %v2201_v17  ;;  %v3001_v16 = vld [vmem:[%s4238_s5 + $0xc4] sm:$0xf]  ;;  %v2713_v17 = vld [vmem:[%s4238_s5 + $0xd0] sm:$0xf0] }
  0x4a   :  { %987 = vmatpush.bf16.msra.mxu1 %v2950_v24  ;;  %1074 = vmatpush.bf16.msra.mxu0 %v2974_v27  ;;  %v2890_v24 = vld [vmem:[%s4235_s0 + $0xac] sm:$0xf] }
  0x4b   :  { %v2284_v27 = vor.u32 %v2890_v24, %v2281_v25  ;;  %v3008_v24 = vld [vmem:[%s4238_s5 + $0xf4] sm:$0xf0]  ;;  %v2712_v25 = vor.u32 %v3003_v22, %v2711_v18  ;;  %v2663_v18 = vld [vmem:[%s4238_s5 + $0x60] sm:$0xf] }
  0x4e   :  { %988 = vmatpush.bf16.msra.mxu1 %v2949_v30  ;;  %1075 = vmatpush.bf16.msra.mxu0 %v2973_v31  ;;  %v2251_v30 = vld [vmem:[%s4235_s0 + $0x68] sm:$0xf]  ;;  %v2886_v31 = vld [vmem:[%s4235_s0 + $0x88] sm:$0xf0] }
  0x4f   :  { %v2252_v33 = vor.u32 %v2886_v31, %v2251_v30  ;;  %v2697_v30 = vld [vmem:[%s4238_s5 + $0xb0] sm:$0xf0]  ;;  %v3006_v31 = vld [vmem:[%s4238_s5 + $0xec] sm:$0xf] }
  0x51   :  { %882 = vmatmul.bf16.gmra.mxu1 %v2224_v41  ;;  %969 = vmatmul.bf16.gmra.mxu0 %v2236_v42  ;;  %v2273_v41 = vld [vmem:[%s4235_s0 + $0xc4] sm:$0xf0]  ;;  %v2287_v42 = vld [vmem:[%s4235_s0 + $0xb0] sm:$0xf] }
  0x52   :  { %989 = vmatpush.bf16.msra.mxu1 %v2948_v34  ;;  %1076 = vmatpush.bf16.msra.mxu0 %v2972_v36  ;;  %v2315_v34 = vld [vmem:[%s4235_s0 + $0xf0] sm:$0xf]  ;;  %v2899_v36 = vld [vmem:[%s4235_s0 + $0xf4] sm:$0xf]  ;;  %v2288_v45 = vor.u32 %v2895_v43, %v2287_v42  ;;  %v3004_v42 = vld [vmem:[%s4238_s5 + $0xd4] sm:$0xf0] }
  0x53   :  { %950 = vmatmul.bf16.gmra.mxu3 %v2304_v50  ;;  %v2316_v38 = vor.u32 %v2903_v35, %v2315_v34  ;;  %v2320_v39 = vor.u32 %v2899_v36, %v2317_v37  ;;  %v2700_v34 = vor.u32 %v2997_v29, %v2697_v30  ;;  %v2737_v35 = vld [vmem:[%s4238_s5 + $0xf8] sm:$0xf0]  ;;  %v2695_v36 = vld [vmem:[%s4238_s5 + $0xa0] sm:$0xf]  ;;  %v2999_v37 = vld [vmem:[%s4238_s5 + $0xac] sm:$0xf0] }
  0x54   :  { %921 = vmatmul.bf16.gmra.mxu2 %v2300_v48  ;;  %v2996_v29 = vld [vmem:[%s4238_s5 + $0x94] sm:$0xf0] }
  0x56   :  { %990 = vmatpush.bf16.msra.mxu1 %v2947_v40  ;;  %1077 = vmatpush.bf16.msra.mxu0 %v2971_v47  ;;  %v2889_v40 = vld [vmem:[%s4235_s0 + $0xa4] sm:$0xf] }
  0x57   :  { %v2276_v44 = vor.u32 %v2889_v40, %v2273_v41  ;;  %v2696_v40 = vor.u32 %v2999_v37, %v2695_v36  ;;  %v2719_v41 = vld [vmem:[%s4238_s5 + $0xc8] sm:$0xf]  ;;  %v2992_v36 = vld [vmem:[%s4238_s5 + $0x74] sm:$0xf0] }
  0x58   :  { %v2720_v43 = vor.u32 %v3004_v42, %v2719_v41 }
  0x5a   :  { %991 = vmatpush.bf16.msra.mxu1 %v2946_v51  ;;  %1078 = vmatpush.bf16.msra.mxu0 %v2970_v53  ;;  %v2309_v53 = vld [vmem:[%s4235_s0 + $0x10c] sm:$0xf0] }
  0x5b   :  { %v2312_v56 = vor.u32 %v2898_v52, %v2309_v53  ;;  %v2993_v52 = vld [vmem:[%s4238_s5 + $0x84] sm:$0xf]  ;;  %v2681_v53 = vld [vmem:[%s4238_s5 + $0x90] sm:$0xf0] }
  0x5e   :  { %992 = vmatpush.bf16.msra.mxu1 %v2945_v54  ;;  %1079 = vmatpush.bf16.msra.mxu0 %v2969_v55  ;;  %v2323_v54 = vld [vmem:[%s4235_s0 + $0xf8] sm:$0xf]  ;;  %v2904_v55 = vld [vmem:[%s4235_s0 + $0x118] sm:$0xf0] }
  0x5f   :  { %v2324_v57 = vor.u32 %v2904_v55, %v2323_v54  ;;  %v3002_v54 = vld [vmem:[%s4238_s5 + $0xcc] sm:$0xf] }
  0x61   :  { %887 = vmatmul.bf16.gmra.mxu1 %v2260_v60  ;;  %974 = vmatmul.bf16.gmra.mxu0 %v2272_v61 }
  0x63   :  { %1051 = vmatmul.bf16.vlgmr.msrb.gmra.mxu3 %v2212_v3  ;;  %v2729_v3 = vld [vmem:[%s4238_s5 + $0xf0] sm:$0xf0] }
  0x64   :  { %1022 = vmatmul.bf16.vlgmr.msrb.gmra.mxu2 %v2208_v2  ;;  %v3005_v2 = vld [vmem:[%s4238_s5 + $0xe4] sm:$0xf] }
  0x65   :  { %v2732_v7 = vor.u32 %v3005_v2, %v2729_v3 }
  0x67   :  { %1358 = vmatpush.bf16.msra.mxu2 %v2732_v7 }
  0x71   :  { %892 = vmatmul.bf16.gmra.mxu1 %v2296_v8  ;;  %979 = vmatmul.bf16.gmra.mxu0 %v2308_v9  ;;  %v3007_v8 = vld [vmem:[%s4238_s5 + $0xec] sm:$0xf0] }
  0x72   :  { %v2728_v11 = vor.u32 %v3007_v8, %v2727_v4  ;;  %v2703_v4 = vld [vmem:[%s4238_s5 + $0xa8] sm:$0xf]  ;;  %v2989_v8 = vld [vmem:[%s4238_s5 + $0x64] sm:$0xf] }
  0x73   :  { %1056 = vmatmul.bf16.gmra.mxu3 %v2248_v15 }
  0x74   :  { %1027 = vmatmul.bf16.gmra.mxu2 %v2244_v14  ;;  %1329 = vmatpush.bf16.msrb.mxu1 %v2728_v11  ;;  %v2998_v11 = vld [vmem:[%s4238_s5 + $0xac] sm:$0xf] }
  0x78   :  { %1330 = vmatpush.bf16.msrb.mxu1 %v2712_v25 }
  0x7c   :  { %1331 = vmatpush.bf16.msrb.mxu1 %v2696_v40  ;;  %v2673_v40 = vld [vmem:[%s4238_s5 + $0x78] sm:$0xf0] }
  0x81   :  { %993 = vmatmul.bf16.vlgmr.msra.gmra.mxu1 %v2204_v20  ;;  %1080 = vmatmul.bf16.vlgmr.msra.gmra.mxu0 %v2216_v21  ;;  %v2716_v21 = vor.u32 %v3001_v16, %v2713_v17  ;;  %v2705_v17 = vld [vmem:[%s4238_s5 + $0xb8] sm:$0xf0] }
  0x83   :  { %1061 = vmatmul.bf16.gmra.mxu3 %v2284_v27  ;;  %1359 = vmatpush.bf16.msra.mxu2 %v2716_v21  ;;  %v2991_v21 = vld [vmem:[%s4238_s5 + $0x6c] sm:$0xf0] }
  0x84   :  { %1032 = vmatmul.bf16.gmra.mxu2 %v2280_v26  ;;  %v2736_v26 = vor.u32 %v3008_v24, %v2735_v23  ;;  %v2708_v24 = vor.u32 %v2998_v11, %v2705_v17  ;;  %v2664_v25 = vor.u32 %v2991_v21, %v2663_v18  ;;  %v2984_v17 = vld [vmem:[%s4238_s5 + $0x34] sm:$0xf0] }
  0x86   :  { %1387 = vmatpush.bf16.msra.mxu3 %v2736_v26  ;;  %v2687_v26 = vld [vmem:[%s4238_s5 + $0x88] sm:$0xf] }
  0x87   :  { %1360 = vmatpush.bf16.msra.mxu2 %v2700_v34  ;;  %v2688_v30 = vor.u32 %v2996_v29, %v2687_v26 }
  0x8a   :  { %1388 = vmatpush.bf16.msra.mxu3 %v2720_v43 }
  0x91   :  { %998 = vmatmul.bf16.gmra.mxu1 %v2240_v32  ;;  %1085 = vmatmul.bf16.gmra.mxu0 %v2252_v33 }
  0x93   :  { %1066 = vmatmul.bf16.gmra.mxu3 %v2320_v39  ;;  %v2740_v39 = vor.u32 %v3006_v31, %v2737_v35 }
  0x94   :  { %1037 = vmatmul.bf16.gmra.mxu2 %v2316_v38 }
  0x95   :  { %1416 = vmatpush.bf16.msrb.mxu0 %v2740_v39 }
  0x9e   :  { %v849_v46 = vpop.f32.mrf.mxu0  ;;  %v3569_v47 = vpop.f32.mrf.mxu1 }
  0xa1   :  { %1003 = vmatmul.bf16.gmra.mxu1 %v2276_v44  ;;  %1090 = vmatmul.bf16.gmra.mxu0 %v2288_v45 }
  0xa6   :  { %v3571_v48 = vpop.f32.mrf.mxu0  ;;  %v3573_v49 = vpop.f32.mrf.mxu1 }
  0xa7   :  { %v907_v50 = vpop.f32.mrf.mxu2  ;;  %v936_v51 = vpop.f32.mrf.mxu3 }
  0xae   :  { %v854_v58 = vpop.f32.mrf.mxu0  ;;  %v3587_v59 = vpop.f32.mrf.mxu1 }
  0xaf   :  { %v3589_v60 = vpop.f32.mrf.mxu2  ;;  %v3591_v61 = vpop.f32.mrf.mxu3 }
  0xb1   :  { %1008 = vmatmul.bf16.gmra.mxu1 %v2312_v56  ;;  %1095 = vmatmul.bf16.gmra.mxu0 %v2324_v57  ;;  %v2684_v57 = vor.u32 %v2993_v52, %v2681_v53  ;;  %v2647_v52 = vld [vmem:[%s4238_s5 + $0x40] sm:$0xf] }
  0xb3   :  { %1361 = vmatpush.bf16.msra.mxu2 %v2684_v57  ;;  %v2655_v57 = vld [vmem:[%s4238_s5 + $0x48] sm:$0xf] }
  0xb6   :  { %v3593_v62 = vpop.f32.mrf.mxu0  ;;  %v3595_v63 = vpop.f32.mrf.mxu1 }
  0xb7   :  { %v912_v0 = vpop.f32.mrf.mxu2  ;;  %v941_v1 = vpop.f32.mrf.mxu3 }
  0xbe   :  { %v878_v5 = vpop.f32.mrf.mxu1  ;;  %v965_v6 = vpop.f32.mrf.mxu0 }
  0xbf   :  { %v879_v9 = vadd.f32 %v878_v5, %v849_v46  ;;  %v3609_v10 = vpop.f32.mrf.mxu2  ;;  %v3611_v13 = vpop.f32.mrf.mxu3  ;;  %v3000_v5 = vld [vmem:[%s4238_s5 + $0xb4] sm:$0xf0] }
  0xc1   :  { %v908_v12 = vadd.f32 %v907_v50, %v879_v9  ;;  %v2665_v9 = vld [vmem:[%s4238_s5 + $0x70] sm:$0xf0] }
  0xc2   :  { %v2668_v16 = vor.u32 %v2989_v8, %v2665_v9  ;;  %v2631_v8 = vld [vmem:[%s4238_s5 + $0x20] sm:$0xf] }
  0xc3   :  { %v937_v14 = vadd.f32 %v936_v51, %v908_v12 }
  0xc4   :  { %1362 = vmatpush.bf16.msra.mxu2 %v2668_v16  ;;  %v2639_v16 = vld [vmem:[%s4238_s5 + $0x28] sm:$0xf] }
  0xc5   :  { %v3613_v15 = vadd.f32 %v965_v6, %v937_v14  ;;  %v2704_v6 = vor.u32 %v3000_v5, %v2703_v4  ;;  %v2981_v5 = vld [vmem:[%s4238_s5 + $0x24] sm:$0xf] }
  0xc6   :  { %v3624_v19 = vpop.f32.mrf.mxu1  ;;  %v3626_v20 = vpop.f32.mrf.mxu0 }
  0xc7   :  { %v3637_v27 = vpop.f32.mrf.mxu2  ;;  %v3639_v28 = vpop.f32.mrf.mxu3  ;;  %1389 = vmatpush.bf16.msra.mxu3 %v2704_v6  ;;  %v2633_v6 = vld [vmem:[%s4238_s5 + $0x30] sm:$0xf0] }
  0xcb   :  { %1390 = vmatpush.bf16.msra.mxu3 %v2688_v30 }
  0xce   :  { %v883_v32 = vpop.f32.mrf.mxu1  ;;  %v970_v33 = vpop.f32.mrf.mxu0 }
  0xcf   :  { %v884_v38 = vadd.f32 %v883_v32, %v854_v58  ;;  %v3665_v46 = vpop.f32.mrf.mxu2  ;;  %v3669_v51 = vpop.f32.mrf.mxu3  ;;  %v2721_v58 = vld [vmem:[%s4238_s5 + $0xd8] sm:$0xf0] }
  0xd0   :  { %v2724_v2 = vor.u32 %v3002_v54, %v2721_v58  ;;  %v2689_v32 = vld [vmem:[%s4238_s5 + $0x98] sm:$0xf0]  ;;  %v2987_v54 = vld [vmem:[%s4238_s5 + $0x4c] sm:$0xf0]  ;;  %v2988_v58 = vld [vmem:[%s4238_s5 + $0x54] sm:$0xf0] }
  0xd1   :  { %v913_v44 = vadd.f32 %v912_v0, %v884_v38  ;;  %v2679_v0 = vld [vmem:[%s4238_s5 + $0x80] sm:$0xf] }
  0xd2   :  { %1417 = vmatpush.bf16.msrb.mxu0 %v2724_v2  ;;  %v2986_v2 = vld [vmem:[%s4238_s5 + $0x4c] sm:$0xf] }
  0xd3   :  { %v942_v45 = vadd.f32 %v941_v1, %v913_v44  ;;  %v2995_v1 = vld [vmem:[%s4238_s5 + $0x8c] sm:$0xf0]  ;;  %v2985_v44 = vld [vmem:[%s4238_s5 + $0x44] sm:$0xf] }
  0xd4   :  { %v2680_v3 = vor.u32 %v2995_v1, %v2679_v0  ;;  %v2648_v0 = vor.u32 %v2987_v54, %v2647_v52  ;;  %v2656_v1 = vor.u32 %v2988_v58, %v2655_v57 }
  0xd5   :  { %v3667_v50 = vadd.f32 %v970_v33, %v942_v45  ;;  %v2649_v45 = vld [vmem:[%s4238_s5 + $0x50] sm:$0xf0] }
  0xd6   :  { %v3680_v55 = vpop.f32.mrf.mxu1  ;;  %v3682_v56 = vpop.f32.mrf.mxu0  ;;  %1332 = vmatpush.bf16.msrb.mxu1 %v2680_v3  ;;  %1418 = vmatpush.bf16.msrb.mxu0 %v2708_v24  ;;  %v2652_v53 = vor.u32 %v2985_v44, %v2649_v45  ;;  %v2657_v3 = vld [vmem:[%s4238_s5 + $0x58] sm:$0xf0]  ;;  %v2982_v24 = vld [vmem:[%s4238_s5 + $0x2c] sm:$0xf] }
  0xd7   :  { %v3699_v7 = vpop.f32.mrf.mxu2  ;;  %v3720_v23 = vpop.f32.mrf.mxu3  ;;  %v2660_v4 = vor.u32 %v2986_v2, %v2657_v3 }
  0xd8   :  { %1363 = vmatpush.bf16.msra.mxu2 %v2652_v53  ;;  %v881_v53 = vadd.f32 %v3624_v19, %v3571_v48  ;;  %v3848_v48 = vld [vmem:[%s4236_s3] ss:$0 sm:$0xff] }
  0xda   :  { %1333 = vmatpush.bf16.msrb.mxu1 %v2664_v25  ;;  %v2641_v25 = vld [vmem:[%s4238_s5 + $0x38] sm:$0xf0]  ;;  %v910_v57 = vadd.f32 %v3589_v60, %v881_v53 }
  0xdb   :  { %v2644_v26 = vor.u32 %v2982_v24, %v2641_v25 }
  0xdc   :  { %v939_v3 = vadd.f32 %v3591_v61, %v910_v57 }
  0xde   :  { %v888_v12 = vpop.f32.mrf.mxu1  ;;  %v975_v14 = vpop.f32.mrf.mxu0  ;;  %1334 = vmatpush.bf16.msrb.mxu1 %v2648_v0 }
  0xdf   :  { %v889_v22 = vadd.f32 %v888_v12, %v3569_v47  ;;  %v2994_v47 = vld [vmem:[%s4238_s5 + $0x8c] sm:$0xf]  ;;  %v3754_v41 = vpop.f32.mrf.mxu2  ;;  %v3756_v43 = vpop.f32.mrf.mxu3  ;;  %v2636_v12 = vor.u32 %v2981_v5, %v2633_v6  ;;  %v968_v6 = vadd.f32 %v3626_v20, %v939_v3  ;;  %v3856_v20 = vld [vmem:[%s4237_s4] ss:$0 sm:$0xff] }
  0xe0   :  { %v2692_v33 = vor.u32 %v2994_v47, %v2689_v32  ;;  %v2615_v47 = vld [vmem:[%s4238_s5] sm:$0xf] }
  0xe1   :  { %v918_v31 = vadd.f32 %v3637_v27, %v889_v22  ;;  %v2671_v27 = vld [vmem:[%s4238_s5 + $0x68] sm:$0xf]  ;;  %v2640_v22 = vor.u32 %v2984_v17, %v2639_v16  ;;  %1364 = vmatpush.bf16.msra.mxu2 %v2636_v12 }
  0xe2   :  { %1419 = vmatpush.bf16.msrb.mxu0 %v2692_v33  ;;  %v2672_v39 = vor.u32 %v2992_v36, %v2671_v27  ;;  %v2623_v33 = vld [vmem:[%s4238_s5 + $0x8] sm:$0xf] }
  0xe3   :  { %v947_v34 = vadd.f32 %v3639_v28, %v918_v31  ;;  %v2990_v28 = vld [vmem:[%s4238_s5 + $0x6c] sm:$0xf]  ;;  %v2617_v31 = vld [vmem:[%s4238_s5 + $0x10] sm:$0xf0] }
  0xe4   :  { %v2676_v42 = vor.u32 %v2990_v28, %v2673_v40  ;;  %1391 = vmatpush.bf16.msra.mxu3 %v2672_v39  ;;  %v2978_v40 = vld [vmem:[%s4238_s5 + $0xc] sm:$0xf] }
  0xe5   :  { %v3736_v35 = vadd.f32 %v975_v14, %v947_v34  ;;  %v2983_v14 = vld [vmem:[%s4238_s5 + $0x2c] sm:$0xf0]  ;;  %v2980_v34 = vld [vmem:[%s4238_s5 + $0x14] sm:$0xf0] }
  0xe6   :  { %v3744_v37 = vpop.f32.mrf.mxu1  ;;  %v3746_v38 = vpop.f32.mrf.mxu0  ;;  %1420 = vmatpush.bf16.msrb.mxu0 %v2676_v42  ;;  %v2632_v21 = vor.u32 %v2983_v14, %v2631_v8  ;;  %v2624_v28 = vor.u32 %v2980_v34, %v2623_v33  ;;  %v2625_v42 = vld [vmem:[%s4238_s5 + $0x18] sm:$0xf0] }
  0xe7   :  { %v1023_v30 = vpop.f32.mrf.mxu2  ;;  %v1052_v36 = vpop.f32.mrf.mxu3  ;;  %v2628_v44 = vor.u32 %v2978_v40, %v2625_v42 }
  0xe8   :  { %1392 = vmatpush.bf16.msra.mxu3 %v2656_v1  ;;  %1335 = vmatpush.bf16.msrb.mxu1 %v2632_v21 }
  0xea   :  { %1421 = vmatpush.bf16.msrb.mxu0 %v2660_v4 }
  0xec   :  { %1393 = vmatpush.bf16.msra.mxu3 %v2640_v22 }
  0xee   :  { %v893_v9 = vpop.f32.mrf.mxu1  ;;  %v980_v11 = vpop.f32.mrf.mxu0  ;;  %1422 = vmatpush.bf16.msrb.mxu0 %v2644_v26 }
  0xef   :  { %v894_v18 = vadd.f32 %v893_v9, %v3587_v59  ;;  %v2977_v59 = vld [vmem:[%s4238_s5 + $0x4] sm:$0xf]  ;;  %v1025_v54 = vpop.f32.mrf.mxu2  ;;  %v1054_v58 = vpop.f32.mrf.mxu3 }
  0xf0   :  { %v2620_v32 = vor.u32 %v2977_v59, %v2617_v31  ;;  %1394 = vmatpush.bf16.msra.mxu3 %v2624_v28 }
  0xf1   :  { %v923_v29 = vadd.f32 %v3699_v7, %v894_v18  ;;  %v2979_v7 = vld [vmem:[%s4238_s5 + $0xc] sm:$0xf0] }
  0xf2   :  { %v2616_v39 = vor.u32 %v2979_v7, %v2615_v47  ;;  %1365 = vmatpush.bf16.msra.mxu2 %v2620_v32  ;;  %1423 = vmatpush.bf16.msrb.mxu0 %v2628_v44 }
  0xf3   :  { %v952_v27 = vadd.f32 %v3720_v23, %v923_v29 }
  0xf4   :  { %1336 = vmatpush.bf16.msrb.mxu1 %v2616_v39 }
  0xf5   :  { %v3833_v45 = vadd.f32 %v980_v11, %v952_v27 }
  0xf6   :  { %v3835_v52 = vpop.f32.mrf.mxu1  ;;  %v3837_v23 = vpop.f32.mrf.mxu0 }
  0xf7   :  { %v1028_v8 = vpop.f32.mrf.mxu2  ;;  %v1057_v19 = vpop.f32.mrf.mxu3 }
  0xfe   :  { %v994_v0 = vpop.f32.mrf.mxu1  ;;  %v1081_v1 = vpop.f32.mrf.mxu0 }
  0xff   :  { %v995_v2 = vadd.f32 %v994_v0, %v3613_v15  ;;  %v886_v15 = vadd.f32 %v3680_v55, %v3593_v62  ;;  %v1030_v55 = vpop.f32.mrf.mxu2  ;;  %v1059_v59 = vpop.f32.mrf.mxu3 }
 0x101   :  { %v1024_v4 = vadd.f32 %v1023_v30, %v995_v2  ;;  %v915_v17 = vadd.f32 %v3609_v10, %v886_v15  ;;  %v3016_v15 = vld [vmem:[%s4239_s8 + $0x38] sm:$0xff] }
 0x102   :  { %2009 = vmatpush.bf16.msra.mxu1 %v3016_v15  ;;  %v1445_v15 = vld [vmem:[%s4240_s6] sm:$0xf] }
 0x103   :  { %v1053_v5 = vadd.f32 %v1052_v36, %v1024_v4  ;;  %v944_v26 = vadd.f32 %v3611_v13, %v915_v17  ;;  %v891_v13 = vadd.f32 %v3744_v37, %v3573_v49 }
 0x105   :  { %v1082_v12 = vadd.f32 %v1081_v1, %v1053_v5  ;;  %v973_v10 = vadd.f32 %v3682_v56, %v944_v26  ;;  %v920_v56 = vadd.f32 %v3665_v46, %v891_v13 }
 0x106   :  { %v996_v9 = vpop.f32.mrf.mxu1  ;;  %v1083_v11 = vpop.f32.mrf.mxu0 }
 0x107   :  { %v997_v60 = vadd.f32 %v996_v9, %v968_v6  ;;  %v1105_v61 = vmul.f32 %v3848_v48, %v1082_v12  ;;  %v1033_v39 = vpop.f32.mrf.mxu2  ;;  %v1062_v42 = vpop.f32.mrf.mxu3  ;;  %v949_v1 = vadd.f32 %v3669_v51, %v920_v56  ;;  %v3024_v51 = vld [vmem:[%s4239_s8 + $0x78] sm:$0xff] }
 0x108   :  { %2038 = vmatpush.bf16.msrb.mxu2 %v3024_v51  ;;  %v3985_v51 = vld [vmem:[%s4239_s8 + $0xc8] sm:$0xff] }
 0x109   :  { %v1026_v14 = vadd.f32 %v1025_v54, %v997_v60  ;;  %v1117_v24 = vadd.f32 %v3856_v20, %v1105_v61  ;;  %v978_v46 = vadd.f32 %v3746_v38, %v949_v1  ;;  %v896_v38 = vadd.f32 %v3835_v52, %v3595_v63  ;;  %v3031_v61 = vld [vmem:[%s4239_s8 + $0xb0] sm:$0xff]  ;;  %v3899_v52 = vld [vmem:[%s4239_s8 + $0xf8] sm:$0xff] }
 0x10a   :  { %v3015_v63 = vld [vmem:[%s4239_s8 + $0x30] sm:$0xff]  ;;  %2096 = vmatpush.bf16.msra.mxu0 %v3899_v52 }
 0x10b   :  { %v1055_v16 = vadd.f32 %v1054_v58, %v1026_v14  ;;  %v1125_v31 = vmax.f32 %v1117_v24, 0.0  ;;  %v3023_v14 = vld [vmem:[%s4239_s8 + $0x70] sm:$0xff]  ;;  %2010 = vmatpush.bf16.msra.mxu1 %v3015_v63 }
 0x10c   :  { %2039 = vmatpush.bf16.msrb.mxu2 %v3023_v14  ;;  %v4003_v14 = vld [vmem:[%s4239_s8 + $0xc0] sm:$0xff] }
 0x10d   :  { %v1084_v18 = vadd.f32 %v1083_v11, %v1055_v16 }
 0x10e   :  { %v999_v21 = vpop.f32.mrf.mxu1  ;;  %v1086_v22 = vpop.f32.mrf.mxu0 }
 0x10f   :  { %v1106_v25 = vmul.f32 %v3848_v48, %v1084_v18  ;;  %v1000_v62 = vadd.f32 %v999_v21, %v3667_v50  ;;  %v1035_v5 = vpop.f32.mrf.mxu2  ;;  %v925_v18 = vadd.f32 %v3754_v41, %v896_v38  ;;  %v3009_v38 = vld [vmem:[%s4239_s8] sm:$0xff] }
 0x111   :  { %v1118_v29 = vadd.f32 %v3856_v20, %v1106_v25  ;;  %v1029_v30 = vadd.f32 %v1028_v8, %v1000_v62  ;;  %v1064_v8 = vpop.f32.mrf.mxu3  ;;  %v3022_v25 = vld [vmem:[%s4239_s8 + $0x68] sm:$0xff] }
 0x112   :  { %v3030_v62 = vld [vmem:[%s4239_s8 + $0xa8] sm:$0xff]  ;;  %2040 = vmatpush.bf16.msrb.mxu2 %v3022_v25 }
 0x113   :  { %v1126_v47 = vmax.f32 %v1118_v29, 0.0  ;;  %v1058_v32 = vadd.f32 %v1057_v19, %v1029_v30  ;;  %v3014_v29 = vld [vmem:[%s4239_s8 + $0x28] sm:$0xff] }
 0x114   :  { %2011 = vmatpush.bf16.msra.mxu1 %v3014_v29 }
 0x115   :  { %v1133_v7 = vpack.c.bf16 %v1126_v47, %v1125_v31  ;;  %v1087_v27 = vadd.f32 %v1086_v22, %v1058_v32 }
 0x116   :  { %v1001_v33 = vpop.f32.mrf.mxu1  ;;  %v1088_v34 = vpop.f32.mrf.mxu0 }
 0x117   :  { %v1002_v36 = vadd.f32 %v1001_v33, %v973_v10  ;;  %1337 = vmatmul.bf16.vlgmr.msrb.gmra.mxu1 %v1133_v7  ;;  %1366 = vmatmul.bf16.vlgmr.msra.gmra.mxu2 %v1133_v7  ;;  %v1107_v28 = vmul.f32 %v3848_v48, %v1087_v27  ;;  %v1038_v22 = vpop.f32.mrf.mxu2  ;;  %v3021_v10 = vld [vmem:[%s4239_s8 + $0x60] sm:$0xff] }
 0x118   :  { %1395 = vmatmul.bf16.vlgmr.msra.gmra.mxu3 %v1133_v7  ;;  %1424 = vmatmul.bf16.vlgmr.msrb.gmra.mxu0 %v1133_v7 }
 0x119   :  { %v1031_v50 = vadd.f32 %v1030_v55, %v1002_v36  ;;  %v1119_v57 = vadd.f32 %v3856_v20, %v1107_v28  ;;  %v1067_v30 = vpop.f32.mrf.mxu3  ;;  %2041 = vmatpush.bf16.msrb.mxu2 %v3021_v10 }
 0x11b   :  { %v1060_v40 = vadd.f32 %v1059_v59, %v1031_v50  ;;  %v1127_v2 = vmax.f32 %v1119_v57, 0.0  ;;  %v954_v59 = vadd.f32 %v3756_v43, %v925_v18  ;;  %v3020_v43 = vld [vmem:[%s4239_s8 + $0x58] sm:$0xff] }
 0x11d   :  { %v1089_v44 = vadd.f32 %v1088_v34, %v1060_v40  ;;  %v983_v34 = vadd.f32 %v3837_v23, %v954_v59  ;;  %2042 = vmatpush.bf16.msrb.mxu2 %v3020_v43 }
 0x11e   :  { %v1004_v53 = vpop.f32.mrf.mxu1  ;;  %v1091_v54 = vpop.f32.mrf.mxu0 }
 0x11f   :  { %v1108_v58 = vmul.f32 %v3848_v48, %v1089_v44  ;;  %v1005_v0 = vadd.f32 %v1004_v53, %v3736_v35  ;;  %v3032_v35 = vld [vmem:[%s4239_s8 + $0xb8] sm:$0xff] }
 0x120   :  { %2067 = vmatpush.bf16.msrb.mxu3 %v3032_v35  ;;  %v3017_v35 = vld [vmem:[%s4239_s8 + $0x40] sm:$0xff] }
 0x121   :  { %v1120_v49 = vadd.f32 %v3856_v20, %v1108_v58  ;;  %v1034_v37 = vadd.f32 %v1033_v39, %v1005_v0  ;;  %v1040_v39 = vpop.f32.mrf.mxu2  ;;  %v1069_v40 = vpop.f32.mrf.mxu3 }
 0x123   :  { %v1128_v3 = vmax.f32 %v1120_v49, 0.0  ;;  %v1063_v4 = vadd.f32 %v1062_v42, %v1034_v37  ;;  %v3039_v49 = vld [vmem:[%s4239_s8 + $0xf0] sm:$0xff]  ;;  %v3038_v37 = vld [vmem:[%s4239_s8 + $0xe8] sm:$0xff] }
 0x124   :  { %2068 = vmatpush.bf16.msrb.mxu3 %v3031_v61  ;;  %2097 = vmatpush.bf16.msra.mxu0 %v3039_v49  ;;  %v4006_v61 = vperm.slane %v1445_v15, 0 }
 0x125   :  { %v1134_v6 = vpack.c.bf16 %v1128_v3, %v1127_v2  ;;  %v1092_v11 = vadd.f32 %v1091_v54, %v1063_v4  ;;  %v3013_v2 = vld [vmem:[%s4239_s8 + $0x20] sm:$0xff]  ;;  %v3028_v4 = vld [vmem:[%s4239_s8 + $0x98] sm:$0xff] }
 0x126   :  { %v1006_v9 = vpop.f32.mrf.mxu1  ;;  %v1093_v60 = vpop.f32.mrf.mxu0  ;;  %v3946_v3 = vld [vmem:[%s4239_s8 + $0xe0] sm:$0xff]  ;;  %2012 = vmatpush.bf16.msra.mxu1 %v3013_v2 }
 0x127   :  { %v1007_v12 = vadd.f32 %v1006_v9, %v978_v46  ;;  %1342 = vmatmul.bf16.gmra.mxu1 %v1134_v6  ;;  %1371 = vmatmul.bf16.gmra.mxu2 %v1134_v6  ;;  %v1109_v16 = vmul.f32 %v3848_v48, %v1092_v11  ;;  %v3958_v46 = vld [vmem:[%s4239_s8 + $0xd8] sm:$0xff]  ;;  %v3970_v9 = vld [vmem:[%s4239_s8 + $0xd0] sm:$0xff]  ;;  %v3018_v11 = vld [vmem:[%s4239_s8 + $0x48] sm:$0xff] }
 0x128   :  { %1400 = vmatmul.bf16.gmra.mxu3 %v1134_v6  ;;  %1429 = vmatmul.bf16.gmra.mxu0 %v1134_v6  ;;  %v3011_v6 = vld [vmem:[%s4239_s8 + $0x10] sm:$0xff] }
 0x129   :  { %v1036_v19 = vadd.f32 %v1035_v5, %v1007_v12  ;;  %v1121_v55 = vadd.f32 %v3856_v20, %v1109_v16  ;;  %2069 = vmatpush.bf16.msrb.mxu3 %v3030_v62  ;;  %2098 = vmatpush.bf16.msra.mxu0 %v3038_v37  ;;  %v3012_v5 = vld [vmem:[%s4239_s8 + $0x18] sm:$0xff]  ;;  %v3010_v12 = vld [vmem:[%s4239_s8 + $0x8] sm:$0xff]  ;;  %v1487_v16 = vld [vmem:[%s4241_s7] sm:$0xf] }
 0x12a   :  { %2013 = vmatpush.bf16.msra.mxu1 %v3012_v5  ;;  %v1530_v62 = vld [vmem:[%s4242_s1 + $0x8] sm:$0xff] }
 0x12b   :  { %v1065_v17 = vadd.f32 %v1064_v8, %v1036_v19  ;;  %v1129_v7 = vmax.f32 %v1121_v55, 0.0  ;;  %v3027_v8 = vld [vmem:[%s4239_s8 + $0x90] sm:$0xff]  ;;  %v3025_v19 = vld [vmem:[%s4239_s8 + $0x80] sm:$0xff]  ;;  %v4026_v55 = vperm.slane %v1445_v15, 1 }
 0x12d   :  { %v1094_v21 = vadd.f32 %v1093_v60, %v1065_v17  ;;  %2099 = vmatpush.bf16.msra.mxu0 %v3946_v3  ;;  %v3026_v60 = vld [vmem:[%s4239_s8 + $0x88] sm:$0xff]  ;;  %v4012_v17 = vperm.slane %v1445_v15, 3 }
 0x12e   :  { %v1009_v24 = vpop.f32.mrf.mxu1  ;;  %v1096_v32 = vpop.f32.mrf.mxu0  ;;  %2014 = vmatpush.bf16.msra.mxu1 %v3011_v6 }
 0x12f   :  { %v1110_v26 = vmul.f32 %v3848_v48, %v1094_v21  ;;  %v1010_v41 = vadd.f32 %v1009_v24, %v3833_v45  ;;  %v4015_v21 = vperm.slane %v1487_v16, 0  ;;  %v1529_v24 = vld [vmem:[%s4242_s1] sm:$0xff] }
 0x130   :  { %v1545_v29 = vunpack.c.l.bf16 %v1529_v24 }
 0x131   :  { %v1122_v31 = vadd.f32 %v3856_v20, %v1110_v26  ;;  %v1039_v47 = vadd.f32 %v1038_v22, %v1010_v41  ;;  %2100 = vmatpush.bf16.msra.mxu0 %v3958_v46  ;;  %v4028_v26 = vperm.slane %v1445_v15, 2 }
 0x132   :  { %2015 = vmatpush.bf16.msra.mxu1 %v3010_v12 }
 0x133   :  { %v1130_v45 = vmax.f32 %v1122_v31, 0.0  ;;  %v1068_v33 = vadd.f32 %v1067_v30, %v1039_v47  ;;  %v4031_v30 = vperm.slane %v1487_v16, 1  ;;  %v1548_v31 = vunpack.c.h.bf16 %v1530_v62 }
 0x135   :  { %v1135_v27 = vpack.c.bf16 %v1130_v45, %v1129_v7  ;;  %v1097_v13 = vadd.f32 %v1096_v32, %v1068_v33  ;;  %2101 = vmatpush.bf16.msra.mxu0 %v3970_v9  ;;  %v4034_v32 = vperm.slane %v1487_v16, 2  ;;  %v1546_v7 = vunpack.c.h.bf16 %v1529_v24 }
 0x136   :  { %v1011_v36 = vpop.f32.mrf.mxu1  ;;  %v1098_v56 = vpop.f32.mrf.mxu0  ;;  %2016 = vmatpush.bf16.msra.mxu1 %v3009_v38 }
 0x137   :  { %v1012_v50 = vadd.f32 %v1011_v36, %v983_v34  ;;  %1347 = vmatmul.bf16.gmra.mxu1 %v1135_v27  ;;  %1376 = vmatmul.bf16.gmra.mxu2 %v1135_v27  ;;  %v1111_v42 = vmul.f32 %v3848_v48, %v1097_v13  ;;  %v1547_v34 = vunpack.c.l.bf16 %v1530_v62 }
 0x138   :  { %1405 = vmatmul.bf16.gmra.mxu3 %v1135_v27  ;;  %1434 = vmatmul.bf16.gmra.mxu0 %v1135_v27 }
 0x139   :  { %v1041_v28 = vadd.f32 %v1040_v39, %v1012_v50  ;;  %v1123_v53 = vadd.f32 %v3856_v20, %v1111_v42  ;;  %2102 = vmatpush.bf16.msra.mxu0 %v3985_v51 }
 0x13b   :  { %v1070_v23 = vadd.f32 %v1069_v40, %v1041_v28  ;;  %v1131_v58 = vmax.f32 %v1123_v53, 0.0  ;;  %v1531_v40 = vld [vmem:[%s4242_s1 + $0x10] sm:$0xff] }
 0x13d   :  { %v1099_v44 = vadd.f32 %v1098_v56, %v1070_v23  ;;  %2103 = vmatpush.bf16.msra.mxu0 %v4003_v14  ;;  %v1532_v56 = vld [vmem:[%s4242_s1 + $0x18] sm:$0xff] }
 0x13f   :  { %v1112_v54 = vmul.f32 %v3848_v48, %v1099_v44  ;;  %v3029_v48 = vld [vmem:[%s4239_s8 + $0xa0] sm:$0xff] }
 0x140   :  { %2070 = vmatpush.bf16.msrb.mxu3 %v3029_v48 }
 0x141   :  { %v1124_v57 = vadd.f32 %v3856_v20, %v1112_v54  ;;  %v3019_v20 = vld [vmem:[%s4239_s8 + $0x50] sm:$0xff] }
 0x142   :  { %2043 = vmatpush.bf16.msrb.mxu2 %v3019_v20 }
 0x143   :  { %v1132_v0 = vmax.f32 %v1124_v57, 0.0 }
 0x144   :  { %2071 = vmatpush.bf16.msrb.mxu3 %v3028_v4 }
 0x145   :  { %v1136_v1 = vpack.c.bf16 %v1132_v0, %v1131_v58  ;;  %v1549_v58 = vunpack.c.l.bf16 %v1531_v40 }
 0x146   :  { %2044 = vmatpush.bf16.msrb.mxu2 %v3018_v11 }
 0x147   :  { %1352 = vmatmul.bf16.gmra.mxu1 %v1136_v1  ;;  %1381 = vmatmul.bf16.gmra.mxu2 %v1136_v1 }
 0x148   :  { %1410 = vmatmul.bf16.gmra.mxu3 %v1136_v1  ;;  %1439 = vmatmul.bf16.gmra.mxu0 %v1136_v1 }
 0x149   :  { %2072 = vmatpush.bf16.msrb.mxu3 %v3027_v8  ;;  %v1551_v8 = vunpack.c.l.bf16 %v1532_v56 }
 0x14a   :  { %2045 = vmatpush.bf16.msrb.mxu2 %v3017_v35 }
 0x14d   :  { %2073 = vmatpush.bf16.msrb.mxu3 %v3026_v60 }
 0x14e   :  { %3072 = vmatpush.bf16.msra.mxu2 %v3899_v52  ;;  %v4021_v52 = vperm.slane %v1487_v16, 3 }
 0x151   :  { %2074 = vmatpush.bf16.msrb.mxu3 %v3025_v19  ;;  %v1534_v19 = vld [vmem:[%s4242_s1 + $0x28] sm:$0xff] }
 0x152   :  { %3073 = vmatpush.bf16.msra.mxu2 %v3039_v49 }
 0x156   :  { %3074 = vmatpush.bf16.msra.mxu2 %v3038_v37  ;;  %v1552_v37 = vunpack.c.h.bf16 %v1532_v56 }
 0x15a   :  { %3075 = vmatpush.bf16.msra.mxu2 %v3946_v3  ;;  %v1550_v3 = vunpack.c.h.bf16 %v1531_v40 }
 0x15e   :  { %3076 = vmatpush.bf16.msra.mxu2 %v3958_v46  ;;  %v1533_v46 = vld [vmem:[%s4242_s1 + $0x20] sm:$0xff] }
 0x162   :  { %3077 = vmatpush.bf16.msra.mxu2 %v3970_v9  ;;  %v1554_v9 = vunpack.c.h.bf16 %v1533_v46 }
 0x166   :  { %3078 = vmatpush.bf16.msra.mxu2 %v3985_v51 }
 0x16a   :  { %3079 = vmatpush.bf16.msra.mxu2 %v4003_v14 }
 0x194   :  { %v1338_v63 = vpop.f32.mrf.mxu1 }
 0x195   :  { %v1455_v18 = vmul.f32 %v4006_v61, %v1338_v63  ;;  %v1425_v22 = vpop.f32.mrf.mxu0 }
 0x196   :  { %v1458_v25 = vmul.f32 %v4012_v17, %v1425_v22  ;;  %v1553_v22 = vunpack.c.l.bf16 %v1533_v46 }
 0x197   :  { %v1497_v41 = vadd.f32 %v4015_v21, %v1455_v18 }
 0x198   :  { %v1500_v59 = vadd.f32 %v4021_v52, %v1458_v25 }
 0x199   :  { %v1577_v36 = vadd.f32 %v1545_v29, %v1497_v41  ;;  %v1556_v41 = vunpack.c.h.bf16 %v1534_v19 }
 0x19a   :  { %v1367_v47 = vpop.f32.mrf.mxu2  ;;  %v1580_v39 = vadd.f32 %v1548_v31, %v1500_v59  ;;  %v1555_v31 = vunpack.c.l.bf16 %v1534_v19 }
 0x19b   :  { %v1456_v10 = vmul.f32 %v4026_v55, %v1367_v47  ;;  %v1396_v45 = vpop.f32.mrf.mxu3  ;;  %v1609_v53 = vmax.f32 %v1577_v36, 0.0 }
 0x19c   :  { %v1457_v33 = vmul.f32 %v4028_v26, %v1396_v45  ;;  %v1340_v27 = vpop.f32.mrf.mxu1  ;;  %v1612_v0 = vmax.f32 %v1580_v39, 0.0 }
 0x19d   :  { %v1498_v43 = vadd.f32 %v4031_v30, %v1456_v10  ;;  %v1459_v13 = vmul.f32 %v4006_v61, %v1340_v27  ;;  %v1427_v50 = vpop.f32.mrf.mxu0 }
 0x19e   :  { %v1499_v28 = vadd.f32 %v4034_v32, %v1457_v33  ;;  %v1462_v42 = vmul.f32 %v4012_v17, %v1427_v50 }
 0x19f   :  { %v1578_v23 = vadd.f32 %v1546_v7, %v1498_v43  ;;  %v1501_v57 = vadd.f32 %v4015_v21, %v1459_v13 }
 0x1a0   :  { %v1579_v44 = vadd.f32 %v1547_v34, %v1499_v28  ;;  %v1504_v49 = vadd.f32 %v4021_v52, %v1462_v42 }
 0x1a1   :  { %v1610_v54 = vmax.f32 %v1578_v23, 0.0  ;;  %v1581_v12 = vadd.f32 %v1549_v58, %v1501_v57 }
 0x1a2   :  { %v1611_v1 = vmax.f32 %v1579_v44, 0.0  ;;  %v1369_v48 = vpop.f32.mrf.mxu2  ;;  %v1584_v15 = vadd.f32 %v1552_v37, %v1504_v49  ;;  %v1536_v37 = vld [vmem:[%s4242_s1 + $0x38] sm:$0xff] }
 0x1a3   :  { %v4052_v20 = vpack.c.bf16 %v1610_v54, %v1609_v53  ;;  %v1460_v2 = vmul.f32 %v4026_v55, %v1369_v48  ;;  %v1398_v4 = vpop.f32.mrf.mxu3  ;;  %v1613_v29 = vmax.f32 %v1581_v12, 0.0 }
 0x1a4   :  { %v1642_v5 = vpack.c.bf16 %v1612_v0, %v1611_v1  ;;  %v1461_v6 = vmul.f32 %v4028_v26, %v1398_v4  ;;  %v1343_v11 = vpop.f32.mrf.mxu1  ;;  %v1616_v7 = vmax.f32 %v1584_v15, 0.0  ;;  %v1535_v0 = vld [vmem:[%s4242_s1 + $0x30] sm:$0xff] }
 0x1a5   :  { %1657 = vst [vmem:[%s4243_s11] sm:$0xff] %v4052_v20  ;;  %v1502_v60 = vadd.f32 %v4031_v30, %v1460_v2  ;;  %v1463_v35 = vmul.f32 %v4006_v61, %v1343_v11  ;;  %v1430_v38 = vpop.f32.mrf.mxu0  ;;  %v1753_v47 = vunpack.c.l.b16 %v4052_v20  ;;  %v1754_v10 = vunpack.c.h.b16 %v4052_v20 }
 0x1a6   :  { %1658 = vst [vmem:[%s4243_s11 + $0x8] sm:$0xff] %v1642_v5  ;;  %v1503_v16 = vadd.f32 %v4034_v32, %v1461_v6  ;;  %v1466_v63 = vmul.f32 %v4012_v17, %v1430_v38  ;;  %v1755_v34 = vunpack.c.l.b16 %v1642_v5  ;;  %v1756_v27 = vunpack.c.h.b16 %v1642_v5 }
 0x1a7   :  { %v1582_v18 = vadd.f32 %v1550_v3, %v1502_v60  ;;  %v1505_v25 = vadd.f32 %v4015_v21, %v1463_v35  ;;  %v1560_v60 = vunpack.c.h.bf16 %v1536_v37  ;;  %v1558_v15 = vunpack.c.h.bf16 %v1535_v0 }
 0x1a8   :  { %v1583_v24 = vadd.f32 %v1551_v8, %v1503_v16  ;;  %v1508_v62 = vadd.f32 %v4021_v52, %v1466_v63  ;;  %v1557_v8 = vunpack.c.l.bf16 %v1535_v0 }
 0x1a9   :  { %v1614_v59 = vmax.f32 %v1582_v18, 0.0  ;;  %v1585_v39 = vadd.f32 %v1553_v22, %v1505_v25  ;;  %v1559_v22 = vunpack.c.l.bf16 %v1536_v37  ;;  %v1537_v25 = vld [vmem:[%s4242_s1 + $0x40] sm:$0xff] }
 0x1aa   :  { %v1615_v45 = vmax.f32 %v1583_v24, 0.0  ;;  %v1372_v33 = vpop.f32.mrf.mxu2  ;;  %v1588_v28 = vadd.f32 %v1556_v41, %v1508_v62 }
 0x1ab   :  { %v1643_v36 = vpack.c.bf16 %v1614_v59, %v1613_v29  ;;  %v1464_v43 = vmul.f32 %v4026_v55, %v1372_v33  ;;  %v1401_v13 = vpop.f32.mrf.mxu3  ;;  %v1617_v4 = vmax.f32 %v1585_v39, 0.0 }
 0x1ac   :  { %v1644_v50 = vpack.c.bf16 %v1616_v7, %v1615_v45  ;;  %v1465_v40 = vmul.f32 %v4028_v26, %v1401_v13  ;;  %v1345_v42 = vpop.f32.mrf.mxu1  ;;  %v1620_v11 = vmax.f32 %v1588_v28, 0.0  ;;  %v1561_v45 = vunpack.c.l.bf16 %v1537_v25 }
 0x1ad   :  { %1659 = vst [vmem:[%s4243_s11 + $0x10] sm:$0xff] %v1643_v36  ;;  %v1757_v51 = vunpack.c.l.b16 %v1643_v36  ;;  %v1758_v23 = vunpack.c.h.b16 %v1643_v36  ;;  %v1506_v56 = vadd.f32 %v4031_v30, %v1464_v43  ;;  %v1467_v44 = vmul.f32 %v4006_v61, %v1345_v42  ;;  %v1432_v53 = vpop.f32.mrf.mxu0 }
 0x1ae   :  { %1660 = vst [vmem:[%s4243_s11 + $0x18] sm:$0xff] %v1644_v50  ;;  %v1759_v54 = vunpack.c.l.b16 %v1644_v50  ;;  %v1760_v57 = vunpack.c.h.b16 %v1644_v50  ;;  %v1507_v58 = vadd.f32 %v4034_v32, %v1465_v40  ;;  %v1470_v1 = vmul.f32 %v4012_v17, %v1432_v53 }
 0x1af   :  { %v1586_v49 = vadd.f32 %v1554_v9, %v1506_v56  ;;  %v1785_v14 = vpack.c.b16 %v1757_v51, %v1753_v47  ;;  %v1786_v48 = vpack.c.b16 %v1758_v23, %v1754_v10  ;;  %v1509_v6 = vadd.f32 %v4015_v21, %v1467_v44  ;;  %v1538_v9 = vld [vmem:[%s4242_s1 + $0x48] sm:$0xff] }
 0x1b0   :  { %v1587_v20 = vadd.f32 %v1555_v31, %v1507_v58  ;;  %v1787_v2 = vpack.c.b16 %v1759_v54, %v1755_v34  ;;  %v1788_v3 = vpack.c.b16 %v1760_v57, %v1756_v27  ;;  %v1512_v12 = vadd.f32 %v4021_v52, %v1470_v1 }
 0x1b1   :  { %v1618_v5 = vmax.f32 %v1586_v49, 0.0  ;;  %2017 = vmatmul.bf16.vlgmr.msra.gmra.mxu1 %v1785_v14  ;;  %2046 = vmatmul.bf16.vlgmr.msrb.gmra.mxu2 %v1786_v48  ;;  %v1589_v62 = vadd.f32 %v1557_v8, %v1509_v6  ;;  %v1564_v36 = vunpack.c.h.bf16 %v1538_v9  ;;  %v1562_v50 = vunpack.c.h.bf16 %v1537_v25 }
 0x1b2   :  { %v1619_v46 = vmax.f32 %v1587_v20, 0.0  ;;  %2075 = vmatmul.bf16.vlgmr.msrb.gmra.mxu3 %v1787_v2  ;;  %2104 = vmatmul.bf16.vlgmr.msra.gmra.mxu0 %v1788_v3  ;;  %v1374_v35 = vpop.f32.mrf.mxu2  ;;  %v1592_v31 = vadd.f32 %v1560_v60, %v1512_v12  ;;  %v1563_v39 = vunpack.c.l.bf16 %v1538_v9  ;;  %v1540_v12 = vld [vmem:[%s4242_s1 + $0x58] sm:$0xff] }
 0x1b3   :  { %v1645_v38 = vpack.c.bf16 %v1618_v5, %v1617_v4  ;;  %v1468_v19 = vmul.f32 %v4026_v55, %v1374_v35  ;;  %v1403_v16 = vpop.f32.mrf.mxu3  ;;  %v1621_v43 = vmax.f32 %v1589_v62, 0.0  ;;  %v1539_v5 = vld [vmem:[%s4242_s1 + $0x50] sm:$0xff] }
 0x1b4   :  { %v1646_v63 = vpack.c.bf16 %v1620_v11, %v1619_v46  ;;  %v1469_v18 = vmul.f32 %v4028_v26, %v1403_v16  ;;  %v1348_v24 = vpop.f32.mrf.mxu1  ;;  %v1624_v28 = vmax.f32 %v1592_v31, 0.0  ;;  %v1566_v31 = vunpack.c.h.bf16 %v1539_v5 }
 0x1b5   :  { %1661 = vst [vmem:[%s4243_s11 + $0x20] sm:$0xff] %v1645_v38  ;;  %v1510_v41 = vadd.f32 %v4031_v30, %v1468_v19  ;;  %v1471_v29 = vmul.f32 %v4006_v61, %v1348_v24  ;;  %v1435_v59 = vpop.f32.mrf.mxu0  ;;  %v1761_v51 = vunpack.c.l.b16 %v1645_v38  ;;  %v1762_v23 = vunpack.c.h.b16 %v1645_v38 }
 0x1b6   :  { %1662 = vst [vmem:[%s4243_s11 + $0x28] sm:$0xff] %v1646_v63  ;;  %v1511_v47 = vadd.f32 %v4034_v32, %v1469_v18  ;;  %v1474_v10 = vmul.f32 %v4012_v17, %v1435_v59  ;;  %v1763_v54 = vunpack.c.l.b16 %v1646_v63  ;;  %v1764_v57 = vunpack.c.h.b16 %v1646_v63 }
 0x1b7   :  { %v1590_v7 = vadd.f32 %v1558_v15, %v1510_v41  ;;  %v1513_v34 = vadd.f32 %v4015_v21, %v1471_v29  ;;  %v1568_v41 = vunpack.c.h.bf16 %v1540_v12 }
 0x1b8   :  { %v1591_v33 = vadd.f32 %v1559_v22, %v1511_v47  ;;  %v1516_v27 = vadd.f32 %v4021_v52, %v1474_v10  ;;  %v1565_v22 = vunpack.c.l.bf16 %v1539_v5 }
 0x1b9   :  { %v1622_v13 = vmax.f32 %v1590_v7, 0.0  ;;  %v1593_v0 = vadd.f32 %v1561_v45, %v1513_v34  ;;  %v1567_v45 = vunpack.c.l.bf16 %v1540_v12  ;;  %v1541_v34 = vld [vmem:[%s4242_s1 + $0x60] sm:$0xff] }
 0x1ba   :  { %v1623_v40 = vmax.f32 %v1591_v33, 0.0  ;;  %v1377_v42 = vpop.f32.mrf.mxu2  ;;  %v1596_v1 = vadd.f32 %v1564_v36, %v1516_v27 }
 0x1bb   :  { %v1647_v56 = vpack.c.bf16 %v1622_v13, %v1621_v43  ;;  %v1472_v44 = vmul.f32 %v4026_v55, %v1377_v42  ;;  %v1406_v53 = vpop.f32.mrf.mxu3  ;;  %v1625_v16 = vmax.f32 %v1593_v0, 0.0 }
 0x1bc   :  { %v1648_v58 = vpack.c.bf16 %v1624_v28, %v1623_v40  ;;  %v1473_v49 = vmul.f32 %v4028_v26, %v1406_v53  ;;  %v1350_v37 = vpop.f32.mrf.mxu1  ;;  %v1628_v24 = vmax.f32 %v1596_v1, 0.0 }
 0x1bd   :  { %1663 = vst [vmem:[%s4243_s11 + $0x30] sm:$0xff] %v1647_v56  ;;  %v1514_v14 = vadd.f32 %v4031_v30, %v1472_v44  ;;  %v1475_v48 = vmul.f32 %v4006_v61, %v1350_v37  ;;  %v1437_v20 = vpop.f32.mrf.mxu0  ;;  %v1765_v2 = vunpack.c.l.b16 %v1647_v56  ;;  %v1766_v3 = vunpack.c.h.b16 %v1647_v56 }
 0x1be   :  { %1664 = vst [vmem:[%s4243_s11 + $0x38] sm:$0xff] %v1648_v58  ;;  %v1515_v4 = vadd.f32 %v4034_v32, %v1473_v49  ;;  %v1478_v6 = vmul.f32 %v4012_v17, %v1437_v20  ;;  %v1767_v8 = vunpack.c.l.b16 %v1648_v58  ;;  %v1768_v11 = vunpack.c.h.b16 %v1648_v58 }
 0x1bf   :  { %v1594_v46 = vadd.f32 %v1562_v50, %v1514_v14  ;;  %v1789_v60 = vpack.c.b16 %v1765_v2, %v1761_v51  ;;  %v1790_v35 = vpack.c.b16 %v1766_v3, %v1762_v23  ;;  %v1517_v18 = vadd.f32 %v4015_v21, %v1475_v48  ;;  %v1542_v50 = vld [vmem:[%s4242_s1 + $0x68] sm:$0xff] }
 0x1c0   :  { %v1595_v38 = vadd.f32 %v1563_v39, %v1515_v4  ;;  %v1791_v19 = vpack.c.b16 %v1767_v8, %v1763_v54  ;;  %v1792_v15 = vpack.c.b16 %v1768_v11, %v1764_v57  ;;  %v1520_v62 = vadd.f32 %v4021_v52, %v1478_v6 }
 0x1c1   :  { %v1626_v63 = vmax.f32 %v1594_v46, 0.0  ;;  %2022 = vmatmul.bf16.gmra.mxu1 %v1789_v60  ;;  %2051 = vmatmul.bf16.gmra.mxu2 %v1790_v35  ;;  %v1597_v27 = vadd.f32 %v1565_v22, %v1517_v18  ;;  %v1569_v51 = vunpack.c.l.bf16 %v1541_v34  ;;  %v1572_v53 = vunpack.c.h.bf16 %v1542_v50 }
 0x1c2   :  { %v1627_v25 = vmax.f32 %v1595_v38, 0.0  ;;  %2080 = vmatmul.bf16.gmra.mxu3 %v1791_v19  ;;  %2109 = vmatmul.bf16.gmra.mxu0 %v1792_v15  ;;  %v1379_v29 = vpop.f32.mrf.mxu2  ;;  %v1600_v39 = vadd.f32 %v1568_v41, %v1520_v62  ;;  %v1570_v58 = vunpack.c.h.bf16 %v1541_v34  ;;  %v1571_v0 = vunpack.c.l.bf16 %v1542_v50 }
 0x1c3   :  { %v1649_v59 = vpack.c.bf16 %v1626_v63, %v1625_v16  ;;  %v1476_v9 = vmul.f32 %v4026_v55, %v1379_v29  ;;  %v1408_v47 = vpop.f32.mrf.mxu3  ;;  %v1629_v54 = vmax.f32 %v1597_v27, 0.0  ;;  %v1543_v63 = vld [vmem:[%s4242_s1 + $0x70] sm:$0xff] }
 0x1c4   :  { %v1650_v10 = vpack.c.bf16 %v1628_v24, %v1627_v25  ;;  %v1477_v7 = vmul.f32 %v4028_v26, %v1408_v47  ;;  %v1353_v33 = vpop.f32.mrf.mxu1  ;;  %v1632_v1 = vmax.f32 %v1600_v39, 0.0 }
 0x1c5   :  { %1665 = vst [vmem:[%s4243_s11 + $0x40] sm:$0xff] %v1649_v59  ;;  %v1518_v36 = vadd.f32 %v4031_v30, %v1476_v9  ;;  %v1479_v43 = vmul.f32 %v4006_v61, %v1353_v33  ;;  %v1440_v13 = vpop.f32.mrf.mxu0  ;;  %v1769_v14 = vunpack.c.l.b16 %v1649_v59  ;;  %v1770_v48 = vunpack.c.h.b16 %v1649_v59 }
 0x1c6   :  { %1666 = vst [vmem:[%s4243_s11 + $0x48] sm:$0xff] %v1650_v10  ;;  %v1519_v28 = vadd.f32 %v4034_v32, %v1477_v7  ;;  %v1482_v40 = vmul.f32 %v4012_v17, %v1440_v13  ;;  %v1771_v4 = vunpack.c.l.b16 %v1650_v10  ;;  %v1772_v5 = vunpack.c.h.b16 %v1650_v10 }
 0x1c7   :  { %v1598_v42 = vadd.f32 %v1566_v31, %v1518_v36  ;;  %v1521_v56 = vadd.f32 %v4015_v21, %v1479_v43  ;;  %v1573_v7 = vunpack.c.l.bf16 %v1543_v63  ;;  %v1574_v13 = vunpack.c.h.bf16 %v1543_v63 }
 0x1c8   :  { %v1599_v23 = vadd.f32 %v1567_v45, %v1519_v28  ;;  %v1524_v44 = vadd.f32 %v4021_v52, %v1482_v40 }
 0x1c9   :  { %v1630_v57 = vmax.f32 %v1598_v42, 0.0  ;;  %v1601_v8 = vadd.f32 %v1569_v51, %v1521_v56 }
 0x1ca   :  { %v1631_v49 = vmax.f32 %v1599_v23, 0.0  ;;  %v1382_v37 = vpop.f32.mrf.mxu2  ;;  %v1604_v11 = vadd.f32 %v1572_v53, %v1524_v44 }
 0x1cb   :  { %v1651_v20 = vpack.c.bf16 %v1630_v57, %v1629_v54  ;;  %v1480_v2 = vmul.f32 %v4026_v55, %v1382_v37  ;;  %v1411_v3 = vpop.f32.mrf.mxu3  ;;  %v1633_v31 = vmax.f32 %v1601_v8, 0.0 }
 0x1cc   :  { %v1652_v6 = vpack.c.bf16 %v1632_v1, %v1631_v49  ;;  %v1481_v46 = vmul.f32 %v4028_v26, %v1411_v3  ;;  %v1355_v12 = vpop.f32.mrf.mxu1 }
 0x1cd   :  { %1667 = vst [vmem:[%s4243_s11 + $0x50] sm:$0xff] %v1651_v20  ;;  %v1522_v60 = vadd.f32 %v4031_v30, %v1480_v2  ;;  %v1483_v35 = vmul.f32 %v4006_v61, %v1355_v12  ;;  %v1442_v38 = vpop.f32.mrf.mxu0  ;;  %v1773_v19 = vunpack.c.l.b16 %v1651_v20  ;;  %v1774_v15 = vunpack.c.h.b16 %v1651_v20  ;;  %v1544_v61 = vld [vmem:[%s4242_s1 + $0x78] sm:$0xff] }
 0x1ce   :  { %1668 = vst [vmem:[%s4243_s11 + $0x58] sm:$0xff] %v1652_v6  ;;  %v1523_v16 = vadd.f32 %v4034_v32, %v1481_v46  ;;  %v1486_v18 = vmul.f32 %v4012_v17, %v1442_v38  ;;  %v1775_v22 = vunpack.c.l.b16 %v1652_v6  ;;  %v1776_v24 = vunpack.c.h.b16 %v1652_v6  ;;  %v4199_v38 = vld [vmem:[%s4244_s9] ss:$0 sm:$0xff] }
 0x1cf   :  { %v1602_v25 = vadd.f32 %v1570_v58, %v1522_v60  ;;  %v1793_v62 = vpack.c.b16 %v1773_v19, %v1769_v14  ;;  %v1794_v41 = vpack.c.b16 %v1774_v15, %v1770_v48  ;;  %v1525_v10 = vadd.f32 %v4015_v21, %v1483_v35 }
 0x1d0   :  { %v1603_v29 = vadd.f32 %v1571_v0, %v1523_v16  ;;  %v1795_v59 = vpack.c.b16 %v1775_v22, %v1771_v4  ;;  %v1796_v9 = vpack.c.b16 %v1776_v24, %v1772_v5  ;;  %v1636_v17 = vmax.f32 %v1604_v11, 0.0  ;;  %v4205_v22 = vld [vmem:[%s4245_s10] ss:$0 sm:$0xff] }
 0x1d1   :  { %v1634_v47 = vmax.f32 %v1602_v25, 0.0  ;;  %2027 = vmatmul.bf16.gmra.mxu1 %v1793_v62  ;;  %2056 = vmatmul.bf16.gmra.mxu2 %v1794_v41  ;;  %v1528_v33 = vadd.f32 %v4021_v52, %v1486_v18  ;;  %v1576_v34 = vunpack.c.h.bf16 %v1544_v61  ;;  %v1575_v21 = vunpack.c.l.bf16 %v1544_v61 }
 0x1d2   :  { %v1635_v45 = vmax.f32 %v1603_v29, 0.0  ;;  %2085 = vmatmul.bf16.gmra.mxu3 %v1795_v59  ;;  %2114 = vmatmul.bf16.gmra.mxu0 %v1796_v9  ;;  %v1384_v27 = vpop.f32.mrf.mxu2  ;;  %v1605_v40 = vadd.f32 %v1573_v7, %v1525_v10 }
 0x1d3   :  { %v1653_v36 = vpack.c.bf16 %v1634_v47, %v1633_v31  ;;  %v1484_v43 = vmul.f32 %v4026_v55, %v1384_v27  ;;  %v1413_v50 = vpop.f32.mrf.mxu3  ;;  %v1608_v42 = vadd.f32 %v1576_v34, %v1528_v33 }
 0x1d4   :  { %v1654_v39 = vpack.c.bf16 %v1636_v17, %v1635_v45  ;;  %v1485_v28 = vmul.f32 %v4028_v26, %v1413_v50  ;;  %v1637_v56 = vmax.f32 %v1605_v40, 0.0 }
 0x1d5   :  { %1669 = vst [vmem:[%s4243_s11 + $0x60] sm:$0xff] %v1653_v36  ;;  %v1526_v52 = vadd.f32 %v4031_v30, %v1484_v43  ;;  %v1640_v26 = vmax.f32 %v1608_v42, 0.0  ;;  %v1777_v30 = vunpack.c.l.b16 %v1653_v36  ;;  %v1778_v0 = vunpack.c.h.b16 %v1653_v36 }
 0x1d6   :  { %1670 = vst [vmem:[%s4243_s11 + $0x68] sm:$0xff] %v1654_v39  ;;  %v1527_v55 = vadd.f32 %v4034_v32, %v1485_v28  ;;  %v1779_v32 = vunpack.c.l.b16 %v1654_v39  ;;  %v1780_v2 = vunpack.c.h.b16 %v1654_v39 }
 0x1d7   :  { %v1606_v51 = vadd.f32 %v1574_v13, %v1526_v52 }
 0x1d8   :  { %v1607_v23 = vadd.f32 %v1575_v21, %v1527_v55 }
 0x1d9   :  { %v1638_v44 = vmax.f32 %v1606_v51, 0.0 }
 0x1da   :  { %v1639_v53 = vmax.f32 %v1607_v23, 0.0 }
 0x1db   :  { %v1655_v54 = vpack.c.bf16 %v1638_v44, %v1637_v56 }
 0x1dc   :  { %v1656_v57 = vpack.c.bf16 %v1640_v26, %v1639_v53 }
 0x1dd   :  { %1671 = vst [vmem:[%s4243_s11 + $0x70] sm:$0xff] %v1655_v54  ;;  %v1781_v58 = vunpack.c.l.b16 %v1655_v54  ;;  %v1782_v1 = vunpack.c.h.b16 %v1655_v54 }
 0x1de   :  { %1672 = vst [vmem:[%s4243_s11 + $0x78] sm:$0xff] %v1656_v57  ;;  %v1783_v49 = vunpack.c.l.b16 %v1656_v57  ;;  %v1784_v20 = vunpack.c.h.b16 %v1656_v57 }
 0x1df   :  { %v1797_v37 = vpack.c.b16 %v1781_v58, %v1777_v30  ;;  %v1798_v14 = vpack.c.b16 %v1782_v1, %v1778_v0 }
 0x1e0   :  { %v1799_v48 = vpack.c.b16 %v1783_v49, %v1779_v32  ;;  %v1800_v3 = vpack.c.b16 %v1784_v20, %v1780_v2 }
 0x1e1   :  { %2032 = vmatmul.bf16.gmra.mxu1 %v1797_v37  ;;  %2061 = vmatmul.bf16.gmra.mxu2 %v1798_v14 }
 0x1e2   :  { %2090 = vmatmul.bf16.gmra.mxu3 %v1799_v48 }
 0x1f1   :  { %2119 = vmatmul.bf16.vlgmr.msra.gmra.mxu2 %v1800_v3 }
 0x22e   :  { %v2018_v4 = vpop.f32.mrf.mxu1 }
 0x22f   :  { %v2105_v5 = vpop.f32.mrf.mxu0 }
 0x234   :  { %v2047_v6 = vpop.f32.mrf.mxu2 }
 0x235   :  { %v2048_v8 = vadd.f32 %v2047_v6, %v2018_v4  ;;  %v2076_v11 = vpop.f32.mrf.mxu3 }
 0x236   :  { %v2020_v46 = vpop.f32.mrf.mxu1 }
 0x237   :  { %v2077_v12 = vadd.f32 %v2076_v11, %v2048_v8  ;;  %v2107_v60 = vpop.f32.mrf.mxu0 }
 0x239   :  { %v2106_v35 = vadd.f32 %v2105_v5, %v2077_v12 }
 0x23b   :  { %v2129_v18 = vmul.f32 %v4199_v38, %v2106_v35 }
 0x23c   :  { %v2049_v19 = vpop.f32.mrf.mxu2 }
 0x23d   :  { %v2050_v15 = vadd.f32 %v2049_v19, %v2020_v46  ;;  %v2078_v16 = vpop.f32.mrf.mxu3  ;;  %v2141_v62 = vadd.f32 %v4205_v22, %v2129_v18 }
 0x23e   :  { %v2023_v63 = vpop.f32.mrf.mxu1 }
 0x23f   :  { %v2079_v24 = vadd.f32 %v2078_v16, %v2050_v15  ;;  %v2110_v61 = vpop.f32.mrf.mxu0  ;;  %v2149_v47 = vmax.f32 %v2141_v62, 0.0 }
 0x241   :  { %v2108_v25 = vadd.f32 %v2107_v60, %v2079_v24 }
 0x243   :  { %v2130_v41 = vmul.f32 %v4199_v38, %v2108_v25 }
 0x244   :  { %v2052_v29 = vpop.f32.mrf.mxu2 }
 0x245   :  { %v2142_v59 = vadd.f32 %v4205_v22, %v2130_v41  ;;  %v2053_v9 = vadd.f32 %v2052_v29, %v2023_v63  ;;  %v2081_v31 = vpop.f32.mrf.mxu3 }
 0x246   :  { %v2025_v17 = vpop.f32.mrf.mxu1 }
 0x247   :  { %v2150_v10 = vmax.f32 %v2142_v59, 0.0  ;;  %v2082_v7 = vadd.f32 %v2081_v31, %v2053_v9  ;;  %v2112_v34 = vpop.f32.mrf.mxu0 }
 0x249   :  { %v3044_v45 = vpack.c.bf16 %v2150_v10, %v2149_v47  ;;  %v2111_v33 = vadd.f32 %v2110_v61, %v2082_v7 }
 0x24b   :  { %3045 = vst [vmem:[%s4246_s12] sm:$0xff] %v3044_v45   ;;  %v2131_v13 = vmul.f32 %v4199_v38, %v2111_v33 }
 0x24c   :  { %v2054_v27 = vpop.f32.mrf.mxu2 }
 0x24d   :  { %v2055_v36 = vadd.f32 %v2054_v27, %v2025_v17  ;;  %v2083_v43 = vpop.f32.mrf.mxu3  ;;  %v2143_v21 = vadd.f32 %v4205_v22, %v2131_v13 }
 0x24e   :  { %v2028_v28 = vpop.f32.mrf.mxu1 }
 0x24f   :  { %v2084_v50 = vadd.f32 %v2083_v43, %v2055_v36  ;;  %v2115_v23 = vpop.f32.mrf.mxu0  ;;  %v2151_v56 = vmax.f32 %v2143_v21, 0.0 }
 0x251   :  { %v2113_v39 = vadd.f32 %v2112_v34, %v2084_v50 }
 0x253   :  { %v2132_v40 = vmul.f32 %v4199_v38, %v2113_v39 }
 0x254   :  { %v2057_v52 = vpop.f32.mrf.mxu2 }
 0x255   :  { %v2144_v42 = vadd.f32 %v4205_v22, %v2132_v40  ;;  %v2058_v55 = vadd.f32 %v2057_v52, %v2028_v28  ;;  %v2086_v51 = vpop.f32.mrf.mxu3 }
 0x256   :  { %v2030_v57 = vpop.f32.mrf.mxu1 }
 0x257   :  { %v2152_v44 = vmax.f32 %v2144_v42, 0.0  ;;  %v2087_v26 = vadd.f32 %v2086_v51, %v2058_v55  ;;  %v2117_v49 = vpop.f32.mrf.mxu0 }
 0x259   :  { %v3049_v53 = vpack.c.bf16 %v2152_v44, %v2151_v56  ;;  %v2116_v54 = vadd.f32 %v2115_v23, %v2087_v26 }
 0x25b   :  { %3061 = vst [vmem:[%s4246_s12 + $0x8] sm:$0xff] %v3049_v53   ;;  %v2133_v1 = vmul.f32 %v4199_v38, %v2116_v54 }
 0x25c   :  { %v2059_v30 = vpop.f32.mrf.mxu2 }
 0x25d   :  { %v2060_v58 = vadd.f32 %v2059_v30, %v2030_v57  ;;  %v2088_v0 = vpop.f32.mrf.mxu3  ;;  %v2145_v14 = vadd.f32 %v4205_v22, %v2133_v1 }
 0x25e   :  { %v2033_v6 = vpop.f32.mrf.mxu1 }
 0x25f   :  { %v2089_v32 = vadd.f32 %v2088_v0, %v2060_v58  ;;  %v2153_v3 = vmax.f32 %v2145_v14, 0.0 }
 0x261   :  { %v2118_v37 = vadd.f32 %v2117_v49, %v2089_v32 }
 0x263   :  { %v2134_v48 = vmul.f32 %v4199_v38, %v2118_v37 }
 0x264   :  { %v2062_v20 = vpop.f32.mrf.mxu2 }
 0x265   :  { %v2146_v2 = vadd.f32 %v4205_v22, %v2134_v48  ;;  %v2091_v11 = vpop.f32.mrf.mxu3  ;;  %v2063_v46 = vadd.f32 %v2062_v20, %v2033_v6 }
 0x266   :  { %v2035_v35 = vpop.f32.mrf.mxu1 }
 0x267   :  { %v2154_v4 = vmax.f32 %v2146_v2, 0.0  ;;  %v2092_v60 = vadd.f32 %v2091_v11, %v2063_v46 }
 0x269   :  { %v3054_v5 = vpack.c.bf16 %v2154_v4, %v2153_v3 }
 0x26b   :  { %3062 = vst [vmem:[%s4246_s12 + $0x10] sm:$0xff] %v3054_v5  }
 0x26c   :  { %v2064_v8 = vpop.f32.mrf.mxu2 }
 0x26d   :  { %v2065_v19 = vadd.f32 %v2064_v8, %v2035_v35  ;;  %v2093_v16 = vpop.f32.mrf.mxu3 }
 0x26f   :  { %v2094_v63 = vadd.f32 %v2093_v16, %v2065_v19 }
 0x274   :  { %v2120_v12 = vpop.f32.mrf.mxu2 }
 0x275   :  { %v2121_v15 = vadd.f32 %v2120_v12, %v2092_v60 }
 0x277   :  { %v2135_v18 = vmul.f32 %v4199_v38, %v2121_v15 }
 0x279   :  { %v2147_v61 = vadd.f32 %v4205_v22, %v2135_v18 }
 0x27b   :  { %v2155_v29 = vmax.f32 %v2147_v61, 0.0 }
 0x27c   :  { %v2122_v24 = vpop.f32.mrf.mxu2 }
 0x27d   :  { %v2123_v25 = vadd.f32 %v2122_v24, %v2094_v63 }
 0x27f   :  { %v2136_v62 = vmul.f32 %v4199_v38, %v2123_v25 }
 0x281   :  { %v2148_v41 = vadd.f32 %v4205_v22, %v2136_v62 }
 0x283   :  { %v2156_v59 = vmax.f32 %v2148_v41, 0.0 }
 0x285   :  { %v3059_v9 = vpack.c.bf16 %v2156_v59, %v2155_v29 }
 0x287   :  { %3063 = vst [vmem:[%s4246_s12 + $0x18] sm:$0xff] %v3059_v9  }

// kernel: rgbd_encoder_forward.22
= control target key start
LH: loop header
LB: loop body
LE: loop exit
PB: predicated region body
PF: predicated region fallthrough
CT: control target
= control target key end

     0   :  { %s3372_s2 = inlined_call_operand.vmem [shape: bf16[1152,128], index: 2, kind: input, shape index: {}]   ;;  %s3373_s0 = inlined_call_operand.vmem [shape: bf16[64,1152], index: 0, kind: input, shape index: {}]   ;;  %s3374_s3 = inlined_call_operand.vmem [shape: f32[1,128], index: 3, kind: input, shape index: {}]   ;;  %s3375_s4 = inlined_call_operand.vmem [shape: f32[1,128], index: 4, kind: input, shape index: {}]   ;;  %s3376_s5 = inlined_call_operand.vmem [shape: bf16[128,512], index: 5, kind: input, shape index: {}]   ;;  %s3377_s6 = inlined_call_operand.vmem [shape: f32[1,512], index: 6, kind: input, shape index: {}]   ;;  %s3378_s7 = inlined_call_operand.vmem [shape: f32[1,512], index: 7, kind: input, shape index: {}]   ;;  %s3379_s1 = inlined_call_operand.vmem [shape: bf16[64,512], index: 1, kind: input, shape index: {}]   ;;  %s3380_s8 = inlined_call_operand.vmem [shape: bf16[64,512], index: 8, kind: output, shape index: {}]  }
   0x1   :  { %v2269_v0 = vld [vmem:[%s3372_s2 + $0x38] sm:$0xff]  ;;  %v2268_v1 = vld [vmem:[%s3372_s2 + $0x30] sm:$0xff]  ;;  %v2267_v6 = vld [vmem:[%s3372_s2 + $0x28] sm:$0xff] }
   0x2   :  { %829 = vmatpush.bf16.msra.mxu0 %v2269_v0  ;;  %2366 = vmatpush.bf16.msra.mxu1 %v2269_v0  ;;  %v2285_v2 = vld [vmem:[%s3372_s2 + $0xb8] sm:$0xff]  ;;  %v2284_v4 = vld [vmem:[%s3372_s2 + $0xb0] sm:$0xff]  ;;  %v2283_v7 = vld [vmem:[%s3372_s2 + $0xa8] sm:$0xff] }
   0x3   :  { %v2293_v3 = vld [vmem:[%s3372_s2 + $0xf8] sm:$0xff]  ;;  %887 = vmatpush.bf16.msra.mxu2 %v2285_v2  ;;  %v2292_v5 = vld [vmem:[%s3372_s2 + $0xf0] sm:$0xff]  ;;  %v2291_v8 = vld [vmem:[%s3372_s2 + $0xe8] sm:$0xff] }
   0x4   :  { %916 = vmatpush.bf16.msra.mxu3 %v2293_v3  ;;  %v2266_v9 = vld [vmem:[%s3372_s2 + $0x20] sm:$0xff]  ;;  %v2265_v12 = vld [vmem:[%s3372_s2 + $0x18] sm:$0xff]  ;;  %v2264_v15 = vld [vmem:[%s3372_s2 + $0x10] sm:$0xff] }
   0x5   :  { %v2282_v10 = vld [vmem:[%s3372_s2 + $0xa0] sm:$0xff]  ;;  %v2281_v13 = vld [vmem:[%s3372_s2 + $0x98] sm:$0xff]  ;;  %v2280_v16 = vld [vmem:[%s3372_s2 + $0x90] sm:$0xff] }
   0x6   :  { %830 = vmatpush.bf16.msra.mxu0 %v2268_v1  ;;  %2367 = vmatpush.bf16.msra.mxu1 %v2268_v1  ;;  %v2290_v11 = vld [vmem:[%s3372_s2 + $0xe0] sm:$0xff]  ;;  %v2289_v14 = vld [vmem:[%s3372_s2 + $0xd8] sm:$0xff]  ;;  %v2288_v17 = vld [vmem:[%s3372_s2 + $0xd0] sm:$0xff] }
   0x7   :  { %888 = vmatpush.bf16.msra.mxu2 %v2284_v4  ;;  %v2263_v18 = vld [vmem:[%s3372_s2 + $0x8] sm:$0xff]  ;;  %v2262_v21 = vld [vmem:[%s3372_s2] sm:$0xff]  ;;  %v1740_v24 = vld [vmem:[%s3373_s0 + $0x90] sm:$0xf] }
   0x8   :  { %917 = vmatpush.bf16.msra.mxu3 %v2292_v5  ;;  %v2279_v19 = vld [vmem:[%s3372_s2 + $0x88] sm:$0xff]  ;;  %v1668_v22 = vld [vmem:[%s3373_s0] sm:$0xf]  ;;  %v2230_v23 = vld [vmem:[%s3373_s0 + $0x20] sm:$0xf0] }
   0x9   :  { %v2287_v20 = vld [vmem:[%s3372_s2 + $0xc8] sm:$0xff]  ;;  %v2248_v25 = vld [vmem:[%s3373_s0 + $0xb0] sm:$0xf0]  ;;  %v2277_v26 = vld [vmem:[%s3372_s2 + $0x78] sm:$0xff]  ;;  %v1669_v31 = vor.u32 %v2230_v23, %v1668_v22 }
   0xa   :  { %831 = vmatpush.bf16.msra.mxu0 %v2267_v6  ;;  %2368 = vmatpush.bf16.msra.mxu1 %v2267_v6  ;;  %v2301_v27 = vld [vmem:[%s3372_s2 + $0x138] sm:$0xff]  ;;  %v2278_v28 = vld [vmem:[%s3372_s2 + $0x80] sm:$0xff]  ;;  %v1676_v30 = vld [vmem:[%s3373_s0 + $0x8] sm:$0xf]  ;;  %v1741_v32 = vor.u32 %v2248_v25, %v1740_v24 }
   0xb   :  { %889 = vmatpush.bf16.msra.mxu2 %v2283_v7  ;;  %v2286_v29 = vld [vmem:[%s3372_s2 + $0xc0] sm:$0xff]  ;;  %v2231_v33 = vld [vmem:[%s3373_s0 + $0x28] sm:$0xf0]  ;;  %v1678_v35 = vld [vmem:[%s3373_s0 + $0x2c] sm:$0xf0] }
   0xc   :  { %918 = vmatpush.bf16.msra.mxu3 %v2291_v8  ;;  %v2227_v34 = vld [vmem:[%s3373_s0 + $0xc] sm:$0xf]  ;;  %v2317_v36 = vld [vmem:[%s3372_s2 + $0x1b8] sm:$0xff]  ;;  %v2276_v38 = vld [vmem:[%s3372_s2 + $0x70] sm:$0xff]  ;;  %v1677_v40 = vor.u32 %v2231_v33, %v1676_v30 }
   0xd   :  { %v2325_v37 = vld [vmem:[%s3372_s2 + $0x1f8] sm:$0xff]  ;;  %v2300_v39 = vld [vmem:[%s3372_s2 + $0x130] sm:$0xff]  ;;  %v1681_v41 = vor.u32 %v2227_v34, %v1678_v35  ;;  %v2275_v43 = vld [vmem:[%s3372_s2 + $0x68] sm:$0xff] }
   0xe   :  { %832 = vmatpush.bf16.msra.mxu0 %v2266_v9  ;;  %2369 = vmatpush.bf16.msra.mxu1 %v2266_v9  ;;  %v2316_v42 = vld [vmem:[%s3372_s2 + $0x1b0] sm:$0xff]  ;;  %v2299_v44 = vld [vmem:[%s3372_s2 + $0x128] sm:$0xff]  ;;  %v2274_v48 = vld [vmem:[%s3372_s2 + $0x60] sm:$0xff] }
   0xf   :  { %890 = vmatpush.bf16.msra.mxu2 %v2282_v10  ;;  %v2324_v45 = vld [vmem:[%s3372_s2 + $0x1f0] sm:$0xff]  ;;  %v2315_v46 = vld [vmem:[%s3372_s2 + $0x1a8] sm:$0xff]  ;;  %v2298_v49 = vld [vmem:[%s3372_s2 + $0x120] sm:$0xff] }
  0x10   :  { %919 = vmatpush.bf16.msra.mxu3 %v2290_v11  ;;  %v2323_v47 = vld [vmem:[%s3372_s2 + $0x1e8] sm:$0xff]  ;;  %v1776_v52 = vld [vmem:[%s3373_s0 + $0xd8] sm:$0xf]  ;;  %v2257_v53 = vld [vmem:[%s3373_s0 + $0xf8] sm:$0xf0] }
  0x11   :  { %v1704_v50 = vld [vmem:[%s3373_s0 + $0x48] sm:$0xf]  ;;  %v2239_v51 = vld [vmem:[%s3373_s0 + $0x68] sm:$0xf0]  ;;  %v2273_v54 = vld [vmem:[%s3372_s2 + $0x58] sm:$0xff]  ;;  %v1777_v58 = vor.u32 %v2257_v53, %v1776_v52 }
  0x12   :  { %833 = vmatpush.bf16.msra.mxu0 %v2265_v12  ;;  %2370 = vmatpush.bf16.msra.mxu1 %v2265_v12  ;;  %v2297_v55 = vld [vmem:[%s3372_s2 + $0x118] sm:$0xff]  ;;  %v1712_v56 = vld [vmem:[%s3373_s0 + $0x50] sm:$0xf]  ;;  %v1705_v57 = vor.u32 %v2239_v51, %v1704_v50  ;;  %v2240_v59 = vld [vmem:[%s3373_s0 + $0x70] sm:$0xf0] }
  0x13   :  { %891 = vmatpush.bf16.msra.mxu2 %v2281_v13  ;;  %v2236_v60 = vld [vmem:[%s3373_s0 + $0x54] sm:$0xf]  ;;  %v1714_v61 = vld [vmem:[%s3373_s0 + $0x74] sm:$0xf0]  ;;  %v1713_v0 = vor.u32 %v2240_v59, %v1712_v56  ;;  %v2314_v2 = vld [vmem:[%s3372_s2 + $0x1a0] sm:$0xff] }
  0x14   :  { %920 = vmatpush.bf16.msra.mxu3 %v2289_v14  ;;  %v2272_v62 = vld [vmem:[%s3372_s2 + $0x50] sm:$0xff]  ;;  %v1717_v1 = vor.u32 %v2236_v60, %v1714_v61  ;;  %v2271_v3 = vld [vmem:[%s3372_s2 + $0x48] sm:$0xff]  ;;  %v2322_v5 = vld [vmem:[%s3372_s2 + $0x1e0] sm:$0xff] }
  0x15   :  { %v2296_v63 = vld [vmem:[%s3372_s2 + $0x110] sm:$0xff]  ;;  %v2295_v4 = vld [vmem:[%s3372_s2 + $0x108] sm:$0xff]  ;;  %v2313_v6 = vld [vmem:[%s3372_s2 + $0x198] sm:$0xff] }
  0x16   :  { %834 = vmatpush.bf16.msra.mxu0 %v2264_v15  ;;  %2371 = vmatpush.bf16.msra.mxu1 %v2264_v15  ;;  %v2321_v7 = vld [vmem:[%s3372_s2 + $0x1d8] sm:$0xff]  ;;  %v2270_v8 = vld [vmem:[%s3372_s2 + $0x40] sm:$0xff]  ;;  %v1670_v13 = vld [vmem:[%s3373_s0 + $0x24] sm:$0xf0] }
  0x17   :  { %892 = vmatpush.bf16.msra.mxu2 %v2280_v16  ;;  %v2294_v9 = vld [vmem:[%s3372_s2 + $0x100] sm:$0xff]  ;;  %v2309_v10 = vld [vmem:[%s3372_s2 + $0x178] sm:$0xff]  ;;  %v1684_v14 = vld [vmem:[%s3373_s0 + $0x10] sm:$0xf] }
  0x18   :  { %921 = vmatpush.bf16.msra.mxu3 %v2288_v17  ;;  %v2333_v11 = vld [vmem:[%s3372_s2 + $0x238] sm:$0xff]  ;;  %v2226_v12 = vld [vmem:[%s3373_s0 + $0x4] sm:$0xf]  ;;  %v2232_v15 = vld [vmem:[%s3373_s0 + $0x30] sm:$0xf0] }
  0x19   :  { %v2308_v16 = vld [vmem:[%s3372_s2 + $0x170] sm:$0xff]  ;;  %v2245_v22 = vld [vmem:[%s3373_s0 + $0x9c] sm:$0xf]  ;;  %v1750_v23 = vld [vmem:[%s3373_s0 + $0xbc] sm:$0xf0] }
  0x1a   :  { %835 = vmatpush.bf16.msra.mxu0 %v2263_v18  ;;  %2372 = vmatpush.bf16.msra.mxu1 %v2263_v18  ;;  %v2332_v17 = vld [vmem:[%s3372_s2 + $0x230] sm:$0xff]  ;;  %v1673_v18 = vor.u32 %v2226_v12, %v1670_v13  ;;  %v2307_v24 = vld [vmem:[%s3372_s2 + $0x168] sm:$0xff]  ;;  %v2306_v30 = vld [vmem:[%s3372_s2 + $0x160] sm:$0xff] }
  0x1b   :  { %893 = vmatpush.bf16.msra.mxu2 %v2279_v19  ;;  %v1685_v19 = vor.u32 %v2232_v15, %v1684_v14  ;;  %v2319_v33 = vld [vmem:[%s3372_s2 + $0x1c8] sm:$0xff]  ;;  %v2305_v34 = vld [vmem:[%s3372_s2 + $0x158] sm:$0xff]  ;;  %v2318_v52 = vld [vmem:[%s3372_s2 + $0x1c0] sm:$0xff] }
  0x1c   :  { %922 = vmatpush.bf16.msra.mxu3 %v2287_v20  ;;  %v1748_v20 = vld [vmem:[%s3373_s0 + $0x98] sm:$0xf]  ;;  %v2235_v35 = vld [vmem:[%s3373_s0 + $0x4c] sm:$0xf]  ;;  %v2244_v56 = vld [vmem:[%s3373_s0 + $0x94] sm:$0xf] }
  0x1d   :  { %v2303_v51 = vld [vmem:[%s3372_s2 + $0x148] sm:$0xff]  ;;  %v2250_v59 = vld [vmem:[%s3373_s0 + $0xc0] sm:$0xf0] }
  0x1e   :  { %836 = vmatpush.bf16.msra.mxu0 %v2262_v21  ;;  %2373 = vmatpush.bf16.msra.mxu1 %v2262_v21  ;;  %v2249_v21 = vld [vmem:[%s3373_s0 + $0xb8] sm:$0xf0]  ;;  %v2327_v53 = vld [vmem:[%s3372_s2 + $0x208] sm:$0xff]  ;;  %v2238_v12 = vld [vmem:[%s3373_s0 + $0x64] sm:$0xf] }
  0x1f   :  { %894 = vmatpush.bf16.msra.mxu2 %v2278_v28  ;;  %v1749_v25 = vor.u32 %v2249_v21, %v1748_v20  ;;  %v2312_v28 = vld [vmem:[%s3372_s2 + $0x190] sm:$0xff]  ;;  %v1730_v13 = vld [vmem:[%s3373_s0 + $0x84] sm:$0xf0] }
  0x20   :  { %923 = vmatpush.bf16.msra.mxu3 %v2286_v29  ;;  %v2320_v29 = vld [vmem:[%s3372_s2 + $0x1d0] sm:$0xff]  ;;  %v1733_v15 = vor.u32 %v2238_v12, %v1730_v13  ;;  %v2358_v13 = vld [vmem:[%s3376_s5 + $0xc4] sm:$0xf] }
  0x21   :  { %837 = vmatmul.bf16.vlgmr.msra.gmra.mxu0 %v1669_v31  ;;  %847 = vmatmul.bf16.vlgmr.msra.gmra.mxu1 %v1741_v32  ;;  %v2330_v31 = vld [vmem:[%s3372_s2 + $0x220] sm:$0xff]  ;;  %v2311_v32 = vld [vmem:[%s3372_s2 + $0x188] sm:$0xff] }
  0x22   :  { %858 = vmatpush.bf16.msrb.mxu1 %v2277_v26  ;;  %945 = vmatpush.bf16.msrb.mxu0 %v2301_v27  ;;  %v1753_v26 = vor.u32 %v2245_v22, %v1750_v23  ;;  %v2331_v27 = vld [vmem:[%s3372_s2 + $0x228] sm:$0xff] }
  0x23   :  { %1003 = vmatpush.bf16.msrb.mxu2 %v2317_v36  ;;  %924 = vmatmul.bf16.vlgmr.msra.gmra.mxu3 %v1681_v41  ;;  %v2329_v36 = vld [vmem:[%s3372_s2 + $0x218] sm:$0xff]  ;;  %v1764_v22 = vld [vmem:[%s3373_s0 + $0xa8] sm:$0xf]  ;;  %v2251_v23 = vld [vmem:[%s3373_s0 + $0xc8] sm:$0xf0] }
  0x24   :  { %1032 = vmatpush.bf16.msrb.mxu3 %v2325_v37  ;;  %895 = vmatmul.bf16.vlgmr.msra.gmra.mxu2 %v1677_v40  ;;  %v1706_v37 = vld [vmem:[%s3373_s0 + $0x6c] sm:$0xf0] }
  0x25   :  { %v2304_v40 = vld [vmem:[%s3372_s2 + $0x150] sm:$0xff]  ;;  %v1709_v41 = vor.u32 %v2235_v35, %v1706_v37  ;;  %v1802_v37 = vld [vmem:[%s3373_s0 + $0x114] sm:$0xf0] }
  0x26   :  { %859 = vmatpush.bf16.msrb.mxu1 %v2276_v38  ;;  %946 = vmatpush.bf16.msrb.mxu0 %v2300_v39  ;;  %v1720_v38 = vld [vmem:[%s3373_s0 + $0x58] sm:$0xf]  ;;  %v2241_v39 = vld [vmem:[%s3373_s0 + $0x78] sm:$0xf0]  ;;  %v2260_v35 = vld [vmem:[%s3373_s0 + $0x110] sm:$0xf0] }
  0x27   :  { %1004 = vmatpush.bf16.msrb.mxu2 %v2316_v42  ;;  %v1721_v42 = vor.u32 %v2241_v39, %v1720_v38 }
  0x28   :  { %1033 = vmatpush.bf16.msrb.mxu3 %v2324_v45  ;;  %v2254_v45 = vld [vmem:[%s3373_s0 + $0xe4] sm:$0xf] }
  0x2a   :  { %860 = vmatpush.bf16.msrb.mxu1 %v2275_v43  ;;  %947 = vmatpush.bf16.msrb.mxu0 %v2299_v44  ;;  %v1784_v43 = vld [vmem:[%s3373_s0 + $0xe0] sm:$0xf]  ;;  %v2258_v44 = vld [vmem:[%s3373_s0 + $0x100] sm:$0xf0] }
  0x2b   :  { %1005 = vmatpush.bf16.msrb.mxu2 %v2315_v46  ;;  %v1786_v46 = vld [vmem:[%s3373_s0 + $0x104] sm:$0xf0] }
  0x2c   :  { %1034 = vmatpush.bf16.msrb.mxu3 %v2323_v47  ;;  %v2328_v47 = vld [vmem:[%s3372_s2 + $0x210] sm:$0xff]  ;;  %v1789_v50 = vor.u32 %v2254_v45, %v1786_v46 }
  0x2e   :  { %861 = vmatpush.bf16.msrb.mxu1 %v2274_v48  ;;  %948 = vmatpush.bf16.msrb.mxu0 %v2298_v49  ;;  %v1785_v48 = vor.u32 %v2258_v44, %v1784_v43  ;;  %v2310_v49 = vld [vmem:[%s3372_s2 + $0x180] sm:$0xff]  ;;  %v2252_v43 = vld [vmem:[%s3373_s0 + $0xd0] sm:$0xf0] }
  0x2f   :  { %1006 = vmatpush.bf16.msrb.mxu2 %v2314_v2 }
  0x30   :  { %1035 = vmatpush.bf16.msrb.mxu3 %v2322_v5  ;;  %v1778_v5 = vld [vmem:[%s3373_s0 + $0xfc] sm:$0xf0] }
  0x31   :  { %842 = vmatmul.bf16.gmra.mxu0 %v1705_v57  ;;  %852 = vmatmul.bf16.gmra.mxu1 %v1777_v58  ;;  %v1742_v57 = vld [vmem:[%s3373_s0 + $0xb4] sm:$0xf0]  ;;  %v1756_v58 = vld [vmem:[%s3373_s0 + $0xa0] sm:$0xf] }
  0x32   :  { %862 = vmatpush.bf16.msrb.mxu1 %v2273_v54  ;;  %949 = vmatpush.bf16.msrb.mxu0 %v2297_v55  ;;  %v2302_v54 = vld [vmem:[%s3372_s2 + $0x140] sm:$0xff]  ;;  %v1745_v60 = vor.u32 %v2244_v56, %v1742_v57  ;;  %v1757_v61 = vor.u32 %v2250_v59, %v1756_v58 }
  0x33   :  { %929 = vmatmul.bf16.gmra.mxu3 %v1717_v1  ;;  %1007 = vmatpush.bf16.msrb.mxu2 %v2313_v6  ;;  %v2326_v55 = vld [vmem:[%s3372_s2 + $0x200] sm:$0xff]  ;;  %v1792_v6 = vld [vmem:[%s3373_s0 + $0xe8] sm:$0xf] }
  0x34   :  { %900 = vmatmul.bf16.gmra.mxu2 %v1713_v0  ;;  %1036 = vmatpush.bf16.msrb.mxu3 %v2321_v7  ;;  %v2229_v0 = vld [vmem:[%s3373_s0 + $0x1c] sm:$0xf]  ;;  %v1694_v1 = vld [vmem:[%s3373_s0 + $0x3c] sm:$0xf0]  ;;  %v2259_v7 = vld [vmem:[%s3373_s0 + $0x108] sm:$0xf0] }
  0x36   :  { %863 = vmatpush.bf16.msrb.mxu1 %v2272_v62  ;;  %950 = vmatpush.bf16.msrb.mxu0 %v2296_v63  ;;  %v1692_v62 = vld [vmem:[%s3373_s0 + $0x18] sm:$0xf]  ;;  %v2233_v63 = vld [vmem:[%s3373_s0 + $0x38] sm:$0xf0] }
  0x37   :  { %1008 = vmatpush.bf16.msrb.mxu2 %v2312_v28  ;;  %v1693_v2 = vor.u32 %v2233_v63, %v1692_v62  ;;  %v2237_v28 = vld [vmem:[%s3373_s0 + $0x5c] sm:$0xf] }
  0x38   :  { %1037 = vmatpush.bf16.msrb.mxu3 %v2320_v29  ;;  %v1722_v29 = vld [vmem:[%s3373_s0 + $0x7c] sm:$0xf0] }
  0x3a   :  { %864 = vmatpush.bf16.msrb.mxu1 %v2271_v3  ;;  %951 = vmatpush.bf16.msrb.mxu0 %v2295_v4  ;;  %v1697_v3 = vor.u32 %v2229_v0, %v1694_v1  ;;  %v2253_v4 = vld [vmem:[%s3373_s0 + $0xdc] sm:$0xf] }
  0x3b   :  { %1009 = vmatpush.bf16.msrb.mxu2 %v2311_v32  ;;  %v1725_v32 = vor.u32 %v2237_v28, %v1722_v29  ;;  %v2364_v28 = vld [vmem:[%s3376_s5 + $0xec] sm:$0xf0] }
  0x3c   :  { %1038 = vmatpush.bf16.msrb.mxu3 %v2319_v33 }
  0x3e   :  { %865 = vmatpush.bf16.msrb.mxu1 %v2270_v8  ;;  %952 = vmatpush.bf16.msrb.mxu0 %v2294_v9  ;;  %v1781_v8 = vor.u32 %v2253_v4, %v1778_v5  ;;  %v1793_v9 = vor.u32 %v2259_v7, %v1792_v6 }
  0x3f   :  { %1010 = vmatpush.bf16.msrb.mxu2 %v2310_v49 }
  0x40   :  { %1039 = vmatpush.bf16.msrb.mxu3 %v2318_v52  ;;  %v2255_v52 = vld [vmem:[%s3373_s0 + $0xec] sm:$0xf] }
  0x41   :  { %866 = vmatmul.bf16.vlgmr.msrb.gmra.mxu1 %v1673_v18  ;;  %953 = vmatmul.bf16.vlgmr.msrb.gmra.mxu0 %v1685_v19  ;;  %v1700_v18 = vld [vmem:[%s3373_s0 + $0x20] sm:$0xf]  ;;  %v2234_v19 = vld [vmem:[%s3373_s0 + $0x40] sm:$0xf0] }
  0x42   :  { %974 = vmatpush.bf16.msra.mxu1 %v2309_v10  ;;  %1061 = vmatpush.bf16.msra.mxu0 %v2333_v11  ;;  %v1728_v10 = vld [vmem:[%s3373_s0 + $0x60] sm:$0xf]  ;;  %v2242_v11 = vld [vmem:[%s3373_s0 + $0x80] sm:$0xf0]  ;;  %v1701_v21 = vor.u32 %v2234_v19, %v1700_v18 }
  0x43   :  { %934 = vmatmul.bf16.gmra.mxu3 %v1753_v26  ;;  %v1729_v14 = vor.u32 %v2242_v11, %v1728_v10  ;;  %v1765_v26 = vor.u32 %v2251_v23, %v1764_v22  ;;  %v2220_v22 = vld [vmem:[%s3376_s5 + $0xe8] sm:$0xf] }
  0x44   :  { %905 = vmatmul.bf16.gmra.mxu2 %v1749_v25  ;;  %v1766_v25 = vld [vmem:[%s3373_s0 + $0xcc] sm:$0xf0] }
  0x46   :  { %975 = vmatpush.bf16.msra.mxu1 %v2308_v16  ;;  %1062 = vmatpush.bf16.msra.mxu0 %v2332_v17  ;;  %v2228_v16 = vld [vmem:[%s3373_s0 + $0x14] sm:$0xf]  ;;  %v1686_v17 = vld [vmem:[%s3373_s0 + $0x34] sm:$0xf0] }
  0x47   :  { %v1689_v20 = vor.u32 %v2228_v16, %v1686_v17 }
  0x4a   :  { %976 = vmatpush.bf16.msra.mxu1 %v2307_v24  ;;  %1063 = vmatpush.bf16.msra.mxu0 %v2331_v27  ;;  %v2247_v24 = vld [vmem:[%s3373_s0 + $0xac] sm:$0xf] }
  0x4b   :  { %v1769_v27 = vor.u32 %v2247_v24, %v1766_v25 }
  0x4e   :  { %977 = vmatpush.bf16.msra.mxu1 %v2306_v30  ;;  %1064 = vmatpush.bf16.msra.mxu0 %v2330_v31  ;;  %v1736_v30 = vld [vmem:[%s3373_s0 + $0x68] sm:$0xf]  ;;  %v2243_v31 = vld [vmem:[%s3373_s0 + $0x88] sm:$0xf0] }
  0x4f   :  { %v1737_v33 = vor.u32 %v2243_v31, %v1736_v30 }
  0x51   :  { %871 = vmatmul.bf16.gmra.mxu1 %v1709_v41  ;;  %958 = vmatmul.bf16.gmra.mxu0 %v1721_v42  ;;  %v1758_v41 = vld [vmem:[%s3373_s0 + $0xc4] sm:$0xf0]  ;;  %v1772_v42 = vld [vmem:[%s3373_s0 + $0xb0] sm:$0xf] }
  0x52   :  { %978 = vmatpush.bf16.msra.mxu1 %v2305_v34  ;;  %1065 = vmatpush.bf16.msra.mxu0 %v2329_v36  ;;  %v1800_v34 = vld [vmem:[%s3373_s0 + $0xf0] sm:$0xf]  ;;  %v2256_v36 = vld [vmem:[%s3373_s0 + $0xf4] sm:$0xf]  ;;  %v1773_v45 = vor.u32 %v2252_v43, %v1772_v42  ;;  %v2361_v43 = vld [vmem:[%s3376_s5 + $0xd4] sm:$0xf0] }
  0x53   :  { %939 = vmatmul.bf16.gmra.mxu3 %v1789_v50  ;;  %v1801_v38 = vor.u32 %v2260_v35, %v1800_v34  ;;  %v1805_v39 = vor.u32 %v2256_v36, %v1802_v37  ;;  %v2350_v37 = vld [vmem:[%s3376_s5 + $0x84] sm:$0xf] }
  0x54   :  { %910 = vmatmul.bf16.gmra.mxu2 %v1785_v48 }
  0x56   :  { %979 = vmatpush.bf16.msra.mxu1 %v2304_v40  ;;  %1066 = vmatpush.bf16.msra.mxu0 %v2328_v47  ;;  %v2246_v40 = vld [vmem:[%s3373_s0 + $0xa4] sm:$0xf] }
  0x57   :  { %v1761_v44 = vor.u32 %v2246_v40, %v1758_v41 }
  0x5a   :  { %980 = vmatpush.bf16.msra.mxu1 %v2303_v51  ;;  %1067 = vmatpush.bf16.msra.mxu0 %v2327_v53  ;;  %v1794_v53 = vld [vmem:[%s3373_s0 + $0x10c] sm:$0xf0] }
  0x5b   :  { %v1797_v56 = vor.u32 %v2255_v52, %v1794_v53  ;;  %v2222_v52 = vld [vmem:[%s3376_s5 + $0xf8] sm:$0xf0] }
  0x5e   :  { %981 = vmatpush.bf16.msra.mxu1 %v2302_v54  ;;  %1068 = vmatpush.bf16.msra.mxu0 %v2326_v55  ;;  %v1808_v54 = vld [vmem:[%s3373_s0 + $0xf8] sm:$0xf]  ;;  %v2261_v55 = vld [vmem:[%s3373_s0 + $0x118] sm:$0xf0] }
  0x5f   :  { %v1809_v57 = vor.u32 %v2261_v55, %v1808_v54  ;;  %v2359_v54 = vld [vmem:[%s3376_s5 + $0xcc] sm:$0xf]  ;;  %v2206_v55 = vld [vmem:[%s3376_s5 + $0xd8] sm:$0xf0] }
  0x61   :  { %876 = vmatmul.bf16.gmra.mxu1 %v1745_v60  ;;  %963 = vmatmul.bf16.gmra.mxu0 %v1757_v61 }
  0x63   :  { %1040 = vmatmul.bf16.vlgmr.msrb.gmra.mxu3 %v1697_v3  ;;  %v2214_v3 = vld [vmem:[%s3376_s5 + $0xf0] sm:$0xf0] }
  0x64   :  { %1011 = vmatmul.bf16.vlgmr.msrb.gmra.mxu2 %v1693_v2  ;;  %v2362_v2 = vld [vmem:[%s3376_s5 + $0xe4] sm:$0xf] }
  0x65   :  { %v2217_v6 = vor.u32 %v2362_v2, %v2214_v3 }
  0x67   :  { %1347 = vmatpush.bf16.msra.mxu2 %v2217_v6  ;;  %v2180_v6 = vld [vmem:[%s3376_s5 + $0xa0] sm:$0xf] }
  0x71   :  { %881 = vmatmul.bf16.gmra.mxu1 %v1781_v8  ;;  %968 = vmatmul.bf16.gmra.mxu0 %v1793_v9 }
  0x73   :  { %1045 = vmatmul.bf16.gmra.mxu3 %v1733_v15 }
  0x74   :  { %1016 = vmatmul.bf16.gmra.mxu2 %v1729_v14  ;;  %v2198_v14 = vld [vmem:[%s3376_s5 + $0xd0] sm:$0xf0] }
  0x75   :  { %v2201_v17 = vor.u32 %v2358_v13, %v2198_v14 }
  0x77   :  { %1348 = vmatpush.bf16.msra.mxu2 %v2201_v17  ;;  %v2355_v17 = vld [vmem:[%s3376_s5 + $0xac] sm:$0xf] }
  0x81   :  { %982 = vmatmul.bf16.vlgmr.msra.gmra.mxu1 %v1689_v20  ;;  %1069 = vmatmul.bf16.vlgmr.msra.gmra.mxu0 %v1701_v21  ;;  %v2354_v20 = vld [vmem:[%s3376_s5 + $0xa4] sm:$0xf]  ;;  %v2182_v21 = vld [vmem:[%s3376_s5 + $0xb0] sm:$0xf0] }
  0x82   :  { %v2185_v25 = vor.u32 %v2354_v20, %v2182_v21  ;;  %v2190_v20 = vld [vmem:[%s3376_s5 + $0xb8] sm:$0xf0] }
  0x83   :  { %1050 = vmatmul.bf16.gmra.mxu3 %v1769_v27  ;;  %v2212_v27 = vld [vmem:[%s3376_s5 + $0xe0] sm:$0xf]  ;;  %v2994_v21 = vor.u32 %v2355_v17, %v2190_v20 }
  0x84   :  { %1021 = vmatmul.bf16.gmra.mxu2 %v1765_v26  ;;  %v2365_v26 = vld [vmem:[%s3376_s5 + $0xf4] sm:$0xf0]  ;;  %v2213_v31 = vor.u32 %v2364_v28, %v2212_v27  ;;  %v2174_v27 = vld [vmem:[%s3376_s5 + $0x98] sm:$0xf0] }
  0x85   :  { %v2221_v30 = vor.u32 %v2365_v26, %v2220_v22  ;;  %1349 = vmatpush.bf16.msra.mxu2 %v2185_v25  ;;  %v2351_v26 = vld [vmem:[%s3376_s5 + $0x8c] sm:$0xf] }
  0x86   :  { %1318 = vmatpush.bf16.msrb.mxu1 %v2213_v31 }
  0x87   :  { %1376 = vmatpush.bf16.msra.mxu3 %v2221_v30  ;;  %v3016_v30 = vor.u32 %v2351_v26, %v2174_v27  ;;  %v2339_v27 = vld [vmem:[%s3376_s5 + $0x2c] sm:$0xf] }
  0x91   :  { %987 = vmatmul.bf16.gmra.mxu1 %v1725_v32  ;;  %1074 = vmatmul.bf16.gmra.mxu0 %v1737_v33 }
  0x93   :  { %1055 = vmatmul.bf16.gmra.mxu3 %v1805_v39  ;;  %v2204_v39 = vld [vmem:[%s3376_s5 + $0xc8] sm:$0xf] }
  0x94   :  { %1026 = vmatmul.bf16.gmra.mxu2 %v1801_v38  ;;  %v2166_v38 = vld [vmem:[%s3376_s5 + $0x90] sm:$0xf0] }
  0x95   :  { %v2169_v42 = vor.u32 %v2350_v37, %v2166_v38 }
  0x97   :  { %1350 = vmatpush.bf16.msra.mxu2 %v2169_v42  ;;  %v2348_v42 = vld [vmem:[%s3376_s5 + $0x6c] sm:$0xf0] }
  0x9e   :  { %v838_v46 = vpop.f32.mrf.mxu0  ;;  %v2849_v47 = vpop.f32.mrf.mxu1 }
  0xa1   :  { %992 = vmatmul.bf16.gmra.mxu1 %v1761_v44  ;;  %1079 = vmatmul.bf16.gmra.mxu0 %v1773_v45  ;;  %v2196_v44 = vld [vmem:[%s3376_s5 + $0xc0] sm:$0xf]  ;;  %v2360_v45 = vld [vmem:[%s3376_s5 + $0xcc] sm:$0xf0] }
  0xa6   :  { %v2851_v48 = vpop.f32.mrf.mxu0  ;;  %v2853_v49 = vpop.f32.mrf.mxu1 }
  0xa7   :  { %v896_v50 = vpop.f32.mrf.mxu2  ;;  %v925_v51 = vpop.f32.mrf.mxu3 }
  0xae   :  { %v843_v58 = vpop.f32.mrf.mxu0  ;;  %v2867_v59 = vpop.f32.mrf.mxu1 }
  0xaf   :  { %v2869_v60 = vpop.f32.mrf.mxu2  ;;  %v2871_v61 = vpop.f32.mrf.mxu3 }
  0xb1   :  { %997 = vmatmul.bf16.gmra.mxu1 %v1797_v56  ;;  %1084 = vmatmul.bf16.gmra.mxu0 %v1809_v57  ;;  %v2962_v56 = vor.u32 %v2359_v54, %v2206_v55  ;;  %v2134_v54 = vld [vmem:[%s3376_s5 + $0x50] sm:$0xf0]  ;;  %v2132_v55 = vld [vmem:[%s3376_s5 + $0x40] sm:$0xf] }
  0xb6   :  { %v2873_v62 = vpop.f32.mrf.mxu0  ;;  %v2875_v63 = vpop.f32.mrf.mxu1 }
  0xb7   :  { %v901_v0 = vpop.f32.mrf.mxu2  ;;  %v930_v1 = vpop.f32.mrf.mxu3 }
  0xbe   :  { %v867_v4 = vpop.f32.mrf.mxu1  ;;  %v954_v5 = vpop.f32.mrf.mxu0 }
  0xbf   :  { %v868_v7 = vadd.f32 %v867_v4, %v838_v46  ;;  %v2883_v8 = vpop.f32.mrf.mxu2  ;;  %v2885_v10 = vpop.f32.mrf.mxu3  ;;  %v2205_v46 = vor.u32 %v2361_v43, %v2204_v39  ;;  %v2148_v39 = vld [vmem:[%s3376_s5 + $0x60] sm:$0xf]  ;;  %v2347_v43 = vld [vmem:[%s3376_s5 + $0x6c] sm:$0xf] }
  0xc1   :  { %v897_v9 = vadd.f32 %v896_v50, %v868_v7  ;;  %v2197_v50 = vor.u32 %v2360_v45, %v2196_v44  ;;  %1377 = vmatpush.bf16.msra.mxu3 %v2205_v46  ;;  %v2356_v7 = vld [vmem:[%s3376_s5 + $0xac] sm:$0xf0]  ;;  %v2149_v45 = vor.u32 %v2348_v42, %v2148_v39  ;;  %v2158_v46 = vld [vmem:[%s3376_s5 + $0x78] sm:$0xf0]  ;;  %v2100_v39 = vld [vmem:[%s3376_s5] sm:$0xf] }
  0xc2   :  { %v2181_v14 = vor.u32 %v2356_v7, %v2180_v6  ;;  %v2142_v6 = vld [vmem:[%s3376_s5 + $0x58] sm:$0xf0] }
  0xc3   :  { %v926_v11 = vadd.f32 %v925_v51, %v897_v9  ;;  %v2363_v51 = vld [vmem:[%s3376_s5 + $0xec] sm:$0xf]  ;;  %1319 = vmatpush.bf16.msrb.mxu1 %v2197_v50  ;;  %v3045_v50 = vor.u32 %v2347_v43, %v2158_v46  ;;  %v2108_v43 = vld [vmem:[%s3376_s5 + $0x8] sm:$0xf] }
  0xc4   :  { %v2953_v53 = vor.u32 %v2363_v51, %v2222_v52  ;;  %v2342_v52 = vld [vmem:[%s3376_s5 + $0x44] sm:$0xf] }
  0xc5   :  { %v2887_v12 = vadd.f32 %v954_v5, %v926_v11  ;;  %v2357_v5 = vld [vmem:[%s3376_s5 + $0xb4] sm:$0xf0] }
  0xc6   :  { %v2895_v15 = vpop.f32.mrf.mxu1  ;;  %v2897_v16 = vpop.f32.mrf.mxu0  ;;  %1405 = vmatpush.bf16.msrb.mxu0 %v2953_v53 }
  0xc7   :  { %v906_v18 = vpop.f32.mrf.mxu2  ;;  %v2899_v19 = vpop.f32.mrf.mxu3  ;;  %1320 = vmatpush.bf16.msrb.mxu1 %v2181_v14  ;;  %v2116_v14 = vld [vmem:[%s3376_s5 + $0x20] sm:$0xf] }
  0xca   :  { %1406 = vmatpush.bf16.msrb.mxu0 %v2962_v56 }
  0xce   :  { %v872_v23 = vpop.f32.mrf.mxu1  ;;  %v959_v24 = vpop.f32.mrf.mxu0  ;;  %1407 = vmatpush.bf16.msrb.mxu0 %v2994_v21 }
  0xcf   :  { %v873_v29 = vadd.f32 %v872_v23, %v843_v58  ;;  %v2919_v34 = vpop.f32.mrf.mxu2  ;;  %v2923_v36 = vpop.f32.mrf.mxu3  ;;  %v2346_v58 = vld [vmem:[%s3376_s5 + $0x64] sm:$0xf]  ;;  %v2353_v23 = vld [vmem:[%s3376_s5 + $0x94] sm:$0xf0] }
  0xd1   :  { %v902_v32 = vadd.f32 %v901_v0, %v873_v29  ;;  %v2150_v0 = vld [vmem:[%s3376_s5 + $0x70] sm:$0xf0] }
  0xd2   :  { %v2153_v4 = vor.u32 %v2346_v58, %v2150_v0  ;;  %1408 = vmatpush.bf16.msrb.mxu0 %v3016_v30  ;;  %v2137_v58 = vor.u32 %v2342_v52, %v2134_v54  ;;  %v2344_v0 = vld [vmem:[%s3376_s5 + $0x4c] sm:$0xf0] }
  0xd3   :  { %v931_v33 = vadd.f32 %v930_v1, %v902_v32  ;;  %v2188_v1 = vld [vmem:[%s3376_s5 + $0xa8] sm:$0xf] }
  0xd4   :  { %v2189_v13 = vor.u32 %v2357_v5, %v2188_v1  ;;  %1351 = vmatpush.bf16.msra.mxu2 %v2153_v4  ;;  %v2156_v32 = vld [vmem:[%s3376_s5 + $0x68] sm:$0xf]  ;;  %v2343_v5 = vld [vmem:[%s3376_s5 + $0x4c] sm:$0xf] }
  0xd5   :  { %v2921_v35 = vadd.f32 %v959_v24, %v931_v33  ;;  %v2164_v24 = vld [vmem:[%s3376_s5 + $0x80] sm:$0xf]  ;;  %v2349_v33 = vld [vmem:[%s3376_s5 + $0x74] sm:$0xf0]  ;;  %v2140_v1 = vld [vmem:[%s3376_s5 + $0x48] sm:$0xf]  ;;  %v3074_v7 = vor.u32 %v2343_v5, %v2142_v6 }
  0xd6   :  { %v2934_v40 = vpop.f32.mrf.mxu1  ;;  %v2936_v41 = vpop.f32.mrf.mxu0  ;;  %1378 = vmatpush.bf16.msra.mxu3 %v2189_v13  ;;  %1409 = vmatpush.bf16.msrb.mxu0 %v3045_v50  ;;  %v2118_v13 = vld [vmem:[%s3376_s5 + $0x30] sm:$0xf0] }
  0xd7   :  { %v2964_v57 = vpop.f32.mrf.mxu2  ;;  %v2986_v11 = vpop.f32.mrf.mxu3 }
  0xd8   :  { %1352 = vmatpush.bf16.msra.mxu2 %v2137_v58  ;;  %v2335_v58 = vld [vmem:[%s3376_s5 + $0xc] sm:$0xf] }
  0xda   :  { %1410 = vmatpush.bf16.msrb.mxu0 %v3074_v7 }
  0xde   :  { %v877_v2 = vpop.f32.mrf.mxu1  ;;  %v964_v3 = vpop.f32.mrf.mxu0 }
  0xdf   :  { %v878_v9 = vadd.f32 %v877_v2, %v2849_v47  ;;  %v2172_v47 = vld [vmem:[%s3376_s5 + $0x88] sm:$0xf]  ;;  %v3040_v44 = vpop.f32.mrf.mxu2  ;;  %v3047_v51 = vpop.f32.mrf.mxu3  ;;  %v2345_v2 = vld [vmem:[%s3376_s5 + $0x54] sm:$0xf0] }
  0xe0   :  { %v2173_v25 = vor.u32 %v2353_v23, %v2172_v47  ;;  %v2141_v4 = vor.u32 %v2345_v2, %v2140_v1  ;;  %v2340_v47 = vld [vmem:[%s3376_s5 + $0x2c] sm:$0xf0]  ;;  %v2124_v23 = vld [vmem:[%s3376_s5 + $0x28] sm:$0xf] }
  0xe1   :  { %v907_v22 = vadd.f32 %v906_v18, %v878_v9  ;;  %v2352_v18 = vld [vmem:[%s3376_s5 + $0x8c] sm:$0xf0]  ;;  %v2338_v9 = vld [vmem:[%s3376_s5 + $0x24] sm:$0xf] }
  0xe2   :  { %v2165_v29 = vor.u32 %v2352_v18, %v2164_v24  ;;  %1379 = vmatpush.bf16.msra.mxu3 %v2173_v25  ;;  %v2341_v24 = vld [vmem:[%s3376_s5 + $0x34] sm:$0xf0]  ;;  %v2117_v18 = vor.u32 %v2340_v47, %v2116_v14 }
  0xe3   :  { %v936_v28 = vadd.f32 %v2899_v19, %v907_v22  ;;  %v2157_v19 = vor.u32 %v2349_v33, %v2156_v32  ;;  %v2121_v22 = vor.u32 %v2338_v9, %v2118_v13  ;;  %v2125_v26 = vor.u32 %v2341_v24, %v2124_v23 }
  0xe4   :  { %1321 = vmatpush.bf16.msrb.mxu1 %v2165_v29 }
  0xe5   :  { %v3018_v31 = vadd.f32 %v964_v3, %v936_v28  ;;  %v2133_v3 = vor.u32 %v2344_v0, %v2132_v55  ;;  %v2126_v28 = vld [vmem:[%s3376_s5 + $0x38] sm:$0xf0]  ;;  %1353 = vmatpush.bf16.msra.mxu2 %v2121_v22 }
  0xe6   :  { %v3026_v37 = vpop.f32.mrf.mxu1  ;;  %v3028_v38 = vpop.f32.mrf.mxu0  ;;  %1380 = vmatpush.bf16.msra.mxu3 %v2157_v19  ;;  %v2129_v29 = vor.u32 %v2339_v27, %v2126_v28  ;;  %v2334_v19 = vld [vmem:[%s3376_s5 + $0x4] sm:$0xf]  ;;  %v2110_v0 = vld [vmem:[%s3376_s5 + $0x18] sm:$0xf0] }
  0xe7   :  { %v1012_v33 = vpop.f32.mrf.mxu2  ;;  %v1041_v52 = vpop.f32.mrf.mxu3  ;;  %v2113_v1 = vor.u32 %v2335_v58, %v2110_v0 }
  0xe8   :  { %1322 = vmatpush.bf16.msrb.mxu1 %v2149_v45  ;;  %1411 = vmatpush.bf16.msrb.mxu0 %v2129_v29  ;;  %v2337_v45 = vld [vmem:[%s3376_s5 + $0x14] sm:$0xf0] }
  0xe9   :  { %v2109_v55 = vor.u32 %v2337_v45, %v2108_v43 }
  0xea   :  { %1381 = vmatpush.bf16.msra.mxu3 %v2141_v4  ;;  %v870_v4 = vadd.f32 %v2895_v15, %v2851_v48 }
  0xec   :  { %1323 = vmatpush.bf16.msrb.mxu1 %v2133_v3  ;;  %1412 = vmatpush.bf16.msrb.mxu0 %v2113_v1  ;;  %v899_v6 = vadd.f32 %v2869_v60, %v870_v4 }
  0xee   :  { %v882_v17 = vpop.f32.mrf.mxu1  ;;  %v969_v20 = vpop.f32.mrf.mxu0  ;;  %1382 = vmatpush.bf16.msra.mxu3 %v2125_v26 }
  0xef   :  { %v883_v25 = vadd.f32 %v882_v17, %v2867_v59  ;;  %v2102_v59 = vld [vmem:[%s3376_s5 + $0x10] sm:$0xf0]  ;;  %v1014_v5 = vpop.f32.mrf.mxu2  ;;  %v1043_v9 = vpop.f32.mrf.mxu3 }
  0xf0   :  { %1324 = vmatpush.bf16.msrb.mxu1 %v2117_v18  ;;  %v2105_v42 = vor.u32 %v2334_v19, %v2102_v59 }
  0xf1   :  { %v912_v32 = vadd.f32 %v2964_v57, %v883_v25  ;;  %v2336_v57 = vld [vmem:[%s3376_s5 + $0xc] sm:$0xf0] }
  0xf2   :  { %v2101_v54 = vor.u32 %v2336_v57, %v2100_v39  ;;  %1354 = vmatpush.bf16.msra.mxu2 %v2105_v42  ;;  %1383 = vmatpush.bf16.msra.mxu3 %v2109_v55 }
  0xf3   :  { %v941_v46 = vadd.f32 %v2986_v11, %v912_v32 }
  0xf4   :  { %1325 = vmatpush.bf16.msrb.mxu1 %v2101_v54 }
  0xf5   :  { %v3128_v2 = vadd.f32 %v969_v20, %v941_v46  ;;  %v928_v20 = vadd.f32 %v2871_v61, %v899_v6  ;;  %v875_v61 = vadd.f32 %v2934_v40, %v2873_v62 }
  0xf6   :  { %v3130_v3 = vpop.f32.mrf.mxu1  ;;  %v3132_v11 = vpop.f32.mrf.mxu0  ;;  %2374 = vmatpush.bf16.msrb.mxu2 %v2953_v53 }
  0xf7   :  { %v957_v48 = vadd.f32 %v2897_v16, %v928_v20  ;;  %v1017_v15 = vpop.f32.mrf.mxu2  ;;  %v1046_v23 = vpop.f32.mrf.mxu3  ;;  %v904_v25 = vadd.f32 %v2883_v8, %v875_v61 }
  0xf9   :  { %v933_v32 = vadd.f32 %v2885_v10, %v904_v25  ;;  %v880_v10 = vadd.f32 %v3026_v37, %v2853_v49 }
  0xfa   :  { %2375 = vmatpush.bf16.msrb.mxu2 %v2962_v56 }
  0xfb   :  { %v962_v57 = vadd.f32 %v2936_v41, %v933_v32  ;;  %v909_v41 = vadd.f32 %v2919_v34, %v880_v10 }
  0xfe   :  { %v983_v13 = vpop.f32.mrf.mxu1  ;;  %v1070_v14 = vpop.f32.mrf.mxu0  ;;  %2376 = vmatpush.bf16.msrb.mxu2 %v2994_v21  ;;  %v3148_v21 = vld [vmem:[%s3374_s3] ss:$0 sm:$0xff] }
  0xff   :  { %v984_v17 = vadd.f32 %v983_v13, %v2887_v12  ;;  %v1048_v59 = vpop.f32.mrf.mxu3 }
 0x101   :  { %v1013_v22 = vadd.f32 %v1012_v33, %v984_v17 }
 0x102   :  { %2377 = vmatpush.bf16.msrb.mxu2 %v3016_v30 }
 0x103   :  { %v1042_v53 = vadd.f32 %v1041_v52, %v1013_v22 }
 0x105   :  { %v1071_v60 = vadd.f32 %v1070_v14, %v1042_v53  ;;  %v938_v14 = vadd.f32 %v2923_v36, %v909_v41  ;;  %v885_v36 = vadd.f32 %v3130_v3, %v2875_v63 }
 0x106   :  { %v985_v56 = vpop.f32.mrf.mxu1  ;;  %v1072_v47 = vpop.f32.mrf.mxu0  ;;  %2378 = vmatpush.bf16.msrb.mxu2 %v3045_v50  ;;  %v3157_v50 = vld [vmem:[%s3375_s4] ss:$0 sm:$0xff] }
 0x107   :  { %v986_v12 = vadd.f32 %v985_v56, %v957_v48  ;;  %v1094_v16 = vmul.f32 %v3148_v21, %v1071_v60  ;;  %v1051_v0 = vpop.f32.mrf.mxu3  ;;  %v967_v34 = vadd.f32 %v3028_v38, %v938_v14 }
 0x109   :  { %v1015_v30 = vadd.f32 %v1014_v5, %v986_v12  ;;  %v1106_v28 = vadd.f32 %v3157_v50, %v1094_v16 }
 0x10a   :  { %2379 = vmatpush.bf16.msrb.mxu2 %v3074_v7  ;;  %v1019_v7 = vpop.f32.mrf.mxu2 }
 0x10b   :  { %v1044_v24 = vadd.f32 %v1043_v9, %v1015_v30  ;;  %v1114_v39 = vmax.f32 %v1106_v28, 0.0  ;;  %v914_v30 = vadd.f32 %v3040_v44, %v885_v36 }
 0x10d   :  { %v1073_v18 = vadd.f32 %v1072_v47, %v1044_v24  ;;  %v943_v28 = vadd.f32 %v3047_v51, %v914_v30 }
 0x10e   :  { %v988_v26 = vpop.f32.mrf.mxu1  ;;  %v1075_v27 = vpop.f32.mrf.mxu0  ;;  %2380 = vmatpush.bf16.msrb.mxu2 %v2129_v29 }
 0x10f   :  { %v1095_v62 = vmul.f32 %v3148_v21, %v1073_v18  ;;  %v989_v40 = vadd.f32 %v988_v26, %v2921_v35  ;;  %v972_v44 = vadd.f32 %v3132_v11, %v943_v28 }
 0x111   :  { %v1107_v33 = vadd.f32 %v3157_v50, %v1095_v62  ;;  %v1018_v19 = vadd.f32 %v1017_v15, %v989_v40  ;;  %v1053_v15 = vpop.f32.mrf.mxu3 }
 0x112   :  { %2381 = vmatpush.bf16.msrb.mxu2 %v2113_v1  ;;  %v1022_v54 = vpop.f32.mrf.mxu2 }
 0x113   :  { %v1115_v8 = vmax.f32 %v1107_v33, 0.0  ;;  %v1047_v42 = vadd.f32 %v1046_v23, %v1018_v19 }
 0x115   :  { %v1122_v29 = vpack.c.bf16 %v1115_v8, %v1114_v39  ;;  %v1076_v46 = vadd.f32 %v1075_v27, %v1047_v42 }
 0x116   :  { %v990_v43 = vpop.f32.mrf.mxu1  ;;  %v1077_v45 = vpop.f32.mrf.mxu0 }
 0x117   :  { %v991_v52 = vadd.f32 %v990_v43, %v962_v57  ;;  %1326 = vmatmul.bf16.vlgmr.msrb.gmra.mxu1 %v1122_v29  ;;  %1355 = vmatmul.bf16.vlgmr.msra.gmra.mxu2 %v1122_v29  ;;  %v1096_v55 = vmul.f32 %v3148_v21, %v1076_v46 }
 0x118   :  { %1384 = vmatmul.bf16.vlgmr.msra.gmra.mxu3 %v1122_v29  ;;  %1413 = vmatmul.bf16.vlgmr.msrb.gmra.mxu0 %v1122_v29 }
 0x119   :  { %v1020_v35 = vadd.f32 %v1019_v7, %v991_v52  ;;  %v1108_v6 = vadd.f32 %v3157_v50, %v1096_v55  ;;  %v1056_v27 = vpop.f32.mrf.mxu3 }
 0x11a   :  { %v1024_v53 = vpop.f32.mrf.mxu2 }
 0x11b   :  { %v1049_v58 = vadd.f32 %v1048_v59, %v1020_v35  ;;  %v1116_v17 = vmax.f32 %v1108_v6, 0.0 }
 0x11d   :  { %v1078_v1 = vadd.f32 %v1077_v45, %v1049_v58  ;;  %v1476_v58 = vld [vmem:[%s3378_s7] sm:$0xf] }
 0x11e   :  { %v993_v4 = vpop.f32.mrf.mxu1  ;;  %v1080_v5 = vpop.f32.mrf.mxu0  ;;  %v3201_v41 = vperm.slane %v1476_v58, 0  ;;  %v3207_v6 = vperm.slane %v1476_v58, 3 }
 0x11f   :  { %v1097_v9 = vmul.f32 %v3148_v21, %v1078_v1  ;;  %v994_v13 = vadd.f32 %v993_v4, %v3018_v31  ;;  %v1518_v4 = vld [vmem:[%s3379_s1] sm:$0xff] }
 0x121   :  { %v1109_v49 = vadd.f32 %v3157_v50, %v1097_v9  ;;  %v1023_v37 = vadd.f32 %v1022_v54, %v994_v13  ;;  %v1058_v51 = vpop.f32.mrf.mxu3  ;;  %v1434_v54 = vld [vmem:[%s3377_s6] sm:$0xf]  ;;  %v1519_v9 = vld [vmem:[%s3379_s1 + $0x8] sm:$0xff] }
 0x122   :  { %v1027_v16 = vpop.f32.mrf.mxu2  ;;  %v3193_v55 = vperm.slane %v1434_v54, 0  ;;  %v3212_v13 = vperm.slane %v1434_v54, 1  ;;  %v3214_v14 = vperm.slane %v1434_v54, 2 }
 0x123   :  { %v1117_v20 = vmax.f32 %v1109_v49, 0.0  ;;  %v1052_v22 = vadd.f32 %v1051_v0, %v1023_v37  ;;  %v1534_v37 = vunpack.c.l.bf16 %v1518_v4 }
 0x125   :  { %v1123_v48 = vpack.c.bf16 %v1117_v20, %v1116_v17  ;;  %v1081_v47 = vadd.f32 %v1080_v5, %v1052_v22  ;;  %v3217_v17 = vperm.slane %v1476_v58, 1  ;;  %v1537_v22 = vunpack.c.h.bf16 %v1519_v9 }
 0x126   :  { %v995_v56 = vpop.f32.mrf.mxu1  ;;  %v1082_v12 = vpop.f32.mrf.mxu0 }
 0x127   :  { %v996_v60 = vadd.f32 %v995_v56, %v967_v34  ;;  %1331 = vmatmul.bf16.gmra.mxu1 %v1123_v48  ;;  %1360 = vmatmul.bf16.gmra.mxu2 %v1123_v48  ;;  %v1098_v23 = vmul.f32 %v3148_v21, %v1081_v47  ;;  %v3220_v34 = vperm.slane %v1476_v58, 2 }
 0x128   :  { %1389 = vmatmul.bf16.gmra.mxu3 %v1123_v48  ;;  %1418 = vmatmul.bf16.gmra.mxu0 %v1123_v48 }
 0x129   :  { %v1025_v31 = vadd.f32 %v1024_v53, %v996_v60  ;;  %v1110_v25 = vadd.f32 %v3157_v50, %v1098_v23  ;;  %v1536_v60 = vunpack.c.l.bf16 %v1519_v9 }
 0x12a   :  { %v1029_v8 = vpop.f32.mrf.mxu2 }
 0x12b   :  { %v1054_v61 = vadd.f32 %v1053_v15, %v1025_v31  ;;  %v1118_v40 = vmax.f32 %v1110_v25, 0.0  ;;  %v1535_v15 = vunpack.c.h.bf16 %v1518_v4 }
 0x12d   :  { %v1083_v38 = vadd.f32 %v1082_v12, %v1054_v61 }
 0x12e   :  { %v998_v24 = vpop.f32.mrf.mxu1  ;;  %v1085_v62 = vpop.f32.mrf.mxu0 }
 0x12f   :  { %v1099_v18 = vmul.f32 %v3148_v21, %v1083_v38  ;;  %v999_v26 = vadd.f32 %v998_v24, %v3128_v2 }
 0x131   :  { %v1111_v63 = vadd.f32 %v3157_v50, %v1099_v18  ;;  %v1028_v3 = vadd.f32 %v1027_v16, %v999_v26  ;;  %v1520_v16 = vld [vmem:[%s3379_s1 + $0x10] sm:$0xff]  ;;  %v1521_v18 = vld [vmem:[%s3379_s1 + $0x18] sm:$0xff] }
 0x133   :  { %v1119_v7 = vmax.f32 %v1111_v63, 0.0  ;;  %v1057_v32 = vadd.f32 %v1056_v27, %v1028_v3  ;;  %v1538_v3 = vunpack.c.l.bf16 %v1520_v16 }
 0x135   :  { %v1124_v33 = vpack.c.bf16 %v1119_v7, %v1118_v40  ;;  %v1086_v59 = vadd.f32 %v1085_v62, %v1057_v32  ;;  %v1541_v32 = vunpack.c.h.bf16 %v1521_v18 }
 0x136   :  { %v1000_v19 = vpop.f32.mrf.mxu1  ;;  %v1087_v29 = vpop.f32.mrf.mxu0 }
 0x137   :  { %v1001_v39 = vadd.f32 %v1000_v19, %v972_v44  ;;  %1336 = vmatmul.bf16.gmra.mxu1 %v1124_v33  ;;  %1365 = vmatmul.bf16.gmra.mxu2 %v1124_v33  ;;  %v1100_v42 = vmul.f32 %v3148_v21, %v1086_v59  ;;  %v1539_v59 = vunpack.c.h.bf16 %v1520_v16  ;;  %v1524_v16 = vld [vmem:[%s3379_s1 + $0x30] sm:$0xff] }
 0x138   :  { %1394 = vmatmul.bf16.gmra.mxu3 %v1124_v33  ;;  %1423 = vmatmul.bf16.gmra.mxu0 %v1124_v33 }
 0x139   :  { %v1030_v2 = vadd.f32 %v1029_v8, %v1001_v39  ;;  %v1112_v45 = vadd.f32 %v3157_v50, %v1100_v42 }
 0x13b   :  { %v1059_v57 = vadd.f32 %v1058_v51, %v1030_v2  ;;  %v1120_v52 = vmax.f32 %v1112_v45, 0.0  ;;  %v1540_v51 = vunpack.c.l.bf16 %v1521_v18  ;;  %v1525_v18 = vld [vmem:[%s3379_s1 + $0x38] sm:$0xff] }
 0x13d   :  { %v1088_v43 = vadd.f32 %v1087_v29, %v1059_v57 }
 0x13f   :  { %v1101_v11 = vmul.f32 %v3148_v21, %v1088_v43  ;;  %v3198_v21 = vperm.slane %v1434_v54, 3  ;;  %v1523_v54 = vld [vmem:[%s3379_s1 + $0x28] sm:$0xff] }
 0x141   :  { %v1113_v46 = vadd.f32 %v3157_v50, %v1101_v11 }
 0x143   :  { %v1121_v10 = vmax.f32 %v1113_v46, 0.0 }
 0x145   :  { %v1125_v35 = vpack.c.bf16 %v1121_v10, %v1120_v52  ;;  %v1522_v52 = vld [vmem:[%s3379_s1 + $0x20] sm:$0xff] }
 0x146   :  { %v1542_v4 = vunpack.c.l.bf16 %v1522_v52 }
 0x147   :  { %1341 = vmatmul.bf16.gmra.mxu1 %v1125_v35  ;;  %1370 = vmatmul.bf16.gmra.mxu2 %v1125_v35 }
 0x148   :  { %1399 = vmatmul.bf16.gmra.mxu3 %v1125_v35 }
 0x157   :  { %1428 = vmatmul.bf16.vlgmr.msrb.gmra.mxu2 %v1125_v35 }
 0x194   :  { %v1327_v50 = vpop.f32.mrf.mxu1 }
 0x195   :  { %v1444_v0 = vmul.f32 %v3193_v55, %v1327_v50  ;;  %v1414_v1 = vpop.f32.mrf.mxu0 }
 0x196   :  { %v1447_v5 = vmul.f32 %v3198_v21, %v1414_v1 }
 0x197   :  { %v1486_v49 = vadd.f32 %v3201_v41, %v1444_v0 }
 0x198   :  { %v1489_v20 = vadd.f32 %v3207_v6, %v1447_v5 }
 0x199   :  { %v1566_v36 = vadd.f32 %v1534_v37, %v1486_v49  ;;  %v1545_v37 = vunpack.c.h.bf16 %v1523_v54 }
 0x19a   :  { %v1356_v53 = vpop.f32.mrf.mxu2  ;;  %v1569_v30 = vadd.f32 %v1537_v22, %v1489_v20 }
 0x19b   :  { %v1445_v48 = vmul.f32 %v3212_v13, %v1356_v53  ;;  %v1385_v56 = vpop.f32.mrf.mxu3  ;;  %v1598_v27 = vmax.f32 %v1566_v36, 0.0 }
 0x19c   :  { %v1446_v47 = vmul.f32 %v3214_v14, %v1385_v56  ;;  %v1329_v12 = vpop.f32.mrf.mxu1  ;;  %v1601_v62 = vmax.f32 %v1569_v30, 0.0 }
 0x19d   :  { %v1487_v31 = vadd.f32 %v3217_v17, %v1445_v48  ;;  %v1448_v23 = vmul.f32 %v3193_v55, %v1329_v12  ;;  %v1416_v61 = vpop.f32.mrf.mxu0  ;;  %v1543_v48 = vunpack.c.h.bf16 %v1522_v52  ;;  %v1526_v52 = vld [vmem:[%s3379_s1 + $0x40] sm:$0xff] }
 0x19e   :  { %v1488_v38 = vadd.f32 %v3220_v34, %v1446_v47  ;;  %v1451_v24 = vmul.f32 %v3198_v21, %v1416_v61 }
 0x19f   :  { %v1567_v25 = vadd.f32 %v1535_v15, %v1487_v31  ;;  %v1490_v63 = vadd.f32 %v3201_v41, %v1448_v23 }
 0x1a0   :  { %v1568_v26 = vadd.f32 %v1536_v60, %v1488_v38  ;;  %v1493_v7 = vadd.f32 %v3207_v6, %v1451_v24  ;;  %v1544_v60 = vunpack.c.l.bf16 %v1523_v54  ;;  %v1527_v54 = vld [vmem:[%s3379_s1 + $0x48] sm:$0xff] }
 0x1a1   :  { %v1599_v28 = vmax.f32 %v1567_v25, 0.0  ;;  %v1570_v57 = vadd.f32 %v1538_v3, %v1490_v63  ;;  %v1546_v3 = vunpack.c.l.bf16 %v1524_v16 }
 0x1a2   :  { %v1600_v40 = vmax.f32 %v1568_v26, 0.0  ;;  %v1358_v44 = vpop.f32.mrf.mxu2  ;;  %v1573_v11 = vadd.f32 %v1541_v32, %v1493_v7  ;;  %v1549_v32 = vunpack.c.h.bf16 %v1525_v18 }
 0x1a3   :  { %v1630_v33 = vpack.c.bf16 %v1599_v28, %v1598_v27  ;;  %v1449_v19 = vmul.f32 %v3212_v13, %v1358_v44  ;;  %v1387_v39 = vpop.f32.mrf.mxu3  ;;  %v1602_v50 = vmax.f32 %v1570_v57, 0.0 }
 0x1a4   :  { %v1631_v8 = vpack.c.bf16 %v1601_v62, %v1600_v40  ;;  %v1450_v2 = vmul.f32 %v3214_v14, %v1387_v39  ;;  %v1332_v42 = vpop.f32.mrf.mxu1  ;;  %v1605_v5 = vmax.f32 %v1573_v11, 0.0 }
 0x1a5   :  { %1646 = vst [vmem:[%s3380_s8] sm:$0xff] %v1630_v33  ;;  %v1491_v29 = vadd.f32 %v3217_v17, %v1449_v19  ;;  %v1452_v43 = vmul.f32 %v3193_v55, %v1332_v42  ;;  %v1419_v45 = vpop.f32.mrf.mxu0 }
 0x1a6   :  { %1647 = vst [vmem:[%s3380_s8 + $0x8] sm:$0xff] %v1631_v8  ;;  %v1492_v46 = vadd.f32 %v3220_v34, %v1450_v2  ;;  %v1455_v10 = vmul.f32 %v3198_v21, %v1419_v45 }
 0x1a7   :  { %v1571_v35 = vadd.f32 %v1539_v59, %v1491_v29  ;;  %v1494_v1 = vadd.f32 %v3201_v41, %v1452_v43  ;;  %v1547_v59 = vunpack.c.h.bf16 %v1524_v16  ;;  %v1528_v16 = vld [vmem:[%s3379_s1 + $0x50] sm:$0xff] }
 0x1a8   :  { %v1572_v58 = vadd.f32 %v1540_v51, %v1492_v46  ;;  %v1497_v49 = vadd.f32 %v3207_v6, %v1455_v10  ;;  %v1548_v51 = vunpack.c.l.bf16 %v1525_v18  ;;  %v1529_v18 = vld [vmem:[%s3379_s1 + $0x58] sm:$0xff] }
 0x1a9   :  { %v1603_v0 = vmax.f32 %v1571_v35, 0.0  ;;  %v1574_v36 = vadd.f32 %v1542_v4, %v1494_v1  ;;  %v1550_v4 = vunpack.c.l.bf16 %v1526_v52 }
 0x1aa   :  { %v1604_v9 = vmax.f32 %v1572_v58, 0.0  ;;  %v1361_v20 = vpop.f32.mrf.mxu2  ;;  %v1577_v30 = vadd.f32 %v1545_v37, %v1497_v49  ;;  %v1553_v37 = vunpack.c.h.bf16 %v1527_v54 }
 0x1ab   :  { %v1632_v22 = vpack.c.bf16 %v1603_v0, %v1602_v50  ;;  %v1453_v53 = vmul.f32 %v3212_v13, %v1361_v20  ;;  %v1390_v15 = vpop.f32.mrf.mxu3  ;;  %v1606_v27 = vmax.f32 %v1574_v36, 0.0 }
 0x1ac   :  { %v1633_v56 = vpack.c.bf16 %v1605_v5, %v1604_v9  ;;  %v1454_v47 = vmul.f32 %v3214_v14, %v1390_v15  ;;  %v1334_v12 = vpop.f32.mrf.mxu1  ;;  %v1609_v62 = vmax.f32 %v1577_v30, 0.0 }
 0x1ad   :  { %1648 = vst [vmem:[%s3380_s8 + $0x10] sm:$0xff] %v1632_v22  ;;  %v1495_v31 = vadd.f32 %v3217_v17, %v1453_v53  ;;  %v1456_v23 = vmul.f32 %v3193_v55, %v1334_v12  ;;  %v1421_v61 = vpop.f32.mrf.mxu0 }
 0x1ae   :  { %1649 = vst [vmem:[%s3380_s8 + $0x18] sm:$0xff] %v1633_v56  ;;  %v1496_v38 = vadd.f32 %v3220_v34, %v1454_v47  ;;  %v1459_v24 = vmul.f32 %v3198_v21, %v1421_v61 }
 0x1af   :  { %v1575_v25 = vadd.f32 %v1543_v48, %v1495_v31  ;;  %v1498_v63 = vadd.f32 %v3201_v41, %v1456_v23  ;;  %v1551_v48 = vunpack.c.h.bf16 %v1526_v52 }
 0x1b0   :  { %v1576_v26 = vadd.f32 %v1544_v60, %v1496_v38  ;;  %v1501_v7 = vadd.f32 %v3207_v6, %v1459_v24  ;;  %v1552_v60 = vunpack.c.l.bf16 %v1527_v54 }
 0x1b1   :  { %v1607_v28 = vmax.f32 %v1575_v25, 0.0  ;;  %v1578_v57 = vadd.f32 %v1546_v3, %v1498_v63  ;;  %v1554_v3 = vunpack.c.l.bf16 %v1528_v16 }
 0x1b2   :  { %v1608_v40 = vmax.f32 %v1576_v26, 0.0  ;;  %v1363_v44 = vpop.f32.mrf.mxu2  ;;  %v1581_v11 = vadd.f32 %v1549_v32, %v1501_v7  ;;  %v1557_v32 = vunpack.c.h.bf16 %v1529_v18 }
 0x1b3   :  { %v1634_v33 = vpack.c.bf16 %v1607_v28, %v1606_v27  ;;  %v1457_v19 = vmul.f32 %v3212_v13, %v1363_v44  ;;  %v1392_v39 = vpop.f32.mrf.mxu3  ;;  %v1610_v50 = vmax.f32 %v1578_v57, 0.0 }
 0x1b4   :  { %v1635_v8 = vpack.c.bf16 %v1609_v62, %v1608_v40  ;;  %v1458_v2 = vmul.f32 %v3214_v14, %v1392_v39  ;;  %v1337_v42 = vpop.f32.mrf.mxu1  ;;  %v1613_v5 = vmax.f32 %v1581_v11, 0.0 }
 0x1b5   :  { %1650 = vst [vmem:[%s3380_s8 + $0x20] sm:$0xff] %v1634_v33  ;;  %v1499_v29 = vadd.f32 %v3217_v17, %v1457_v19  ;;  %v1460_v43 = vmul.f32 %v3193_v55, %v1337_v42  ;;  %v1424_v45 = vpop.f32.mrf.mxu0 }
 0x1b6   :  { %1651 = vst [vmem:[%s3380_s8 + $0x28] sm:$0xff] %v1635_v8  ;;  %v1500_v46 = vadd.f32 %v3220_v34, %v1458_v2  ;;  %v1463_v10 = vmul.f32 %v3198_v21, %v1424_v45 }
 0x1b7   :  { %v1579_v35 = vadd.f32 %v1547_v59, %v1499_v29  ;;  %v1502_v1 = vadd.f32 %v3201_v41, %v1460_v43  ;;  %v1555_v59 = vunpack.c.h.bf16 %v1528_v16 }
 0x1b8   :  { %v1580_v58 = vadd.f32 %v1548_v51, %v1500_v46  ;;  %v1505_v49 = vadd.f32 %v3207_v6, %v1463_v10  ;;  %v1556_v51 = vunpack.c.l.bf16 %v1529_v18  ;;  %v1530_v46 = vld [vmem:[%s3379_s1 + $0x60] sm:$0xff] }
 0x1b9   :  { %v1611_v0 = vmax.f32 %v1579_v35, 0.0  ;;  %v1582_v36 = vadd.f32 %v1550_v4, %v1502_v1 }
 0x1ba   :  { %v1612_v9 = vmax.f32 %v1580_v58, 0.0  ;;  %v1366_v20 = vpop.f32.mrf.mxu2  ;;  %v1585_v30 = vadd.f32 %v1553_v37, %v1505_v49  ;;  %v1559_v37 = vunpack.c.h.bf16 %v1530_v46 }
 0x1bb   :  { %v1636_v22 = vpack.c.bf16 %v1611_v0, %v1610_v50  ;;  %v1461_v53 = vmul.f32 %v3212_v13, %v1366_v20  ;;  %v1395_v15 = vpop.f32.mrf.mxu3  ;;  %v1614_v27 = vmax.f32 %v1582_v36, 0.0  ;;  %v1558_v50 = vunpack.c.l.bf16 %v1530_v46  ;;  %v1531_v0 = vld [vmem:[%s3379_s1 + $0x68] sm:$0xff]  ;;  %v1532_v36 = vld [vmem:[%s3379_s1 + $0x70] sm:$0xff] }
 0x1bc   :  { %v1637_v56 = vpack.c.bf16 %v1613_v5, %v1612_v9  ;;  %v1462_v47 = vmul.f32 %v3214_v14, %v1395_v15  ;;  %v1339_v12 = vpop.f32.mrf.mxu1  ;;  %v1617_v62 = vmax.f32 %v1585_v30, 0.0  ;;  %v1562_v16 = vunpack.c.l.bf16 %v1532_v36 }
 0x1bd   :  { %1652 = vst [vmem:[%s3380_s8 + $0x30] sm:$0xff] %v1636_v22  ;;  %v1503_v31 = vadd.f32 %v3217_v17, %v1461_v53  ;;  %v1464_v23 = vmul.f32 %v3193_v55, %v1339_v12  ;;  %v1426_v61 = vpop.f32.mrf.mxu0 }
 0x1be   :  { %1653 = vst [vmem:[%s3380_s8 + $0x38] sm:$0xff] %v1637_v56  ;;  %v1504_v38 = vadd.f32 %v3220_v34, %v1462_v47  ;;  %v1467_v24 = vmul.f32 %v3198_v21, %v1426_v61 }
 0x1bf   :  { %v1583_v25 = vadd.f32 %v1551_v48, %v1503_v31  ;;  %v1506_v63 = vadd.f32 %v3201_v41, %v1464_v23  ;;  %v1560_v48 = vunpack.c.l.bf16 %v1531_v0 }
 0x1c0   :  { %v1584_v26 = vadd.f32 %v1552_v60, %v1504_v38  ;;  %v1509_v7 = vadd.f32 %v3207_v6, %v1467_v24 }
 0x1c1   :  { %v1615_v28 = vmax.f32 %v1583_v25, 0.0  ;;  %v1586_v57 = vadd.f32 %v1554_v3, %v1506_v63 }
 0x1c2   :  { %v1616_v40 = vmax.f32 %v1584_v26, 0.0  ;;  %v1368_v44 = vpop.f32.mrf.mxu2  ;;  %v1589_v45 = vadd.f32 %v1557_v32, %v1509_v7  ;;  %v1563_v26 = vunpack.c.h.bf16 %v1532_v36 }
 0x1c3   :  { %v1638_v33 = vpack.c.bf16 %v1615_v28, %v1614_v27  ;;  %v1465_v19 = vmul.f32 %v3212_v13, %v1368_v44  ;;  %v1397_v39 = vpop.f32.mrf.mxu3  ;;  %v1618_v35 = vmax.f32 %v1586_v57, 0.0 }
 0x1c4   :  { %v1639_v8 = vpack.c.bf16 %v1617_v62, %v1616_v40  ;;  %v1466_v2 = vmul.f32 %v3214_v14, %v1397_v39  ;;  %v1342_v42 = vpop.f32.mrf.mxu1  ;;  %v1621_v1 = vmax.f32 %v1589_v45, 0.0 }
 0x1c5   :  { %1654 = vst [vmem:[%s3380_s8 + $0x40] sm:$0xff] %v1638_v33  ;;  %v1507_v29 = vadd.f32 %v3217_v17, %v1465_v19  ;;  %v1468_v43 = vmul.f32 %v3193_v55, %v1342_v42 }
 0x1c6   :  { %1655 = vst [vmem:[%s3380_s8 + $0x48] sm:$0xff] %v1639_v8  ;;  %v1508_v11 = vadd.f32 %v3220_v34, %v1466_v2 }
 0x1c7   :  { %v1587_v52 = vadd.f32 %v1555_v59, %v1507_v29  ;;  %v1510_v58 = vadd.f32 %v3201_v41, %v1468_v43  ;;  %v1561_v59 = vunpack.c.h.bf16 %v1531_v0 }
 0x1c8   :  { %v1588_v10 = vadd.f32 %v1556_v51, %v1508_v11 }
 0x1c9   :  { %v1619_v54 = vmax.f32 %v1587_v52, 0.0  ;;  %v1590_v56 = vadd.f32 %v1558_v50, %v1510_v58 }
 0x1ca   :  { %v1620_v4 = vmax.f32 %v1588_v10, 0.0  ;;  %v1371_v5 = vpop.f32.mrf.mxu2 }
 0x1cb   :  { %v1640_v9 = vpack.c.bf16 %v1619_v54, %v1618_v35  ;;  %v1469_v49 = vmul.f32 %v3212_v13, %v1371_v5  ;;  %v1400_v20 = vpop.f32.mrf.mxu3  ;;  %v1622_v61 = vmax.f32 %v1590_v56, 0.0 }
 0x1cc   :  { %v1641_v22 = vpack.c.bf16 %v1621_v1, %v1620_v4  ;;  %v1470_v53 = vmul.f32 %v3214_v14, %v1400_v20  ;;  %v1344_v15 = vpop.f32.mrf.mxu1 }
 0x1cd   :  { %1656 = vst [vmem:[%s3380_s8 + $0x50] sm:$0xff] %v1640_v9  ;;  %v1511_v47 = vadd.f32 %v3217_v17, %v1469_v49  ;;  %v1472_v60 = vmul.f32 %v3193_v55, %v1344_v15  ;;  %v1533_v55 = vld [vmem:[%s3379_s1 + $0x78] sm:$0xff] }
 0x1ce   :  { %1657 = vst [vmem:[%s3380_s8 + $0x58] sm:$0xff] %v1641_v22  ;;  %v1512_v12 = vadd.f32 %v3220_v34, %v1470_v53  ;;  %v1564_v63 = vunpack.c.l.bf16 %v1533_v55  ;;  %v1565_v42 = vunpack.c.h.bf16 %v1533_v55 }
 0x1cf   :  { %v1591_v31 = vadd.f32 %v1559_v37, %v1511_v47  ;;  %v1514_v38 = vadd.f32 %v3201_v41, %v1472_v60 }
 0x1d0   :  { %v1592_v23 = vadd.f32 %v1560_v48, %v1512_v12 }
 0x1d1   :  { %v1623_v30 = vmax.f32 %v1591_v31, 0.0  ;;  %v1594_v3 = vadd.f32 %v1562_v16, %v1514_v38 }
 0x1d2   :  { %v1373_v24 = vpop.f32.mrf.mxu2  ;;  %v1624_v8 = vmax.f32 %v1592_v23, 0.0 }
 0x1d3   :  { %v1642_v25 = vpack.c.bf16 %v1623_v30, %v1622_v61  ;;  %v1473_v18 = vmul.f32 %v3212_v13, %v1373_v24  ;;  %v1402_v27 = vpop.f32.mrf.mxu3  ;;  %v1626_v32 = vmax.f32 %v1594_v3, 0.0 }
 0x1d4   :  { %v1474_v28 = vmul.f32 %v3214_v14, %v1402_v27 }
 0x1d5   :  { %1658 = vst [vmem:[%s3380_s8 + $0x60] sm:$0xff] %v1642_v25  ;;  %v1515_v41 = vadd.f32 %v3217_v17, %v1473_v18 }
 0x1d6   :  { %v1516_v62 = vadd.f32 %v3220_v34, %v1474_v28 }
 0x1d7   :  { %v1595_v40 = vadd.f32 %v1563_v26, %v1515_v41 }
 0x1d8   :  { %v1596_v7 = vadd.f32 %v1564_v63, %v1516_v62 }
 0x1d9   :  { %v1627_v44 = vmax.f32 %v1595_v40, 0.0 }
 0x1da   :  { %v1429_v33 = vpop.f32.mrf.mxu2  ;;  %v1628_v43 = vmax.f32 %v1596_v7, 0.0 }
 0x1db   :  { %v1644_v13 = vpack.c.bf16 %v1627_v44, %v1626_v32  ;;  %v1471_v19 = vmul.f32 %v3198_v21, %v1429_v33 }
 0x1dd   :  { %1660 = vst [vmem:[%s3380_s8 + $0x70] sm:$0xff] %v1644_v13  ;;  %v1513_v14 = vadd.f32 %v3207_v6, %v1471_v19 }
 0x1df   :  { %v1593_v39 = vadd.f32 %v1561_v59, %v1513_v14 }
 0x1e1   :  { %v1625_v17 = vmax.f32 %v1593_v39, 0.0 }
 0x1e2   :  { %v1431_v2 = vpop.f32.mrf.mxu2 }
 0x1e3   :  { %v1643_v34 = vpack.c.bf16 %v1625_v17, %v1624_v8  ;;  %v1475_v51 = vmul.f32 %v3198_v21, %v1431_v2 }
 0x1e5   :  { %1659 = vst [vmem:[%s3380_s8 + $0x68] sm:$0xff] %v1643_v34  ;;  %v1517_v57 = vadd.f32 %v3207_v6, %v1475_v51 }
 0x1e7   :  { %v1597_v29 = vadd.f32 %v1565_v42, %v1517_v57 }
 0x1e9   :  { %v1629_v45 = vmax.f32 %v1597_v29, 0.0 }
 0x1eb   :  { %v1645_v11 = vpack.c.bf16 %v1629_v45, %v1628_v43 }
 0x1ed   :  { %1661 = vst [vmem:[%s3380_s8 + $0x78] sm:$0xff] %v1645_v11 }

// kernel: rgbd_encoder_forward.23
= control target key start
LH: loop header
LB: loop body
LE: loop exit
PB: predicated region body
PF: predicated region fallthrough
CT: control target
= control target key end

     0   :  { %s6334_s0 = inlined_call_operand.vmem [shape: bf16[32,1024], index: 0, kind: input, shape index: {}]   ;;  %s6335_s1 = inlined_call_operand.vmem [shape: bf16[1024,512], index: 1, kind: input, shape index: {}]   ;;  %s6336_s2 = inlined_call_operand.vmem [shape: f32[1,512], index: 2, kind: input, shape index: {}]   ;;  %s6337_s3 = inlined_call_operand.vmem [shape: bf16[512,128], index: 3, kind: input, shape index: {}]   ;;  %s6338_s4 = inlined_call_operand.vmem [shape: f32[1,128], index: 4, kind: input, shape index: {}]   ;;  %s6339_s5 = inlined_call_operand.vmem [shape: bf16[128,128], index: 5, kind: input, shape index: {}]   ;;  %s6340_s6 = inlined_call_operand.vmem [shape: f32[1,128], index: 6, kind: input, shape index: {}]   ;;  %s6341_s7 = inlined_call_operand.hbm [shape: f32[32,128], index: 7, kind: output, shape index: {}]  }
   0x1   :  { %v2914_v0 = vld [vmem:[%s6335_s1 + $0xe0] sm:$0xf]  ;;  %v4030_v1 = vld [vmem:[%s6335_s1 + $0xec] sm:$0xf0] }
   0x2   :  { %v3042_v2 = vld [vmem:[%s6335_s1 + $0x1e0] sm:$0xf]  ;;  %v2915_v3 = vor.u32 %v4030_v1, %v2914_v0  ;;  %v4062_v4 = vld [vmem:[%s6335_s1 + $0x1ec] sm:$0xf0] }
   0x3   :  { %v3170_v5 = vld [vmem:[%s6335_s1 + $0x2e0] sm:$0xf]  ;;  %v4094_v6 = vld [vmem:[%s6335_s1 + $0x2ec] sm:$0xf0]  ;;  %v3043_v7 = vor.u32 %v4062_v4, %v3042_v2 }
   0x4   :  { %v3171_v8 = vor.u32 %v4094_v6, %v3170_v5  ;;  %v3298_v9 = vld [vmem:[%s6335_s1 + $0x3e0] sm:$0xf]  ;;  %v4126_v10 = vld [vmem:[%s6335_s1 + $0x3ec] sm:$0xf0]  ;;  %1669 = vmatpush.bf16.msra.mxu0 %v2915_v3 }
   0x5   :  { %v2898_v11 = vld [vmem:[%s6335_s1 + $0xc0] sm:$0xf]  ;;  %v3299_v12 = vor.u32 %v4126_v10, %v3298_v9  ;;  %v4026_v13 = vld [vmem:[%s6335_s1 + $0xcc] sm:$0xf0]  ;;  %1688 = vmatpush.bf16.msra.mxu1 %v3043_v7 }
   0x6   :  { %v3026_v14 = vld [vmem:[%s6335_s1 + $0x1c0] sm:$0xf]  ;;  %v4058_v15 = vld [vmem:[%s6335_s1 + $0x1cc] sm:$0xf0]  ;;  %1707 = vmatpush.bf16.msra.mxu2 %v3171_v8  ;;  %v2899_v16 = vor.u32 %v4026_v13, %v2898_v11 }
   0x7   :  { %v3027_v17 = vor.u32 %v4058_v15, %v3026_v14  ;;  %v3154_v18 = vld [vmem:[%s6335_s1 + $0x2c0] sm:$0xf]  ;;  %v4090_v19 = vld [vmem:[%s6335_s1 + $0x2cc] sm:$0xf0]  ;;  %1726 = vmatpush.bf16.msra.mxu3 %v3299_v12 }
   0x8   :  { %v3282_v20 = vld [vmem:[%s6335_s1 + $0x3c0] sm:$0xf]  ;;  %v3155_v21 = vor.u32 %v4090_v19, %v3154_v18  ;;  %v4122_v22 = vld [vmem:[%s6335_s1 + $0x3cc] sm:$0xf0]  ;;  %1670 = vmatpush.bf16.msra.mxu0 %v2899_v16 }
   0x9   :  { %v2882_v23 = vld [vmem:[%s6335_s1 + $0xa0] sm:$0xf]  ;;  %v4022_v24 = vld [vmem:[%s6335_s1 + $0xac] sm:$0xf0]  ;;  %v3283_v25 = vor.u32 %v4122_v22, %v3282_v20  ;;  %1689 = vmatpush.bf16.msra.mxu1 %v3027_v17 }
   0xa   :  { %v3010_v26 = vld [vmem:[%s6335_s1 + $0x1a0] sm:$0xf]  ;;  %v4054_v27 = vld [vmem:[%s6335_s1 + $0x1ac] sm:$0xf0]  ;;  %v2883_v29 = vor.u32 %v4022_v24, %v2882_v23  ;;  %1708 = vmatpush.bf16.msra.mxu2 %v3155_v21 }
   0xb   :  { %v3138_v28 = vld [vmem:[%s6335_s1 + $0x2a0] sm:$0xf]  ;;  %v4086_v30 = vld [vmem:[%s6335_s1 + $0x2ac] sm:$0xf0]  ;;  %v3011_v33 = vor.u32 %v4054_v27, %v3010_v26  ;;  %1727 = vmatpush.bf16.msra.mxu3 %v3283_v25 }
   0xc   :  { %v3266_v31 = vld [vmem:[%s6335_s1 + $0x3a0] sm:$0xf]  ;;  %v4118_v32 = vld [vmem:[%s6335_s1 + $0x3ac] sm:$0xf0]  ;;  %v3139_v34 = vor.u32 %v4086_v30, %v3138_v28  ;;  %1671 = vmatpush.bf16.msra.mxu0 %v2883_v29  ;;  %v3984_v30 = vld [vmem:[%s6334_s0 + $0x4] sm:$0xf] }
   0xd   :  { %v2866_v35 = vld [vmem:[%s6335_s1 + $0x80] sm:$0xf]  ;;  %v4018_v36 = vld [vmem:[%s6335_s1 + $0x8c] sm:$0xf0]  ;;  %v3267_v38 = vor.u32 %v4118_v32, %v3266_v31  ;;  %1690 = vmatpush.bf16.msra.mxu1 %v3011_v33  ;;  %v2740_v31 = vld [vmem:[%s6334_s0 + $0x20] sm:$0xf0] }
   0xe   :  { %v2994_v37 = vld [vmem:[%s6335_s1 + $0x180] sm:$0xf]  ;;  %v4050_v39 = vld [vmem:[%s6335_s1 + $0x18c] sm:$0xf0]  ;;  %v2867_v44 = vor.u32 %v4018_v36, %v2866_v35  ;;  %1709 = vmatpush.bf16.msra.mxu2 %v3139_v34  ;;  %v2746_v35 = vld [vmem:[%s6334_s0 + $0x8] sm:$0xf] }
   0xf   :  { %v3122_v40 = vld [vmem:[%s6335_s1 + $0x280] sm:$0xf]  ;;  %v4082_v41 = vld [vmem:[%s6335_s1 + $0x28c] sm:$0xf0]  ;;  %v2995_v45 = vor.u32 %v4050_v39, %v2994_v37  ;;  %1728 = vmatpush.bf16.msra.mxu3 %v3267_v38 }
  0x10   :  { %v3250_v42 = vld [vmem:[%s6335_s1 + $0x380] sm:$0xf]  ;;  %v4114_v43 = vld [vmem:[%s6335_s1 + $0x38c] sm:$0xf0]  ;;  %v3123_v46 = vor.u32 %v4082_v41, %v3122_v40  ;;  %1672 = vmatpush.bf16.msra.mxu0 %v2867_v44  ;;  %v3989_v40 = vld [vmem:[%s6334_s0 + $0x24] sm:$0xf0] }
  0x11   :  { %v2850_v47 = vld [vmem:[%s6335_s1 + $0x60] sm:$0xf]  ;;  %v4014_v48 = vld [vmem:[%s6335_s1 + $0x6c] sm:$0xf0]  ;;  %v3251_v50 = vor.u32 %v4114_v43, %v3250_v42  ;;  %1691 = vmatpush.bf16.msra.mxu1 %v2995_v45  ;;  %v3985_v41 = vld [vmem:[%s6334_s0 + $0xc] sm:$0xf] }
  0x12   :  { %v2978_v49 = vld [vmem:[%s6335_s1 + $0x160] sm:$0xf]  ;;  %v4046_v51 = vld [vmem:[%s6335_s1 + $0x16c] sm:$0xf0]  ;;  %v2851_v56 = vor.u32 %v4014_v48, %v2850_v47  ;;  %1710 = vmatpush.bf16.msra.mxu2 %v3123_v46  ;;  %v2748_v42 = vld [vmem:[%s6334_s0 + $0x28] sm:$0xf0] }
  0x13   :  { %v3106_v52 = vld [vmem:[%s6335_s1 + $0x260] sm:$0xf]  ;;  %v4078_v53 = vld [vmem:[%s6335_s1 + $0x26c] sm:$0xf0]  ;;  %v2979_v57 = vor.u32 %v4046_v51, %v2978_v49  ;;  %1729 = vmatpush.bf16.msra.mxu3 %v3251_v50 }
  0x14   :  { %v3234_v54 = vld [vmem:[%s6335_s1 + $0x360] sm:$0xf]  ;;  %v4110_v55 = vld [vmem:[%s6335_s1 + $0x36c] sm:$0xf0]  ;;  %v3107_v58 = vor.u32 %v4078_v53, %v3106_v52  ;;  %1673 = vmatpush.bf16.msra.mxu0 %v2851_v56  ;;  %v4627_v53 = vor.u32 %v3984_v30, %v2740_v31 }
  0x15   :  { %v2834_v59 = vld [vmem:[%s6335_s1 + $0x40] sm:$0xf]  ;;  %v4010_v60 = vld [vmem:[%s6335_s1 + $0x4c] sm:$0xf0]  ;;  %v3235_v62 = vor.u32 %v4110_v55, %v3234_v54  ;;  %1692 = vmatpush.bf16.msra.mxu1 %v2979_v57  ;;  %v4629_v54 = vor.u32 %v3989_v40, %v2746_v35  ;;  %v4637_v57 = vor.u32 %v3985_v41, %v2748_v42 }
  0x16   :  { %v2962_v61 = vld [vmem:[%s6335_s1 + $0x140] sm:$0xf]  ;;  %v4042_v63 = vld [vmem:[%s6335_s1 + $0x14c] sm:$0xf0]  ;;  %v2835_v4 = vor.u32 %v4010_v60, %v2834_v59  ;;  %1711 = vmatpush.bf16.msra.mxu2 %v3107_v58 }
  0x17   :  { %v3090_v0 = vld [vmem:[%s6335_s1 + $0x240] sm:$0xf]  ;;  %v4074_v1 = vld [vmem:[%s6335_s1 + $0x24c] sm:$0xf0]  ;;  %v2963_v5 = vor.u32 %v4042_v63, %v2962_v61  ;;  %1730 = vmatpush.bf16.msra.mxu3 %v3235_v62 }
  0x18   :  { %v3218_v2 = vld [vmem:[%s6335_s1 + $0x340] sm:$0xf]  ;;  %v4106_v3 = vld [vmem:[%s6335_s1 + $0x34c] sm:$0xf0]  ;;  %v3091_v6 = vor.u32 %v4074_v1, %v3090_v0  ;;  %1674 = vmatpush.bf16.msra.mxu0 %v2835_v4 }
  0x19   :  { %v2818_v7 = vld [vmem:[%s6335_s1 + $0x20] sm:$0xf]  ;;  %v4006_v8 = vld [vmem:[%s6335_s1 + $0x2c] sm:$0xf0]  ;;  %v3219_v10 = vor.u32 %v4106_v3, %v3218_v2  ;;  %1693 = vmatpush.bf16.msra.mxu1 %v2963_v5 }
  0x1a   :  { %v2946_v9 = vld [vmem:[%s6335_s1 + $0x120] sm:$0xf]  ;;  %v4038_v11 = vld [vmem:[%s6335_s1 + $0x12c] sm:$0xf0]  ;;  %v2819_v17 = vor.u32 %v4006_v8, %v2818_v7  ;;  %1712 = vmatpush.bf16.msra.mxu2 %v3091_v6 }
  0x1b   :  { %v3074_v12 = vld [vmem:[%s6335_s1 + $0x220] sm:$0xf]  ;;  %v4070_v13 = vld [vmem:[%s6335_s1 + $0x22c] sm:$0xf0]  ;;  %v2947_v21 = vor.u32 %v4038_v11, %v2946_v9  ;;  %1731 = vmatpush.bf16.msra.mxu3 %v3219_v10 }
  0x1c   :  { %v3202_v14 = vld [vmem:[%s6335_s1 + $0x320] sm:$0xf]  ;;  %v4102_v15 = vld [vmem:[%s6335_s1 + $0x32c] sm:$0xf0]  ;;  %v3075_v22 = vor.u32 %v4070_v13, %v3074_v12  ;;  %1675 = vmatpush.bf16.msra.mxu0 %v2819_v17 }
  0x1d   :  { %v2802_v16 = vld [vmem:[%s6335_s1] sm:$0xf]  ;;  %v4002_v18 = vld [vmem:[%s6335_s1 + $0xc] sm:$0xf0]  ;;  %v3203_v26 = vor.u32 %v4102_v15, %v3202_v14  ;;  %1694 = vmatpush.bf16.msra.mxu1 %v2947_v21 }
  0x1e   :  { %v2930_v19 = vld [vmem:[%s6335_s1 + $0x100] sm:$0xf]  ;;  %v4034_v20 = vld [vmem:[%s6335_s1 + $0x10c] sm:$0xf0]  ;;  %v2803_v34 = vor.u32 %v4002_v18, %v2802_v16  ;;  %1713 = vmatpush.bf16.msra.mxu2 %v3075_v22 }
  0x1f   :  { %v3058_v23 = vld [vmem:[%s6335_s1 + $0x200] sm:$0xf]  ;;  %v4066_v24 = vld [vmem:[%s6335_s1 + $0x20c] sm:$0xf0]  ;;  %v2931_v38 = vor.u32 %v4034_v20, %v2930_v19  ;;  %1732 = vmatpush.bf16.msra.mxu3 %v3203_v26 }
  0x20   :  { %v3186_v25 = vld [vmem:[%s6335_s1 + $0x300] sm:$0xf]  ;;  %v4098_v27 = vld [vmem:[%s6335_s1 + $0x30c] sm:$0xf0]  ;;  %v3059_v39 = vor.u32 %v4066_v24, %v3058_v23  ;;  %1676 = vmatpush.bf16.msra.mxu0 %v2803_v34 }
  0x21   :  { %v2738_v28 = vld [vmem:[%s6334_s0] sm:$0xf]  ;;  %v4222_v33 = vld [vmem:[%s6335_s1 + $0x6ec] sm:$0xf0]  ;;  %v3187_v43 = vor.u32 %v4098_v27, %v3186_v25  ;;  %1695 = vmatpush.bf16.msra.mxu1 %v2931_v38  ;;  %v2780_v38 = vld [vmem:[%s6334_s0 + $0x68] sm:$0xf0] }
  0x22   :  { %v3988_v29 = vld [vmem:[%s6334_s0 + $0x1c] sm:$0xf0]  ;;  %v4190_v37 = vld [vmem:[%s6335_s1 + $0x5ec] sm:$0xf0]  ;;  %1714 = vmatpush.bf16.msra.mxu2 %v3059_v39 }
  0x23   :  { %v3682_v32 = vld [vmem:[%s6335_s1 + $0x6e0] sm:$0xf]  ;;  %v4158_v46 = vld [vmem:[%s6335_s1 + $0x4ec] sm:$0xf0]  ;;  %v4616_v48 = vor.u32 %v3988_v29, %v2738_v28  ;;  %1733 = vmatpush.bf16.msra.mxu3 %v3187_v43  ;;  %v3992_v28 = vld [vmem:[%s6334_s0 + $0x44] sm:$0xf] }
  0x24   :  { %v3554_v36 = vld [vmem:[%s6335_s1 + $0x5e0] sm:$0xf]  ;;  %v3683_v44 = vor.u32 %v4222_v33, %v3682_v32  ;;  %v4254_v50 = vld [vmem:[%s6335_s1 + $0x7ec] sm:$0xf0]  ;;  %1696 = vmatmul.bf16.vlgmr.msra.gmra.mxu1 %v4627_v53  ;;  %v2772_v29 = vld [vmem:[%s6334_s0 + $0x60] sm:$0xf0] }
  0x25   :  { %v3426_v45 = vld [vmem:[%s6335_s1 + $0x4e0] sm:$0xf]  ;;  %v3555_v49 = vor.u32 %v4190_v37, %v3554_v36  ;;  %v4218_v52 = vld [vmem:[%s6335_s1 + $0x6cc] sm:$0xf0]  ;;  %1677 = vmatmul.bf16.vlgmr.msra.gmra.mxu0 %v4616_v48  ;;  %1715 = vmatmul.bf16.vlgmr.msra.gmra.mxu2 %v4629_v54  ;;  %v2778_v32 = vld [vmem:[%s6334_s0 + $0x48] sm:$0xf] }
  0x26   :  { %v3810_v47 = vld [vmem:[%s6335_s1 + $0x7e0] sm:$0xf]  ;;  %v4186_v56 = vld [vmem:[%s6335_s1 + $0x5cc] sm:$0xf0]  ;;  %v3427_v58 = vor.u32 %v4158_v46, %v3426_v45  ;;  %1783 = vmatpush.bf16.msrb.mxu2 %v3683_v44  ;;  %1734 = vmatmul.bf16.vlgmr.msra.gmra.mxu3 %v4637_v57  ;;  %v3997_v36 = vld [vmem:[%s6334_s0 + $0x64] sm:$0xf0] }
  0x27   :  { %v3666_v51 = vld [vmem:[%s6335_s1 + $0x6c0] sm:$0xf]  ;;  %v3811_v59 = vor.u32 %v4254_v50, %v3810_v47  ;;  %v4154_v62 = vld [vmem:[%s6335_s1 + $0x4cc] sm:$0xf0]  ;;  %1764 = vmatpush.bf16.msrb.mxu1 %v3555_v49  ;;  %v3993_v37 = vld [vmem:[%s6334_s0 + $0x4c] sm:$0xf]  ;;  %v4759_v50 = vor.u32 %v3992_v28, %v2772_v29 }
  0x28   :  { %v3538_v55 = vld [vmem:[%s6335_s1 + $0x5c0] sm:$0xf]  ;;  %v3667_v60 = vor.u32 %v4218_v52, %v3666_v51  ;;  %v4250_v1 = vld [vmem:[%s6335_s1 + $0x7cc] sm:$0xf0]  ;;  %1745 = vmatpush.bf16.msrb.mxu0 %v3427_v58  ;;  %v4761_v51 = vor.u32 %v3997_v36, %v2778_v32  ;;  %v3986_v32 = vld [vmem:[%s6334_s0 + $0x14] sm:$0xf] }
  0x29   :  { %v3410_v61 = vld [vmem:[%s6335_s1 + $0x4c0] sm:$0xf]  ;;  %v3539_v0 = vor.u32 %v4186_v56, %v3538_v55  ;;  %v4214_v3 = vld [vmem:[%s6335_s1 + $0x6ac] sm:$0xf0]  ;;  %1802 = vmatpush.bf16.msrb.mxu3 %v3811_v59  ;;  %v4769_v56 = vor.u32 %v3993_v37, %v2780_v38  ;;  %v2916_v36 = vld [vmem:[%s6335_s1 + $0xf0] sm:$0xf0] }
  0x2a   :  { %v3794_v63 = vld [vmem:[%s6335_s1 + $0x7c0] sm:$0xf]  ;;  %v4182_v5 = vld [vmem:[%s6335_s1 + $0x5ac] sm:$0xf0]  ;;  %v3411_v6 = vor.u32 %v4154_v62, %v3410_v61  ;;  %1784 = vmatpush.bf16.msrb.mxu2 %v3667_v60  ;;  %v4124_v37 = vld [vmem:[%s6335_s1 + $0x3e4] sm:$0xf] }
  0x2b   :  { %v3650_v2 = vld [vmem:[%s6335_s1 + $0x6a0] sm:$0xf]  ;;  %v3795_v7 = vor.u32 %v4250_v1, %v3794_v63  ;;  %v4150_v10 = vld [vmem:[%s6335_s1 + $0x4ac] sm:$0xf0]  ;;  %1765 = vmatpush.bf16.msrb.mxu1 %v3539_v0 }
  0x2c   :  { %v3522_v4 = vld [vmem:[%s6335_s1 + $0x5a0] sm:$0xf]  ;;  %v3651_v8 = vor.u32 %v4214_v3, %v3650_v2  ;;  %v4246_v13 = vld [vmem:[%s6335_s1 + $0x7ac] sm:$0xf0]  ;;  %1746 = vmatpush.bf16.msrb.mxu0 %v3411_v6 }
  0x2d   :  { %v3394_v9 = vld [vmem:[%s6335_s1 + $0x4a0] sm:$0xf]  ;;  %v3523_v12 = vor.u32 %v4182_v5, %v3522_v4  ;;  %v4210_v15 = vld [vmem:[%s6335_s1 + $0x68c] sm:$0xf0]  ;;  %1803 = vmatpush.bf16.msrb.mxu3 %v3795_v7 }
  0x2e   :  { %v3778_v11 = vld [vmem:[%s6335_s1 + $0x7a0] sm:$0xf]  ;;  %v4178_v17 = vld [vmem:[%s6335_s1 + $0x58c] sm:$0xf0]  ;;  %v3395_v18 = vor.u32 %v4150_v10, %v3394_v9  ;;  %1785 = vmatpush.bf16.msrb.mxu2 %v3651_v8 }
  0x2f   :  { %v3634_v14 = vld [vmem:[%s6335_s1 + $0x680] sm:$0xf]  ;;  %v4146_v20 = vld [vmem:[%s6335_s1 + $0x48c] sm:$0xf0]  ;;  %v3779_v22 = vor.u32 %v4246_v13, %v3778_v11  ;;  %1766 = vmatpush.bf16.msrb.mxu1 %v3523_v12 }
  0x30   :  { %v3506_v16 = vld [vmem:[%s6335_s1 + $0x580] sm:$0xf]  ;;  %v3635_v23 = vor.u32 %v4210_v15, %v3634_v14  ;;  %v4242_v24 = vld [vmem:[%s6335_s1 + $0x78c] sm:$0xf0]  ;;  %1747 = vmatpush.bf16.msrb.mxu0 %v3395_v18  ;;  %v4092_v18 = vld [vmem:[%s6335_s1 + $0x2e4] sm:$0xf] }
  0x31   :  { %v3378_v19 = vld [vmem:[%s6335_s1 + $0x480] sm:$0xf]  ;;  %v3507_v27 = vor.u32 %v4178_v17, %v3506_v16  ;;  %v4206_v31 = vld [vmem:[%s6335_s1 + $0x66c] sm:$0xf0]  ;;  %1804 = vmatpush.bf16.msrb.mxu3 %v3779_v22  ;;  %v4060_v22 = vld [vmem:[%s6335_s1 + $0x1e4] sm:$0xf] }
  0x32   :  { %v3762_v21 = vld [vmem:[%s6335_s1 + $0x780] sm:$0xf]  ;;  %v4174_v34 = vld [vmem:[%s6335_s1 + $0x56c] sm:$0xf0]  ;;  %v3379_v35 = vor.u32 %v4146_v20, %v3378_v19  ;;  %1786 = vmatpush.bf16.msrb.mxu2 %v3635_v23  ;;  %v3172_v19 = vld [vmem:[%s6335_s1 + $0x2f0] sm:$0xf0] }
  0x33   :  { %v2770_v25 = vld [vmem:[%s6334_s0 + $0x40] sm:$0xf]  ;;  %v3763_v39 = vor.u32 %v4242_v24, %v3762_v21  ;;  %v4142_v42 = vld [vmem:[%s6335_s1 + $0x46c] sm:$0xf0]  ;;  %1767 = vmatpush.bf16.msrb.mxu1 %v3507_v27  ;;  %v3044_v23 = vld [vmem:[%s6335_s1 + $0x1f0] sm:$0xf0] }
  0x34   :  { %v3996_v26 = vld [vmem:[%s6334_s0 + $0x5c] sm:$0xf0]  ;;  %v4238_v46 = vld [vmem:[%s6335_s1 + $0x76c] sm:$0xf0]  ;;  %1748 = vmatpush.bf16.msrb.mxu0 %v3379_v35  ;;  %1701 = vmatmul.bf16.gmra.mxu1 %v4759_v50  ;;  %v4028_v35 = vld [vmem:[%s6335_s1 + $0xe4] sm:$0xf]  ;;  %v3047_v38 = vor.u32 %v4060_v22, %v3044_v23 }
  0x35   :  { %v3618_v30 = vld [vmem:[%s6335_s1 + $0x660] sm:$0xf]  ;;  %v4748_v44 = vor.u32 %v3996_v26, %v2770_v25  ;;  %v4202_v49 = vld [vmem:[%s6335_s1 + $0x64c] sm:$0xf0]  ;;  %1805 = vmatpush.bf16.msrb.mxu3 %v3763_v39  ;;  %1720 = vmatmul.bf16.gmra.mxu2 %v4761_v51  ;;  %v3300_v39 = vld [vmem:[%s6335_s1 + $0x3f0] sm:$0xf0] }
  0x36   :  { %v3490_v33 = vld [vmem:[%s6335_s1 + $0x560] sm:$0xf]  ;;  %v3619_v40 = vor.u32 %v4206_v31, %v3618_v30  ;;  %v4170_v55 = vld [vmem:[%s6335_s1 + $0x54c] sm:$0xf0]  ;;  %1739 = vmatmul.bf16.gmra.mxu3 %v4769_v56  ;;  %v2868_v22 = vld [vmem:[%s6335_s1 + $0x90] sm:$0xf0] }
  0x37   :  { %v3362_v41 = vld [vmem:[%s6335_s1 + $0x460] sm:$0xf]  ;;  %v3491_v45 = vor.u32 %v4174_v34, %v3490_v33  ;;  %v4138_v62 = vld [vmem:[%s6335_s1 + $0x44c] sm:$0xf0]  ;;  %1682 = vmatmul.bf16.gmra.mxu0 %v4748_v44  ;;  %v2756_v33 = vld [vmem:[%s6334_s0 + $0x30] sm:$0xf0]  ;;  %v3175_v34 = vor.u32 %v4092_v18, %v3172_v19 }
  0x38   :  { %v3746_v43 = vld [vmem:[%s6335_s1 + $0x760] sm:$0xf]  ;;  %v3363_v58 = vor.u32 %v4142_v42, %v3362_v41  ;;  %1787 = vmatpush.bf16.msrb.mxu2 %v3619_v40  ;;  %v4234_v1 = vld [vmem:[%s6335_s1 + $0x74c] sm:$0xf0]  ;;  %v4088_v40 = vld [vmem:[%s6335_s1 + $0x2c4] sm:$0xf] }
  0x39   :  { %v3602_v47 = vld [vmem:[%s6335_s1 + $0x640] sm:$0xf]  ;;  %v3747_v59 = vor.u32 %v4238_v46, %v3746_v43  ;;  %1768 = vmatpush.bf16.msrb.mxu1 %v3491_v45  ;;  %v4198_v3 = vld [vmem:[%s6335_s1 + $0x62c] sm:$0xf0]  ;;  %v3156_v41 = vld [vmem:[%s6335_s1 + $0x2d0] sm:$0xf0] }
  0x3a   :  { %v3474_v52 = vld [vmem:[%s6335_s1 + $0x540] sm:$0xf]  ;;  %v3603_v60 = vor.u32 %v4202_v49, %v3602_v47  ;;  %v4166_v5 = vld [vmem:[%s6335_s1 + $0x52c] sm:$0xf0]  ;;  %1749 = vmatpush.bf16.msrb.mxu0 %v3363_v58  ;;  %v2762_v43 = vld [vmem:[%s6334_s0 + $0x18] sm:$0xf] }
  0x3b   :  { %v3346_v61 = vld [vmem:[%s6335_s1 + $0x440] sm:$0xf]  ;;  %v3475_v0 = vor.u32 %v4170_v55, %v3474_v52  ;;  %1806 = vmatpush.bf16.msrb.mxu3 %v3747_v59  ;;  %v4134_v10 = vld [vmem:[%s6335_s1 + $0x42c] sm:$0xf0]  ;;  %v3991_v45 = vld [vmem:[%s6334_s0 + $0x34] sm:$0xf0]  ;;  %v2919_v52 = vor.u32 %v4028_v35, %v2916_v36  ;;  %v3303_v59 = vor.u32 %v4124_v37, %v3300_v39 }
  0x3c   :  { %v3730_v63 = vld [vmem:[%s6335_s1 + $0x740] sm:$0xf]  ;;  %v3347_v6 = vor.u32 %v4138_v62, %v3346_v61  ;;  %1788 = vmatpush.bf16.msrb.mxu2 %v3603_v60  ;;  %v4230_v12 = vld [vmem:[%s6335_s1 + $0x72c] sm:$0xf0]  ;;  %v3987_v46 = vld [vmem:[%s6334_s0 + $0x1c] sm:$0xf]  ;;  %v3159_v60 = vor.u32 %v4088_v40, %v3156_v41 }
  0x3d   :  { %v3586_v2 = vld [vmem:[%s6335_s1 + $0x620] sm:$0xf]  ;;  %v3731_v8 = vor.u32 %v4234_v1, %v3730_v63  ;;  %1769 = vmatpush.bf16.msrb.mxu1 %v3475_v0  ;;  %v4194_v15 = vld [vmem:[%s6335_s1 + $0x60c] sm:$0xf0]  ;;  %v2764_v49 = vld [vmem:[%s6334_s0 + $0x38] sm:$0xf0]  ;;  %v4906_v1 = vor.u32 %v3986_v32, %v2756_v33 }
  0x3e   :  { %v3458_v4 = vld [vmem:[%s6335_s1 + $0x520] sm:$0xf]  ;;  %v3587_v9 = vor.u32 %v4198_v3, %v3586_v2  ;;  %v4162_v17 = vld [vmem:[%s6335_s1 + $0x50c] sm:$0xf0]  ;;  %1750 = vmatpush.bf16.msrb.mxu0 %v3347_v6  ;;  %v4024_v55 = vld [vmem:[%s6335_s1 + $0xc4] sm:$0xf]  ;;  %v4919_v6 = vor.u32 %v3987_v46, %v2764_v49 }
  0x3f   :  { %v3330_v7 = vld [vmem:[%s6335_s1 + $0x420] sm:$0xf]  ;;  %v3459_v13 = vor.u32 %v4166_v5, %v3458_v4  ;;  %1807 = vmatpush.bf16.msrb.mxu3 %v3731_v8  ;;  %v4130_v26 = vld [vmem:[%s6335_s1 + $0x40c] sm:$0xf0]  ;;  %v2900_v58 = vld [vmem:[%s6335_s1 + $0xd0] sm:$0xf0]  ;;  %v4917_v5 = vor.u32 %v3991_v45, %v2762_v43 }
  0x40   :  { %v3714_v11 = vld [vmem:[%s6335_s1 + $0x720] sm:$0xf]  ;;  %v3331_v20 = vor.u32 %v4134_v10, %v3330_v7  ;;  %1789 = vmatpush.bf16.msrb.mxu2 %v3587_v9  ;;  %v4226_v28 = vld [vmem:[%s6335_s1 + $0x70c] sm:$0xf0]  ;;  %v4056_v61 = vld [vmem:[%s6335_s1 + $0x1c4] sm:$0xf]  ;;  %v2903_v7 = vor.u32 %v4024_v55, %v2900_v58 }
  0x41   :  { %v3570_v14 = vld [vmem:[%s6335_s1 + $0x600] sm:$0xf]  ;;  %v3715_v24 = vor.u32 %v4230_v12, %v3714_v11  ;;  %1770 = vmatpush.bf16.msrb.mxu1 %v3459_v13  ;;  %v2754_v30 = vld [vmem:[%s6334_s0 + $0x10] sm:$0xf]  ;;  %v3028_v62 = vld [vmem:[%s6335_s1 + $0x1d0] sm:$0xf0] }
  0x42   :  { %v3442_v16 = vld [vmem:[%s6335_s1 + $0x500] sm:$0xf]  ;;  %v3571_v25 = vor.u32 %v4194_v15, %v3570_v14  ;;  %v3990_v31 = vld [vmem:[%s6334_s0 + $0x2c] sm:$0xf0]  ;;  %1751 = vmatpush.bf16.msrb.mxu0 %v3331_v20  ;;  %v4120_v63 = vld [vmem:[%s6335_s1 + $0x3c4] sm:$0xf]  ;;  %v3031_v8 = vor.u32 %v4056_v61, %v3028_v62 }
  0x43   :  { %v3314_v21 = vld [vmem:[%s6335_s1 + $0x400] sm:$0xf]  ;;  %v3443_v29 = vor.u32 %v4162_v17, %v3442_v16  ;;  %1808 = vmatpush.bf16.msrb.mxu3 %v3715_v24  ;;  %v4904_v0 = vor.u32 %v3990_v31, %v2754_v30  ;;  %v3284_v2 = vld [vmem:[%s6335_s1 + $0x3d0] sm:$0xf0]  ;;  %v4084_v3 = vld [vmem:[%s6335_s1 + $0x2a4] sm:$0xf] }
  0x44   :  { %v3698_v27 = vld [vmem:[%s6335_s1 + $0x700] sm:$0xf]  ;;  %v3315_v42 = vor.u32 %v4130_v26, %v3314_v21  ;;  %1790 = vmatpush.bf16.msrb.mxu2 %v3571_v25  ;;  %v3140_v4 = vld [vmem:[%s6335_s1 + $0x2b0] sm:$0xf0]  ;;  %v4020_v9 = vld [vmem:[%s6335_s1 + $0xa4] sm:$0xf]  ;;  %v3287_v11 = vor.u32 %v4120_v63, %v3284_v2 }
  0x45   :  { %v3699_v47 = vor.u32 %v4226_v28, %v3698_v27  ;;  %1771 = vmatpush.bf16.msrb.mxu1 %v3443_v29  ;;  %v2884_v10 = vld [vmem:[%s6335_s1 + $0xb0] sm:$0xf0]  ;;  %v3143_v12 = vor.u32 %v4084_v3, %v3140_v4  ;;  %v4052_v13 = vld [vmem:[%s6335_s1 + $0x1a4] sm:$0xf]  ;;  %v2786_v36 = vld [vmem:[%s6334_s0 + $0x50] sm:$0xf] }
  0x46   :  { %1752 = vmatpush.bf16.msrb.mxu0 %v3315_v42  ;;  %v3012_v14 = vld [vmem:[%s6335_s1 + $0x1b0] sm:$0xf0]  ;;  %v4116_v15 = vld [vmem:[%s6335_s1 + $0x3a4] sm:$0xf]  ;;  %v2887_v19 = vor.u32 %v4020_v9, %v2884_v10  ;;  %v3998_v37 = vld [vmem:[%s6334_s0 + $0x6c] sm:$0xf0] }
  0x47   :  { %1809 = vmatpush.bf16.msrb.mxu3 %v3699_v47  ;;  %v3268_v16 = vld [vmem:[%s6335_s1 + $0x3b0] sm:$0xf0]  ;;  %v4080_v17 = vld [vmem:[%s6335_s1 + $0x284] sm:$0xf]  ;;  %1791 = vmatmul.bf16.vlgmr.msrb.gmra.mxu2 %v4917_v5  ;;  %v3015_v20 = vor.u32 %v4052_v13, %v3012_v14  ;;  %v2794_v49 = vld [vmem:[%s6334_s0 + $0x58] sm:$0xf] }
  0x48   :  { %1859 = vmatpush.bf16.msra.mxu2 %v3175_v34  ;;  %1772 = vmatmul.bf16.vlgmr.msrb.gmra.mxu1 %v4906_v1  ;;  %v3124_v18 = vld [vmem:[%s6335_s1 + $0x290] sm:$0xf0]  ;;  %v4016_v21 = vld [vmem:[%s6335_s1 + $0x84] sm:$0xf]  ;;  %v3271_v23 = vor.u32 %v4116_v15, %v3268_v16  ;;  %v3995_v55 = vld [vmem:[%s6334_s0 + $0x5c] sm:$0xf] }
  0x49   :  { %1840 = vmatpush.bf16.msra.mxu1 %v3047_v38  ;;  %1753 = vmatmul.bf16.vlgmr.msrb.gmra.mxu0 %v4904_v0  ;;  %v3127_v24 = vor.u32 %v4080_v17, %v3124_v18  ;;  %v4048_v25 = vld [vmem:[%s6335_s1 + $0x184] sm:$0xf]  ;;  %v2996_v26 = vld [vmem:[%s6335_s1 + $0x190] sm:$0xf0]  ;;  %v2871_v31 = vor.u32 %v4016_v21, %v2868_v22  ;;  %v2796_v58 = vld [vmem:[%s6334_s0 + $0x78] sm:$0xf0] }
  0x4a   :  { %1821 = vmatpush.bf16.msra.mxu0 %v2919_v52  ;;  %1810 = vmatmul.bf16.vlgmr.msrb.gmra.mxu3 %v4919_v6  ;;  %v4112_v27 = vld [vmem:[%s6335_s1 + $0x384] sm:$0xf]  ;;  %v3252_v28 = vld [vmem:[%s6335_s1 + $0x390] sm:$0xf0]  ;;  %v2999_v32 = vor.u32 %v4048_v25, %v2996_v26  ;;  %v3999_v52 = vld [vmem:[%s6334_s0 + $0x74] sm:$0xf0]  ;;  %v5051_v14 = vor.u32 %v3995_v55, %v2796_v58 }
  0x4b   :  { %1878 = vmatpush.bf16.msra.mxu3 %v3303_v59  ;;  %v4076_v29 = vld [vmem:[%s6335_s1 + $0x264] sm:$0xf]  ;;  %v3108_v30 = vld [vmem:[%s6335_s1 + $0x270] sm:$0xf0]  ;;  %v3255_v35 = vor.u32 %v4112_v27, %v3252_v28  ;;  %v5049_v13 = vor.u32 %v3999_v52, %v2794_v49 }
  0x4c   :  { %1860 = vmatpush.bf16.msra.mxu2 %v3159_v60  ;;  %v4012_v33 = vld [vmem:[%s6335_s1 + $0x64] sm:$0xf]  ;;  %v2852_v34 = vld [vmem:[%s6335_s1 + $0x70] sm:$0xf0]  ;;  %v3111_v40 = vor.u32 %v4076_v29, %v3108_v30 }
  0x4d   :  { %1841 = vmatpush.bf16.msra.mxu1 %v3031_v8  ;;  %v3994_v38 = vld [vmem:[%s6334_s0 + $0x54] sm:$0xf]  ;;  %v4044_v41 = vld [vmem:[%s6335_s1 + $0x164] sm:$0xf]  ;;  %v2855_v59 = vor.u32 %v4012_v33, %v2852_v34  ;;  %v5036_v8 = vor.u32 %v3998_v37, %v2786_v36 }
  0x4e   :  { %1822 = vmatpush.bf16.msra.mxu0 %v2903_v7  ;;  %v2788_v39 = vld [vmem:[%s6334_s0 + $0x70] sm:$0xf0]  ;;  %v4108_v43 = vld [vmem:[%s6335_s1 + $0x364] sm:$0xf] }
  0x4f   :  { %1879 = vmatpush.bf16.msra.mxu3 %v3287_v11  ;;  %v2980_v42 = vld [vmem:[%s6335_s1 + $0x170] sm:$0xf0]  ;;  %v4072_v46 = vld [vmem:[%s6335_s1 + $0x244] sm:$0xf]  ;;  %v5038_v9 = vor.u32 %v3994_v38, %v2788_v39 }
  0x50   :  { %1861 = vmatpush.bf16.msra.mxu2 %v3143_v12  ;;  %v3236_v45 = vld [vmem:[%s6335_s1 + $0x370] sm:$0xf0]  ;;  %v2983_v60 = vor.u32 %v4044_v41, %v2980_v42  ;;  %v4008_v61 = vld [vmem:[%s6335_s1 + $0x44] sm:$0xf] }
  0x51   :  { %1842 = vmatpush.bf16.msra.mxu1 %v3015_v20  ;;  %v3092_v47 = vld [vmem:[%s6335_s1 + $0x250] sm:$0xf0]  ;;  %v3239_v63 = vor.u32 %v4108_v43, %v3236_v45  ;;  %v4040_v3 = vld [vmem:[%s6335_s1 + $0x144] sm:$0xf] }
  0x52   :  { %1823 = vmatpush.bf16.msra.mxu0 %v2887_v19  ;;  %v2836_v62 = vld [vmem:[%s6335_s1 + $0x50] sm:$0xf0]  ;;  %v3095_v2 = vor.u32 %v4072_v46, %v3092_v47  ;;  %v4104_v7 = vld [vmem:[%s6335_s1 + $0x344] sm:$0xf] }
  0x53   :  { %1880 = vmatpush.bf16.msra.mxu3 %v3271_v23  ;;  %v2964_v4 = vld [vmem:[%s6335_s1 + $0x150] sm:$0xf0]  ;;  %v4068_v11 = vld [vmem:[%s6335_s1 + $0x224] sm:$0xf]  ;;  %v2839_v15 = vor.u32 %v4008_v61, %v2836_v62 }
  0x54   :  { %1862 = vmatpush.bf16.msra.mxu2 %v3127_v24  ;;  %v3220_v10 = vld [vmem:[%s6335_s1 + $0x350] sm:$0xf0]  ;;  %v2967_v16 = vor.u32 %v4040_v3, %v2964_v4  ;;  %v4004_v17 = vld [vmem:[%s6335_s1 + $0x24] sm:$0xf] }
  0x55   :  { %1843 = vmatpush.bf16.msra.mxu1 %v2999_v32  ;;  %v3076_v12 = vld [vmem:[%s6335_s1 + $0x230] sm:$0xf0]  ;;  %v3223_v19 = vor.u32 %v4104_v7, %v3220_v10  ;;  %v4036_v21 = vld [vmem:[%s6335_s1 + $0x124] sm:$0xf] }
  0x56   :  { %1824 = vmatpush.bf16.msra.mxu0 %v2871_v31  ;;  %v2820_v18 = vld [vmem:[%s6335_s1 + $0x30] sm:$0xf0]  ;;  %v3079_v20 = vor.u32 %v4068_v11, %v3076_v12  ;;  %v4100_v23 = vld [vmem:[%s6335_s1 + $0x324] sm:$0xf] }
  0x57   :  { %1881 = vmatpush.bf16.msra.mxu3 %v3255_v35  ;;  %v2948_v22 = vld [vmem:[%s6335_s1 + $0x130] sm:$0xf0]  ;;  %v4064_v25 = vld [vmem:[%s6335_s1 + $0x204] sm:$0xf]  ;;  %1796 = vmatmul.bf16.gmra.mxu2 %v5049_v13  ;;  %v2823_v29 = vor.u32 %v4004_v17, %v2820_v18 }
  0x58   :  { %1863 = vmatpush.bf16.msra.mxu2 %v3111_v40  ;;  %1777 = vmatmul.bf16.gmra.mxu1 %v5038_v9  ;;  %v3204_v24 = vld [vmem:[%s6335_s1 + $0x330] sm:$0xf0]  ;;  %v4220_v27 = vld [vmem:[%s6335_s1 + $0x6e4] sm:$0xf]  ;;  %v2951_v30 = vor.u32 %v4036_v21, %v2948_v22 }
  0x59   :  { %1844 = vmatpush.bf16.msra.mxu1 %v2983_v60  ;;  %1758 = vmatmul.bf16.gmra.mxu0 %v5036_v8  ;;  %v3060_v26 = vld [vmem:[%s6335_s1 + $0x210] sm:$0xf0]  ;;  %v4000_v31 = vld [vmem:[%s6335_s1 + $0x4] sm:$0xf]  ;;  %v3207_v34 = vor.u32 %v4100_v23, %v3204_v24 }
  0x5a   :  { %1825 = vmatpush.bf16.msra.mxu0 %v2855_v59  ;;  %1815 = vmatmul.bf16.gmra.mxu3 %v5051_v14  ;;  %v3684_v28 = vld [vmem:[%s6335_s1 + $0x6f0] sm:$0xf0]  ;;  %v4032_v33 = vld [vmem:[%s6335_s1 + $0x104] sm:$0xf]  ;;  %v3063_v35 = vor.u32 %v4064_v25, %v3060_v26 }
  0x5b   :  { %1882 = vmatpush.bf16.msra.mxu3 %v3239_v63  ;;  %v2804_v32 = vld [vmem:[%s6335_s1 + $0x10] sm:$0xf0]  ;;  %v4096_v37 = vld [vmem:[%s6335_s1 + $0x304] sm:$0xf]  ;;  %v3687_v39 = vor.u32 %v4220_v27, %v3684_v28 }
  0x5c   :  { %1864 = vmatpush.bf16.msra.mxu2 %v3095_v2  ;;  %v2932_v36 = vld [vmem:[%s6335_s1 + $0x110] sm:$0xf0]  ;;  %v4156_v40 = vld [vmem:[%s6335_s1 + $0x4e4] sm:$0xf]  ;;  %v2807_v47 = vor.u32 %v4000_v31, %v2804_v32 }
  0x5d   :  { %1845 = vmatpush.bf16.msra.mxu1 %v2967_v16  ;;  %v3188_v38 = vld [vmem:[%s6335_s1 + $0x310] sm:$0xf0]  ;;  %v4188_v42 = vld [vmem:[%s6335_s1 + $0x5e4] sm:$0xf]  ;;  %v2935_v49 = vor.u32 %v4032_v33, %v2932_v36 }
  0x5e   :  { %1826 = vmatpush.bf16.msra.mxu0 %v2839_v15  ;;  %v3428_v41 = vld [vmem:[%s6335_s1 + $0x4f0] sm:$0xf0]  ;;  %v4252_v45 = vld [vmem:[%s6335_s1 + $0x7e4] sm:$0xf]  ;;  %v3191_v58 = vor.u32 %v4096_v37, %v3188_v38 }
  0x5f   :  { %1883 = vmatpush.bf16.msra.mxu3 %v3223_v19  ;;  %v3556_v43 = vld [vmem:[%s6335_s1 + $0x5f0] sm:$0xf0]  ;;  %v4216_v52 = vld [vmem:[%s6335_s1 + $0x6c4] sm:$0xf]  ;;  %v3431_v59 = vor.u32 %v4156_v40, %v3428_v41 }
  0x60   :  { %1865 = vmatpush.bf16.msra.mxu2 %v3079_v20  ;;  %v3812_v46 = vld [vmem:[%s6335_s1 + $0x7f0] sm:$0xf0]  ;;  %v3559_v60 = vor.u32 %v4188_v42, %v3556_v43  ;;  %v4152_v62 = vld [vmem:[%s6335_s1 + $0x4c4] sm:$0xf] }
  0x61   :  { %1846 = vmatpush.bf16.msra.mxu1 %v2951_v30  ;;  %v3668_v55 = vld [vmem:[%s6335_s1 + $0x6d0] sm:$0xf0]  ;;  %v3815_v61 = vor.u32 %v4252_v45, %v3812_v46  ;;  %v4184_v3 = vld [vmem:[%s6335_s1 + $0x5c4] sm:$0xf] }
  0x62   :  { %1827 = vmatpush.bf16.msra.mxu0 %v2823_v29  ;;  %v3412_v63 = vld [vmem:[%s6335_s1 + $0x4d0] sm:$0xf0]  ;;  %v3671_v2 = vor.u32 %v4216_v52, %v3668_v55  ;;  %v4248_v10 = vld [vmem:[%s6335_s1 + $0x7c4] sm:$0xf] }
  0x63   :  { %1884 = vmatpush.bf16.msra.mxu3 %v3207_v34  ;;  %v3540_v4 = vld [vmem:[%s6335_s1 + $0x5d0] sm:$0xf0]  ;;  %v3415_v7 = vor.u32 %v4152_v62, %v3412_v63  ;;  %v4212_v12 = vld [vmem:[%s6335_s1 + $0x6a4] sm:$0xf] }
  0x64   :  { %1866 = vmatpush.bf16.msra.mxu2 %v3063_v35  ;;  %v3796_v11 = vld [vmem:[%s6335_s1 + $0x7d0] sm:$0xf0]  ;;  %v4148_v16 = vld [vmem:[%s6335_s1 + $0x4a4] sm:$0xf] }
  0x65   :  { %1847 = vmatpush.bf16.msra.mxu1 %v2935_v49  ;;  %v3652_v15 = vld [vmem:[%s6335_s1 + $0x6b0] sm:$0xf0] }
  0x66   :  { %1828 = vmatpush.bf16.msra.mxu0 %v2807_v47  ;;  %v3396_v17 = vld [vmem:[%s6335_s1 + $0x4b0] sm:$0xf0] }
  0x67   :  { %1885 = vmatpush.bf16.msra.mxu3 %v3191_v58 }
  0x68   :  { %1935 = vmatpush.bf16.msrb.mxu2 %v3687_v39 }
  0x69   :  { %1916 = vmatpush.bf16.msrb.mxu1 %v3559_v60 }
  0x6a   :  { %1897 = vmatpush.bf16.msrb.mxu0 %v3431_v59 }
  0x6b   :  { %1954 = vmatpush.bf16.msrb.mxu3 %v3815_v61 }
  0x6c   :  { %1936 = vmatpush.bf16.msrb.mxu2 %v3671_v2 }
  0x6d   :  { %12 = vsyncpa [#allocation3], 0  ;;  %v3543_v18 = vor.u32 %v4184_v3, %v3540_v4  ;;  %v3799_v19 = vor.u32 %v4248_v10, %v3796_v11  ;;  %v4180_v20 = vld [vmem:[%s6335_s1 + $0x5a4] sm:$0xf]  ;;  %v3524_v21 = vld [vmem:[%s6335_s1 + $0x5b0] sm:$0xf0]  ;;  %v3655_v22 = vor.u32 %v4212_v12, %v3652_v15  ;;  %v3399_v23 = vor.u32 %v4148_v16, %v3396_v17  ;;  %1829 = vmatmul.bf16.vlgmr.msra.gmra.mxu0 %v4616_v48 }
  0x6e   :  { %1898 = vmatpush.bf16.msrb.mxu0 %v3415_v7  ;;  %v4244_v24 = vld [vmem:[%s6335_s1 + $0x7a4] sm:$0xf]  ;;  %v3780_v25 = vld [vmem:[%s6335_s1 + $0x7b0] sm:$0xf0]  ;;  %1848 = vmatmul.bf16.vlgmr.msra.gmra.mxu1 %v4627_v53  ;;  %v3527_v30 = vor.u32 %v4180_v20, %v3524_v21  ;;  %s4336_s9 = smov [#allocation2]   ;;  %s2724_s13 = sshll.u32 %s6341_s7, 4  ;;  %s2725_s13 = int_to_ptr.hbm [resolvable:$true] %s2724_s13 }
  0x6f   :  { %v4208_v26 = vld [vmem:[%s6335_s1 + $0x684] sm:$0xf]  ;;  %v3636_v27 = vld [vmem:[%s6335_s1 + $0x690] sm:$0xf0]  ;;  %1867 = vmatmul.bf16.vlgmr.msra.gmra.mxu2 %v4629_v54  ;;  %1886 = vmatmul.bf16.vlgmr.msra.gmra.mxu3 %v4637_v57  ;;  %v3783_v31 = vor.u32 %v4244_v24, %v3780_v25  ;;  %s2722_s10 = sshll.u32 %s4336_s9, 4  ;;  %s4338_s14 = smov 8   ;;  %s2723_s10 = int_to_ptr.vmem [resolvable:$true] %s2722_s10 }
  0x70   :  { %v4144_v28 = vld [vmem:[%s6335_s1 + $0x484] sm:$0xf]  ;;  %v3380_v29 = vld [vmem:[%s6335_s1 + $0x490] sm:$0xf0]  ;;  %1917 = vmatpush.bf16.msrb.mxu1 %v3543_v18  ;;  %1955 = vmatpush.bf16.msrb.mxu3 %v3799_v19  ;;  %v3639_v34 = vor.u32 %v4208_v26, %v3636_v27 }
  0x71   :  { %v4176_v32 = vld [vmem:[%s6335_s1 + $0x584] sm:$0xf]  ;;  %v3508_v33 = vld [vmem:[%s6335_s1 + $0x590] sm:$0xf0]  ;;  %1937 = vmatpush.bf16.msrb.mxu2 %v3655_v22  ;;  %v3383_v35 = vor.u32 %v4144_v28, %v3380_v29 }
  0x72   :  { %1899 = vmatpush.bf16.msrb.mxu0 %v3399_v23  ;;  %v4240_v36 = vld [vmem:[%s6335_s1 + $0x784] sm:$0xf]  ;;  %v3764_v37 = vld [vmem:[%s6335_s1 + $0x790] sm:$0xf0]  ;;  %v3511_v42 = vor.u32 %v4176_v32, %v3508_v33  ;;  %v2922_v32 = vld [vmem:[%s6335_s1 + $0xe8] sm:$0xf] }
  0x73   :  { %v4204_v38 = vld [vmem:[%s6335_s1 + $0x664] sm:$0xf]  ;;  %v3620_v39 = vld [vmem:[%s6335_s1 + $0x670] sm:$0xf0]  ;;  %v3767_v43 = vor.u32 %v4240_v36, %v3764_v37  ;;  %v4031_v33 = vld [vmem:[%s6335_s1 + $0xf4] sm:$0xf0] }
  0x74   :  { %v4140_v40 = vld [vmem:[%s6335_s1 + $0x464] sm:$0xf]  ;;  %v3364_v41 = vld [vmem:[%s6335_s1 + $0x470] sm:$0xf0]  ;;  %1918 = vmatpush.bf16.msrb.mxu1 %v3527_v30  ;;  %1956 = vmatpush.bf16.msrb.mxu3 %v3783_v31  ;;  %v3623_v47 = vor.u32 %v4204_v38, %v3620_v39  ;;  %v3178_v30 = vld [vmem:[%s6335_s1 + $0x2e8] sm:$0xf] }
  0x75   :  { %v4172_v45 = vld [vmem:[%s6335_s1 + $0x564] sm:$0xf]  ;;  %v3492_v46 = vld [vmem:[%s6335_s1 + $0x570] sm:$0xf0]  ;;  %1938 = vmatpush.bf16.msrb.mxu2 %v3639_v34  ;;  %v3367_v49 = vor.u32 %v4140_v40, %v3364_v41  ;;  %v4095_v31 = vld [vmem:[%s6335_s1 + $0x2f4] sm:$0xf0] }
  0x76   :  { %1900 = vmatpush.bf16.msrb.mxu0 %v3383_v35  ;;  %v4236_v52 = vld [vmem:[%s6335_s1 + $0x764] sm:$0xf]  ;;  %v3748_v55 = vld [vmem:[%s6335_s1 + $0x770] sm:$0xf0]  ;;  %v3495_v62 = vor.u32 %v4172_v45, %v3492_v46  ;;  %v3179_v45 = vor.u32 %v4095_v31, %v3178_v30  ;;  %v2923_v46 = vor.u32 %v4031_v33, %v2922_v32  ;;  %v2874_v30 = vld [vmem:[%s6335_s1 + $0x88] sm:$0xf] }
  0x77   :  { %v4200_v58 = vld [vmem:[%s6335_s1 + $0x644] sm:$0xf]  ;;  %v3604_v59 = vld [vmem:[%s6335_s1 + $0x650] sm:$0xf0]  ;;  %v3751_v63 = vor.u32 %v4236_v52, %v3748_v55  ;;  %v3162_v52 = vld [vmem:[%s6335_s1 + $0x2c8] sm:$0xf] }
  0x78   :  { %v4136_v60 = vld [vmem:[%s6335_s1 + $0x444] sm:$0xf]  ;;  %v3348_v61 = vld [vmem:[%s6335_s1 + $0x450] sm:$0xf0]  ;;  %1919 = vmatpush.bf16.msrb.mxu1 %v3511_v42  ;;  %1957 = vmatpush.bf16.msrb.mxu3 %v3767_v43  ;;  %v3607_v4 = vor.u32 %v4200_v58, %v3604_v59  ;;  %v3050_v42 = vld [vmem:[%s6335_s1 + $0x1e8] sm:$0xf] }
  0x79   :  { %v4168_v2 = vld [vmem:[%s6335_s1 + $0x544] sm:$0xf]  ;;  %v3476_v3 = vld [vmem:[%s6335_s1 + $0x550] sm:$0xf0]  ;;  %1939 = vmatpush.bf16.msrb.mxu2 %v3623_v47  ;;  %v3351_v7 = vor.u32 %v4136_v60, %v3348_v61  ;;  %v4063_v43 = vld [vmem:[%s6335_s1 + $0x1f4] sm:$0xf0] }
  0x7a   :  { %1901 = vmatpush.bf16.msrb.mxu0 %v3367_v49  ;;  %v4232_v10 = vld [vmem:[%s6335_s1 + $0x744] sm:$0xf]  ;;  %v3732_v11 = vld [vmem:[%s6335_s1 + $0x750] sm:$0xf0]  ;;  %v3479_v18 = vor.u32 %v4168_v2, %v3476_v3  ;;  %v3306_v47 = vld [vmem:[%s6335_s1 + $0x3e8] sm:$0xf] }
  0x7b   :  { %v4196_v12 = vld [vmem:[%s6335_s1 + $0x624] sm:$0xf]  ;;  %v3588_v15 = vld [vmem:[%s6335_s1 + $0x630] sm:$0xf0]  ;;  %v3735_v19 = vor.u32 %v4232_v10, %v3732_v11  ;;  %v4127_v49 = vld [vmem:[%s6335_s1 + $0x3f4] sm:$0xf0] }
  0x7c   :  { %v4132_v16 = vld [vmem:[%s6335_s1 + $0x424] sm:$0xf]  ;;  %v3332_v17 = vld [vmem:[%s6335_s1 + $0x430] sm:$0xf0]  ;;  %1920 = vmatpush.bf16.msrb.mxu1 %v3495_v62  ;;  %1958 = vmatpush.bf16.msrb.mxu3 %v3751_v63  ;;  %v3591_v23 = vor.u32 %v4196_v12, %v3588_v15  ;;  %v4091_v55 = vld [vmem:[%s6335_s1 + $0x2d4] sm:$0xf0]  ;;  %v3051_v62 = vor.u32 %v4063_v43, %v3050_v42  ;;  %v3307_v63 = vor.u32 %v4127_v49, %v3306_v47 }
  0x7d   :  { %v4164_v20 = vld [vmem:[%s6335_s1 + $0x524] sm:$0xf]  ;;  %v3460_v21 = vld [vmem:[%s6335_s1 + $0x530] sm:$0xf0]  ;;  %1940 = vmatpush.bf16.msrb.mxu2 %v3607_v4  ;;  %v3335_v24 = vor.u32 %v4132_v16, %v3332_v17  ;;  %1834 = vmatmul.bf16.gmra.mxu0 %v4748_v44  ;;  %v2906_v58 = vld [vmem:[%s6335_s1 + $0xc8] sm:$0xf]  ;;  %v3163_v3 = vor.u32 %v4091_v55, %v3162_v52 }
  0x7e   :  { %v4228_v22 = vld [vmem:[%s6335_s1 + $0x724] sm:$0xf]  ;;  %1902 = vmatpush.bf16.msrb.mxu0 %v3351_v7  ;;  %v3716_v25 = vld [vmem:[%s6335_s1 + $0x730] sm:$0xf0]  ;;  %1853 = vmatmul.bf16.gmra.mxu1 %v4759_v50  ;;  %v3463_v34 = vor.u32 %v4164_v20, %v3460_v21  ;;  %v4027_v59 = vld [vmem:[%s6335_s1 + $0xd4] sm:$0xf0] }
  0x7f   :  { %v4192_v26 = vld [vmem:[%s6335_s1 + $0x604] sm:$0xf]  ;;  %v3572_v27 = vld [vmem:[%s6335_s1 + $0x610] sm:$0xf0]  ;;  %1872 = vmatmul.bf16.gmra.mxu2 %v4761_v51  ;;  %1891 = vmatmul.bf16.gmra.mxu3 %v4769_v56  ;;  %v3719_v35 = vor.u32 %v4228_v22, %v3716_v25  ;;  %v3034_v2 = vld [vmem:[%s6335_s1 + $0x1c8] sm:$0xf]  ;;  %v2907_v4 = vor.u32 %v4027_v59, %v2906_v58 }
  0x80   :  { %v4128_v28 = vld [vmem:[%s6335_s1 + $0x404] sm:$0xf]  ;;  %v3316_v29 = vld [vmem:[%s6335_s1 + $0x410] sm:$0xf0]  ;;  %1921 = vmatpush.bf16.msrb.mxu1 %v3479_v18  ;;  %1959 = vmatpush.bf16.msrb.mxu3 %v3735_v19  ;;  %v3575_v39 = vor.u32 %v4192_v26, %v3572_v27  ;;  %v4059_v7 = vld [vmem:[%s6335_s1 + $0x1d4] sm:$0xf0] }
  0x81   :  { %v4160_v36 = vld [vmem:[%s6335_s1 + $0x504] sm:$0xf]  ;;  %v3444_v37 = vld [vmem:[%s6335_s1 + $0x510] sm:$0xf0]  ;;  %1941 = vmatpush.bf16.msrb.mxu2 %v3591_v23  ;;  %v3319_v40 = vor.u32 %v4128_v28, %v3316_v29  ;;  %v3290_v10 = vld [vmem:[%s6335_s1 + $0x3c8] sm:$0xf]  ;;  %v3035_v16 = vor.u32 %v4059_v7, %v3034_v2 }
  0x82   :  { %v4224_v38 = vld [vmem:[%s6335_s1 + $0x704] sm:$0xf]  ;;  %1903 = vmatpush.bf16.msrb.mxu0 %v3335_v24  ;;  %v3700_v41 = vld [vmem:[%s6335_s1 + $0x710] sm:$0xf0]  ;;  %v3447_v60 = vor.u32 %v4160_v36, %v3444_v37  ;;  %v4123_v11 = vld [vmem:[%s6335_s1 + $0x3d4] sm:$0xf0] }
  0x83   :  { %v3703_v61 = vor.u32 %v4224_v38, %v3700_v41  ;;  %v3146_v12 = vld [vmem:[%s6335_s1 + $0x2a8] sm:$0xf]  ;;  %v4087_v15 = vld [vmem:[%s6335_s1 + $0x2b4] sm:$0xf0]  ;;  %v3291_v17 = vor.u32 %v4123_v11, %v3290_v10 }
  0x84   :  { %1922 = vmatpush.bf16.msrb.mxu1 %v3463_v34  ;;  %1960 = vmatpush.bf16.msrb.mxu3 %v3719_v35  ;;  %v2890_v18 = vld [vmem:[%s6335_s1 + $0xa8] sm:$0xf]  ;;  %v4023_v19 = vld [vmem:[%s6335_s1 + $0xb4] sm:$0xf0]  ;;  %v3147_v24 = vor.u32 %v4087_v15, %v3146_v12 }
  0x85   :  { %1942 = vmatpush.bf16.msrb.mxu2 %v3575_v39  ;;  %v3018_v20 = vld [vmem:[%s6335_s1 + $0x1a8] sm:$0xf]  ;;  %v4055_v21 = vld [vmem:[%s6335_s1 + $0x1b4] sm:$0xf0]  ;;  %v2891_v25 = vor.u32 %v4023_v19, %v2890_v18 }
  0x86   :  { %1904 = vmatpush.bf16.msrb.mxu0 %v3319_v40  ;;  %v3274_v22 = vld [vmem:[%s6335_s1 + $0x3a8] sm:$0xf]  ;;  %v4119_v23 = vld [vmem:[%s6335_s1 + $0x3b4] sm:$0xf0]  ;;  %v3019_v28 = vor.u32 %v4055_v21, %v3018_v20 }
  0x87   :  { %v3130_v26 = vld [vmem:[%s6335_s1 + $0x288] sm:$0xf]  ;;  %v4083_v27 = vld [vmem:[%s6335_s1 + $0x294] sm:$0xf0]  ;;  %v3275_v29 = vor.u32 %v4119_v23, %v3274_v22 }
  0x88   :  { %1923 = vmatpush.bf16.msrb.mxu1 %v3447_v60  ;;  %1961 = vmatpush.bf16.msrb.mxu3 %v3703_v61  ;;  %v4019_v31 = vld [vmem:[%s6335_s1 + $0x94] sm:$0xf0]  ;;  %v3002_v32 = vld [vmem:[%s6335_s1 + $0x188] sm:$0xf]  ;;  %v3131_v36 = vor.u32 %v4083_v27, %v3130_v26 }
  0x89   :  { %2011 = vmatpush.bf16.msra.mxu2 %v3179_v45  ;;  %v4051_v33 = vld [vmem:[%s6335_s1 + $0x194] sm:$0xf0]  ;;  %v3258_v34 = vld [vmem:[%s6335_s1 + $0x388] sm:$0xf]  ;;  %v2875_v37 = vor.u32 %v4019_v31, %v2874_v30 }
  0x8a   :  { %1973 = vmatpush.bf16.msra.mxu0 %v2923_v46  ;;  %v4115_v35 = vld [vmem:[%s6335_s1 + $0x394] sm:$0xf0]  ;;  %v3114_v38 = vld [vmem:[%s6335_s1 + $0x268] sm:$0xf]  ;;  %v3003_v40 = vor.u32 %v4051_v33, %v3002_v32 }
  0x8b   :  { %v4079_v39 = vld [vmem:[%s6335_s1 + $0x274] sm:$0xf0]  ;;  %v3259_v41 = vor.u32 %v4115_v35, %v3258_v34  ;;  %v2858_v42 = vld [vmem:[%s6335_s1 + $0x68] sm:$0xf] }
  0x8c   :  { %1992 = vmatpush.bf16.msra.mxu1 %v3051_v62  ;;  %2030 = vmatpush.bf16.msra.mxu3 %v3307_v63  ;;  %v4015_v43 = vld [vmem:[%s6335_s1 + $0x74] sm:$0xf0]  ;;  %v2986_v45 = vld [vmem:[%s6335_s1 + $0x168] sm:$0xf]  ;;  %v3115_v52 = vor.u32 %v4079_v39, %v3114_v38 }
  0x8d   :  { %2012 = vmatpush.bf16.msra.mxu2 %v3163_v3  ;;  %1905 = vmatmul.bf16.vlgmr.msrb.gmra.mxu0 %v4904_v0  ;;  %v4047_v46 = vld [vmem:[%s6335_s1 + $0x174] sm:$0xf0]  ;;  %v3242_v47 = vld [vmem:[%s6335_s1 + $0x368] sm:$0xf]  ;;  %v2859_v55 = vor.u32 %v4015_v43, %v2858_v42 }
  0x8e   :  { %1974 = vmatpush.bf16.msra.mxu0 %v2907_v4  ;;  %1924 = vmatmul.bf16.vlgmr.msrb.gmra.mxu1 %v4906_v1  ;;  %v4111_v49 = vld [vmem:[%s6335_s1 + $0x374] sm:$0xf0]  ;;  %v3098_v58 = vld [vmem:[%s6335_s1 + $0x248] sm:$0xf]  ;;  %v2987_v60 = vor.u32 %v4047_v46, %v2986_v45 }
  0x8f   :  { %1943 = vmatmul.bf16.vlgmr.msrb.gmra.mxu2 %v4917_v5  ;;  %1962 = vmatmul.bf16.vlgmr.msrb.gmra.mxu3 %v4919_v6  ;;  %v4075_v59 = vld [vmem:[%s6335_s1 + $0x254] sm:$0xf0]  ;;  %v3243_v61 = vor.u32 %v4111_v49, %v3242_v47  ;;  %v2842_v62 = vld [vmem:[%s6335_s1 + $0x48] sm:$0xf] }
  0x90   :  { %1993 = vmatpush.bf16.msra.mxu1 %v3035_v16  ;;  %2031 = vmatpush.bf16.msra.mxu3 %v3291_v17  ;;  %v4011_v63 = vld [vmem:[%s6335_s1 + $0x54] sm:$0xf0]  ;;  %v2970_v2 = vld [vmem:[%s6335_s1 + $0x148] sm:$0xf]  ;;  %v3099_v10 = vor.u32 %v4075_v59, %v3098_v58 }
  0x91   :  { %2013 = vmatpush.bf16.msra.mxu2 %v3147_v24  ;;  %v4043_v3 = vld [vmem:[%s6335_s1 + $0x154] sm:$0xf0]  ;;  %v3226_v4 = vld [vmem:[%s6335_s1 + $0x348] sm:$0xf]  ;;  %v2843_v11 = vor.u32 %v4011_v63, %v2842_v62 }
  0x92   :  { %1975 = vmatpush.bf16.msra.mxu0 %v2891_v25  ;;  %v4107_v7 = vld [vmem:[%s6335_s1 + $0x354] sm:$0xf0]  ;;  %v3082_v12 = vld [vmem:[%s6335_s1 + $0x228] sm:$0xf]  ;;  %v2971_v16 = vor.u32 %v4043_v3, %v2970_v2 }
  0x93   :  { %v4071_v15 = vld [vmem:[%s6335_s1 + $0x234] sm:$0xf0]  ;;  %v3227_v17 = vor.u32 %v4107_v7, %v3226_v4  ;;  %v2826_v18 = vld [vmem:[%s6335_s1 + $0x28] sm:$0xf] }
  0x94   :  { %1994 = vmatpush.bf16.msra.mxu1 %v3019_v28  ;;  %2032 = vmatpush.bf16.msra.mxu3 %v3275_v29  ;;  %v4007_v19 = vld [vmem:[%s6335_s1 + $0x34] sm:$0xf0]  ;;  %v2954_v20 = vld [vmem:[%s6335_s1 + $0x128] sm:$0xf]  ;;  %v3083_v25 = vor.u32 %v4071_v15, %v3082_v12 }
  0x95   :  { %2014 = vmatpush.bf16.msra.mxu2 %v3131_v36  ;;  %v4039_v21 = vld [vmem:[%s6335_s1 + $0x134] sm:$0xf0]  ;;  %v3210_v22 = vld [vmem:[%s6335_s1 + $0x328] sm:$0xf]  ;;  %v2827_v26 = vor.u32 %v4007_v19, %v2826_v18 }
  0x96   :  { %1976 = vmatpush.bf16.msra.mxu0 %v2875_v37  ;;  %v4103_v23 = vld [vmem:[%s6335_s1 + $0x334] sm:$0xf0]  ;;  %v3066_v24 = vld [vmem:[%s6335_s1 + $0x208] sm:$0xf]  ;;  %v2955_v30 = vor.u32 %v4039_v21, %v2954_v20 }
  0x97   :  { %v4067_v27 = vld [vmem:[%s6335_s1 + $0x214] sm:$0xf0]  ;;  %v2810_v28 = vld [vmem:[%s6335_s1 + $0x8] sm:$0xf]  ;;  %v3211_v31 = vor.u32 %v4103_v23, %v3210_v22 }
  0x98   :  { %1995 = vmatpush.bf16.msra.mxu1 %v3003_v40  ;;  %2033 = vmatpush.bf16.msra.mxu3 %v3259_v41  ;;  %v4003_v29 = vld [vmem:[%s6335_s1 + $0x14] sm:$0xf0]  ;;  %v2938_v32 = vld [vmem:[%s6335_s1 + $0x108] sm:$0xf]  ;;  %v3067_v41 = vor.u32 %v4067_v27, %v3066_v24 }
  0x99   :  { %2015 = vmatpush.bf16.msra.mxu2 %v3115_v52  ;;  %v4035_v33 = vld [vmem:[%s6335_s1 + $0x114] sm:$0xf0]  ;;  %v3194_v34 = vld [vmem:[%s6335_s1 + $0x308] sm:$0xf]  ;;  %v2811_v42 = vor.u32 %v4003_v29, %v2810_v28  ;;  %v5526_v52 = vld [vmem:[%s6336_s2] sm:$0xf] }
  0x9a   :  { %1977 = vmatpush.bf16.msra.mxu0 %v2859_v55  ;;  %v4099_v35 = vld [vmem:[%s6335_s1 + $0x314] sm:$0xf0]  ;;  %v3690_v36 = vld [vmem:[%s6335_s1 + $0x6e8] sm:$0xf]  ;;  %v2939_v47 = vor.u32 %v4035_v33, %v2938_v32  ;;  %v5553_v15 = vperm.slane %v5526_v52, 0 }
  0x9b   :  { %v4223_v37 = vld [vmem:[%s6335_s1 + $0x6f4] sm:$0xf0]  ;;  %v3434_v38 = vld [vmem:[%s6335_s1 + $0x4e8] sm:$0xf]  ;;  %v3195_v49 = vor.u32 %v4099_v35, %v3194_v34 }
  0x9c   :  { %1996 = vmatpush.bf16.msra.mxu1 %v2987_v60  ;;  %2034 = vmatpush.bf16.msra.mxu3 %v3243_v61  ;;  %v4159_v39 = vld [vmem:[%s6335_s1 + $0x4f4] sm:$0xf0]  ;;  %v3562_v40 = vld [vmem:[%s6335_s1 + $0x5e8] sm:$0xf]  ;;  %v3691_v55 = vor.u32 %v4223_v37, %v3690_v36 }
  0x9d   :  { %2016 = vmatpush.bf16.msra.mxu2 %v3099_v10  ;;  %1910 = vmatmul.bf16.gmra.mxu0 %v5036_v8  ;;  %v4191_v43 = vld [vmem:[%s6335_s1 + $0x5f4] sm:$0xf0]  ;;  %v3818_v45 = vld [vmem:[%s6335_s1 + $0x7e8] sm:$0xf]  ;;  %v3435_v58 = vor.u32 %v4159_v39, %v3434_v38 }
  0x9e   :  { %1978 = vmatpush.bf16.msra.mxu0 %v2843_v11  ;;  %1929 = vmatmul.bf16.gmra.mxu1 %v5038_v9  ;;  %v4255_v46 = vld [vmem:[%s6335_s1 + $0x7f4] sm:$0xf0]  ;;  %v3674_v59 = vld [vmem:[%s6335_s1 + $0x6c8] sm:$0xf]  ;;  %v3563_v61 = vor.u32 %v4191_v43, %v3562_v40 }
  0x9f   :  { %1948 = vmatmul.bf16.gmra.mxu2 %v5049_v13  ;;  %1967 = vmatmul.bf16.gmra.mxu3 %v5051_v14  ;;  %v4219_v60 = vld [vmem:[%s6335_s1 + $0x6d4] sm:$0xf0]  ;;  %v3819_v62 = vor.u32 %v4255_v46, %v3818_v45  ;;  %v3418_v63 = vld [vmem:[%s6335_s1 + $0x4c8] sm:$0xf] }
  0xa0   :  { %1997 = vmatpush.bf16.msra.mxu1 %v2971_v16  ;;  %2035 = vmatpush.bf16.msra.mxu3 %v3227_v17  ;;  %v4155_v2 = vld [vmem:[%s6335_s1 + $0x4d4] sm:$0xf0]  ;;  %v3546_v3 = vld [vmem:[%s6335_s1 + $0x5c8] sm:$0xf]  ;;  %v3675_v11 = vor.u32 %v4219_v60, %v3674_v59 }
  0xa1   :  { %2017 = vmatpush.bf16.msra.mxu2 %v3083_v25  ;;  %v4187_v4 = vld [vmem:[%s6335_s1 + $0x5d4] sm:$0xf0]  ;;  %v3802_v7 = vld [vmem:[%s6335_s1 + $0x7c8] sm:$0xf]  ;;  %v3419_v12 = vor.u32 %v4155_v2, %v3418_v63  ;;  %v1697_v28 = vpop.f32.mrf.mxu1 }
  0xa2   :  { %1979 = vmatpush.bf16.msra.mxu0 %v2827_v26  ;;  %v4251_v10 = vld [vmem:[%s6335_s1 + $0x7d4] sm:$0xf0]  ;;  %v3547_v16 = vor.u32 %v4187_v4, %v3546_v3  ;;  %v3658_v18 = vld [vmem:[%s6335_s1 + $0x6a8] sm:$0xf]  ;;  %v1678_v23 = vpop.f32.mrf.mxu0 }
  0xa3   :  { %v3803_v17 = vor.u32 %v4251_v10, %v3802_v7  ;;  %v4215_v19 = vld [vmem:[%s6335_s1 + $0x6b4] sm:$0xf0]  ;;  %v3402_v20 = vld [vmem:[%s6335_s1 + $0x4a8] sm:$0xf]  ;;  %v1679_v27 = vadd.f32 %v1678_v23, %v5553_v15 }
  0xa4   :  { %1998 = vmatpush.bf16.msra.mxu1 %v2955_v30  ;;  %2036 = vmatpush.bf16.msra.mxu3 %v3211_v31  ;;  %v4151_v21 = vld [vmem:[%s6335_s1 + $0x4b4] sm:$0xf0]  ;;  %v3530_v22 = vld [vmem:[%s6335_s1 + $0x5a8] sm:$0xf]  ;;  %v3659_v29 = vor.u32 %v4215_v19, %v3658_v18 }
  0xa5   :  { %2018 = vmatpush.bf16.msra.mxu2 %v3067_v41  ;;  %v4183_v24 = vld [vmem:[%s6335_s1 + $0x5b4] sm:$0xf0]  ;;  %v3786_v25 = vld [vmem:[%s6335_s1 + $0x7a8] sm:$0xf]  ;;  %v3403_v30 = vor.u32 %v4151_v21, %v3402_v20  ;;  %v1698_v33 = vadd.f32 %v1697_v28, %v1679_v27 }
  0xa6   :  { %1980 = vmatpush.bf16.msra.mxu0 %v2811_v42  ;;  %v4247_v26 = vld [vmem:[%s6335_s1 + $0x7b4] sm:$0xf0]  ;;  %v3642_v31 = vld [vmem:[%s6335_s1 + $0x688] sm:$0xf]  ;;  %v3531_v34 = vor.u32 %v4183_v24, %v3530_v22 }
  0xa7   :  { %v4211_v32 = vld [vmem:[%s6335_s1 + $0x694] sm:$0xf0]  ;;  %v3787_v35 = vor.u32 %v4247_v26, %v3786_v25  ;;  %v3386_v36 = vld [vmem:[%s6335_s1 + $0x488] sm:$0xf] }
  0xa8   :  { %1999 = vmatpush.bf16.msra.mxu1 %v2939_v47  ;;  %2037 = vmatpush.bf16.msra.mxu3 %v3195_v49  ;;  %v4147_v37 = vld [vmem:[%s6335_s1 + $0x494] sm:$0xf0]  ;;  %v3514_v38 = vld [vmem:[%s6335_s1 + $0x588] sm:$0xf]  ;;  %v3643_v42 = vor.u32 %v4211_v32, %v3642_v31  ;;  %v1716_v47 = vpop.f32.mrf.mxu2 }
  0xa9   :  { %2087 = vmatpush.bf16.msrb.mxu2 %v3691_v55  ;;  %v4179_v39 = vld [vmem:[%s6335_s1 + $0x594] sm:$0xf0]  ;;  %v3770_v40 = vld [vmem:[%s6335_s1 + $0x788] sm:$0xf]  ;;  %v3387_v43 = vor.u32 %v4147_v37, %v3386_v36  ;;  %v1699_v10 = vpop.f32.mrf.mxu1 }
  0xaa   :  { %2049 = vmatpush.bf16.msrb.mxu0 %v3435_v58  ;;  %v4243_v41 = vld [vmem:[%s6335_s1 + $0x794] sm:$0xf0]  ;;  %v3626_v45 = vld [vmem:[%s6335_s1 + $0x668] sm:$0xf]  ;;  %v3515_v49 = vor.u32 %v4179_v39, %v3514_v38  ;;  %v1680_v63 = vpop.f32.mrf.mxu0 }
  0xab   :  { %v4207_v46 = vld [vmem:[%s6335_s1 + $0x674] sm:$0xf0]  ;;  %v3771_v55 = vor.u32 %v4243_v41, %v3770_v40  ;;  %v3370_v58 = vld [vmem:[%s6335_s1 + $0x468] sm:$0xf]  ;;  %v1681_v7 = vadd.f32 %v1680_v63, %v5553_v15 }
  0xac   :  { %2068 = vmatpush.bf16.msrb.mxu1 %v3563_v61  ;;  %2106 = vmatpush.bf16.msrb.mxu3 %v3819_v62  ;;  %v4143_v59 = vld [vmem:[%s6335_s1 + $0x474] sm:$0xf0]  ;;  %v3498_v60 = vld [vmem:[%s6335_s1 + $0x568] sm:$0xf]  ;;  %v1717_v61 = vadd.f32 %v1716_v47, %v1698_v33  ;;  %v1735_v62 = vpop.f32.mrf.mxu3 }
  0xad   :  { %2088 = vmatpush.bf16.msrb.mxu2 %v3675_v11  ;;  %1981 = vmatmul.bf16.vlgmr.msra.gmra.mxu0 %v4616_v48  ;;  %v4175_v2 = vld [vmem:[%s6335_s1 + $0x574] sm:$0xf0]  ;;  %v3754_v3 = vld [vmem:[%s6335_s1 + $0x768] sm:$0xf]  ;;  %v1700_v19 = vadd.f32 %v1699_v10, %v1681_v7 }
  0xae   :  { %2050 = vmatpush.bf16.msrb.mxu0 %v3419_v12  ;;  %2000 = vmatmul.bf16.vlgmr.msra.gmra.mxu1 %v4627_v53  ;;  %v4239_v4 = vld [vmem:[%s6335_s1 + $0x774] sm:$0xf0]  ;;  %v5633_v11 = vadd.f32 %v1735_v62, %v1717_v61  ;;  %v3627_v12 = vor.u32 %v4207_v46, %v3626_v45  ;;  %v3499_v20 = vor.u32 %v4175_v2, %v3498_v60  ;;  %v3354_v22 = vld [vmem:[%s6335_s1 + $0x448] sm:$0xf] }
  0xaf   :  { %2019 = vmatmul.bf16.vlgmr.msra.gmra.mxu2 %v4629_v54  ;;  %2038 = vmatmul.bf16.vlgmr.msra.gmra.mxu3 %v4637_v57  ;;  %v4203_v18 = vld [vmem:[%s6335_s1 + $0x654] sm:$0xf0]  ;;  %v3755_v21 = vor.u32 %v4239_v4, %v3754_v3  ;;  %v3482_v24 = vld [vmem:[%s6335_s1 + $0x548] sm:$0xf] }
  0xb0   :  { %2069 = vmatpush.bf16.msrb.mxu1 %v3547_v16  ;;  %2107 = vmatpush.bf16.msrb.mxu3 %v3803_v17  ;;  %v3371_v16 = vor.u32 %v4143_v59, %v3370_v58  ;;  %v3610_v17 = vld [vmem:[%s6335_s1 + $0x648] sm:$0xf]  ;;  %v4139_v23 = vld [vmem:[%s6335_s1 + $0x454] sm:$0xf0]  ;;  %v1718_v32 = vpop.f32.mrf.mxu2 }
  0xb1   :  { %2089 = vmatpush.bf16.msrb.mxu2 %v3659_v29  ;;  %v4171_v25 = vld [vmem:[%s6335_s1 + $0x554] sm:$0xf0]  ;;  %v3738_v26 = vld [vmem:[%s6335_s1 + $0x748] sm:$0xf]  ;;  %v3611_v28 = vor.u32 %v4203_v18, %v3610_v17  ;;  %v3355_v29 = vor.u32 %v4139_v23, %v3354_v22  ;;  %v1719_v38 = vadd.f32 %v1718_v32, %v1700_v19  ;;  %v1702_v46 = vpop.f32.mrf.mxu1  ;;  %v4029_v17 = vld [vmem:[%s6335_s1 + $0xec] sm:$0xf] }
  0xb2   :  { %2051 = vmatpush.bf16.msrb.mxu0 %v3403_v30  ;;  %v4235_v27 = vld [vmem:[%s6335_s1 + $0x754] sm:$0xf0]  ;;  %v3594_v30 = vld [vmem:[%s6335_s1 + $0x628] sm:$0xf]  ;;  %v3483_v33 = vor.u32 %v4171_v25, %v3482_v24  ;;  %v2924_v18 = vld [vmem:[%s6335_s1 + $0xf8] sm:$0xf0] }
  0xb3   :  { %v4199_v31 = vld [vmem:[%s6335_s1 + $0x634] sm:$0xf0]  ;;  %v3466_v37 = vld [vmem:[%s6335_s1 + $0x528] sm:$0xf]  ;;  %v4061_v19 = vld [vmem:[%s6335_s1 + $0x1ec] sm:$0xf]  ;;  %v2927_v32 = vor.u32 %v4029_v17, %v2924_v18 }
  0xb4   :  { %2070 = vmatpush.bf16.msrb.mxu1 %v3531_v34  ;;  %2108 = vmatpush.bf16.msrb.mxu3 %v3787_v35  ;;  %v3739_v34 = vor.u32 %v4235_v27, %v3738_v26  ;;  %v3338_v35 = vld [vmem:[%s6335_s1 + $0x428] sm:$0xf]  ;;  %v4135_v36 = vld [vmem:[%s6335_s1 + $0x434] sm:$0xf0]  ;;  %v1737_v39 = vpop.f32.mrf.mxu3  ;;  %v1683_v40 = vpop.f32.mrf.mxu0  ;;  %v3052_v22 = vld [vmem:[%s6335_s1 + $0x1f8] sm:$0xf0] }
  0xb5   :  { %2090 = vmatpush.bf16.msrb.mxu2 %v3643_v42  ;;  %v4167_v41 = vld [vmem:[%s6335_s1 + $0x534] sm:$0xf0]  ;;  %v3722_v42 = vld [vmem:[%s6335_s1 + $0x728] sm:$0xf]  ;;  %v1684_v45 = vadd.f32 %v1683_v40, %v5553_v15  ;;  %v3339_v58 = vor.u32 %v4135_v36, %v3338_v35  ;;  %v4125_v23 = vld [vmem:[%s6335_s1 + $0x3ec] sm:$0xf] }
  0xb6   :  { %2052 = vmatpush.bf16.msrb.mxu0 %v3387_v43  ;;  %v4231_v43 = vld [vmem:[%s6335_s1 + $0x734] sm:$0xf0]  ;;  %v3578_v47 = vld [vmem:[%s6335_s1 + $0x608] sm:$0xf]  ;;  %v3467_v63 = vor.u32 %v4167_v41, %v3466_v37  ;;  %v3308_v24 = vld [vmem:[%s6335_s1 + $0x3f8] sm:$0xf0]  ;;  %v3055_v37 = vor.u32 %v4061_v19, %v3052_v22 }
  0xb7   :  { %v4195_v59 = vld [vmem:[%s6335_s1 + $0x614] sm:$0xf0]  ;;  %v3322_v60 = vld [vmem:[%s6335_s1 + $0x408] sm:$0xf]  ;;  %v1703_v62 = vadd.f32 %v1702_v46, %v1684_v45  ;;  %v3723_v2 = vor.u32 %v4231_v43, %v3722_v42  ;;  %v2908_v40 = vld [vmem:[%s6335_s1 + $0xd8] sm:$0xf0] }
  0xb8   :  { %2071 = vmatpush.bf16.msrb.mxu1 %v3515_v49  ;;  %2109 = vmatpush.bf16.msrb.mxu3 %v3771_v55  ;;  %v5687_v49 = vadd.f32 %v1737_v39, %v1719_v38  ;;  %v3595_v55 = vor.u32 %v4199_v31, %v3594_v30  ;;  %v4131_v61 = vld [vmem:[%s6335_s1 + $0x414] sm:$0xf0]  ;;  %v3450_v3 = vld [vmem:[%s6335_s1 + $0x508] sm:$0xf]  ;;  %v1721_v25 = vpop.f32.mrf.mxu2  ;;  %v3311_v38 = vor.u32 %v4125_v23, %v3308_v24  ;;  %v4025_v39 = vld [vmem:[%s6335_s1 + $0xcc] sm:$0xf] }
  0xb9   :  { %2091 = vmatpush.bf16.msrb.mxu2 %v3627_v12  ;;  %v4163_v4 = vld [vmem:[%s6335_s1 + $0x514] sm:$0xf0]  ;;  %v3706_v7 = vld [vmem:[%s6335_s1 + $0x708] sm:$0xf]  ;;  %v4093_v12 = vld [vmem:[%s6335_s1 + $0x2ec] sm:$0xf]  ;;  %v1704_v36 = vpop.f32.mrf.mxu1 }
  0xba   :  { %2053 = vmatpush.bf16.msrb.mxu0 %v3371_v16  ;;  %v4227_v10 = vld [vmem:[%s6335_s1 + $0x714] sm:$0xf0]  ;;  %v3180_v16 = vld [vmem:[%s6335_s1 + $0x2f8] sm:$0xf0]  ;;  %v3451_v26 = vor.u32 %v4163_v4, %v3450_v3  ;;  %v4057_v41 = vld [vmem:[%s6335_s1 + $0x1cc] sm:$0xf] }
  0xbb   :  { %v3707_v27 = vor.u32 %v4227_v10, %v3706_v7  ;;  %v3183_v31 = vor.u32 %v4093_v12, %v3180_v16  ;;  %v4121_v43 = vld [vmem:[%s6335_s1 + $0x3cc] sm:$0xf]  ;;  %v3292_v45 = vld [vmem:[%s6335_s1 + $0x3d8] sm:$0xf0] }
  0xbc   :  { %2072 = vmatpush.bf16.msrb.mxu1 %v3499_v20  ;;  %2110 = vmatpush.bf16.msrb.mxu3 %v3755_v21  ;;  %v3579_v20 = vor.u32 %v4195_v59, %v3578_v47  ;;  %v3323_v21 = vor.u32 %v4131_v61, %v3322_v60  ;;  %v1685_v30 = vpop.f32.mrf.mxu0  ;;  %v3295_v59 = vor.u32 %v4121_v43, %v3292_v45  ;;  %v4085_v60 = vld [vmem:[%s6335_s1 + $0x2ac] sm:$0xf]  ;;  %v3148_v61 = vld [vmem:[%s6335_s1 + $0x2b8] sm:$0xf0] }
  0xbd   :  { %2092 = vmatpush.bf16.msrb.mxu2 %v3611_v28  ;;  %1986 = vmatmul.bf16.gmra.mxu0 %v4748_v44  ;;  %v1722_v28 = vadd.f32 %v1721_v25, %v1703_v62  ;;  %v1686_v35 = vadd.f32 %v1685_v30, %v5553_v15  ;;  %v3036_v15 = vld [vmem:[%s6335_s1 + $0x1d8] sm:$0xf0]  ;;  %v4053_v3 = vld [vmem:[%s6335_s1 + $0x1ac] sm:$0xf] }
  0xbe   :  { %2054 = vmatpush.bf16.msrb.mxu0 %v3355_v29  ;;  %2005 = vmatmul.bf16.gmra.mxu1 %v4759_v50  ;;  %v1740_v29 = vpop.f32.mrf.mxu3  ;;  %v3020_v10 = vld [vmem:[%s6335_s1 + $0x1b8] sm:$0xf0]  ;;  %v4117_v12 = vld [vmem:[%s6335_s1 + $0x3ac] sm:$0xf] }
  0xbf   :  { %2024 = vmatmul.bf16.gmra.mxu2 %v4761_v51  ;;  %2043 = vmatmul.bf16.gmra.mxu3 %v4769_v56  ;;  %v5754_v42 = vadd.f32 %v1740_v29, %v1722_v28  ;;  %v1705_v46 = vadd.f32 %v1704_v36, %v1686_v35  ;;  %v3276_v16 = vld [vmem:[%s6335_s1 + $0x3b8] sm:$0xf0]  ;;  %v4081_v23 = vld [vmem:[%s6335_s1 + $0x28c] sm:$0xf]  ;;  %v3023_v25 = vor.u32 %v4053_v3, %v3020_v10 }
  0xc0   :  { %2073 = vmatpush.bf16.msrb.mxu1 %v3483_v33  ;;  %2111 = vmatpush.bf16.msrb.mxu3 %v3739_v34  ;;  %v4089_v33 = vld [vmem:[%s6335_s1 + $0x2cc] sm:$0xf]  ;;  %v3164_v34 = vld [vmem:[%s6335_s1 + $0x2d8] sm:$0xf0]  ;;  %v1723_v62 = vpop.f32.mrf.mxu2 }
  0xc1   :  { %2093 = vmatpush.bf16.msrb.mxu2 %v3595_v55  ;;  %v3167_v47 = vor.u32 %v4089_v33, %v3164_v34  ;;  %v2911_v55 = vor.u32 %v4025_v39, %v2908_v40  ;;  %v1724_v4 = vadd.f32 %v1723_v62, %v1705_v46  ;;  %v3132_v24 = vld [vmem:[%s6335_s1 + $0x298] sm:$0xf0]  ;;  %v4049_v28 = vld [vmem:[%s6335_s1 + $0x18c] sm:$0xf] }
  0xc2   :  { %2055 = vmatpush.bf16.msrb.mxu0 %v3339_v58  ;;  %v3039_v58 = vor.u32 %v4057_v41, %v3036_v15  ;;  %v3004_v30 = vld [vmem:[%s6335_s1 + $0x198] sm:$0xf0]  ;;  %v3135_v33 = vor.u32 %v4081_v23, %v3132_v24  ;;  %v4077_v35 = vld [vmem:[%s6335_s1 + $0x26c] sm:$0xf] }
  0xc3   :  { %v3116_v36 = vld [vmem:[%s6335_s1 + $0x278] sm:$0xf0]  ;;  %v4013_v39 = vld [vmem:[%s6335_s1 + $0x6c] sm:$0xf] }
  0xc4   :  { %2074 = vmatpush.bf16.msrb.mxu1 %v3467_v63  ;;  %2112 = vmatpush.bf16.msrb.mxu3 %v3723_v2  ;;  %v4021_v63 = vld [vmem:[%s6335_s1 + $0xac] sm:$0xf]  ;;  %v2892_v2 = vld [vmem:[%s6335_s1 + $0xb8] sm:$0xf0] }
  0xc5   :  { %2094 = vmatpush.bf16.msrb.mxu2 %v3579_v20  ;;  %v1773_v18 = vpop.f32.mrf.mxu1  ;;  %v2895_v22 = vor.u32 %v4021_v63, %v2892_v2  ;;  %v2860_v40 = vld [vmem:[%s6335_s1 + $0x78] sm:$0xf0]  ;;  %v4045_v41 = vld [vmem:[%s6335_s1 + $0x16c] sm:$0xf] }
  0xc6   :  { %2056 = vmatpush.bf16.msrb.mxu0 %v3323_v21  ;;  %v1742_v7 = vpop.f32.mrf.mxu3  ;;  %v1754_v17 = vpop.f32.mrf.mxu0  ;;  %v3151_v21 = vor.u32 %v4085_v60, %v3148_v61  ;;  %v2988_v45 = vld [vmem:[%s6335_s1 + $0x178] sm:$0xf0]  ;;  %v4109_v46 = vld [vmem:[%s6335_s1 + $0x36c] sm:$0xf]  ;;  %v3119_v61 = vor.u32 %v4077_v35, %v3116_v36  ;;  %v2863_v62 = vor.u32 %v4013_v39, %v2860_v40 }
  0xc7   :  { %v5789_v19 = vadd.f32 %v1742_v7, %v1724_v4  ;;  %v1755_v20 = vadd.f32 %v1754_v17, %v5633_v11  ;;  %v2876_v11 = vld [vmem:[%s6335_s1 + $0x98] sm:$0xf0]  ;;  %v4073_v63 = vld [vmem:[%s6335_s1 + $0x24c] sm:$0xf]  ;;  %v2991_v4 = vor.u32 %v4045_v41, %v2988_v45 }
  0xc8   :  { %2075 = vmatpush.bf16.msrb.mxu1 %v3451_v26  ;;  %2113 = vmatpush.bf16.msrb.mxu3 %v3707_v27  ;;  %v3279_v26 = vor.u32 %v4117_v12, %v3276_v16  ;;  %v4017_v27 = vld [vmem:[%s6335_s1 + $0x8c] sm:$0xf]  ;;  %v3100_v2 = vld [vmem:[%s6335_s1 + $0x258] sm:$0xf0] }
  0xc9   :  { %2163 = vmatpush.bf16.msra.mxu2 %v3183_v31  ;;  %v1774_v29 = vadd.f32 %v1773_v18, %v1755_v20  ;;  %v4113_v31 = vld [vmem:[%s6335_s1 + $0x38c] sm:$0xf]  ;;  %v2879_v34 = vor.u32 %v4017_v27, %v2876_v11  ;;  %v2844_v10 = vld [vmem:[%s6335_s1 + $0x58] sm:$0xf0] }
  0xca   :  { %2125 = vmatpush.bf16.msra.mxu0 %v2927_v32  ;;  %v3260_v32 = vld [vmem:[%s6335_s1 + $0x398] sm:$0xf0]  ;;  %v1792_v15 = vpop.f32.mrf.mxu2  ;;  %v4041_v12 = vld [vmem:[%s6335_s1 + $0x14c] sm:$0xf] }
  0xcb   :  { %v2972_v17 = vld [vmem:[%s6335_s1 + $0x158] sm:$0xf0]  ;;  %v4105_v18 = vld [vmem:[%s6335_s1 + $0x34c] sm:$0xf] }
  0xcc   :  { %2144 = vmatpush.bf16.msra.mxu1 %v3055_v37  ;;  %2182 = vmatpush.bf16.msra.mxu3 %v3311_v38  ;;  %v3007_v37 = vor.u32 %v4049_v28, %v3004_v30  ;;  %v3263_v38 = vor.u32 %v4113_v31, %v3260_v32  ;;  %v3228_v20 = vld [vmem:[%s6335_s1 + $0x358] sm:$0xf0]  ;;  %v4069_v23 = vld [vmem:[%s6335_s1 + $0x22c] sm:$0xf] }
  0xcd   :  { %2164 = vmatpush.bf16.msra.mxu2 %v3167_v47  ;;  %2057 = vmatmul.bf16.vlgmr.msrb.gmra.mxu0 %v4904_v0  ;;  %v3244_v47 = vld [vmem:[%s6335_s1 + $0x378] sm:$0xf0]  ;;  %v4005_v27 = vld [vmem:[%s6335_s1 + $0x2c] sm:$0xf] }
  0xce   :  { %2126 = vmatpush.bf16.msra.mxu0 %v2911_v55  ;;  %2076 = vmatmul.bf16.vlgmr.msrb.gmra.mxu1 %v4906_v1  ;;  %v1811_v43 = vpop.f32.mrf.mxu3  ;;  %v1793_v55 = vadd.f32 %v1792_v15, %v1774_v29  ;;  %v3247_v7 = vor.u32 %v4109_v46, %v3244_v47  ;;  %v3084_v24 = vld [vmem:[%s6335_s1 + $0x238] sm:$0xf0]  ;;  %v4037_v28 = vld [vmem:[%s6335_s1 + $0x12c] sm:$0xf] }
  0xcf   :  { %2095 = vmatmul.bf16.vlgmr.msrb.gmra.mxu2 %v4917_v5  ;;  %2114 = vmatmul.bf16.vlgmr.msrb.gmra.mxu3 %v4919_v6  ;;  %v2828_v11 = vld [vmem:[%s6335_s1 + $0x38] sm:$0xf0]  ;;  %v4101_v32 = vld [vmem:[%s6335_s1 + $0x32c] sm:$0xf]  ;;  %v3087_v39 = vor.u32 %v4069_v23, %v3084_v24 }
  0xd0   :  { %2145 = vmatpush.bf16.msra.mxu1 %v3039_v58  ;;  %2183 = vmatpush.bf16.msra.mxu3 %v3295_v59  ;;  %v1756_v58 = vpop.f32.mrf.mxu0  ;;  %v1775_v59 = vpop.f32.mrf.mxu1  ;;  %v5851_v3 = vadd.f32 %v1811_v43, %v1793_v55  ;;  %v2956_v31 = vld [vmem:[%s6335_s1 + $0x138] sm:$0xf0]  ;;  %v2831_v40 = vor.u32 %v4005_v27, %v2828_v11  ;;  %v4001_v15 = vld [vmem:[%s6335_s1 + $0xc] sm:$0xf] }
  0xd1   :  { %2165 = vmatpush.bf16.msra.mxu2 %v3151_v21  ;;  %v1757_v60 = vadd.f32 %v1756_v58, %v5687_v49  ;;  %v4009_v49 = vld [vmem:[%s6335_s1 + $0x4c] sm:$0xf]  ;;  %v3103_v21 = vor.u32 %v4073_v63, %v3100_v2  ;;  %v3068_v41 = vld [vmem:[%s6335_s1 + $0x218] sm:$0xf0] }
  0xd2   :  { %2127 = vmatpush.bf16.msra.mxu0 %v2895_v22  ;;  %v2847_v22 = vor.u32 %v4009_v49, %v2844_v10  ;;  %v1794_v29 = vpop.f32.mrf.mxu2  ;;  %v2812_v43 = vld [vmem:[%s6335_s1 + $0x18] sm:$0xf0]  ;;  %v4033_v47 = vld [vmem:[%s6335_s1 + $0x10c] sm:$0xf] }
  0xd3   :  { %v1776_v16 = vadd.f32 %v1775_v59, %v1757_v60  ;;  %v2940_v55 = vld [vmem:[%s6335_s1 + $0x118] sm:$0xf0]  ;;  %v4097_v58 = vld [vmem:[%s6335_s1 + $0x30c] sm:$0xf]  ;;  %v2815_v10 = vor.u32 %v4001_v15, %v2812_v43 }
  0xd4   :  { %2146 = vmatpush.bf16.msra.mxu1 %v3023_v25  ;;  %2184 = vmatpush.bf16.msra.mxu3 %v3279_v26  ;;  %v2975_v25 = vor.u32 %v4041_v12, %v2972_v17  ;;  %v3231_v26 = vor.u32 %v4105_v18, %v3228_v20  ;;  %v3196_v60 = vld [vmem:[%s6335_s1 + $0x318] sm:$0xf0]  ;;  %v4157_v2 = vld [vmem:[%s6335_s1 + $0x4ec] sm:$0xf]  ;;  %v2943_v18 = vor.u32 %v4033_v47, %v2940_v55 }
  0xd5   :  { %2166 = vmatpush.bf16.msra.mxu2 %v3135_v33  ;;  %v3212_v33 = vld [vmem:[%s6335_s1 + $0x338] sm:$0xf0]  ;;  %v3199_v20 = vor.u32 %v4097_v58, %v3196_v60  ;;  %v4213_v43 = vld [vmem:[%s6335_s1 + $0x6ac] sm:$0xf] }
  0xd6   :  { %2128 = vmatpush.bf16.msra.mxu0 %v2879_v34  ;;  %v1813_v30 = vpop.f32.mrf.mxu3  ;;  %v1795_v34 = vadd.f32 %v1794_v29, %v1776_v16  ;;  %v3215_v46 = vor.u32 %v4101_v32, %v3212_v33  ;;  %v3564_v12 = vld [vmem:[%s6335_s1 + $0x5f8] sm:$0xf0]  ;;  %v4253_v16 = vld [vmem:[%s6335_s1 + $0x7ec] sm:$0xf] }
  0xd7   :  { %v3820_v17 = vld [vmem:[%s6335_s1 + $0x7f8] sm:$0xf0]  ;;  %v4185_v33 = vld [vmem:[%s6335_s1 + $0x5cc] sm:$0xf] }
  0xd8   :  { %2147 = vmatpush.bf16.msra.mxu1 %v3007_v37  ;;  %2185 = vmatpush.bf16.msra.mxu3 %v3263_v38  ;;  %v1759_v35 = vpop.f32.mrf.mxu0  ;;  %v1778_v36 = vpop.f32.mrf.mxu1  ;;  %v4065_v37 = vld [vmem:[%s6335_s1 + $0x20c] sm:$0xf]  ;;  %v5908_v45 = vadd.f32 %v1813_v30, %v1795_v34  ;;  %v3823_v30 = vor.u32 %v4253_v16, %v3820_v17  ;;  %v3420_v32 = vld [vmem:[%s6335_s1 + $0x4d8] sm:$0xf0] }
  0xd9   :  { %2167 = vmatpush.bf16.msra.mxu2 %v3119_v61  ;;  %v1760_v38 = vadd.f32 %v1759_v35, %v5754_v42  ;;  %v2959_v42 = vor.u32 %v4037_v28, %v2956_v31  ;;  %v4221_v61 = vld [vmem:[%s6335_s1 + $0x6ec] sm:$0xf]  ;;  %v3071_v49 = vor.u32 %v4065_v37, %v3068_v41  ;;  %v3548_v35 = vld [vmem:[%s6335_s1 + $0x5d8] sm:$0xf0] }
  0xda   :  { %2129 = vmatpush.bf16.msra.mxu0 %v2863_v62  ;;  %v3692_v62 = vld [vmem:[%s6335_s1 + $0x6f8] sm:$0xf0]  ;;  %v2277_v63 = vpack.c.bf16 %v5908_v45, %v5851_v3  ;;  %v4153_v31 = vld [vmem:[%s6335_s1 + $0x4cc] sm:$0xf]  ;;  %v3551_v41 = vor.u32 %v4185_v33, %v3548_v35  ;;  %v4274_v3 = vld [vmem:[%s6337_s3 + $0x90] sm:$0xff] }
  0xdb   :  { %v1779_v59 = vadd.f32 %v1778_v36, %v1760_v38  ;;  %v3695_v23 = vor.u32 %v4221_v61, %v3692_v62  ;;  %v4249_v36 = vld [vmem:[%s6335_s1 + $0x7cc] sm:$0xf]  ;;  %v3804_v37 = vld [vmem:[%s6335_s1 + $0x7d8] sm:$0xf0] }
  0xdc   :  { %2148 = vmatpush.bf16.msra.mxu1 %v2991_v4  ;;  %2186 = vmatpush.bf16.msra.mxu3 %v3247_v7  ;;  %v3436_v4 = vld [vmem:[%s6335_s1 + $0x4f8] sm:$0xf0]  ;;  %v4189_v7 = vld [vmem:[%s6335_s1 + $0x5ec] sm:$0xf]  ;;  %v3807_v15 = vor.u32 %v4249_v36, %v3804_v37 }
  0xdd   :  { %2168 = vmatpush.bf16.msra.mxu2 %v3103_v21  ;;  %2062 = vmatmul.bf16.gmra.mxu0 %v5036_v8  ;;  %v1797_v21 = vpop.f32.mrf.mxu2  ;;  %v3439_v24 = vor.u32 %v4157_v2, %v3436_v4  ;;  %v3567_v29 = vor.u32 %v4189_v7, %v3564_v12  ;;  %v3404_v47 = vld [vmem:[%s6335_s1 + $0x4b8] sm:$0xf0]  ;;  %v4181_v55 = vld [vmem:[%s6335_s1 + $0x5ac] sm:$0xf] }
  0xde   :  { %2130 = vmatpush.bf16.msra.mxu0 %v2847_v22  ;;  %2081 = vmatmul.bf16.gmra.mxu1 %v5038_v9  ;;  %v1816_v22 = vpop.f32.mrf.mxu3  ;;  %v1798_v27 = vadd.f32 %v1797_v21, %v1779_v59  ;;  %v3532_v60 = vld [vmem:[%s6335_s1 + $0x5b8] sm:$0xf0]  ;;  %v4245_v61 = vld [vmem:[%s6335_s1 + $0x7ac] sm:$0xf] }
  0xdf   :  { %2100 = vmatmul.bf16.gmra.mxu2 %v5049_v13  ;;  %2119 = vmatmul.bf16.gmra.mxu3 %v5051_v14  ;;  %v3788_v62 = vld [vmem:[%s6335_s1 + $0x7b8] sm:$0xf0]  ;;  %v4209_v12 = vld [vmem:[%s6335_s1 + $0x68c] sm:$0xf] }
  0xe0   :  { %2149 = vmatpush.bf16.msra.mxu1 %v2975_v25  ;;  %2187 = vmatpush.bf16.msra.mxu3 %v3231_v26  ;;  %v4217_v25 = vld [vmem:[%s6335_s1 + $0x6cc] sm:$0xf]  ;;  %v3676_v26 = vld [vmem:[%s6335_s1 + $0x6d8] sm:$0xf0]  ;;  %v1761_v11 = vpop.f32.mrf.mxu0  ;;  %v1780_v28 = vpop.f32.mrf.mxu1  ;;  %v5977_v38 = vadd.f32 %v1816_v22, %v1798_v27 }
  0xe1   :  { %2169 = vmatpush.bf16.msra.mxu2 %v3087_v39  ;;  %v1762_v34 = vadd.f32 %v1761_v11, %v5789_v19  ;;  %v3679_v19 = vor.u32 %v4217_v25, %v3676_v26  ;;  %v3644_v16 = vld [vmem:[%s6335_s1 + $0x698] sm:$0xf0]  ;;  %v4145_v21 = vld [vmem:[%s6335_s1 + $0x48c] sm:$0xf] }
  0xe2   :  { %2131 = vmatpush.bf16.msra.mxu0 %v2831_v40  ;;  %v3423_v40 = vor.u32 %v4153_v31, %v3420_v32  ;;  %v3388_v22 = vld [vmem:[%s6335_s1 + $0x498] sm:$0xf0]  ;;  %v4241_v25 = vld [vmem:[%s6335_s1 + $0x78c] sm:$0xf] }
  0xe3   :  { %v1781_v39 = vadd.f32 %v1780_v28, %v1762_v34  ;;  %v3772_v26 = vld [vmem:[%s6335_s1 + $0x798] sm:$0xf0]  ;;  %v4205_v11 = vld [vmem:[%s6335_s1 + $0x66c] sm:$0xf] }
  0xe4   :  { %2150 = vmatpush.bf16.msra.mxu1 %v2959_v42  ;;  %2188 = vmatpush.bf16.msra.mxu3 %v3215_v46  ;;  %v3660_v42 = vld [vmem:[%s6335_s1 + $0x6b8] sm:$0xf0]  ;;  %v4149_v46 = vld [vmem:[%s6335_s1 + $0x4ac] sm:$0xf] }
  0xe5   :  { %2170 = vmatpush.bf16.msra.mxu2 %v3071_v49  ;;  %v1799_v58 = vpop.f32.mrf.mxu2  ;;  %v3663_v49 = vor.u32 %v4213_v43, %v3660_v42  ;;  %v3628_v28 = vld [vmem:[%s6335_s1 + $0x678] sm:$0xf0]  ;;  %v4173_v31 = vld [vmem:[%s6335_s1 + $0x56c] sm:$0xf] }
  0xe6   :  { %2132 = vmatpush.bf16.msra.mxu0 %v2815_v10  ;;  %v1818_v59 = vpop.f32.mrf.mxu3  ;;  %v1800_v2 = vadd.f32 %v1799_v58, %v1781_v39  ;;  %v3407_v10 = vor.u32 %v4149_v46, %v3404_v47  ;;  %v3500_v34 = vld [vmem:[%s6335_s1 + $0x578] sm:$0xf0]  ;;  %v4237_v35 = vld [vmem:[%s6335_s1 + $0x76c] sm:$0xf] }
  0xe7   :  { %v3756_v36 = vld [vmem:[%s6335_s1 + $0x778] sm:$0xf0]  ;;  %v3503_v43 = vor.u32 %v4173_v31, %v3500_v34  ;;  %v4137_v46 = vld [vmem:[%s6335_s1 + $0x44c] sm:$0xf] }
  0xe8   :  { %2151 = vmatpush.bf16.msra.mxu1 %v2943_v18  ;;  %2189 = vmatpush.bf16.msra.mxu3 %v3199_v20  ;;  %v6013_v17 = vadd.f32 %v1818_v59, %v1800_v2  ;;  %v3535_v18 = vor.u32 %v4181_v55, %v3532_v60  ;;  %v3791_v20 = vor.u32 %v4245_v61, %v3788_v62  ;;  %v3356_v47 = vld [vmem:[%s6335_s1 + $0x458] sm:$0xf0]  ;;  %v4169_v55 = vld [vmem:[%s6335_s1 + $0x54c] sm:$0xf] }
  0xe9   :  { %2239 = vmatpush.bf16.msrb.mxu2 %v3695_v23  ;;  %v4177_v23 = vld [vmem:[%s6335_s1 + $0x58c] sm:$0xf]  ;;  %v3759_v42 = vor.u32 %v4237_v35, %v3756_v36  ;;  %v3484_v58 = vld [vmem:[%s6335_s1 + $0x558] sm:$0xf0]  ;;  %v3359_v62 = vor.u32 %v4137_v46, %v3356_v47  ;;  %v4262_v47 = vld [vmem:[%s6337_s3 + $0x30] sm:$0xff] }
  0xea   :  { %2201 = vmatpush.bf16.msrb.mxu0 %v3439_v24  ;;  %v6003_v4 = vpop.f32.mrf.mxu0  ;;  %v3516_v24 = vld [vmem:[%s6335_s1 + $0x598] sm:$0xf0]  ;;  %v2281_v27 = vpack.c.bf16 %v6013_v17, %v5977_v38  ;;  %v4233_v59 = vld [vmem:[%s6335_s1 + $0x74c] sm:$0xf] }
  0xeb   :  { %v6005_v7 = vpop.f32.mrf.mxu1  ;;  %v3740_v60 = vld [vmem:[%s6335_s1 + $0x758] sm:$0xf0]  ;;  %v4197_v2 = vld [vmem:[%s6335_s1 + $0x62c] sm:$0xf] }
  0xec   :  { %2220 = vmatpush.bf16.msrb.mxu1 %v3567_v29  ;;  %2258 = vmatpush.bf16.msrb.mxu3 %v3823_v30  ;;  %v3519_v29 = vor.u32 %v4177_v23, %v3516_v24  ;;  %v3775_v30 = vor.u32 %v4241_v25, %v3772_v26  ;;  %v3468_v23 = vld [vmem:[%s6335_s1 + $0x538] sm:$0xf0]  ;;  %v4229_v24 = vld [vmem:[%s6335_s1 + $0x72c] sm:$0xf] }
  0xed   :  { %2240 = vmatpush.bf16.msrb.mxu2 %v3679_v19  ;;  %2133 = vmatmul.bf16.vlgmr.msra.gmra.mxu0 %v4616_v48  ;;  %v3647_v48 = vor.u32 %v4209_v12, %v3644_v16  ;;  %v3631_v19 = vor.u32 %v4205_v11, %v3628_v28  ;;  %v3743_v12 = vor.u32 %v4233_v59, %v3740_v60  ;;  %v4133_v16 = vld [vmem:[%s6335_s1 + $0x42c] sm:$0xf]  ;;  %v3724_v25 = vld [vmem:[%s6335_s1 + $0x738] sm:$0xf0] }
  0xee   :  { %2202 = vmatpush.bf16.msrb.mxu0 %v3423_v40  ;;  %2152 = vmatmul.bf16.vlgmr.msra.gmra.mxu1 %v4627_v53  ;;  %v3391_v53 = vor.u32 %v4145_v21, %v3388_v22  ;;  %v4193_v28 = vld [vmem:[%s6335_s1 + $0x60c] sm:$0xf]  ;;  %v3324_v31 = vld [vmem:[%s6335_s1 + $0x418] sm:$0xf0] }
  0xef   :  { %2171 = vmatmul.bf16.vlgmr.msra.gmra.mxu2 %v4629_v54  ;;  %2190 = vmatmul.bf16.vlgmr.msra.gmra.mxu3 %v4637_v57  ;;  %v4141_v54 = vld [vmem:[%s6335_s1 + $0x46c] sm:$0xf]  ;;  %v3372_v57 = vld [vmem:[%s6335_s1 + $0x478] sm:$0xf0] }
  0xf0   :  { %2221 = vmatpush.bf16.msrb.mxu1 %v3551_v41  ;;  %2259 = vmatpush.bf16.msrb.mxu3 %v3807_v15  ;;  %v3375_v40 = vor.u32 %v4141_v54, %v3372_v57  ;;  %v4201_v41 = vld [vmem:[%s6335_s1 + $0x64c] sm:$0xf]  ;;  %v3612_v15 = vld [vmem:[%s6335_s1 + $0x658] sm:$0xf0]  ;;  %v3727_v54 = vor.u32 %v4229_v24, %v3724_v25  ;;  %v4258_v24 = vld [vmem:[%s6337_s3 + $0x10] sm:$0xff] }
  0xf1   :  { %2241 = vmatpush.bf16.msrb.mxu2 %v3663_v49  ;;  %v3615_v61 = vor.u32 %v4201_v41, %v3612_v15  ;;  %v3596_v49 = vld [vmem:[%s6335_s1 + $0x638] sm:$0xf0]  ;;  %v4129_v57 = vld [vmem:[%s6335_s1 + $0x40c] sm:$0xf]  ;;  %v4266_v25 = vld [vmem:[%s6337_s3 + $0x50] sm:$0xff] }
  0xf2   :  { %2203 = vmatpush.bf16.msrb.mxu0 %v3407_v10  ;;  %v6054_v32 = vpop.f32.mrf.mxu2  ;;  %v6056_v33 = vpop.f32.mrf.mxu3  ;;  %v3487_v10 = vor.u32 %v4169_v55, %v3484_v58  ;;  %v4161_v34 = vld [vmem:[%s6335_s1 + $0x50c] sm:$0xf]  ;;  %v3452_v35 = vld [vmem:[%s6335_s1 + $0x518] sm:$0xf0]  ;;  %v4270_v55 = vld [vmem:[%s6337_s3 + $0x70] sm:$0xff] }
  0xf3   :  { %v6067_v37 = vpop.f32.mrf.mxu0  ;;  %v6069_v39 = vpop.f32.mrf.mxu1  ;;  %v4225_v36 = vld [vmem:[%s6335_s1 + $0x70c] sm:$0xf] }
  0xf4   :  { %2222 = vmatpush.bf16.msrb.mxu1 %v3535_v18  ;;  %2260 = vmatpush.bf16.msrb.mxu3 %v3791_v20  ;;  %v3340_v18 = vld [vmem:[%s6335_s1 + $0x438] sm:$0xf0]  ;;  %v4165_v20 = vld [vmem:[%s6335_s1 + $0x52c] sm:$0xf] }
  0xf5   :  { %2242 = vmatpush.bf16.msrb.mxu2 %v3647_v48  ;;  %v3343_v11 = vor.u32 %v4133_v16, %v3340_v18 }
  0xf6   :  { %2204 = vmatpush.bf16.msrb.mxu0 %v3391_v53  ;;  %v3599_v53 = vor.u32 %v4197_v2, %v3596_v49  ;;  %v4269_v2 = vld [vmem:[%s6337_s3 + $0x68] sm:$0xff]  ;;  %v302_v49 = vperm.slane %v5526_v52, 1 }
  0xf8   :  { %2223 = vmatpush.bf16.msrb.mxu1 %v3519_v29  ;;  %2261 = vmatpush.bf16.msrb.mxu3 %v3775_v30  ;;  %v3580_v29 = vld [vmem:[%s6335_s1 + $0x618] sm:$0xf0]  ;;  %v3471_v30 = vor.u32 %v4165_v20, %v3468_v23  ;;  %v1831_v52 = vadd.f32 %v6003_v4, %v302_v49 }
  0xf9   :  { %2243 = vmatpush.bf16.msrb.mxu2 %v3631_v19  ;;  %v3708_v19 = vld [vmem:[%s6335_s1 + $0x718] sm:$0xf0] }
  0xfa   :  { %2205 = vmatpush.bf16.msrb.mxu0 %v3375_v40  ;;  %v6110_v21 = vpop.f32.mrf.mxu2  ;;  %v6112_v22 = vpop.f32.mrf.mxu3  ;;  %v3455_v40 = vor.u32 %v4161_v34, %v3452_v35  ;;  %v3711_v41 = vor.u32 %v4225_v36, %v3708_v19  ;;  %v4267_v20 = vld [vmem:[%s6337_s3 + $0x58] sm:$0xff]  ;;  %v1850_v23 = vadd.f32 %v6005_v7, %v1831_v52 }
  0xfb   :  { %v6123_v26 = vpop.f32.mrf.mxu0  ;;  %v6125_v48 = vpop.f32.mrf.mxu1 }
  0xfc   :  { %2224 = vmatpush.bf16.msrb.mxu1 %v3503_v43  ;;  %2262 = vmatpush.bf16.msrb.mxu3 %v3759_v42  ;;  %v4263_v42 = vld [vmem:[%s6337_s3 + $0x38] sm:$0xff] }
  0xfd   :  { %2244 = vmatpush.bf16.msrb.mxu2 %v3615_v61  ;;  %2138 = vmatmul.bf16.gmra.mxu0 %v4748_v44  ;;  %v3583_v44 = vor.u32 %v4193_v28, %v3580_v29 }
  0xfe   :  { %2206 = vmatpush.bf16.msrb.mxu0 %v3359_v62  ;;  %2157 = vmatmul.bf16.gmra.mxu1 %v4759_v50  ;;  %v3327_v50 = vor.u32 %v4129_v57, %v3324_v31  ;;  %v4261_v62 = vld [vmem:[%s6337_s3 + $0x28] sm:$0xff] }
  0xff   :  { %2176 = vmatmul.bf16.gmra.mxu2 %v4761_v51  ;;  %2195 = vmatmul.bf16.gmra.mxu3 %v4769_v56  ;;  %v4271_v51 = vld [vmem:[%s6337_s3 + $0x78] sm:$0xff] }
 0x100   :  { %2225 = vmatpush.bf16.msrb.mxu1 %v3487_v10  ;;  %2263 = vmatpush.bf16.msrb.mxu3 %v3743_v12  ;;  %v4260_v10 = vld [vmem:[%s6337_s3 + $0x20] sm:$0xff] }
 0x101   :  { %2245 = vmatpush.bf16.msrb.mxu2 %v3599_v53  ;;  %v4268_v12 = vld [vmem:[%s6337_s3 + $0x60] sm:$0xff]  ;;  %v1869_v53 = vadd.f32 %v6054_v32, %v1850_v23 }
 0x102   :  { %2207 = vmatpush.bf16.msrb.mxu0 %v3343_v11  ;;  %v6155_v15 = vpop.f32.mrf.mxu2  ;;  %v6157_v43 = vpop.f32.mrf.mxu3 }
 0x103   :  { %v6165_v56 = vpop.f32.mrf.mxu0  ;;  %v6167_v46 = vpop.f32.mrf.mxu1 }
 0x104   :  { %2226 = vmatpush.bf16.msrb.mxu1 %v3471_v30  ;;  %2264 = vmatpush.bf16.msrb.mxu3 %v3727_v54  ;;  %v4265_v30 = vld [vmem:[%s6337_s3 + $0x48] sm:$0xff]  ;;  %v1888_v54 = vadd.f32 %v6056_v33, %v1869_v53  ;;  %v4264_v33 = vld [vmem:[%s6337_s3 + $0x40] sm:$0xff] }
 0x105   :  { %2246 = vmatpush.bf16.msrb.mxu2 %v3583_v44  ;;  %v6273_v53 = vld [vmem:[%s6336_s2] sm:$0xf] }
 0x106   :  { %2208 = vmatpush.bf16.msrb.mxu0 %v3327_v50  ;;  %v4278_v50 = vld [vmem:[%s6337_s3 + $0xb0] sm:$0xff] }
 0x108   :  { %2227 = vmatpush.bf16.msrb.mxu1 %v3455_v40  ;;  %2265 = vmatpush.bf16.msrb.mxu3 %v3711_v41 }
 0x10a   :  { %2545 = vmatpush.bf16.msra.mxu0 %v4263_v42  ;;  %v6175_v58 = vpop.f32.mrf.mxu2  ;;  %v6177_v59 = vpop.f32.mrf.mxu3 }
 0x10b   :  { %v1906_v60 = vpop.f32.mrf.mxu0  ;;  %v1925_v61 = vpop.f32.mrf.mxu1 }
 0x10c   :  { %2564 = vmatpush.bf16.msra.mxu1 %v4271_v51  ;;  %v1907_v32 = vadd.f32 %v1906_v60, %v1888_v54 }
 0x10d   :  { %2209 = vmatmul.bf16.vlgmr.msrb.gmra.mxu0 %v4904_v0  ;;  %v1833_v0 = vadd.f32 %v6067_v37, %v302_v49 }
 0x10e   :  { %2546 = vmatpush.bf16.msra.mxu0 %v4262_v47  ;;  %2228 = vmatmul.bf16.vlgmr.msrb.gmra.mxu1 %v4906_v1  ;;  %v1926_v19 = vadd.f32 %v1925_v61, %v1907_v32 }
 0x10f   :  { %2247 = vmatmul.bf16.vlgmr.msrb.gmra.mxu2 %v4917_v5  ;;  %2266 = vmatmul.bf16.vlgmr.msrb.gmra.mxu3 %v4919_v6  ;;  %v4259_v6 = vld [vmem:[%s6337_s3 + $0x18] sm:$0xff]  ;;  %v1852_v4 = vadd.f32 %v6069_v39, %v1833_v0 }
 0x110   :  { %2565 = vmatpush.bf16.msra.mxu1 %v4270_v55 }
 0x111   :  { %v1871_v37 = vadd.f32 %v6110_v21, %v1852_v4  ;;  %v4257_v21 = vld [vmem:[%s6337_s3 + $0x8] sm:$0xff] }
 0x112   :  { %2547 = vmatpush.bf16.msra.mxu0 %v4261_v62  ;;  %v1944_v16 = vpop.f32.mrf.mxu2  ;;  %v1963_v1 = vpop.f32.mrf.mxu3 }
 0x113   :  { %v1908_v18 = vpop.f32.mrf.mxu0  ;;  %v1927_v5 = vpop.f32.mrf.mxu1  ;;  %v1890_v39 = vadd.f32 %v6112_v22, %v1871_v37  ;;  %v4256_v22 = vld [vmem:[%s6337_s3] sm:$0xff]  ;;  %v1945_v41 = vadd.f32 %v1944_v16, %v1926_v19 }
 0x114   :  { %2566 = vmatpush.bf16.msra.mxu1 %v4269_v2 }
 0x115   :  { %v1909_v57 = vadd.f32 %v1908_v18, %v1890_v39  ;;  %v1964_v55 = vadd.f32 %v1963_v1, %v1945_v41 }
 0x116   :  { %2548 = vmatpush.bf16.msra.mxu0 %v4260_v10 }
 0x118   :  { %2567 = vmatpush.bf16.msra.mxu1 %v4268_v12  ;;  %v4275_v12 = vld [vmem:[%s6337_s3 + $0x98] sm:$0xff] }
 0x11a   :  { %2549 = vmatpush.bf16.msra.mxu0 %v4259_v6  ;;  %v1946_v11 = vpop.f32.mrf.mxu2  ;;  %v1965_v28 = vpop.f32.mrf.mxu3 }
 0x11b   :  { %v1911_v29 = vpop.f32.mrf.mxu0  ;;  %v1930_v7 = vpop.f32.mrf.mxu1 }
 0x11c   :  { %2568 = vmatpush.bf16.msra.mxu1 %v4267_v20 }
 0x11d   :  { %2214 = vmatmul.bf16.gmra.mxu0 %v5036_v8  ;;  %v4279_v8 = vld [vmem:[%s6337_s3 + $0xb8] sm:$0xff] }
 0x11e   :  { %2550 = vmatpush.bf16.msra.mxu0 %v4258_v24  ;;  %2233 = vmatmul.bf16.gmra.mxu1 %v5038_v9  ;;  %v1836_v9 = vadd.f32 %v6123_v26, %v302_v49 }
 0x11f   :  { %2252 = vmatmul.bf16.gmra.mxu2 %v5049_v13  ;;  %2271 = vmatmul.bf16.gmra.mxu3 %v5051_v14  ;;  %v1838_v13 = vadd.f32 %v6165_v56, %v302_v49  ;;  %v1928_v14 = vadd.f32 %v1927_v5, %v1909_v57  ;;  %v4277_v56 = vld [vmem:[%s6337_s3 + $0xa8] sm:$0xff] }
 0x120   :  { %2569 = vmatpush.bf16.msra.mxu1 %v4266_v25  ;;  %2583 = vmatpush.bf16.msra.mxu2 %v4279_v8  ;;  %v1855_v40 = vadd.f32 %v6125_v48, %v1836_v9  ;;  %v4273_v5 = vld [vmem:[%s6337_s3 + $0x88] sm:$0xff]  ;;  %v4272_v25 = vld [vmem:[%s6337_s3 + $0x80] sm:$0xff] }
 0x121   :  { %v1947_v44 = vadd.f32 %v1946_v11, %v1928_v14  ;;  %v1857_v26 = vadd.f32 %v6167_v46, %v1838_v13  ;;  %v303_v11 = vperm.slane %v6273_v53, 2 }
 0x122   :  { %2551 = vmatpush.bf16.msra.mxu0 %v4257_v21  ;;  %v1949_v31 = vpop.f32.mrf.mxu2  ;;  %v1968_v34 = vpop.f32.mrf.mxu3  ;;  %v1874_v47 = vadd.f32 %v6155_v15, %v1855_v40 }
 0x123   :  { %v1913_v35 = vpop.f32.mrf.mxu0  ;;  %v1932_v36 = vpop.f32.mrf.mxu1  ;;  %v1876_v42 = vadd.f32 %v6175_v58, %v1857_v26  ;;  %v1966_v51 = vadd.f32 %v1965_v28, %v1947_v44  ;;  %v4276_v58 = vld [vmem:[%s6337_s3 + $0xa0] sm:$0xff] }
 0x124   :  { %2570 = vmatpush.bf16.msra.mxu1 %v4265_v30  ;;  %2584 = vmatpush.bf16.msra.mxu2 %v4278_v50  ;;  %v1893_v49 = vadd.f32 %v6157_v43, %v1874_v47 }
 0x125   :  { %v1895_v48 = vadd.f32 %v6177_v59, %v1876_v42  ;;  %v2278_v46 = vpack.c.bf16 %v1966_v51, %v1964_v55 }
 0x126   :  { %2552 = vmatpush.bf16.msra.mxu0 %v4256_v22  ;;  %v1912_v15 = vadd.f32 %v1911_v29, %v1893_v49 }
 0x127   :  { %v1914_v10 = vadd.f32 %v1913_v35, %v1895_v48  ;;  %v4287_v48 = vld [vmem:[%s6337_s3 + $0xf8] sm:$0xff] }
 0x128   :  { %2571 = vmatpush.bf16.msra.mxu1 %v4264_v33  ;;  %2585 = vmatpush.bf16.msra.mxu2 %v4277_v56  ;;  %v1931_v18 = vadd.f32 %v1930_v7, %v1912_v15 }
 0x129   :  { %v1933_v59 = vadd.f32 %v1932_v36, %v1914_v10  ;;  %2602 = vmatpush.bf16.msra.mxu3 %v4287_v48 }
 0x12a   :  { %v1951_v60 = vpop.f32.mrf.mxu2  ;;  %v1970_v61 = vpop.f32.mrf.mxu3  ;;  %v1950_v45 = vadd.f32 %v1949_v31, %v1931_v18  ;;  %v4285_v18 = vld [vmem:[%s6337_s3 + $0xe8] sm:$0xff] }
 0x12b   :  { %v1982_v62 = vpop.f32.mrf.mxu0  ;;  %v2001_v2 = vpop.f32.mrf.mxu1  ;;  %v1952_v43 = vadd.f32 %v1951_v60, %v1933_v59 }
 0x12c   :  { %2586 = vmatpush.bf16.msra.mxu2 %v4276_v58  ;;  %v1969_v6 = vadd.f32 %v1968_v34, %v1950_v45  ;;  %v1983_v21 = vadd.f32 %v1982_v62, %v303_v11 }
 0x12d   :  { %2553 = vmatmul.bf16.vlgmr.msra.gmra.mxu0 %v2277_v63  ;;  %v1971_v63 = vadd.f32 %v1970_v61, %v1952_v43 }
 0x12e   :  { %2572 = vmatmul.bf16.vlgmr.msra.gmra.mxu1 %v2278_v46  ;;  %v2002_v30 = vadd.f32 %v2001_v2, %v1983_v21  ;;  %v4282_v21 = vld [vmem:[%s6337_s3 + $0xd0] sm:$0xff] }
 0x12f   :  { %v2282_v24 = vpack.c.bf16 %v1971_v63, %v1969_v6 }
 0x130   :  { %2587 = vmatpush.bf16.msra.mxu2 %v4275_v12 }
 0x132   :  { %v2020_v52 = vpop.f32.mrf.mxu2  ;;  %v2039_v0 = vpop.f32.mrf.mxu3 }
 0x133   :  { %v1984_v16 = vpop.f32.mrf.mxu0  ;;  %v2003_v1 = vpop.f32.mrf.mxu1 }
 0x134   :  { %2588 = vmatpush.bf16.msra.mxu2 %v4274_v3  ;;  %v1985_v54 = vadd.f32 %v1984_v16, %v303_v11  ;;  %v4286_v16 = vld [vmem:[%s6337_s3 + $0xf0] sm:$0xff] }
 0x135   :  { %2603 = vmatpush.bf16.msra.mxu3 %v4286_v16 }
 0x136   :  { %v2004_v22 = vadd.f32 %v2003_v1, %v1985_v54 }
 0x138   :  { %2589 = vmatpush.bf16.msra.mxu2 %v4273_v5 }
 0x139   :  { %2604 = vmatpush.bf16.msra.mxu3 %v4285_v18 }
 0x13a   :  { %v2022_v20 = vpop.f32.mrf.mxu2  ;;  %v2041_v23 = vpop.f32.mrf.mxu3 }
 0x13b   :  { %v1987_v4 = vpop.f32.mrf.mxu0  ;;  %v2006_v37 = vpop.f32.mrf.mxu1  ;;  %v2023_v33 = vadd.f32 %v2022_v20, %v2004_v22 }
 0x13c   :  { %2590 = vmatpush.bf16.msra.mxu2 %v4272_v25  ;;  %v1988_v36 = vadd.f32 %v1987_v4, %v303_v11  ;;  %v4284_v4 = vld [vmem:[%s6337_s3 + $0xe0] sm:$0xff]  ;;  %v4283_v25 = vld [vmem:[%s6337_s3 + $0xd8] sm:$0xff] }
 0x13d   :  { %2558 = vmatmul.bf16.gmra.mxu0 %v2281_v27  ;;  %v2021_v27 = vadd.f32 %v2020_v52, %v2002_v30  ;;  %v2042_v14 = vadd.f32 %v2041_v23, %v2023_v33  ;;  %2605 = vmatpush.bf16.msra.mxu3 %v4284_v4  ;;  %v4281_v30 = vld [vmem:[%s6337_s3 + $0xc8] sm:$0xff] }
 0x13e   :  { %2577 = vmatmul.bf16.gmra.mxu1 %v2282_v24  ;;  %v2007_v50 = vadd.f32 %v2006_v37, %v1988_v36 }
 0x13f   :  { %v2040_v8 = vadd.f32 %v2039_v0, %v2021_v27  ;;  %v304_v27 = vperm.slane %v6273_v53, 3 }
 0x141   :  { %2606 = vmatpush.bf16.msra.mxu3 %v4283_v25 }
 0x142   :  { %v2025_v28 = vpop.f32.mrf.mxu2  ;;  %v2044_v29 = vpop.f32.mrf.mxu3 }
 0x143   :  { %v1989_v7 = vpop.f32.mrf.mxu0  ;;  %v2008_v39 = vpop.f32.mrf.mxu1  ;;  %v2026_v60 = vadd.f32 %v2025_v28, %v2007_v50 }
 0x144   :  { %v1990_v40 = vadd.f32 %v1989_v7, %v303_v11 }
 0x145   :  { %v2045_v49 = vadd.f32 %v2044_v29, %v2026_v60  ;;  %2607 = vmatpush.bf16.msra.mxu3 %v4282_v21  ;;  %v4295_v21 = vld [vmem:[%s6339_s5 + $0x38] sm:$0xff] }
 0x146   :  { %v2009_v61 = vadd.f32 %v2008_v39, %v1990_v40  ;;  %2691 = vmatpush.bf16.msrb.mxu0 %v4295_v21  ;;  %4296 = vmatpush.bf16.msrb.mxu1 %v4295_v21 }
 0x149   :  { %2608 = vmatpush.bf16.msra.mxu3 %v4281_v30  ;;  %v4294_v30 = vld [vmem:[%s6339_s5 + $0x30] sm:$0xff] }
 0x14a   :  { %v2027_v57 = vpop.f32.mrf.mxu2  ;;  %v2046_v32 = vpop.f32.mrf.mxu3  ;;  %2692 = vmatpush.bf16.msrb.mxu0 %v4294_v30  ;;  %4297 = vmatpush.bf16.msrb.mxu1 %v4294_v30 }
 0x14b   :  { %v2058_v38 = vpop.f32.mrf.mxu0  ;;  %v2077_v17 = vpop.f32.mrf.mxu1  ;;  %v2028_v46 = vadd.f32 %v2027_v57, %v2009_v61 }
 0x14c   :  { %v2059_v31 = vadd.f32 %v2058_v38, %v2040_v8 }
 0x14d   :  { %v2047_v12 = vadd.f32 %v2046_v32, %v2028_v46 }
 0x14e   :  { %v2078_v44 = vadd.f32 %v2077_v17, %v2059_v31  ;;  %v4280_v17 = vld [vmem:[%s6337_s3 + $0xc0] sm:$0xff] }
 0x14f   :  { %2609 = vmatpush.bf16.msra.mxu3 %v4280_v17  ;;  %v4289_v17 = vld [vmem:[%s6339_s5 + $0x8] sm:$0xff] }
 0x152   :  { %v2096_v9 = vpop.f32.mrf.mxu2  ;;  %v2115_v13 = vpop.f32.mrf.mxu3 }
 0x153   :  { %v2060_v34 = vpop.f32.mrf.mxu0  ;;  %v2079_v35 = vpop.f32.mrf.mxu1  ;;  %v2097_v26 = vadd.f32 %v2096_v9, %v2078_v44 }
 0x154   :  { %v2061_v19 = vadd.f32 %v2060_v34, %v2042_v14 }
 0x155   :  { %v2116_v62 = vadd.f32 %v2115_v13, %v2097_v26 }
 0x156   :  { %v2080_v41 = vadd.f32 %v2079_v35, %v2061_v19 }
 0x15a   :  { %v2098_v42 = vpop.f32.mrf.mxu2  ;;  %v2117_v51 = vpop.f32.mrf.mxu3 }
 0x15b   :  { %v2099_v56 = vadd.f32 %v2098_v42, %v2080_v41  ;;  %v2063_v47 = vpop.f32.mrf.mxu0  ;;  %v2082_v55 = vpop.f32.mrf.mxu1 }
 0x15c   :  { %v2064_v59 = vadd.f32 %v2063_v47, %v2045_v49 }
 0x15d   :  { %v2118_v2 = vadd.f32 %v2117_v51, %v2099_v56 }
 0x15e   :  { %v2083_v43 = vadd.f32 %v2082_v55, %v2064_v59 }
 0x15f   :  { %v2279_v58 = vpack.c.bf16 %v2118_v2, %v2116_v62 }
 0x161   :  { %2591 = vmatmul.bf16.vlgmr.msra.gmra.mxu2 %v2279_v58 }
 0x162   :  { %v2101_v10 = vpop.f32.mrf.mxu2  ;;  %v2120_v15 = vpop.f32.mrf.mxu3 }
 0x163   :  { %v2065_v52 = vpop.f32.mrf.mxu0  ;;  %v2084_v0 = vpop.f32.mrf.mxu1  ;;  %v2102_v3 = vadd.f32 %v2101_v10, %v2083_v43 }
 0x164   :  { %v2066_v1 = vadd.f32 %v2065_v52, %v2047_v12 }
 0x165   :  { %v2121_v37 = vadd.f32 %v2120_v15, %v2102_v3 }
 0x166   :  { %v2085_v45 = vadd.f32 %v2084_v0, %v2066_v1 }
 0x16a   :  { %v2103_v63 = vpop.f32.mrf.mxu2  ;;  %v2122_v5 = vpop.f32.mrf.mxu3 }
 0x16b   :  { %v2104_v6 = vadd.f32 %v2103_v63, %v2085_v45  ;;  %v2134_v20 = vpop.f32.mrf.mxu0  ;;  %v2153_v23 = vpop.f32.mrf.mxu1 }
 0x16c   :  { %v2135_v13 = vadd.f32 %v2134_v20, %v304_v27 }
 0x16d   :  { %v2123_v24 = vadd.f32 %v2122_v5, %v2104_v6 }
 0x16e   :  { %v2154_v14 = vadd.f32 %v2153_v23, %v2135_v13  ;;  %v4307_v13 = vld [vmem:[%s6338_s4] ss:$0 sm:$0xff] }
 0x16f   :  { %v2283_v11 = vpack.c.bf16 %v2123_v24, %v2121_v37 }
 0x171   :  { %2596 = vmatmul.bf16.gmra.mxu2 %v2283_v11 }
 0x172   :  { %v2172_v28 = vpop.f32.mrf.mxu2  ;;  %v2191_v29 = vpop.f32.mrf.mxu3 }
 0x173   :  { %v2136_v7 = vpop.f32.mrf.mxu0  ;;  %v2155_v39 = vpop.f32.mrf.mxu1  ;;  %v2173_v44 = vadd.f32 %v2172_v28, %v2154_v14 }
 0x174   :  { %v2137_v31 = vadd.f32 %v2136_v7, %v304_v27 }
 0x175   :  { %v2192_v26 = vadd.f32 %v2191_v29, %v2173_v44 }
 0x176   :  { %v2156_v50 = vadd.f32 %v2155_v39, %v2137_v31 }
 0x17a   :  { %v2174_v54 = vpop.f32.mrf.mxu2  ;;  %v2193_v57 = vpop.f32.mrf.mxu3 }
 0x17b   :  { %v2139_v32 = vpop.f32.mrf.mxu0  ;;  %v2158_v38 = vpop.f32.mrf.mxu1  ;;  %v2175_v40 = vadd.f32 %v2174_v54, %v2156_v50  ;;  %v4293_v54 = vld [vmem:[%s6339_s5 + $0x28] sm:$0xff] }
 0x17c   :  { %v2140_v55 = vadd.f32 %v2139_v32, %v304_v27  ;;  %2693 = vmatpush.bf16.msrb.mxu0 %v4293_v54  ;;  %4298 = vmatpush.bf16.msrb.mxu1 %v4293_v54  ;;  %v4291_v32 = vld [vmem:[%s6339_s5 + $0x18] sm:$0xff] }
 0x17d   :  { %v2194_v51 = vadd.f32 %v2193_v57, %v2175_v40  ;;  %v4292_v57 = vld [vmem:[%s6339_s5 + $0x20] sm:$0xff] }
 0x17e   :  { %v2159_v62 = vadd.f32 %v2158_v38, %v2140_v55  ;;  %v4290_v38 = vld [vmem:[%s6339_s5 + $0x10] sm:$0xff] }
 0x180   :  { %2694 = vmatpush.bf16.msrb.mxu0 %v4292_v57  ;;  %4299 = vmatpush.bf16.msrb.mxu1 %v4292_v57 }
 0x182   :  { %v2177_v22 = vpop.f32.mrf.mxu2  ;;  %v2196_v33 = vpop.f32.mrf.mxu3 }
 0x183   :  { %v2141_v8 = vpop.f32.mrf.mxu0  ;;  %v2160_v9 = vpop.f32.mrf.mxu1  ;;  %v2178_v12 = vadd.f32 %v2177_v22, %v2159_v62 }
 0x184   :  { %v2142_v2 = vadd.f32 %v2141_v8, %v304_v27  ;;  %2695 = vmatpush.bf16.msrb.mxu0 %v4291_v32  ;;  %4300 = vmatpush.bf16.msrb.mxu1 %v4291_v32  ;;  %v4288_v27 = vld [vmem:[%s6339_s5] sm:$0xff] }
 0x185   :  { %v2197_v43 = vadd.f32 %v2196_v33, %v2178_v12 }
 0x186   :  { %v2161_v59 = vadd.f32 %v2160_v9, %v2142_v2 }
 0x188   :  { %2696 = vmatpush.bf16.msrb.mxu0 %v4290_v38  ;;  %4301 = vmatpush.bf16.msrb.mxu1 %v4290_v38 }
 0x18a   :  { %v2179_v34 = vpop.f32.mrf.mxu2  ;;  %v2198_v35 = vpop.f32.mrf.mxu3 }
 0x18b   :  { %v2210_v36 = vpop.f32.mrf.mxu0  ;;  %v2229_v19 = vpop.f32.mrf.mxu1  ;;  %v2180_v1 = vadd.f32 %v2179_v34, %v2161_v59 }
 0x18c   :  { %v2211_v56 = vadd.f32 %v2210_v36, %v2192_v26  ;;  %2697 = vmatpush.bf16.msrb.mxu0 %v4289_v17  ;;  %4302 = vmatpush.bf16.msrb.mxu1 %v4289_v17 }
 0x18d   :  { %v2199_v63 = vadd.f32 %v2198_v35, %v2180_v1 }
 0x18e   :  { %v2230_v61 = vadd.f32 %v2229_v19, %v2211_v56 }
 0x190   :  { %2698 = vmatpush.bf16.msrb.mxu0 %v4288_v27  ;;  %4303 = vmatpush.bf16.msrb.mxu1 %v4288_v27 }
 0x192   :  { %v2248_v41 = vpop.f32.mrf.mxu2  ;;  %v2267_v42 = vpop.f32.mrf.mxu3 }
 0x193   :  { %v2212_v53 = vpop.f32.mrf.mxu0  ;;  %v2231_v47 = vpop.f32.mrf.mxu1  ;;  %v2249_v48 = vadd.f32 %v2248_v41, %v2230_v61 }
 0x194   :  { %v2213_v60 = vadd.f32 %v2212_v53, %v2194_v51 }
 0x195   :  { %v2268_v52 = vadd.f32 %v2267_v42, %v2249_v48 }
 0x196   :  { %v2232_v46 = vadd.f32 %v2231_v47, %v2213_v60 }
 0x19a   :  { %v2250_v58 = vpop.f32.mrf.mxu2  ;;  %v2269_v49 = vpop.f32.mrf.mxu3 }
 0x19b   :  { %v2251_v10 = vadd.f32 %v2250_v58, %v2232_v46  ;;  %v2215_v15 = vpop.f32.mrf.mxu0  ;;  %v2234_v16 = vpop.f32.mrf.mxu1 }
 0x19c   :  { %v2216_v5 = vadd.f32 %v2215_v15, %v2197_v43 }
 0x19d   :  { %v2270_v0 = vadd.f32 %v2269_v49, %v2251_v10 }
 0x19e   :  { %v2235_v23 = vadd.f32 %v2234_v16, %v2216_v5 }
 0x19f   :  { %v2280_v18 = vpack.c.bf16 %v2270_v0, %v2268_v52  ;;  %v4308_v0 = vld [vmem:[%s6340_s6] ss:$0 sm:$0xff]  ;;  %s4337_s6 = smov 128  }
 0x1a1   :  { %2610 = vmatmul.bf16.vlgmr.msra.gmra.mxu3 %v2280_v18 }
 0x1a2   :  { %v2253_v3 = vpop.f32.mrf.mxu2  ;;  %v2272_v45 = vpop.f32.mrf.mxu3 }
 0x1a3   :  { %v2217_v6 = vpop.f32.mrf.mxu0  ;;  %v2236_v4 = vpop.f32.mrf.mxu1  ;;  %v2254_v37 = vadd.f32 %v2253_v3, %v2235_v23 }
 0x1a4   :  { %v2218_v20 = vadd.f32 %v2217_v6, %v2199_v63 }
 0x1a5   :  { %v2273_v29 = vadd.f32 %v2272_v45, %v2254_v37 }
 0x1a6   :  { %v2237_v24 = vadd.f32 %v2236_v4, %v2218_v20 }
 0x1aa   :  { %v2255_v25 = vpop.f32.mrf.mxu2  ;;  %v2274_v28 = vpop.f32.mrf.mxu3 }
 0x1ab   :  { %v2256_v11 = vadd.f32 %v2255_v25, %v2237_v24  ;;  %v2554_v22 = vpop.f32.mrf.mxu0  ;;  %v2573_v33 = vpop.f32.mrf.mxu1 }
 0x1ac   :  { %v2555_v35 = vadd.f32 %v4307_v13, %v2554_v22 }
 0x1ad   :  { %v2275_v7 = vadd.f32 %v2274_v28, %v2256_v11 }
 0x1ae   :  { %v2574_v44 = vadd.f32 %v2573_v33, %v2555_v35 }
 0x1af   :  { %v2284_v39 = vpack.c.bf16 %v2275_v7, %v2273_v29 }
 0x1b1   :  { %2615 = vmatmul.bf16.gmra.mxu3 %v2284_v39 }
 0x1b3   :  { %v2556_v9 = vpop.f32.mrf.mxu0  ;;  %v2575_v14 = vpop.f32.mrf.mxu1 }
 0x1b4   :  { %v2557_v36 = vadd.f32 %v4307_v13, %v2556_v9 }
 0x1b6   :  { %v2576_v50 = vadd.f32 %v2575_v14, %v2557_v36 }
 0x1bb   :  { %v2559_v19 = vpop.f32.mrf.mxu0  ;;  %v2578_v56 = vpop.f32.mrf.mxu1 }
 0x1bc   :  { %v2560_v61 = vadd.f32 %v4307_v13, %v2559_v19 }
 0x1be   :  { %v2579_v46 = vadd.f32 %v2578_v56, %v2560_v61 }
 0x1c3   :  { %v2561_v55 = vpop.f32.mrf.mxu0  ;;  %v2580_v2 = vpop.f32.mrf.mxu1 }
 0x1c4   :  { %v2562_v62 = vadd.f32 %v4307_v13, %v2561_v55 }
 0x1c6   :  { %v2581_v58 = vadd.f32 %v2580_v2, %v2562_v62 }
 0x1e4   :  { %v2592_v8 = vpop.f32.mrf.mxu2 }
 0x1e5   :  { %v2593_v40 = vadd.f32 %v2592_v8, %v2574_v44 }
 0x1ec   :  { %v2594_v31 = vpop.f32.mrf.mxu2 }
 0x1ed   :  { %v2595_v26 = vadd.f32 %v2594_v31, %v2576_v50 }
 0x1f4   :  { %v2597_v53 = vpop.f32.mrf.mxu2 }
 0x1f5   :  { %v2598_v49 = vadd.f32 %v2597_v53, %v2579_v46 }
 0x1fc   :  { %v2599_v48 = vpop.f32.mrf.mxu2 }
 0x1fd   :  { %v2600_v10 = vadd.f32 %v2599_v48, %v2581_v58 }
 0x224   :  { %v2611_v34 = vpop.f32.mrf.mxu3 }
 0x225   :  { %v2612_v42 = vadd.f32 %v2611_v34, %v2593_v40 }
 0x22c   :  { %v2613_v41 = vpop.f32.mrf.mxu3 }
 0x22d   :  { %v2614_v51 = vadd.f32 %v2613_v41, %v2595_v26 }
 0x22f   :  { %v2621_v47 = vpack.c.bf16 %v2614_v51, %v2612_v42 }
 0x231   :  { %2699 = vmatmul.bf16.vlgmr.msrb.gmra.mxu0 %v2621_v47 }
 0x234   :  { %v2616_v60 = vpop.f32.mrf.mxu3 }
 0x235   :  { %v2617_v12 = vadd.f32 %v2616_v60, %v2598_v49 }
 0x23c   :  { %v2618_v15 = vpop.f32.mrf.mxu3 }
 0x23d   :  { %v2619_v59 = vadd.f32 %v2618_v15, %v2600_v10 }
 0x23f   :  { %v2622_v52 = vpack.c.bf16 %v2619_v59, %v2617_v12 }
 0x241   :  { %2704 = vmatmul.bf16.vlgmr.msrb.gmra.mxu1 %v2622_v52 }
 0x2ae   :  { %v2700_v16 = vpop.f32.mrf.mxu0 }
 0x2af   :  { %v2701_v1 = vadd.f32 %v4308_v0, %v2700_v16 }
 0x2b1   :  { %v2710_v18 = vmax.f32 %v2701_v1, 0.0 }
 0x2b3   :  { %2714 = vst [vmem:[#allocation2] sm:$0xff] %v2710_v18 }
 0x2b6   :  { %v2702_v43 = vpop.f32.mrf.mxu0 }
 0x2b7   :  { %v2703_v3 = vadd.f32 %v4308_v0, %v2702_v43 }
 0x2b9   :  { %v2711_v45 = vmax.f32 %v2703_v3, 0.0 }
 0x2bb   :  { %2715 = vst [vmem:[#allocation2 + $0x8] sm:$0xff] %v2711_v45 }
 0x2be   :  { %v2705_v63 = vpop.f32.mrf.mxu1 }
 0x2bf   :  { %v2706_v5 = vadd.f32 %v4308_v0, %v2705_v63 }
 0x2c1   :  { %v2712_v6 = vmax.f32 %v2706_v5, 0.0 }
 0x2c3   :  { %2716 = vst [vmem:[#allocation2 + $0x10] sm:$0xff] %v2712_v6 }
 0x2c6   :  { %v2707_v20 = vpop.f32.mrf.mxu1 }
 0x2c7   :  { %v2708_v23 = vadd.f32 %v4308_v0, %v2707_v20 }
 0x2c9   :  { %v2713_v4 = vmax.f32 %v2708_v23, 0.0 }
 0x2cb   :  { %2717 = vst [vmem:[#allocation2 + $0x18] sm:$0xff] %v2713_v4 }
 0x2cc   :  { %2730 = dma.vmem_to_hbm [thread:$0]  %s2723_s10, 512, %s2725_s13, [#allocation3], %s4337_s6, %s4337_s6, %s4338_s14  }
 0x2cd   :  { %4334 = dma.done.wait [#allocation3], 512  }
 0x2ce   :  { %4335 = vsyncadd [#allocation3], 4294966784 }
 0x2cf   :  { %2735 = vsyncpa [#allocation3], 1 }

</bundles_post_ra>
